<compile_context>
chip_gen: v6e
topology: v6e:2x2x1
jax: 0.10.0
libtpu: 0.0.40
codegen_flags: <defaults>
</compile_context>

<pallas_src>
import functools

import jax
import jax.numpy as jnp
from jax.experimental import pallas as pl
from jax.experimental.pallas import tpu as pltpu


def _round_up(x, m):
    return (x + m - 1) // m * m


def _pick_tm(M, tm_max):
    """Largest multiple of 8 <= tm_max that divides M exactly (or None)."""
    if M % 8 != 0:
        return None
    best = None
    t = 8
    lim = min(tm_max, M)
    while t <= lim:
        if M % t == 0:
            best = t
        t += 8
    if best is not None and (best >= 128 or best == M):
        return best
    return None


# ----------------------------------------------------------------------------
# Pallas kernels
# ----------------------------------------------------------------------------
def _matmul_bias_kernel(x_ref, w_ref, b_ref, o_ref, *, relu):
    """One output tile: o = x @ w + b (optional ReLU). K and N live in one block."""
    acc = jnp.dot(x_ref[...], w_ref[...], preferred_element_type=jnp.float32)
    acc = acc + b_ref[...]
    if relu:
        acc = jnp.maximum(acc, 0.0)
    o_ref[...] = acc.astype(o_ref.dtype)


def pallas_matmul_bias(x, w, b, *, relu=False, tm_max=2048):
    """y = x @ w + b (optionally ReLU). x:(M,K) f32, w:(K,N), b:(N,).

    Grid tiles M only; K and N are single full blocks (all matmuls here have
    K <= 1600, N <= 256).  Tile is picked so no padding / slice copies are
    needed when M is a multiple of 8 (true for every call in this network).
    """
    M, K = x.shape
    N = w.shape[1]
    b2d = b.reshape(1, N).astype(jnp.float32)

    tm = _pick_tm(M, tm_max)
    padded = tm is None
    if padded:  # generic fallback (unused for this network's shapes)
        tm = min(tm_max, _round_up(M, 8))
        Mp = _round_up(M, tm)
        x = jnp.pad(x, ((0, Mp - M), (0, 0)))
    else:
        Mp = M

    out = pl.pallas_call(
        functools.partial(_matmul_bias_kernel, relu=relu),
        out_shape=jax.ShapeDtypeStruct((Mp, N), jnp.float32),
        grid=(Mp // tm,),
        in_specs=[
            pl.BlockSpec((tm, K), lambda i: (i, 0)),
            pl.BlockSpec((K, N), lambda i: (0, 0)),
            pl.BlockSpec((1, N), lambda i: (0, 0)),
        ],
        out_specs=pl.BlockSpec((tm, N), lambda i: (i, 0)),
        compiler_params=pltpu.CompilerParams(
            dimension_semantics=("parallel",)),
    )(x, w, b2d)
    return out[:M] if padded else out


def _mlp_head_kernel(x_ref, w1_ref, b1_ref, w2_ref, b2_ref, w3_ref, b3_ref,
                     o_ref):
    """fc1+ReLU -> fc2+ReLU -> fc3 -> log_softmax, single VMEM-resident block."""
    h = jnp.dot(x_ref[...], w1_ref[...], preferred_element_type=jnp.float32)
    h = jnp.maximum(h + b1_ref[...], 0.0)
    h = jnp.dot(h, w2_ref[...], preferred_element_type=jnp.float32)
    h = jnp.maximum(h + b2_ref[...], 0.0)
    logits = jnp.dot(h, w3_ref[...], preferred_element_type=jnp.float32)
    logits = logits + b3_ref[...]
    m = jnp.max(logits, axis=-1, keepdims=True)
    z = logits - m
    lse = jnp.log(jnp.sum(jnp.exp(z), axis=-1, keepdims=True))
    o_ref[...] = z - lse


def pallas_mlp_head(x, w1, b1, w2, b2, w3, b3):
    B = x.shape[0]
    nc = w3.shape[1]
    return pl.pallas_call(
        _mlp_head_kernel,
        out_shape=jax.ShapeDtypeStruct((B, nc), jnp.float32),
    )(x, w1, b1.reshape(1, -1), w2, b2.reshape(1, -1), w3, b3.reshape(1, -1))


# ----------------------------------------------------------------------------
# Conv layers
# ----------------------------------------------------------------------------
def conv2d_tapwise(x, w, b, *, relu=True):
    """Stride-1 conv via a single Pallas matmul over ALL pixels producing
    tap-major partial products, then a cheap shifted-OUTPUT combine.

    No im2col materialization: the (big) input is read exactly once; only the
    small (KH*KW*Cout)-wide partial-product tensor is shifted.  Used for conv1.
    """
    N, H, W, Cin = x.shape
    KH, KW, _, Cout = w.shape
    OH, OW = H - KH + 1, W - KW + 1
    w_all = jnp.transpose(w, (2, 0, 1, 3)).reshape(Cin, KH * KW * Cout)
    p = pallas_matmul_bias(x.reshape(N * H * W, Cin), w_all,
                           jnp.zeros((KH * KW * Cout,), jnp.float32),
                           relu=False)
    p = p.reshape(N, H, W, KH, KW, Cout)
    # Shift-and-add the 9 small Cout-wide planes (~25 MB of XLA glue vs the
    # ~100 MB input read) + bias + ReLU.
    acc = jnp.zeros((N, OH, OW, Cout), jnp.float32)
    for kh in range(KH):
        for kw in range(KW):
            acc = acc + p[:, kh:kh + OH, kw:kw + OW, kh, kw, :]
    acc = acc + b
    return jnp.maximum(acc, 0.0) if relu else acc


def conv2d_im2col(x, w, b, *, stride=1, relu=True):
    """im2col + Pallas matmul; used for the small convs (patches are a few MB)."""
    N, H, W, Cin = x.shape
    KH, KW, _, Cout = w.shape
    OH = (H - KH) // stride + 1
    OW = (W - KW) // stride + 1
    cols = []
    for i in range(KH):
        for j in range(KW):
            cols.append(x[:, i:i + (OH - 1) * stride + 1:stride,
                          j:j + (OW - 1) * stride + 1:stride, :])
    patches = jnp.concatenate(cols, axis=-1).reshape(N * OH * OW, KH * KW * Cin)
    wmat = w.reshape(KH * KW * Cin, Cout)
    y = pallas_matmul_bias(patches, wmat, b, relu=relu)
    return y.reshape(N, OH, OW, Cout)


def maxpool2(x):
    # TODO(synk): 2x2/stride-2 max-pool kept as an XLA reshape+max (window
    # reshapes are awkward under Mosaic tiling); it is not the hot path.
    N, H, W, C = x.shape
    return x.reshape(N, H // 2, 2, W // 2, 2, C).max(axis=(2, 4))


# ----------------------------------------------------------------------------
# Params + forward
# ----------------------------------------------------------------------------
def init_params(key, num_classes):
    """Deterministic PyTorch-style uniform(-1/sqrt(fan_in), 1/sqrt(fan_in))."""
    def uniform(k, shape, fan_in):
        bound = 1.0 / jnp.sqrt(jnp.float32(fan_in))
        return jax.random.uniform(k, shape, jnp.float32, -bound, bound)

    keys = jax.random.split(key, 14)
    p = {}
    # Conv weights stored HWIO (= PyTorch OIHW transposed by (2, 3, 1, 0)).
    p['w1'] = uniform(keys[0], (3, 3, 300, 8), 300 * 9)
    p['b1'] = uniform(keys[1], (8,), 300 * 9)
    p['w2'] = uniform(keys[2], (3, 3, 8, 16), 8 * 9)
    p['b2'] = uniform(keys[3], (16,), 8 * 9)
    p['w3'] = uniform(keys[4], (5, 5, 16, 32), 16 * 25)
    p['b3'] = uniform(keys[5], (32,), 16 * 25)
    p['w4'] = uniform(keys[6], (5, 5, 32, 64), 32 * 25)
    p['b4'] = uniform(keys[7], (64,), 32 * 25)
    # FC weights stored (in, out) (= PyTorch (out, in) transposed).
    p['wf1'] = uniform(keys[8], (64 * 5 * 5, 256), 64 * 5 * 5)
    p['bf1'] = uniform(keys[9], (256,), 64 * 5 * 5)
    p['wf2'] = uniform(keys[10], (256, 64), 256)
    p['bf2'] = uniform(keys[11], (64,), 256)
    p['wf3'] = uniform(keys[12], (64, num_classes), 64)
    p['bf3'] = uniform(keys[13], (num_classes,), 64)
    return p


def cnn_forward(params, x_nchw):
    # Accept PyTorch-convention NCHW input, compute in NHWC.
    x = jnp.transpose(x_nchw, (0, 2, 3, 1))

    x = conv2d_tapwise(x, params['w1'], params['b1'], relu=True)          # conv1+relu
    x = maxpool2(x)                                                        # pool1
    x = conv2d_im2col(x, params['w2'], params['b2'], stride=1, relu=True)  # conv2+relu
    x = maxpool2(x)                                                        # pool2
    x = conv2d_im2col(x, params['w3'], params['b3'], stride=1, relu=True)  # conv3+relu
    x = maxpool2(x)                                                        # pool3
    # dropout1 (p=0.25): eval-mode identity.
    x = conv2d_im2col(x, params['w4'], params['b4'], stride=2, relu=True)  # conv4+relu
    x = maxpool2(x)                                                        # pool4

    # flatten in NCHW order to match torch.flatten(x, 1).
    x = jnp.transpose(x, (0, 3, 1, 2)).reshape(x.shape[0], -1)             # (N, 1600)

    # dropout2 (p=0.5): eval-mode identity.
    # fc1+relu, fc2+relu, fc3, log_softmax fused into one Pallas kernel.
    return pallas_mlp_head(x, params['wf1'], params['bf1'],
                           params['wf2'], params['bf2'],
                           params['wf3'], params['bf3'])


if __name__ == "__main__":
    num_classes = 10
    batch = 2
    key = jax.random.PRNGKey(0)
    pkey, xkey = jax.random.split(key)
    params = init_params(pkey, num_classes)

    # 206x206 is the smallest spatial size consistent with the module's
    # hard-coded 64*5*5 flatten; 300 input channels per nn.Conv2d(300, 8, 3).
    x = jax.random.normal(xkey, (batch, 300, 206, 206), dtype=jnp.float32)

    fwd = jax.jit(cnn_forward)
    out = jax.block_until_ready(fwd(params, x))
    assert out.shape == (batch, num_classes)
    assert bool(jnp.all(jnp.isfinite(out)))
    print("KERNEL_OK")
</pallas_src>

<mosaic_0001>
module attributes {stable_mosaic.version = 11 : i64} {
  func.func @_matmul_bias_kernel(%arg0: i32, %arg1: memref<824x300xf32, #tpu.memory_space<vmem>>, %arg2: memref<300x72xf32, #tpu.memory_space<vmem>>, %arg3: memref<1x72xf32, #tpu.memory_space<vmem>>, %arg4: memref<824x72xf32, #tpu.memory_space<vmem>>) attributes {dimension_semantics = [#tpu.dimension_semantics<parallel>], iteration_bounds = array<i64: 103>, scalar_prefetch = 0 : i64, scratch_operands = 0 : i64, tpu.core_type = #tpu.core_type<tc>, window_params = [{transform_indices = @transform_0, window_bounds = array<i64: 824, 300>}, {pipeline_mode = #tpu.pipeline_mode<synchronous>, transform_indices = @transform_1, window_bounds = array<i64: 300, 72>}, {pipeline_mode = #tpu.pipeline_mode<synchronous>, transform_indices = @transform_2, window_bounds = array<i64: 1, 72>}, {transform_indices = @transform_3, window_bounds = array<i64: 824, 72>}]} {
    %c0 = arith.constant 0 : index
    %c0_0 = arith.constant 0 : index
    %0 = vector.load %arg1[%c0, %c0_0] : memref<824x300xf32, #tpu.memory_space<vmem>>, vector<824x300xf32>
    %c0_1 = arith.constant 0 : index
    %c0_2 = arith.constant 0 : index
    %1 = vector.load %arg2[%c0_1, %c0_2] : memref<300x72xf32, #tpu.memory_space<vmem>>, vector<300x72xf32>
    %cst = arith.constant dense<0.000000e+00> : vector<824x72xf32>
    %2 = tpu.matmul %0, %1, %cst {dimension_numbers = #tpu.dot_dimension_numbers<[1], [0], [0], [1], [0, 0, 1, 1], [], []>} : vector<824x300xf32>, vector<300x72xf32>, vector<824x72xf32> -> vector<824x72xf32>
    %c0_3 = arith.constant 0 : index
    %c0_4 = arith.constant 0 : index
    %3 = vector.load %arg3[%c0_3, %c0_4] : memref<1x72xf32, #tpu.memory_space<vmem>>, vector<1x72xf32>
    %4 = vector.broadcast %3 : vector<1x72xf32> to vector<824x72xf32>
    %5 = arith.addf %2, %4 : vector<824x72xf32>
    %c0_5 = arith.constant 0 : index
    %c0_6 = arith.constant 0 : index
    %6 = vector.load %arg4[%c0_5, %c0_6] : memref<824x72xf32, #tpu.memory_space<vmem>>, vector<824x72xf32>
    tpu.vector_store %arg4[%c0_5, %c0_6], %5 {strides = array<i32>} : memref<824x72xf32, #tpu.memory_space<vmem>>, vector<824x72xf32>,
    return
  }
  func.func @transform_0(%arg0: i32) -> (i32, i32) {
    %c0_i32 = arith.constant 0 : i32
    %c0_i32_0 = arith.constant 0 : i32
    return %arg0, %c0_i32 : i32, i32
  }
  func.func @transform_1(%arg0: i32) -> (i32, i32) {
    %c0_i32 = arith.constant 0 : i32
    %c0_i32_0 = arith.constant 0 : i32
    %c0_i32_1 = arith.constant 0 : i32
    return %c0_i32, %c0_i32_0 : i32, i32
  }
  func.func @transform_2(%arg0: i32) -> (i32, i32) {
    %c0_i32 = arith.constant 0 : i32
    %c0_i32_0 = arith.constant 0 : i32
    %c0_i32_1 = arith.constant 0 : i32
    return %c0_i32, %c0_i32_0 : i32, i32
  }
  func.func @transform_3(%arg0: i32) -> (i32, i32) {
    %c0_i32 = arith.constant 0 : i32
    %c0_i32_0 = arith.constant 0 : i32
    return %arg0, %c0_i32 : i32, i32
  }
}

module attributes {stable_mosaic.version = 11 : i64} {
  func.func @_matmul_bias_kernel(%arg0: i32, %arg1: memref<2000x72xf32, #tpu.memory_space<vmem>>, %arg2: memref<72x16xf32, #tpu.memory_space<vmem>>, %arg3: memref<1x16xf32, #tpu.memory_space<vmem>>, %arg4: memref<2000x16xf32, #tpu.memory_space<vmem>>) attributes {dimension_semantics = [#tpu.dimension_semantics<parallel>], iteration_bounds = array<i64: 10>, scalar_prefetch = 0 : i64, scratch_operands = 0 : i64, tpu.core_type = #tpu.core_type<tc>, window_params = [{transform_indices = @transform_0, window_bounds = array<i64: 2000, 72>}, {pipeline_mode = #tpu.pipeline_mode<synchronous>, transform_indices = @transform_1, window_bounds = array<i64: 72, 16>}, {pipeline_mode = #tpu.pipeline_mode<synchronous>, transform_indices = @transform_2, window_bounds = array<i64: 1, 16>}, {transform_indices = @transform_3, window_bounds = array<i64: 2000, 16>}]} {
    %c0 = arith.constant 0 : index
    %c0_0 = arith.constant 0 : index
    %0 = vector.load %arg1[%c0, %c0_0] : memref<2000x72xf32, #tpu.memory_space<vmem>>, vector<2000x72xf32>
    %c0_1 = arith.constant 0 : index
    %c0_2 = arith.constant 0 : index
    %1 = vector.load %arg2[%c0_1, %c0_2] : memref<72x16xf32, #tpu.memory_space<vmem>>, vector<72x16xf32>
    %cst = arith.constant dense<0.000000e+00> : vector<2000x16xf32>
    %2 = tpu.matmul %0, %1, %cst {dimension_numbers = #tpu.dot_dimension_numbers<[1], [0], [0], [1], [0, 0, 1, 1], [], []>} : vector<2000x72xf32>, vector<72x16xf32>, vector<2000x16xf32> -> vector<2000x16xf32>
    %c0_3 = arith.constant 0 : index
    %c0_4 = arith.constant 0 : index
    %3 = vector.load %arg3[%c0_3, %c0_4] : memref<1x16xf32, #tpu.memory_space<vmem>>, vector<1x16xf32>
    %4 = vector.broadcast %3 : vector<1x16xf32> to vector<2000x16xf32>
    %5 = arith.addf %2, %4 : vector<2000x16xf32>
    %cst_5 = arith.constant 0.000000e+00 : f32
    %6 = vector.broadcast %cst_5 : f32 to vector<2000x16xf32>
    %7 = arith.maximumf %5, %6 : vector<2000x16xf32>
    %c0_6 = arith.constant 0 : index
    %c0_7 = arith.constant 0 : index
    %8 = vector.load %arg4[%c0_6, %c0_7] : memref<2000x16xf32, #tpu.memory_space<vmem>>, vector<2000x16xf32>
    tpu.vector_store %arg4[%c0_6, %c0_7], %7 {strides = array<i32>} : memref<2000x16xf32, #tpu.memory_space<vmem>>, vector<2000x16xf32>,
    return
  }
  func.func @transform_0(%arg0: i32) -> (i32, i32) {
    %c0_i32 = arith.constant 0 : i32
    %c0_i32_0 = arith.constant 0 : i32
    return %arg0, %c0_i32 : i32, i32
  }
  func.func @transform_1(%arg0: i32) -> (i32, i32) {
    %c0_i32 = arith.constant 0 : i32
    %c0_i32_0 = arith.constant 0 : i32
    %c0_i32_1 = arith.constant 0 : i32
    return %c0_i32, %c0_i32_0 : i32, i32
  }
  func.func @transform_2(%arg0: i32) -> (i32, i32) {
    %c0_i32 = arith.constant 0 : i32
    %c0_i32_0 = arith.constant 0 : i32
    %c0_i32_1 = arith.constant 0 : i32
    return %c0_i32, %c0_i32_0 : i32, i32
  }
  func.func @transform_3(%arg0: i32) -> (i32, i32) {
    %c0_i32 = arith.constant 0 : i32
    %c0_i32_0 = arith.constant 0 : i32
    return %arg0, %c0_i32 : i32, i32
  }
}

module attributes {stable_mosaic.version = 11 : i64} {
  func.func @_matmul_bias_kernel(%arg0: i32, %arg1: memref<184x400xf32, #tpu.memory_space<vmem>>, %arg2: memref<400x32xf32, #tpu.memory_space<vmem>>, %arg3: memref<1x32xf32, #tpu.memory_space<vmem>>, %arg4: memref<184x32xf32, #tpu.memory_space<vmem>>) attributes {dimension_semantics = [#tpu.dimension_semantics<parallel>], iteration_bounds = array<i64: 23>, scalar_prefetch = 0 : i64, scratch_operands = 0 : i64, tpu.core_type = #tpu.core_type<tc>, window_params = [{transform_indices = @transform_0, window_bounds = array<i64: 184, 400>}, {pipeline_mode = #tpu.pipeline_mode<synchronous>, transform_indices = @transform_1, window_bounds = array<i64: 400, 32>}, {pipeline_mode = #tpu.pipeline_mode<synchronous>, transform_indices = @transform_2, window_bounds = array<i64: 1, 32>}, {transform_indices = @transform_3, window_bounds = array<i64: 184, 32>}]} {
    %c0 = arith.constant 0 : index
    %c0_0 = arith.constant 0 : index
    %0 = vector.load %arg1[%c0, %c0_0] : memref<184x400xf32, #tpu.memory_space<vmem>>, vector<184x400xf32>
    %c0_1 = arith.constant 0 : index
    %c0_2 = arith.constant 0 : index
    %1 = vector.load %arg2[%c0_1, %c0_2] : memref<400x32xf32, #tpu.memory_space<vmem>>, vector<400x32xf32>
    %cst = arith.constant dense<0.000000e+00> : vector<184x32xf32>
    %2 = tpu.matmul %0, %1, %cst {dimension_numbers = #tpu.dot_dimension_numbers<[1], [0], [0], [1], [0, 0, 1, 1], [], []>} : vector<184x400xf32>, vector<400x32xf32>, vector<184x32xf32> -> vector<184x32xf32>
    %c0_3 = arith.constant 0 : index
    %c0_4 = arith.constant 0 : index
    %3 = vector.load %arg3[%c0_3, %c0_4] : memref<1x32xf32, #tpu.memory_space<vmem>>, vector<1x32xf32>
    %4 = vector.broadcast %3 : vector<1x32xf32> to vector<184x32xf32>
    %5 = arith.addf %2, %4 : vector<184x32xf32>
    %cst_5 = arith.constant 0.000000e+00 : f32
    %6 = vector.broadcast %cst_5 : f32 to vector<184x32xf32>
    %7 = arith.maximumf %5, %6 : vector<184x32xf32>
    %c0_6 = arith.constant 0 : index
    %c0_7 = arith.constant 0 : index
    %8 = vector.load %arg4[%c0_6, %c0_7] : memref<184x32xf32, #tpu.memory_space<vmem>>, vector<184x32xf32>
    tpu.vector_store %arg4[%c0_6, %c0_7], %7 {strides = array<i32>} : memref<184x32xf32, #tpu.memory_space<vmem>>, vector<184x32xf32>,
    return
  }
  func.func @transform_0(%arg0: i32) -> (i32, i32) {
    %c0_i32 = arith.constant 0 : i32
    %c0_i32_0 = arith.constant 0 : i32
    return %arg0, %c0_i32 : i32, i32
  }
  func.func @transform_1(%arg0: i32) -> (i32, i32) {
    %c0_i32 = arith.constant 0 : i32
    %c0_i32_0 = arith.constant 0 : i32
    %c0_i32_1 = arith.constant 0 : i32
    return %c0_i32, %c0_i32_0 : i32, i32
  }
  func.func @transform_2(%arg0: i32) -> (i32, i32) {
    %c0_i32 = arith.constant 0 : i32
    %c0_i32_0 = arith.constant 0 : i32
    %c0_i32_1 = arith.constant 0 : i32
    return %c0_i32, %c0_i32_0 : i32, i32
  }
  func.func @transform_3(%arg0: i32) -> (i32, i32) {
    %c0_i32 = arith.constant 0 : i32
    %c0_i32_0 = arith.constant 0 : i32
    return %arg0, %c0_i32 : i32, i32
  }
}

module attributes {stable_mosaic.version = 11 : i64} {
  func.func @_matmul_bias_kernel(%arg0: i32, %arg1: memref<200x800xf32, #tpu.memory_space<vmem>>, %arg2: memref<800x64xf32, #tpu.memory_space<vmem>>, %arg3: memref<1x64xf32, #tpu.memory_space<vmem>>, %arg4: memref<200x64xf32, #tpu.memory_space<vmem>>) attributes {dimension_semantics = [#tpu.dimension_semantics<parallel>], iteration_bounds = array<i64: 1>, scalar_prefetch = 0 : i64, scratch_operands = 0 : i64, tpu.core_type = #tpu.core_type<tc>, window_params = [{transform_indices = @transform_0, window_bounds = array<i64: 200, 800>}, {pipeline_mode = #tpu.pipeline_mode<synchronous>, transform_indices = @transform_1, window_bounds = array<i64: 800, 64>}, {pipeline_mode = #tpu.pipeline_mode<synchronous>, transform_indices = @transform_2, window_bounds = array<i64: 1, 64>}, {transform_indices = @transform_3, window_bounds = array<i64: 200, 64>}]} {
    %c0 = arith.constant 0 : index
    %c0_0 = arith.constant 0 : index
    %0 = vector.load %arg1[%c0, %c0_0] : memref<200x800xf32, #tpu.memory_space<vmem>>, vector<200x800xf32>
    %c0_1 = arith.constant 0 : index
    %c0_2 = arith.constant 0 : index
    %1 = vector.load %arg2[%c0_1, %c0_2] : memref<800x64xf32, #tpu.memory_space<vmem>>, vector<800x64xf32>
    %cst = arith.constant dense<0.000000e+00> : vector<200x64xf32>
    %2 = tpu.matmul %0, %1, %cst {dimension_numbers = #tpu.dot_dimension_numbers<[1], [0], [0], [1], [0, 0, 1, 1], [], []>} : vector<200x800xf32>, vector<800x64xf32>, vector<200x64xf32> -> vector<200x64xf32>
    %c0_3 = arith.constant 0 : index
    %c0_4 = arith.constant 0 : index
    %3 = vector.load %arg3[%c0_3, %c0_4] : memref<1x64xf32, #tpu.memory_space<vmem>>, vector<1x64xf32>
    %4 = vector.broadcast %3 : vector<1x64xf32> to vector<200x64xf32>
    %5 = arith.addf %2, %4 : vector<200x64xf32>
    %cst_5 = arith.constant 0.000000e+00 : f32
    %6 = vector.broadcast %cst_5 : f32 to vector<200x64xf32>
    %7 = arith.maximumf %5, %6 : vector<200x64xf32>
    %c0_6 = arith.constant 0 : index
    %c0_7 = arith.constant 0 : index
    %8 = vector.load %arg4[%c0_6, %c0_7] : memref<200x64xf32, #tpu.memory_space<vmem>>, vector<200x64xf32>
    tpu.vector_store %arg4[%c0_6, %c0_7], %7 {strides = array<i32>} : memref<200x64xf32, #tpu.memory_space<vmem>>, vector<200x64xf32>,
    return
  }
  func.func @transform_0(%arg0: i32) -> (i32, i32) {
    %c0_i32 = arith.constant 0 : i32
    %c0_i32_0 = arith.constant 0 : i32
    return %arg0, %c0_i32 : i32, i32
  }
  func.func @transform_1(%arg0: i32) -> (i32, i32) {
    %c0_i32 = arith.constant 0 : i32
    %c0_i32_0 = arith.constant 0 : i32
    %c0_i32_1 = arith.constant 0 : i32
    return %c0_i32, %c0_i32_0 : i32, i32
  }
  func.func @transform_2(%arg0: i32) -> (i32, i32) {
    %c0_i32 = arith.constant 0 : i32
    %c0_i32_0 = arith.constant 0 : i32
    %c0_i32_1 = arith.constant 0 : i32
    return %c0_i32, %c0_i32_0 : i32, i32
  }
  func.func @transform_3(%arg0: i32) -> (i32, i32) {
    %c0_i32 = arith.constant 0 : i32
    %c0_i32_0 = arith.constant 0 : i32
    return %arg0, %c0_i32 : i32, i32
  }
}

module attributes {stable_mosaic.version = 11 : i64} {
  func.func @_mlp_head_kernel(%arg0: memref<2x1600xf32, #tpu.memory_space<vmem>>, %arg1: memref<1600x256xf32, #tpu.memory_space<vmem>>, %arg2: memref<1x256xf32, #tpu.memory_space<vmem>>, %arg3: memref<256x64xf32, #tpu.memory_space<vmem>>, %arg4: memref<1x64xf32, #tpu.memory_space<vmem>>, %arg5: memref<64x10xf32, #tpu.memory_space<vmem>>, %arg6: memref<1x10xf32, #tpu.memory_space<vmem>>, %arg7: memref<2x10xf32, #tpu.memory_space<vmem>>) attributes {dimension_semantics = [], scalar_prefetch = 0 : i64, scratch_operands = 0 : i64, tpu.core_type = #tpu.core_type<tc>} {
    %c0 = arith.constant 0 : index
    %c0_0 = arith.constant 0 : index
    %0 = vector.load %arg0[%c0, %c0_0] : memref<2x1600xf32, #tpu.memory_space<vmem>>, vector<2x1600xf32>
    %c0_1 = arith.constant 0 : index
    %c0_2 = arith.constant 0 : index
    %1 = vector.load %arg1[%c0_1, %c0_2] : memref<1600x256xf32, #tpu.memory_space<vmem>>, vector<1600x256xf32>
    %cst = arith.constant dense<0.000000e+00> : vector<2x256xf32>
    %2 = tpu.matmul %0, %1, %cst {dimension_numbers = #tpu.dot_dimension_numbers<[1], [0], [0], [1], [0, 0, 1, 1], [], []>} : vector<2x1600xf32>, vector<1600x256xf32>, vector<2x256xf32> -> vector<2x256xf32>
    %c0_3 = arith.constant 0 : index
    %c0_4 = arith.constant 0 : index
    %3 = vector.load %arg2[%c0_3, %c0_4] : memref<1x256xf32, #tpu.memory_space<vmem>>, vector<1x256xf32>
    %4 = vector.broadcast %3 : vector<1x256xf32> to vector<2x256xf32>
    %5 = arith.addf %2, %4 : vector<2x256xf32>
    %cst_5 = arith.constant 0.000000e+00 : f32
    %6 = vector.broadcast %cst_5 : f32 to vector<2x256xf32>
    %7 = arith.maximumf %5, %6 : vector<2x256xf32>
    %c0_6 = arith.constant 0 : index
    %c0_7 = arith.constant 0 : index
    %8 = vector.load %arg3[%c0_6, %c0_7] : memref<256x64xf32, #tpu.memory_space<vmem>>, vector<256x64xf32>
    %cst_8 = arith.constant dense<0.000000e+00> : vector<2x64xf32>
    %9 = tpu.matmul %7, %8, %cst_8 {dimension_numbers = #tpu.dot_dimension_numbers<[1], [0], [0], [1], [0, 0, 1, 1], [], []>} : vector<2x256xf32>, vector<256x64xf32>, vector<2x64xf32> -> vector<2x64xf32>
    %c0_9 = arith.constant 0 : index
    %c0_10 = arith.constant 0 : index
    %10 = vector.load %arg4[%c0_9, %c0_10] : memref<1x64xf32, #tpu.memory_space<vmem>>, vector<1x64xf32>
    %11 = vector.broadcast %10 : vector<1x64xf32> to vector<2x64xf32>
    %12 = arith.addf %9, %11 : vector<2x64xf32>
    %cst_11 = arith.constant 0.000000e+00 : f32
    %13 = vector.broadcast %cst_11 : f32 to vector<2x64xf32>
    %14 = arith.maximumf %12, %13 : vector<2x64xf32>
    %c0_12 = arith.constant 0 : index
    %c0_13 = arith.constant 0 : index
    %15 = vector.load %arg5[%c0_12, %c0_13] : memref<64x10xf32, #tpu.memory_space<vmem>>, vector<64x10xf32>
    %cst_14 = arith.constant dense<0.000000e+00> : vector<2x10xf32>
    %16 = tpu.matmul %14, %15, %cst_14 {dimension_numbers = #tpu.dot_dimension_numbers<[1], [0], [0], [1], [0, 0, 1, 1], [], []>} : vector<2x64xf32>, vector<64x10xf32>, vector<2x10xf32> -> vector<2x10xf32>
    %c0_15 = arith.constant 0 : index
    %c0_16 = arith.constant 0 : index
    %17 = vector.load %arg6[%c0_15, %c0_16] : memref<1x10xf32, #tpu.memory_space<vmem>>, vector<1x10xf32>
    %18 = vector.broadcast %17 : vector<1x10xf32> to vector<2x10xf32>
    %19 = arith.addf %16, %18 : vector<2x10xf32>
    %cst_17 = arith.constant dense<0xFF800000> : vector<2xf32>
    %20 = vector.multi_reduction <maximumf>, %19, %cst_17 [1] : vector<2x10xf32> to vector<2xf32>
    %21 = vector.shape_cast %20 : vector<2xf32> to vector<2x1xf32>
    %22 = vector.broadcast %21 : vector<2x1xf32> to vector<2x10xf32>
    %23 = arith.subf %19, %22 : vector<2x10xf32>
    %24 = math.exp %23 : vector<2x10xf32>
    %cst_18 = arith.constant dense<0.000000e+00> : vector<2xf32>
    %25 = vector.multi_reduction <add>, %24, %cst_18 [1] : vector<2x10xf32> to vector<2xf32>
    %26 = vector.shape_cast %25 : vector<2xf32> to vector<2x1xf32>
    %27 = math.log %26 : vector<2x1xf32>
    %28 = vector.broadcast %27 : vector<2x1xf32> to vector<2x10xf32>
    %29 = arith.subf %23, %28 : vector<2x10xf32>
    %c0_19 = arith.constant 0 : index
    %c0_20 = arith.constant 0 : index
    %30 = vector.load %arg7[%c0_19, %c0_20] : memref<2x10xf32, #tpu.memory_space<vmem>>, vector<2x10xf32>
    tpu.vector_store %arg7[%c0_19, %c0_20], %29 {strides = array<i32>} : memref<2x10xf32, #tpu.memory_space<vmem>>, vector<2x10xf32>,
    return
  }
}

</mosaic_0001>

<bundles_post_ra>
// kernel: cnn_forward.5
= control target key start
LH: loop header
LB: loop body
LE: loop exit
PB: predicated region body
PF: predicated region fallthrough
CT: control target
= control target key end

     0   :  { %8 = vsyncpa [#allocation3], 0  ;;  %s4364_s0 = inlined_call_operand.hbm [shape: f32[84872,300], index: 0, kind: input, shape index: {}]   ;;  %s4365_s1 = inlined_call_operand.vmem [shape: f32[300,72], index: 1, kind: input, shape index: {}]   ;;  %s4366_s2 = inlined_call_operand.vmem [shape: f32[1,72], index: 2, kind: input, shape index: {}]   ;;  %s4367_s3 = inlined_call_operand.vmem [shape: f32[84872,72], index: 3, kind: output, shape index: {}]  }
   0x1   :  { %10 = vsyncpa [#allocation3 + $0x1], 0  ;;  %s2875_s12 = smov 0   ;;  %s2877_s13 = smov 0  }
   0x2   :  { %s2879_s14 = smov 0   ;;  %s2881_s15 = smov 0  }
   0x3 LB: > { %s2193_s16 = sadd.s32 4294967295, %s2848_s15   ;;  %s2895_s17 = sadd.s32 1, %s2848_s15   ;;  %s2848_s15 = sphi %s2881_s15, %s4375_s15   ;;  %s2844_s14 = sphi %s2879_s14, %s4374_s14   ;;  %s2840_s13 = sphi %s2877_s13, %s4373_s13   ;;  %s2836_s12 = sphi %s2875_s12, %s4372_s12  }
   0x4   : > { %s20_s18 = ssub.s32 %s2848_s15, %s2895_s17  ;;  %s23_s19 = sadd.s32 1, %s2844_s14 }
   0x5   : > { %p21_p0 = scmp.eq.s32.totalorder %s20_s18, 0  ;;  %p30_p1 = scmp.ne.s32.totalorder %s2844_s14, %s2840_s13 }
   0x6   : > { %p31_p2 = scmp.eq.s32.totalorder %s2848_s15, 0  ;;  %p36_p3 = scmp.ne.s32.totalorder %s2840_s13, %s2836_s12 }
   0x7   : > { %s2905_s20 = scalar_select %p21_p0, %s2844_s14, %s23_s19  }
   0x8   : > { %p32_p4 = por %p31_p2, %p30_p1  ;;  %p37_p5 = scmp.eq.s32.totalorder %s2193_s16, 0 }
   0x9   : > { %p2746_p6 = scmp.lt.s32.totalorder %s2848_s15, 103  ;;  %s134_s22 = sand.u32 1, %s2844_s14  }
   0xa   : > { %p2910_p7 = por %p37_p5, %p36_p3  ;;  %s2737_s23 = smul.u32 2472, %s134_s22 }
   0xb   : > { %p2915_p8 = pnand %p2746_p6, %p32_p4  ;;  %s2747_s25 = smul.u32 39552, %s2848_s15 }
   0xc   : > { %s4369_s21 = scalar_select %p2910_p7, 1, 0 }
   0xd   : > { %s138_s26 = scalar_lea.vmem [#allocation2], %s2737_s23  ;;  %s2923_s30 = scalar_lea.hbm %s4364_s0, %s2747_s25 }
   0xe   : > { %s146_s27 = sshll.u32 %s138_s26, 4  ;;  %s2927_s4 = scalar_lea.sflag [#allocation3], %s134_s22  ;;  %s2925_s27 = int_to_ptr.vmem [resolvable:$true] %s146_s27 }
   0xf   : > { %s2786_s5 = scalar_lea.hbm %s2923_s30, 39552  ;;  %p2788_p10 = pneg %p2915_p8 }
  0x10   : > { %p2787_p9 = scmp.ne.s32.totalorder %s2923_s30, %s2786_s5  ;;  %s2791_s8 = scalar_lea.hbm %s4364_s0, 4073856 }
  0x11   : > { %p2792_p13 = scmp.lt.s32.totalorder %s2923_s30, %s4364_s0  ;;  %p2793_p0 = scmp.lt.s32.totalorder %s2791_s8, %s2786_s5 }
  0x12   : > { %p2789_p11 = pnand %p2788_p10, %p2787_p9 }
  0x13   : > { %p2794_p1 = por %p2793_p0, %p2792_p13 }
  0x14   : > { %p2790_p12 = pneg %p2789_p11 }
  0x16   : > { %p2795_p2 = pnand %p2794_p1, %p2790_p12 }
  0x18   : > { %2798 = shalt.err (!%p2795_p2)
}
  0x19   : > { %s2799_s11 = scalar_lea.vmem %s2925_s27, 39552  ;;  %s2850_s12 = smov [#allocation2]  }
  0x1a   : > { %p2800_p3 = scmp.ne.s32.totalorder %s2925_s27, %s2799_s11  ;;  %s2804_s18 = sshll.u32 %s2850_s12, 4  ;;  %s2805_s18 = int_to_ptr.vmem [resolvable:$false] %s2804_s18 }
  0x1b   : > { %s2806_s19 = scalar_lea.vmem %s2805_s18, 79104  ;;  %p2807_p6 = scmp.lt.s32.totalorder %s2925_s27, %s2805_s18 }
  0x1c   : > { %p2802_p4 = pnand %p2800_p3, %p2788_p10  ;;  %p2808_p9 = scmp.lt.s32.totalorder %s2806_s19, %s2799_s11 }
  0x1e   : > { %p2803_p5 = pneg %p2802_p4  ;;  %p2809_p11 = por %p2808_p9, %p2807_p6 }
  0x20   : > { %p2810_p7 = pnand %p2809_p11, %p2803_p5 }
  0x22   : > { %2813 = shalt.err (!%p2810_p7)
}
  0x23   : > { %s2851_s22 = smov 384   ;;  %s2852_s23 = smov 24  }
  0x24   : > { %2745 = dma.hbm_to_vmem [thread:$0]  (!%p2915_p8), %s2923_s30, 39552, %s2925_s27, %s2927_s4, %s2851_s22, %s2851_s22, %s2852_s23  }
  0x25   : > { %p2198_p10 = scmp.ge.s32.totalorder %s2848_s15, 1  ;;  %p154_p12 = scmp.lt.s32.totalorder %s2848_s15, 104 }
  0x27   : > { %p155_p13 = pnand %p2198_p10, %p154_p12 }
  0x28   : > { %s160_s25 = sand.u32 (!%p155_p13), 1, %s2840_s13   ;;  %p4371_p7 = scmp.ne.s32.totalorder (!%p155_p13), %s4369_s21, 0 }
  0x29   : > { %158 = sbr.rel (%p155_p13) target bundleno = 718 (0x2ce), region = 32  ;;  %s161_s28 = scalar_lea.sflag (!%p155_p13), [#allocation3], %s160_s25 }
  0x2a   : > { %s2739_s26 = smul.u32 (!%p155_p13), 2472, %s160_s25 }
  0x2c   : > { %s2951_s29 = scalar_lea.vmem (!%p155_p13), [#allocation2], %s2739_s26 }
  0x2e   : > { %2831 = dma.done.wait (%p4371_p7), %s161_s28, 39552  }
  0x2f   : > { %2833 = vsyncadd (%p4371_p7), %s161_s28, 4294927744  ;;  %v2853_v0 = vmov 0.0   ;;  %vm2854_vm0 = vmmov 0   ;;  %v518_v1 = vld [vmem:[%s4365_s1 + $0x78] sm:$0xff]  ;;  %v517_v2 = vld [vmem:[%s4365_s1 + $0x70] sm:$0xff]  ;;  %vm858_vm1 = vcmask 1043456  }
  0x30   : > { %862 = vmatprep.subr.mxu0 %v2853_v0  ;;  %2416 = vmatprep.subr.mxu1 %v2853_v0  ;;  %v516_v3 = vld [vmem:[%s4365_s1 + $0x68] sm:$0xff]  ;;  %v515_v4 = vld [vmem:[%s4365_s1 + $0x60] sm:$0xff]  ;;  %v514_v5 = vld [vmem:[%s4365_s1 + $0x58] sm:$0xff]  ;;  %vm548_vm2 = vcmask 359424   ;;  %s188_s23 = smul.u32 103, %s2193_s16  ;;  %vm2022_vm3 = vcmask 588800  }
  0x31   : > { %2428 = vmatprep.mubr.msk.f32.mxu1 %vm2854_vm0, %v2853_v0  ;;  %863 = vmatpush1.msra.mxu0 %v518_v1  ;;  %v513_v6 = vld [vmem:[%s4365_s1 + $0x50] sm:$0xff]  ;;  %v540_v7 = vld [vmem:[%s4365_s1 + $0x128] sm:$0xf]  ;;  %v539_v8 = vld [vmem:[%s4365_s1 + $0x120] sm:$0xff] }
  0x32   : > { %864 = vmatprep.subr.mxu0 %v2853_v0  ;;  %v512_v9 = vld [vmem:[%s4365_s1 + $0x48] sm:$0xff]  ;;  %2417 = vmatpush3.msk.msra.mxu1 %vm858_vm1, %v540_v7  ;;  %v538_v10 = vld [vmem:[%s4365_s1 + $0x118] sm:$0xff]  ;;  %v511_v11 = vld [vmem:[%s4365_s1 + $0x40] sm:$0xff]  ;;  %p189_p8 = scmp.lt.s32.totalorder %s188_s23, 10608 }
  0x33   : > { %865 = vmatpush1.msra.mxu0 %v517_v2  ;;  %2418 = vmatprep.subr.mxu1 %v2853_v0  ;;  %v537_v12 = vld [vmem:[%s4365_s1 + $0x110] sm:$0xff]  ;;  %v510_v13 = vld [vmem:[%s4365_s1 + $0x38] sm:$0xff]  ;;  %v536_v14 = vld [vmem:[%s4365_s1 + $0x108] sm:$0xff] }
  0x34   : > { %866 = vmatprep.subr.mxu0 %v2853_v0  ;;  %2419 = vmatpush3.msra.mxu1 %v539_v8  ;;  %v509_v15 = vld [vmem:[%s4365_s1 + $0x30] sm:$0xff]  ;;  %v508_v17 = vld [vmem:[%s4365_s1 + $0x28] sm:$0xff]  ;;  %v535_v18 = vld [vmem:[%s4365_s1 + $0x100] sm:$0xff]  ;;  %s4377_s23 = smov (!%p189_p8, %s188_s23), 10608 }
  0x35   : > { %867 = vmatpush1.msra.mxu0 %v516_v3  ;;  %2420 = vmatprep.subr.mxu1 %v2853_v0  ;;  %v195_v16 = vld [vmem:[%s2951_s29 + $0x8] sm:$0xff]  ;;  %v196_v19 = vld [vmem:[%s2951_s29 + $0x10] sm:$0xff]  ;;  %v507_v20 = vld [vmem:[%s4365_s1 + $0x20] sm:$0xff]  ;;  %s2199_s25 = sshll.u32 %s4377_s23, 3 }
  0x36   : > { %868 = vmatprep.subr.mxu0 %v2853_v0  ;;  %2421 = vmatpush3.msra.mxu1 %v538_v10  ;;  %v506_v21 = vld [vmem:[%s4365_s1 + $0x18] sm:$0xff]  ;;  %v199_v22 = vld [vmem:[%s2951_s29 + $0x28] sm:$0xff]  ;;  %v202_v25 = vld [vmem:[%s2951_s29 + $0x40] sm:$0xff]  ;;  %s3481_s24 = scalar_lea.vmem %s4367_s3, %s2199_s25 }
  0x37   : > { %869 = vmatpush1.msra.mxu0 %v515_v4  ;;  %2422 = vmatprep.subr.mxu1 %v2853_v0  ;;  %v505_v23 = vld [vmem:[%s4365_s1 + $0x10] sm:$0xff]  ;;  %v504_v24 = vld [vmem:[%s4365_s1 + $0x8] sm:$0xff]  ;;  %v503_v26 = vld [vmem:[%s4365_s1] sm:$0xff] }
  0x38   : > { %870 = vmatprep.subr.mxu0 %v2853_v0  ;;  %2423 = vmatpush3.msra.mxu1 %v537_v12  ;;  %v534_v27 = vld [vmem:[%s4365_s1 + $0xf8] sm:$0xff]  ;;  %v533_v29 = vld [vmem:[%s4365_s1 + $0xf0] sm:$0xff]  ;;  %v532_v30 = vld [vmem:[%s4365_s1 + $0xe8] sm:$0xff] }
  0x39   : > { %871 = vmatpush1.msra.mxu0 %v514_v5  ;;  %2424 = vmatprep.subr.mxu1 %v2853_v0  ;;  %v205_v28 = vld [vmem:[%s2951_s29 + $0x58] sm:$0xff]  ;;  %v208_v31 = vld [vmem:[%s2951_s29 + $0x70] sm:$0xff]  ;;  %v211_v34 = vld [vmem:[%s2951_s29 + $0x88] sm:$0xff] }
  0x3a   : > { %872 = vmatprep.subr.mxu0 %v2853_v0  ;;  %2425 = vmatpush3.msra.mxu1 %v536_v14  ;;  %v531_v32 = vld [vmem:[%s4365_s1 + $0xe0] sm:$0xff]  ;;  %v530_v33 = vld [vmem:[%s4365_s1 + $0xd8] sm:$0xff]  ;;  %v529_v35 = vld [vmem:[%s4365_s1 + $0xd0] sm:$0xff] }
  0x3b   : > { %873 = vmatpush1.msra.mxu0 %v513_v6  ;;  %2426 = vmatprep.subr.mxu1 %v2853_v0  ;;  %v528_v36 = vld [vmem:[%s4365_s1 + $0xc8] sm:$0xff]  ;;  %v527_v38 = vld [vmem:[%s4365_s1 + $0xc0] sm:$0xff]  ;;  %v526_v39 = vld [vmem:[%s4365_s1 + $0xb8] sm:$0xff] }
  0x3c   : > { %874 = vmatprep.subr.mxu0 %v2853_v0  ;;  %926 = vmatprep.mubr.f32.mxu0 %v195_v16  ;;  %v214_v37 = vld [vmem:[%s2951_s29 + $0xa0] sm:$0xff]  ;;  %v217_v40 = vld [vmem:[%s2951_s29 + $0xb8] sm:$0xff]  ;;  %v525_v41 = vld [vmem:[%s4365_s1 + $0xb0] sm:$0xff] }
  0x3d   : > { %875 = vmatpush1.msra.mxu0 %v512_v9  ;;  %2427 = vmatpush3.msra.mxu1 %v535_v18  ;;  %v524_v42 = vld [vmem:[%s4365_s1 + $0xa8] sm:$0xff]  ;;  %v220_v43 = vld [vmem:[%s2951_s29 + $0xd0] sm:$0xff]  ;;  %v523_v44 = vld [vmem:[%s4365_s1 + $0xa0] sm:$0xff] }
  0x3e   : > { %876 = vmatprep.subr.mxu0 %v2853_v0  ;;  %2429 = vmatmul.mubr.msk.f32.vlgmr.msra.gmra.mxu1 %vm548_vm2, %v196_v19  ;;  %v522_v45 = vld [vmem:[%s4365_s1 + $0x98] sm:$0xff]  ;;  %v223_v46 = vld [vmem:[%s2951_s29 + $0xe8] sm:$0xff]  ;;  %v226_v49 = vld [vmem:[%s2951_s29 + $0x100] sm:$0xff] }
  0x3f   : > { %877 = vmatpush1.msra.mxu0 %v511_v11  ;;  %2431 = vmatprep.mubr.msk.f32.mxu1 %vm2854_vm0, %v2853_v0  ;;  %v521_v47 = vld [vmem:[%s4365_s1 + $0x90] sm:$0xff]  ;;  %v520_v48 = vld [vmem:[%s4365_s1 + $0x88] sm:$0xff]  ;;  %v519_v50 = vld [vmem:[%s4365_s1 + $0x80] sm:$0xff] }
  0x40   : > { %878 = vmatprep.subr.mxu0 %v2853_v0  ;;  %v194_v51 = vld [vmem:[%s2951_s29] sm:$0xff]  ;;  %v229_v53 = vld [vmem:[%s2951_s29 + $0x118] sm:$0xff]  ;;  %v232_v56 = vld [vmem:[%s2951_s29 + $0x130] sm:$0xff] }
  0x41   : > { %879 = vmatpush1.msra.mxu0 %v510_v13  ;;  %v198_v52 = vld [vmem:[%s2951_s29 + $0x20] sm:$0xff]  ;;  %v197_v54 = vld [vmem:[%s2951_s29 + $0x18] sm:$0xff]  ;;  %v200_v57 = vld [vmem:[%s2951_s29 + $0x30] sm:$0xff] }
  0x42   : > { %880 = vmatprep.subr.mxu0 %v2853_v0  ;;  %2432 = vmatmul.mubr.msk.f32.gmra.mxu1 %vm548_vm2, %v199_v22  ;;  %v201_v55 = vld [vmem:[%s2951_s29 + $0x38] sm:$0xff]  ;;  %v204_v58 = vld [vmem:[%s2951_s29 + $0x50] sm:$0xff]  ;;  %v235_v59 = vld [vmem:[%s2951_s29 + $0x148] sm:$0xff] }
  0x43   : > { %881 = vmatpush1.msra.mxu0 %v509_v15  ;;  %2434 = vmatprep.mubr.msk.f32.mxu1 %vm2854_vm0, %v2853_v0  ;;  %v203_v60 = vld [vmem:[%s2951_s29 + $0x48] sm:$0xff]  ;;  %v238_v62 = vld [vmem:[%s2951_s29 + $0x160] sm:$0xff]  ;;  %v241_v2 = vld [vmem:[%s2951_s29 + $0x178] sm:$0xff] }
  0x44   : > { %882 = vmatprep.subr.mxu0 %v2853_v0  ;;  %v207_v61 = vld [vmem:[%s2951_s29 + $0x68] sm:$0xff]  ;;  %v206_v63 = vld [vmem:[%s2951_s29 + $0x60] sm:$0xff]  ;;  %v209_v3 = vld [vmem:[%s2951_s29 + $0x78] sm:$0xff] }
  0x45   : > { %883 = vmatpush1.msra.mxu0 %v508_v17  ;;  %v210_v1 = vld [vmem:[%s2951_s29 + $0x80] sm:$0xff]  ;;  %v213_v4 = vld [vmem:[%s2951_s29 + $0x98] sm:$0xff]  ;;  %v244_v5 = vld [vmem:[%s2951_s29 + $0x190] sm:$0xff] }
  0x46   : > { %884 = vmatprep.subr.mxu0 %v2853_v0  ;;  %2435 = vmatmul.mubr.msk.f32.gmra.mxu1 %vm548_vm2, %v202_v25  ;;  %v212_v6 = vld [vmem:[%s2951_s29 + $0x90] sm:$0xff]  ;;  %v247_v8 = vld [vmem:[%s2951_s29 + $0x1a8] sm:$0xff]  ;;  %v250_v11 = vld [vmem:[%s2951_s29 + $0x1c0] sm:$0xff] }
  0x47   : > { %885 = vmatpush1.msra.mxu0 %v507_v20  ;;  %2437 = vmatprep.mubr.msk.f32.mxu1 %vm2854_vm0, %v2853_v0  ;;  %v216_v7 = vld [vmem:[%s2951_s29 + $0xb0] sm:$0xff]  ;;  %v215_v9 = vld [vmem:[%s2951_s29 + $0xa8] sm:$0xff]  ;;  %v218_v12 = vld [vmem:[%s2951_s29 + $0xc0] sm:$0xff] }
  0x48   : > { %886 = vmatprep.subr.mxu0 %v2853_v0  ;;  %v219_v10 = vld [vmem:[%s2951_s29 + $0xc8] sm:$0xff]  ;;  %v222_v13 = vld [vmem:[%s2951_s29 + $0xe0] sm:$0xff]  ;;  %v253_v14 = vld [vmem:[%s2951_s29 + $0x1d8] sm:$0xff] }
  0x49   : > { %887 = vmatpush1.msra.mxu0 %v506_v21  ;;  %v221_v15 = vld [vmem:[%s2951_s29 + $0xd8] sm:$0xff]  ;;  %v256_v17 = vld [vmem:[%s2951_s29 + $0x1f0] sm:$0xff]  ;;  %v259_v20 = vld [vmem:[%s2951_s29 + $0x208] sm:$0xff] }
  0x4a   : > { %888 = vmatprep.subr.mxu0 %v2853_v0  ;;  %2438 = vmatmul.mubr.msk.f32.gmra.mxu1 %vm548_vm2, %v205_v28  ;;  %v225_v16 = vld [vmem:[%s2951_s29 + $0xf8] sm:$0xff]  ;;  %v224_v18 = vld [vmem:[%s2951_s29 + $0xf0] sm:$0xff]  ;;  %v227_v21 = vld [vmem:[%s2951_s29 + $0x108] sm:$0xff] }
  0x4b   : > { %889 = vmatpush1.msra.mxu0 %v505_v23  ;;  %2440 = vmatprep.mubr.msk.f32.mxu1 %vm2854_vm0, %v2853_v0  ;;  %v228_v19 = vld [vmem:[%s2951_s29 + $0x110] sm:$0xff]  ;;  %v231_v22 = vld [vmem:[%s2951_s29 + $0x128] sm:$0xff]  ;;  %v262_v23 = vld [vmem:[%s2951_s29 + $0x220] sm:$0xff] }
  0x4c   : > { %890 = vmatprep.subr.mxu0 %v2853_v0  ;;  %v234_v25 = vld [vmem:[%s2951_s29 + $0x140] sm:$0xff]  ;;  %v237_v28 = vld [vmem:[%s2951_s29 + $0x158] sm:$0xff] }
  0x4d   : > { %891 = vmatpush1.msra.mxu0 %v504_v24  ;;  %v230_v24 = vld [vmem:[%s2951_s29 + $0x120] sm:$0xff] }
  0x4e   : > { %892 = vmatprep.subr.mxu0 %v2853_v0  ;;  %2441 = vmatmul.mubr.msk.f32.gmra.mxu1 %vm548_vm2, %v208_v31  ;;  %v240_v31 = vld [vmem:[%s2951_s29 + $0x170] sm:$0xff] }
  0x4f   : > { %893 = vmatpush1.msra.mxu0 %v503_v26  ;;  %2443 = vmatprep.mubr.msk.f32.mxu1 %vm2854_vm0, %v2853_v0  ;;  %v265_v26 = vld [vmem:[%s2951_s29 + $0x238] sm:$0xff] }
  0x50   : > { %894 = vmatprep.subr.mxu0 %v2853_v0 }
  0x51   : > { %895 = vmatpush2.msra.mxu0 %v534_v27  ;;  %v233_v27 = vld [vmem:[%s2951_s29 + $0x138] sm:$0xff] }
  0x52   : > { %896 = vmatprep.subr.mxu0 %v2853_v0  ;;  %2444 = vmatmul.mubr.msk.f32.gmra.mxu1 %vm548_vm2, %v211_v34  ;;  %v243_v34 = vld [vmem:[%s2951_s29 + $0x188] sm:$0xff] }
  0x53   : > { %897 = vmatpush2.msra.mxu0 %v533_v29  ;;  %2446 = vmatprep.mubr.msk.f32.mxu1 %vm2854_vm0, %v2853_v0  ;;  %v268_v29 = vld [vmem:[%s2951_s29 + $0x250] sm:$0xff] }
  0x54   : > { %898 = vmatprep.subr.mxu0 %v2853_v0 }
  0x55   : > { %899 = vmatpush2.msra.mxu0 %v532_v30  ;;  %v236_v30 = vld [vmem:[%s2951_s29 + $0x150] sm:$0xff] }
  0x56   : > { %900 = vmatprep.subr.mxu0 %v2853_v0  ;;  %2447 = vmatmul.mubr.msk.f32.gmra.mxu1 %vm548_vm2, %v214_v37  ;;  %v246_v37 = vld [vmem:[%s2951_s29 + $0x1a0] sm:$0xff] }
  0x57   : > { %901 = vmatpush2.msra.mxu0 %v531_v32  ;;  %2449 = vmatprep.mubr.msk.f32.mxu1 %vm2854_vm0, %v2853_v0  ;;  %v271_v32 = vld [vmem:[%s2951_s29 + $0x268] sm:$0xff] }
  0x58   : > { %902 = vmatprep.subr.mxu0 %v2853_v0 }
  0x59   : > { %903 = vmatpush2.msra.mxu0 %v530_v33  ;;  %v239_v33 = vld [vmem:[%s2951_s29 + $0x168] sm:$0xff] }
  0x5a   : > { %904 = vmatprep.subr.mxu0 %v2853_v0  ;;  %2450 = vmatmul.mubr.msk.f32.gmra.mxu1 %vm548_vm2, %v217_v40  ;;  %v249_v40 = vld [vmem:[%s2951_s29 + $0x1b8] sm:$0xff] }
  0x5b   : > { %905 = vmatpush2.msra.mxu0 %v529_v35  ;;  %2452 = vmatprep.mubr.msk.f32.mxu1 %vm2854_vm0, %v2853_v0  ;;  %v274_v35 = vld [vmem:[%s2951_s29 + $0x280] sm:$0xff] }
  0x5c   : > { %906 = vmatprep.subr.mxu0 %v2853_v0 }
  0x5d   : > { %907 = vmatpush2.msra.mxu0 %v528_v36  ;;  %v242_v36 = vld [vmem:[%s2951_s29 + $0x180] sm:$0xff] }
  0x5e   : > { %908 = vmatprep.subr.mxu0 %v2853_v0  ;;  %2453 = vmatmul.mubr.msk.f32.gmra.mxu1 %vm548_vm2, %v220_v43  ;;  %v252_v43 = vld [vmem:[%s2951_s29 + $0x1d0] sm:$0xff] }
  0x5f   : > { %909 = vmatpush2.msra.mxu0 %v527_v38  ;;  %2455 = vmatprep.mubr.msk.f32.mxu1 %vm2854_vm0, %v2853_v0  ;;  %v277_v38 = vld [vmem:[%s2951_s29 + $0x298] sm:$0xff] }
  0x60   : > { %910 = vmatprep.subr.mxu0 %v2853_v0 }
  0x61   : > { %911 = vmatpush2.msra.mxu0 %v526_v39  ;;  %v245_v39 = vld [vmem:[%s2951_s29 + $0x198] sm:$0xff] }
  0x62   : > { %912 = vmatprep.subr.mxu0 %v2853_v0  ;;  %2456 = vmatmul.mubr.msk.f32.gmra.mxu1 %vm548_vm2, %v223_v46  ;;  %v255_v46 = vld [vmem:[%s2951_s29 + $0x1e8] sm:$0xff] }
  0x63   : > { %913 = vmatpush2.msra.mxu0 %v525_v41  ;;  %2458 = vmatprep.mubr.msk.f32.mxu1 %vm2854_vm0, %v2853_v0  ;;  %v280_v41 = vld [vmem:[%s2951_s29 + $0x2b0] sm:$0xff] }
  0x64   : > { %914 = vmatprep.subr.mxu0 %v2853_v0 }
  0x65   : > { %915 = vmatpush2.msra.mxu0 %v524_v42  ;;  %v248_v42 = vld [vmem:[%s2951_s29 + $0x1b0] sm:$0xff] }
  0x66   : > { %916 = vmatprep.subr.mxu0 %v2853_v0  ;;  %2459 = vmatmul.mubr.msk.f32.gmra.mxu1 %vm548_vm2, %v226_v49  ;;  %v258_v49 = vld [vmem:[%s2951_s29 + $0x200] sm:$0xff] }
  0x67   : > { %917 = vmatpush2.msra.mxu0 %v523_v44  ;;  %2461 = vmatprep.mubr.msk.f32.mxu1 %vm2854_vm0, %v2853_v0  ;;  %v283_v44 = vld [vmem:[%s2951_s29 + $0x2c8] sm:$0xff] }
  0x68   : > { %918 = vmatprep.subr.mxu0 %v2853_v0 }
  0x69   : > { %919 = vmatpush2.msra.mxu0 %v522_v45  ;;  %v251_v45 = vld [vmem:[%s2951_s29 + $0x1c8] sm:$0xff] }
  0x6a   : > { %920 = vmatprep.subr.mxu0 %v2853_v0  ;;  %2462 = vmatmul.mubr.msk.f32.gmra.mxu1 %vm548_vm2, %v229_v53  ;;  %v292_v53 = vld [vmem:[%s2951_s29 + $0x310] sm:$0xff] }
  0x6b   : > { %921 = vmatpush2.msra.mxu0 %v521_v47  ;;  %2464 = vmatprep.mubr.msk.f32.mxu1 %vm2854_vm0, %v2853_v0  ;;  %v286_v47 = vld [vmem:[%s2951_s29 + $0x2e0] sm:$0xff] }
  0x6c   : > { %922 = vmatprep.subr.mxu0 %v2853_v0 }
  0x6d   : > { %923 = vmatpush2.msra.mxu0 %v520_v48  ;;  %v254_v48 = vld [vmem:[%s2951_s29 + $0x1e0] sm:$0xff] }
  0x6e   : > { %924 = vmatprep.subr.mxu0 %v2853_v0  ;;  %2465 = vmatmul.mubr.msk.f32.gmra.mxu1 %vm548_vm2, %v232_v56  ;;  %v295_v56 = vld [vmem:[%s2951_s29 + $0x328] sm:$0xff] }
  0x6f   : > { %925 = vmatpush2.msra.mxu0 %v519_v50  ;;  %2467 = vmatprep.mubr.msk.f32.mxu1 %vm2854_vm0, %v2853_v0  ;;  %v289_v50 = vld [vmem:[%s2951_s29 + $0x2f8] sm:$0xff] }
  0x70   : > { %927 = vmatmul.mubr.f32.vlgmr.msra.gmra.mxu0 %v194_v51  ;;  %v257_v51 = vld [vmem:[%s2951_s29 + $0x1f8] sm:$0xff] }
  0x71   : > { %931 = vmatprep.mubr.f32.mxu0 %v198_v52  ;;  %v261_v52 = vld [vmem:[%s2951_s29 + $0x218] sm:$0xff] }
  0x72   : > { %2468 = vmatmul.mubr.msk.f32.gmra.mxu1 %vm548_vm2, %v235_v59  ;;  %v298_v59 = vld [vmem:[%s2951_s29 + $0x340] sm:$0xff] }
  0x73   : > { %2470 = vmatprep.mubr.msk.f32.mxu1 %vm2854_vm0, %v2853_v0 }
  0x74   : > { %932 = vmatmul.mubr.f32.gmra.mxu0 %v197_v54  ;;  %v260_v54 = vld [vmem:[%s2951_s29 + $0x210] sm:$0xff] }
  0x75   : > { %936 = vmatprep.mubr.f32.mxu0 %v201_v55  ;;  %v264_v55 = vld [vmem:[%s2951_s29 + $0x230] sm:$0xff] }
  0x76   : > { %2471 = vmatmul.mubr.msk.f32.gmra.mxu1 %vm548_vm2, %v238_v62  ;;  %v301_v62 = vld [vmem:[%s2951_s29 + $0x358] sm:$0xff] }
  0x77   : > { %2473 = vmatprep.mubr.msk.f32.mxu1 %vm2854_vm0, %v2853_v0 }
  0x78   : > { %937 = vmatmul.mubr.f32.gmra.mxu0 %v200_v57  ;;  %v263_v57 = vld [vmem:[%s2951_s29 + $0x228] sm:$0xff] }
  0x79   : > { %941 = vmatprep.mubr.f32.mxu0 %v204_v58  ;;  %v267_v58 = vld [vmem:[%s2951_s29 + $0x248] sm:$0xff] }
  0x7a   : > { %2474 = vmatmul.mubr.msk.f32.gmra.mxu1 %vm548_vm2, %v241_v2  ;;  %v304_v2 = vld [vmem:[%s2951_s29 + $0x370] sm:$0xff] }
  0x7b   : > { %2476 = vmatprep.mubr.msk.f32.mxu1 %vm2854_vm0, %v2853_v0 }
  0x7c   : > { %942 = vmatmul.mubr.f32.gmra.mxu0 %v203_v60  ;;  %v266_v60 = vld [vmem:[%s2951_s29 + $0x240] sm:$0xff] }
  0x7d   : > { %946 = vmatprep.mubr.f32.mxu0 %v207_v61  ;;  %v270_v61 = vld [vmem:[%s2951_s29 + $0x260] sm:$0xff] }
  0x7e   : > { %2477 = vmatmul.mubr.msk.f32.gmra.mxu1 %vm548_vm2, %v244_v5  ;;  %v307_v5 = vld [vmem:[%s2951_s29 + $0x388] sm:$0xff] }
  0x7f   : > { %2479 = vmatprep.mubr.msk.f32.mxu1 %vm2854_vm0, %v2853_v0 }
  0x80   : > { %947 = vmatmul.mubr.f32.gmra.mxu0 %v206_v63  ;;  %v269_v63 = vld [vmem:[%s2951_s29 + $0x258] sm:$0xff] }
  0x81   : > { %951 = vmatprep.mubr.f32.mxu0 %v210_v1  ;;  %v273_v1 = vld [vmem:[%s2951_s29 + $0x278] sm:$0xff] }
  0x82   : > { %2480 = vmatmul.mubr.msk.f32.gmra.mxu1 %vm548_vm2, %v247_v8  ;;  %v310_v8 = vld [vmem:[%s2951_s29 + $0x3a0] sm:$0xff] }
  0x83   : > { %2482 = vmatprep.mubr.msk.f32.mxu1 %vm2854_vm0, %v2853_v0 }
  0x84   : > { %952 = vmatmul.mubr.f32.gmra.mxu0 %v209_v3  ;;  %v272_v3 = vld [vmem:[%s2951_s29 + $0x270] sm:$0xff] }
  0x85   : > { %956 = vmatprep.mubr.f32.mxu0 %v213_v4  ;;  %v276_v4 = vld [vmem:[%s2951_s29 + $0x290] sm:$0xff] }
  0x86   : > { %2483 = vmatmul.mubr.msk.f32.gmra.mxu1 %vm548_vm2, %v250_v11  ;;  %v313_v11 = vld [vmem:[%s2951_s29 + $0x3b8] sm:$0xff] }
  0x87   : > { %2485 = vmatprep.mubr.msk.f32.mxu1 %vm2854_vm0, %v2853_v0 }
  0x88   : > { %957 = vmatmul.mubr.f32.gmra.mxu0 %v212_v6  ;;  %v275_v6 = vld [vmem:[%s2951_s29 + $0x288] sm:$0xff] }
  0x89   : > { %961 = vmatprep.mubr.f32.mxu0 %v216_v7  ;;  %v279_v7 = vld [vmem:[%s2951_s29 + $0x2a8] sm:$0xff] }
  0x8a   : > { %2486 = vmatmul.mubr.msk.f32.gmra.mxu1 %vm548_vm2, %v253_v14  ;;  %v316_v14 = vld [vmem:[%s2951_s29 + $0x3d0] sm:$0xff] }
  0x8b   : > { %2488 = vmatprep.mubr.msk.f32.mxu1 %vm2854_vm0, %v2853_v0 }
  0x8c   : > { %962 = vmatmul.mubr.f32.gmra.mxu0 %v215_v9  ;;  %v278_v9 = vld [vmem:[%s2951_s29 + $0x2a0] sm:$0xff] }
  0x8d   : > { %966 = vmatprep.mubr.f32.mxu0 %v219_v10  ;;  %v282_v10 = vld [vmem:[%s2951_s29 + $0x2c0] sm:$0xff] }
  0x8e   : > { %2489 = vmatmul.mubr.msk.f32.gmra.mxu1 %vm548_vm2, %v256_v17  ;;  %v319_v17 = vld [vmem:[%s2951_s29 + $0x3e8] sm:$0xff] }
  0x8f   : > { %2491 = vmatprep.mubr.msk.f32.mxu1 %vm2854_vm0, %v2853_v0 }
  0x90   : > { %967 = vmatmul.mubr.f32.gmra.mxu0 %v218_v12  ;;  %v281_v12 = vld [vmem:[%s2951_s29 + $0x2b8] sm:$0xff] }
  0x91   : > { %971 = vmatprep.mubr.f32.mxu0 %v222_v13  ;;  %v285_v13 = vld [vmem:[%s2951_s29 + $0x2d8] sm:$0xff] }
  0x92   : > { %2492 = vmatmul.mubr.msk.f32.gmra.mxu1 %vm548_vm2, %v259_v20  ;;  %v322_v20 = vld [vmem:[%s2951_s29 + $0x400] sm:$0xff] }
  0x93   : > { %2494 = vmatprep.mubr.msk.f32.mxu1 %vm2854_vm0, %v2853_v0 }
  0x94   : > { %972 = vmatmul.mubr.f32.gmra.mxu0 %v221_v15  ;;  %v284_v15 = vld [vmem:[%s2951_s29 + $0x2d0] sm:$0xff] }
  0x95   : > { %976 = vmatprep.mubr.f32.mxu0 %v225_v16  ;;  %v288_v16 = vld [vmem:[%s2951_s29 + $0x2f0] sm:$0xff] }
  0x96   : > { %2495 = vmatmul.mubr.msk.f32.gmra.mxu1 %vm548_vm2, %v262_v23  ;;  %v325_v23 = vld [vmem:[%s2951_s29 + $0x418] sm:$0xff] }
  0x97   : > { %2497 = vmatprep.mubr.msk.f32.mxu1 %vm2854_vm0, %v2853_v0 }
  0x98   : > { %977 = vmatmul.mubr.f32.gmra.mxu0 %v224_v18  ;;  %v287_v18 = vld [vmem:[%s2951_s29 + $0x2e8] sm:$0xff] }
  0x99   : > { %981 = vmatprep.mubr.f32.mxu0 %v228_v19  ;;  %v291_v19 = vld [vmem:[%s2951_s29 + $0x308] sm:$0xff] }
  0x9a   : > { %2498 = vmatmul.mubr.msk.f32.gmra.mxu1 %vm548_vm2, %v265_v26  ;;  %v328_v26 = vld [vmem:[%s2951_s29 + $0x430] sm:$0xff] }
  0x9b   : > { %2500 = vmatprep.mubr.msk.f32.mxu1 %vm2854_vm0, %v2853_v0 }
  0x9c   : > { %982 = vmatmul.mubr.f32.gmra.mxu0 %v227_v21  ;;  %v290_v21 = vld [vmem:[%s2951_s29 + $0x300] sm:$0xff] }
  0x9d   : > { %986 = vmatprep.mubr.f32.mxu0 %v231_v22  ;;  %v294_v22 = vld [vmem:[%s2951_s29 + $0x320] sm:$0xff] }
  0x9e   : > { %2501 = vmatmul.mubr.msk.f32.gmra.mxu1 %vm548_vm2, %v268_v29  ;;  %v331_v29 = vld [vmem:[%s2951_s29 + $0x448] sm:$0xff] }
  0x9f   : > { %2503 = vmatprep.mubr.msk.f32.mxu1 %vm2854_vm0, %v2853_v0 }
  0xa0   : > { %987 = vmatmul.mubr.f32.gmra.mxu0 %v230_v24  ;;  %v293_v24 = vld [vmem:[%s2951_s29 + $0x318] sm:$0xff] }
  0xa1   : > { %991 = vmatprep.mubr.f32.mxu0 %v234_v25  ;;  %v297_v25 = vld [vmem:[%s2951_s29 + $0x338] sm:$0xff] }
  0xa2   : > { %2504 = vmatmul.mubr.msk.f32.gmra.mxu1 %vm548_vm2, %v271_v32  ;;  %v334_v32 = vld [vmem:[%s2951_s29 + $0x460] sm:$0xff] }
  0xa3   : > { %2506 = vmatprep.mubr.msk.f32.mxu1 %vm2854_vm0, %v2853_v0 }
  0xa4   : > { %992 = vmatmul.mubr.f32.gmra.mxu0 %v233_v27  ;;  %v296_v27 = vld [vmem:[%s2951_s29 + $0x330] sm:$0xff] }
  0xa5   : > { %996 = vmatprep.mubr.f32.mxu0 %v237_v28  ;;  %v300_v28 = vld [vmem:[%s2951_s29 + $0x350] sm:$0xff] }
  0xa6   : > { %2507 = vmatmul.mubr.msk.f32.gmra.mxu1 %vm548_vm2, %v274_v35  ;;  %v337_v35 = vld [vmem:[%s2951_s29 + $0x478] sm:$0xff] }
  0xa7   : > { %2509 = vmatprep.mubr.msk.f32.mxu1 %vm2854_vm0, %v2853_v0 }
  0xa8   : > { %997 = vmatmul.mubr.f32.gmra.mxu0 %v236_v30  ;;  %v299_v30 = vld [vmem:[%s2951_s29 + $0x348] sm:$0xff] }
  0xa9   : > { %1001 = vmatprep.mubr.f32.mxu0 %v240_v31  ;;  %v303_v31 = vld [vmem:[%s2951_s29 + $0x368] sm:$0xff] }
  0xaa   : > { %2510 = vmatmul.mubr.msk.f32.gmra.mxu1 %vm548_vm2, %v277_v38  ;;  %v340_v38 = vld [vmem:[%s2951_s29 + $0x490] sm:$0xff] }
  0xab   : > { %2512 = vmatprep.mubr.msk.f32.mxu1 %vm2854_vm0, %v2853_v0 }
  0xac   : > { %1002 = vmatmul.mubr.f32.gmra.mxu0 %v239_v33  ;;  %v302_v33 = vld [vmem:[%s2951_s29 + $0x360] sm:$0xff] }
  0xad   : > { %1006 = vmatprep.mubr.f32.mxu0 %v243_v34  ;;  %v306_v34 = vld [vmem:[%s2951_s29 + $0x380] sm:$0xff] }
  0xae   : > { %2513 = vmatmul.mubr.msk.f32.gmra.mxu1 %vm548_vm2, %v280_v41 }
  0xaf   : > { %2515 = vmatprep.mubr.msk.f32.mxu1 %vm2854_vm0, %v2853_v0 }
  0xb0   : > { %1007 = vmatmul.mubr.f32.gmra.mxu0 %v242_v36  ;;  %v305_v36 = vld [vmem:[%s2951_s29 + $0x378] sm:$0xff] }
  0xb1   : > { %1011 = vmatprep.mubr.f32.mxu0 %v246_v37  ;;  %v309_v37 = vld [vmem:[%s2951_s29 + $0x398] sm:$0xff] }
  0xb2   : > { %2516 = vmatmul.mubr.msk.f32.gmra.mxu1 %vm548_vm2, %v283_v44  ;;  %v311_v44 = vld [vmem:[%s2951_s29 + $0x3a8] sm:$0xff] }
  0xb3   : > { %2518 = vmatprep.mubr.msk.f32.mxu1 %vm2854_vm0, %v2853_v0 }
  0xb4   : > { %1012 = vmatmul.mubr.f32.gmra.mxu0 %v245_v39  ;;  %v308_v39 = vld [vmem:[%s2951_s29 + $0x390] sm:$0xff] }
  0xb5   : > { %1016 = vmatprep.mubr.f32.mxu0 %v249_v40  ;;  %v312_v40 = vld [vmem:[%s2951_s29 + $0x3b0] sm:$0xff] }
  0xb6   : > { %2519 = vmatmul.mubr.msk.f32.gmra.mxu1 %vm548_vm2, %v286_v47  ;;  %v346_v47 = vld [vmem:[%s2951_s29 + $0x4c0] sm:$0xff] }
  0xb7   : > { %2521 = vmatprep.mubr.msk.f32.mxu1 %vm2854_vm0, %v2853_v0 }
  0xb8   : > { %1017 = vmatmul.mubr.f32.gmra.mxu0 %v248_v42  ;;  %v343_v42 = vld [vmem:[%s2951_s29 + $0x4a8] sm:$0xff] }
  0xb9   : > { %1021 = vmatprep.mubr.f32.mxu0 %v252_v43 }
  0xba   : > { %2522 = vmatmul.mubr.msk.f32.gmra.mxu1 %vm548_vm2, %v289_v50  ;;  %v318_v50 = vld [vmem:[%s2951_s29 + $0x3e0] sm:$0xff] }
  0xbb   : > { %2524 = vmatprep.mubr.msk.f32.mxu1 %vm2854_vm0, %v2853_v0 }
  0xbc   : > { %1022 = vmatmul.mubr.f32.gmra.mxu0 %v251_v45  ;;  %v315_v45 = vld [vmem:[%s2951_s29 + $0x3c8] sm:$0xff] }
  0xbd   : > { %1026 = vmatprep.mubr.f32.mxu0 %v255_v46 }
  0xbe   : > { %2525 = vmatmul.mubr.msk.f32.gmra.mxu1 %vm548_vm2, %v292_v53 }
  0xbf   : > { %2527 = vmatprep.mubr.msk.f32.mxu1 %vm2854_vm0, %v2853_v0 }
  0xc0   : > { %1027 = vmatmul.mubr.f32.gmra.mxu0 %v254_v48 }
  0xc1   : > { %1031 = vmatprep.mubr.f32.mxu0 %v258_v49  ;;  %v314_v49 = vld [vmem:[%s2951_s29 + $0x3c0] sm:$0xff] }
  0xc2   : > { %2528 = vmatmul.mubr.msk.f32.gmra.mxu1 %vm548_vm2, %v295_v56 }
  0xc3   : > { %2530 = vmatprep.mubr.msk.f32.mxu1 %vm2854_vm0, %v2853_v0 }
  0xc4   : > { %1032 = vmatmul.mubr.f32.gmra.mxu0 %v257_v51 }
  0xc5   : > { %1036 = vmatprep.mubr.f32.mxu0 %v261_v52  ;;  %v349_v52 = vld [vmem:[%s2951_s29 + $0x4d8] sm:$0xff] }
  0xc6   : > { %2531 = vmatmul.mubr.msk.f32.gmra.mxu1 %vm548_vm2, %v298_v59  ;;  %v320_v59 = vld [vmem:[%s2951_s29 + $0x3f0] sm:$0xff] }
  0xc7   : > { %2533 = vmatprep.mubr.msk.f32.mxu1 %vm2854_vm0, %v2853_v0 }
  0xc8   : > { %1037 = vmatmul.mubr.f32.gmra.mxu0 %v260_v54  ;;  %v317_v54 = vld [vmem:[%s2951_s29 + $0x3d8] sm:$0xff] }
  0xc9   : > { %1041 = vmatprep.mubr.f32.mxu0 %v264_v55  ;;  %v321_v55 = vld [vmem:[%s2951_s29 + $0x3f8] sm:$0xff] }
  0xca   : > { %2534 = vmatmul.mubr.msk.f32.gmra.mxu1 %vm548_vm2, %v301_v62  ;;  %v355_v62 = vld [vmem:[%s2951_s29 + $0x508] sm:$0xff] }
  0xcb   : > { %2536 = vmatprep.mubr.msk.f32.mxu1 %vm2854_vm0, %v2853_v0 }
  0xcc   : > { %1042 = vmatmul.mubr.f32.gmra.mxu0 %v263_v57  ;;  %v352_v57 = vld [vmem:[%s2951_s29 + $0x4f0] sm:$0xff] }
  0xcd   : > { %1046 = vmatprep.mubr.f32.mxu0 %v267_v58 }
  0xce   : > { %2537 = vmatmul.mubr.msk.f32.gmra.mxu1 %vm548_vm2, %v304_v2  ;;  %v327_v2 = vld [vmem:[%s2951_s29 + $0x428] sm:$0xff] }
  0xcf   : > { %2539 = vmatprep.mubr.msk.f32.mxu1 %vm2854_vm0, %v2853_v0 }
  0xd0   : > { %1047 = vmatmul.mubr.f32.gmra.mxu0 %v266_v60  ;;  %v324_v60 = vld [vmem:[%s2951_s29 + $0x410] sm:$0xff] }
  0xd1   : > { %1051 = vmatprep.mubr.f32.mxu0 %v270_v61 }
  0xd2   : > { %2540 = vmatmul.mubr.msk.f32.gmra.mxu1 %vm548_vm2, %v307_v5 }
  0xd3   : > { %2542 = vmatprep.mubr.msk.f32.mxu1 %vm2854_vm0, %v2853_v0 }
  0xd4   : > { %1052 = vmatmul.mubr.f32.gmra.mxu0 %v269_v63 }
  0xd5   : > { %1056 = vmatprep.mubr.f32.mxu0 %v273_v1  ;;  %v323_v1 = vld [vmem:[%s2951_s29 + $0x408] sm:$0xff] }
  0xd6   : > { %2543 = vmatmul.mubr.msk.f32.gmra.mxu1 %vm548_vm2, %v310_v8 }
  0xd7   : > { %2545 = vmatprep.mubr.msk.f32.mxu1 %vm2854_vm0, %v2853_v0 }
  0xd8   : > { %1057 = vmatmul.mubr.f32.gmra.mxu0 %v272_v3 }
  0xd9   : > { %1061 = vmatprep.mubr.f32.mxu0 %v276_v4  ;;  %v358_v4 = vld [vmem:[%s2951_s29 + $0x520] sm:$0xff] }
  0xda   : > { %2546 = vmatmul.mubr.msk.f32.gmra.mxu1 %vm548_vm2, %v313_v11  ;;  %v329_v11 = vld [vmem:[%s2951_s29 + $0x438] sm:$0xff] }
  0xdb   : > { %2548 = vmatprep.mubr.msk.f32.mxu1 %vm2854_vm0, %v2853_v0 }
  0xdc   : > { %1062 = vmatmul.mubr.f32.gmra.mxu0 %v275_v6  ;;  %v326_v6 = vld [vmem:[%s2951_s29 + $0x420] sm:$0xff] }
  0xdd   : > { %1066 = vmatprep.mubr.f32.mxu0 %v279_v7  ;;  %v330_v7 = vld [vmem:[%s2951_s29 + $0x440] sm:$0xff] }
  0xde   : > { %2549 = vmatmul.mubr.msk.f32.gmra.mxu1 %vm548_vm2, %v316_v14  ;;  %v364_v14 = vld [vmem:[%s2951_s29 + $0x550] sm:$0xff] }
  0xdf   : > { %2551 = vmatprep.mubr.msk.f32.mxu1 %vm2854_vm0, %v2853_v0 }
  0xe0   : > { %1067 = vmatmul.mubr.f32.gmra.mxu0 %v278_v9  ;;  %v361_v9 = vld [vmem:[%s2951_s29 + $0x538] sm:$0xff] }
  0xe1   : > { %1071 = vmatprep.mubr.f32.mxu0 %v282_v10 }
  0xe2   : > { %2552 = vmatmul.mubr.msk.f32.gmra.mxu1 %vm548_vm2, %v319_v17  ;;  %v336_v17 = vld [vmem:[%s2951_s29 + $0x470] sm:$0xff] }
  0xe3   : > { %2554 = vmatprep.mubr.msk.f32.mxu1 %vm2854_vm0, %v2853_v0 }
  0xe4   : > { %1072 = vmatmul.mubr.f32.gmra.mxu0 %v281_v12  ;;  %v333_v12 = vld [vmem:[%s2951_s29 + $0x458] sm:$0xff] }
  0xe5   : > { %1076 = vmatprep.mubr.f32.mxu0 %v285_v13 }
  0xe6   : > { %2555 = vmatmul.mubr.msk.f32.gmra.mxu1 %vm548_vm2, %v322_v20 }
  0xe7   : > { %2557 = vmatprep.mubr.msk.f32.mxu1 %vm2854_vm0, %v2853_v0 }
  0xe8   : > { %1077 = vmatmul.mubr.f32.gmra.mxu0 %v284_v15 }
  0xe9   : > { %1081 = vmatprep.mubr.f32.mxu0 %v288_v16  ;;  %v332_v16 = vld [vmem:[%s2951_s29 + $0x450] sm:$0xff] }
  0xea   : > { %2558 = vmatmul.mubr.msk.f32.gmra.mxu1 %vm548_vm2, %v325_v23 }
  0xeb   : > { %2560 = vmatprep.mubr.msk.f32.mxu1 %vm2854_vm0, %v2853_v0 }
  0xec   : > { %1082 = vmatmul.mubr.f32.gmra.mxu0 %v287_v18 }
  0xed   : > { %1086 = vmatprep.mubr.f32.mxu0 %v291_v19  ;;  %v367_v19 = vld [vmem:[%s2951_s29 + $0x568] sm:$0xff] }
  0xee   : > { %2561 = vmatmul.mubr.msk.f32.gmra.mxu1 %vm548_vm2, %v328_v26  ;;  %v338_v26 = vld [vmem:[%s2951_s29 + $0x480] sm:$0xff] }
  0xef   : > { %2563 = vmatprep.mubr.msk.f32.mxu1 %vm2854_vm0, %v2853_v0 }
  0xf0   : > { %1087 = vmatmul.mubr.f32.gmra.mxu0 %v290_v21  ;;  %v335_v21 = vld [vmem:[%s2951_s29 + $0x468] sm:$0xff] }
  0xf1   : > { %1091 = vmatprep.mubr.f32.mxu0 %v294_v22  ;;  %v339_v22 = vld [vmem:[%s2951_s29 + $0x488] sm:$0xff] }
  0xf2   : > { %2564 = vmatmul.mubr.msk.f32.gmra.mxu1 %vm548_vm2, %v331_v29 }
  0xf3   : > { %2566 = vmatprep.mubr.msk.f32.mxu1 %vm2854_vm0, %v2853_v0 }
  0xf4   : > { %1092 = vmatmul.mubr.f32.gmra.mxu0 %v293_v24  ;;  %v370_v24 = vld [vmem:[%s2951_s29 + $0x580] sm:$0xff] }
  0xf5   : > { %1096 = vmatprep.mubr.f32.mxu0 %v297_v25 }
  0xf6   : > { %2567 = vmatmul.mubr.msk.f32.gmra.mxu1 %vm548_vm2, %v334_v32 }
  0xf7   : > { %2569 = vmatprep.mubr.msk.f32.mxu1 %vm2854_vm0, %v2853_v0 }
  0xf8   : > { %1097 = vmatmul.mubr.f32.gmra.mxu0 %v296_v27  ;;  %v3467_v27 = vld [vmem:[%s4366_s2] ss:$0 sm:$0xff] }
  0xf9   : > { %1101 = vmatprep.mubr.f32.mxu0 %v300_v28  ;;  %v342_v28 = vld [vmem:[%s2951_s29 + $0x4a0] sm:$0xff] }
  0xfa   : > { %2570 = vmatmul.mubr.msk.f32.gmra.mxu1 %vm548_vm2, %v337_v35 }
  0xfb   : > { %2572 = vmatprep.mubr.msk.f32.mxu1 %vm2854_vm0, %v2853_v0 }
  0xfc   : > { %1102 = vmatmul.mubr.f32.gmra.mxu0 %v299_v30  ;;  %v373_v30 = vld [vmem:[%s2951_s29 + $0x598] sm:$0xff] }
  0xfd   : > { %1106 = vmatprep.mubr.f32.mxu0 %v303_v31 }
  0xfe   : > { %v3383_v41 = vpop.f32.mrf.mxu1  ;;  %2573 = vmatmul.mubr.msk.f32.gmra.mxu1 %vm548_vm2, %v340_v38 }
  0xff   : > { %2575 = vmatprep.mubr.msk.f32.mxu1 %vm2854_vm0, %v2853_v0 }
 0x100   : > { %1107 = vmatmul.mubr.f32.gmra.mxu0 %v302_v33  ;;  %v2430_v43 = vpop.f32.mrf.mxu1 }
 0x101   : > { %1111 = vmatprep.mubr.f32.mxu0 %v306_v34  ;;  %v341_v34 = vld [vmem:[%s2951_s29 + $0x498] sm:$0xff] }
 0x102   : > { %v3391_v46 = vpop.f32.mrf.mxu1  ;;  %2576 = vmatmul.mubr.msk.f32.gmra.mxu1 %vm548_vm2, %v343_v42 }
 0x103   : > { %2578 = vmatprep.mubr.msk.f32.mxu1 %vm2854_vm0, %v2853_v0 }
 0x104   : > { %1112 = vmatmul.mubr.f32.gmra.mxu0 %v305_v36  ;;  %v2433_v48 = vpop.f32.mrf.mxu1  ;;  %v345_v36 = vld [vmem:[%s2951_s29 + $0x4b8] sm:$0xff] }
 0x105   : > { %1116 = vmatprep.mubr.f32.mxu0 %v309_v37 }
 0x106   : > { %v3399_v51 = vpop.f32.mrf.mxu1  ;;  %2579 = vmatmul.mubr.msk.f32.gmra.mxu1 %vm548_vm2, %v346_v47  ;;  %v348_v47 = vld [vmem:[%s2951_s29 + $0x4d0] sm:$0xff] }
 0x107   : > { %2581 = vmatprep.mubr.msk.f32.mxu1 %vm2854_vm0, %v2853_v0 }
 0x108   : > { %1117 = vmatmul.mubr.f32.gmra.mxu0 %v308_v39  ;;  %v2436_v53 = vpop.f32.mrf.mxu1  ;;  %v376_v39 = vld [vmem:[%s2951_s29 + $0x5b0] sm:$0xff] }
 0x109   : > { %1121 = vmatprep.mubr.f32.mxu0 %v312_v40 }
 0x10a   : > { %v3407_v56 = vpop.f32.mrf.mxu1  ;;  %2582 = vmatmul.mubr.msk.f32.gmra.mxu1 %vm548_vm2, %v349_v52 }
 0x10b   : > { %2584 = vmatprep.mubr.msk.f32.mxu1 %vm2854_vm0, %v2853_v0 }
 0x10c   : > { %1122 = vmatmul.mubr.f32.gmra.mxu0 %v311_v44  ;;  %v2439_v58 = vpop.f32.mrf.mxu1  ;;  %v344_v44 = vld [vmem:[%s2951_s29 + $0x4b0] sm:$0xff] }
 0x10d   : > { %1126 = vmatprep.mubr.f32.mxu0 %v315_v45 }
 0x10e   : > { %v3415_v61 = vpop.f32.mrf.mxu1  ;;  %2585 = vmatmul.mubr.msk.f32.gmra.mxu1 %vm548_vm2, %v352_v57  ;;  %v351_v57 = vld [vmem:[%s2951_s29 + $0x4e8] sm:$0xff] }
 0x10f   : > { %2587 = vmatprep.mubr.msk.f32.mxu1 %vm2854_vm0, %v2853_v0 }
 0x110   : > { %1127 = vmatmul.mubr.f32.gmra.mxu0 %v314_v49  ;;  %v2442_v63 = vpop.f32.mrf.mxu1  ;;  %v379_v49 = vld [vmem:[%s2951_s29 + $0x5c8] sm:$0xff] }
 0x111   : > { %1131 = vmatprep.mubr.f32.mxu0 %v318_v50 }
 0x112   : > { %v3423_v3 = vpop.f32.mrf.mxu1  ;;  %2588 = vmatmul.mubr.msk.f32.gmra.mxu1 %vm548_vm2, %v355_v62 }
 0x113   : > { %2590 = vmatprep.mubr.msk.f32.mxu1 %vm2854_vm0, %v2853_v0 }
 0x114   : > { %1132 = vmatmul.mubr.f32.gmra.mxu0 %v317_v54  ;;  %v2445_v5 = vpop.f32.mrf.mxu1  ;;  %v347_v54 = vld [vmem:[%s2951_s29 + $0x4c8] sm:$0xff] }
 0x115   : > { %1136 = vmatprep.mubr.f32.mxu0 %v321_v55 }
 0x116   : > { %v3431_v8 = vpop.f32.mrf.mxu1  ;;  %2591 = vmatmul.mubr.msk.f32.gmra.mxu1 %vm548_vm2, %v358_v4  ;;  %v354_v4 = vld [vmem:[%s2951_s29 + $0x500] sm:$0xff] }
 0x117   : > { %2593 = vmatprep.mubr.msk.f32.mxu1 %vm2854_vm0, %v2853_v0 }
 0x118   : > { %1137 = vmatmul.mubr.f32.gmra.mxu0 %v320_v59  ;;  %v2448_v10 = vpop.f32.mrf.mxu1  ;;  %v382_v59 = vld [vmem:[%s2951_s29 + $0x5e0] sm:$0xff] }
 0x119   : > { %1141 = vmatprep.mubr.f32.mxu0 %v324_v60 }
 0x11a   : > { %v3439_v13 = vpop.f32.mrf.mxu1  ;;  %2594 = vmatmul.mubr.msk.f32.gmra.mxu1 %vm548_vm2, %v361_v9 }
 0x11b   : > { %2596 = vmatprep.mubr.msk.f32.mxu1 %vm2854_vm0, %v2853_v0 }
 0x11c   : > { %1142 = vmatmul.mubr.f32.gmra.mxu0 %v323_v1  ;;  %v2451_v15 = vpop.f32.mrf.mxu1  ;;  %v350_v1 = vld [vmem:[%s2951_s29 + $0x4e0] sm:$0xff] }
 0x11d   : > { %1146 = vmatprep.mubr.f32.mxu0 %v327_v2 }
 0x11e   : > { %v3449_v18 = vpop.f32.mrf.mxu1  ;;  %2597 = vmatmul.mubr.msk.f32.gmra.mxu1 %vm548_vm2, %v364_v14  ;;  %v357_v14 = vld [vmem:[%s2951_s29 + $0x518] sm:$0xff] }
 0x11f   : > { %2599 = vmatprep.mubr.msk.f32.mxu1 %vm2854_vm0, %v2853_v0 }
 0x120   : > { %1147 = vmatmul.mubr.f32.gmra.mxu0 %v326_v6  ;;  %v2454_v20 = vpop.f32.mrf.mxu1  ;;  %v385_v6 = vld [vmem:[%s2951_s29 + $0x5f8] sm:$0xff] }
 0x121   : > { %1151 = vmatprep.mubr.f32.mxu0 %v330_v7 }
 0x122   : > { %v3457_v23 = vpop.f32.mrf.mxu1  ;;  %2600 = vmatmul.mubr.msk.f32.gmra.mxu1 %vm548_vm2, %v367_v19 }
 0x123   : > { %2602 = vmatprep.mubr.msk.f32.mxu1 %vm2854_vm0, %v2853_v0 }
 0x124   : > { %1152 = vmatmul.mubr.f32.gmra.mxu0 %v329_v11  ;;  %v2457_v25 = vpop.f32.mrf.mxu1  ;;  %v353_v11 = vld [vmem:[%s2951_s29 + $0x4f8] sm:$0xff] }
 0x125   : > { %1156 = vmatprep.mubr.f32.mxu0 %v333_v12 }
 0x126   : > { %v3470_v29 = vpop.f32.mrf.mxu1  ;;  %2603 = vmatmul.mubr.msk.f32.gmra.mxu1 %vm548_vm2, %v370_v24  ;;  %v360_v24 = vld [vmem:[%s2951_s29 + $0x530] sm:$0xff] }
 0x127   : > { %2605 = vmatprep.mubr.msk.f32.mxu1 %vm2854_vm0, %v2853_v0 }
 0x128   : > { %1157 = vmatmul.mubr.f32.gmra.mxu0 %v332_v16  ;;  %v2460_v32 = vpop.f32.mrf.mxu1  ;;  %v388_v16 = vld [vmem:[%s2951_s29 + $0x610] sm:$0xff] }
 0x129   : > { %1161 = vmatprep.mubr.f32.mxu0 %v336_v17  ;;  %v359_v32 = vld [vmem:[%s2951_s29 + $0x528] sm:$0xff] }
 0x12a   : > { %v3484_v37 = vpop.f32.mrf.mxu1  ;;  %2606 = vmatmul.mubr.msk.f32.gmra.mxu1 %vm548_vm2, %v373_v30 }
 0x12b   : > { %2608 = vmatprep.mubr.msk.f32.mxu1 %vm2854_vm0, %v2853_v0 }
 0x12c   : > { %1162 = vmatmul.mubr.f32.gmra.mxu0 %v335_v21  ;;  %v2463_v42 = vpop.f32.mrf.mxu1  ;;  %v356_v21 = vld [vmem:[%s2951_s29 + $0x510] sm:$0xff] }
 0x12d   : > { %1166 = vmatprep.mubr.f32.mxu0 %v339_v22  ;;  %v362_v42 = vld [vmem:[%s2951_s29 + $0x540] sm:$0xff] }
 0x12e   : > { %2609 = vmatmul.mubr.msk.f32.gmra.mxu1 %vm548_vm2, %v376_v39 }
 0x12f   : > { %2611 = vmatprep.mubr.msk.f32.mxu1 %vm2854_vm0, %v2853_v0 }
 0x130   : > { %v928_v31 = vpop.f32.mrf.mxu0  ;;  %1167 = vmatmul.mubr.f32.gmra.mxu0 %v338_v26  ;;  %v391_v26 = vld [vmem:[%s2951_s29 + $0x628] sm:$0xff] }
 0x131   : > { %v929_v33 = vadd.f32 %v3467_v27, %v928_v31  ;;  %1171 = vmatprep.mubr.f32.mxu0 %v342_v28 }
 0x132   : > { %v930_v35 = vpop.f32.mrf.mxu0  ;;  %2612 = vmatmul.mubr.msk.f32.gmra.mxu1 %vm548_vm2, %v379_v49 }
 0x133   : > { %v1509_v38 = vadd.f32 %v3383_v41, %v929_v33  ;;  %v3496_v41 = vpop.f32.mrf.mxu1  ;;  %2614 = vmatprep.mubr.msk.f32.mxu1 %vm2854_vm0, %v2853_v0 }
 0x134   : > { %v933_v40 = vpop.f32.mrf.mxu0  ;;  %1172 = vmatmul.mubr.f32.gmra.mxu0 %v341_v34  ;;  %v363_v34 = vld [vmem:[%s2951_s29 + $0x548] sm:$0xff] }
 0x135   : > { %2023 = vst.msk [vmem:[%s3481_s24] sm:$0xff] %vm2022_vm3, %v1509_v38  ;;  %v934_v43 = vadd.f32 %v3467_v27, %v933_v40  ;;  %1176 = vmatprep.mubr.f32.mxu0 %v345_v36  ;;  %v2466_v52 = vpop.f32.mrf.mxu1  ;;  %v394_v36 = vld [vmem:[%s2951_s29 + $0x640] sm:$0xff] }
 0x136   : > { %v935_v45 = vpop.f32.mrf.mxu0  ;;  %2615 = vmatmul.mubr.msk.f32.gmra.mxu1 %vm548_vm2, %v382_v59  ;;  %v365_v52 = vld [vmem:[%s2951_s29 + $0x558] sm:$0xff] }
 0x137   : > { %v1514_v48 = vadd.f32 %v3391_v46, %v934_v43  ;;  %v3508_v46 = vpop.f32.mrf.mxu1  ;;  %2617 = vmatprep.mubr.msk.f32.mxu1 %vm2854_vm0, %v2853_v0 }
 0x138   : > { %v938_v50 = vpop.f32.mrf.mxu0  ;;  %1177 = vmatmul.mubr.f32.gmra.mxu0 %v344_v44  ;;  %v366_v44 = vld [vmem:[%s2951_s29 + $0x560] sm:$0xff] }
 0x139   : > { %2024 = vst.msk [vmem:[%s3481_s24 + $0x8] sm:$0xff] %vm2022_vm3, %v1514_v48  ;;  %v939_v53 = vadd.f32 %v3467_v27, %v938_v50  ;;  %1181 = vmatprep.mubr.f32.mxu0 %v348_v47  ;;  %v2469_v62 = vpop.f32.mrf.mxu1  ;;  %v397_v47 = vld [vmem:[%s2951_s29 + $0x658] sm:$0xff] }
 0x13a   : > { %v940_v55 = vpop.f32.mrf.mxu0  ;;  %2618 = vmatmul.mubr.msk.f32.gmra.mxu1 %vm548_vm2, %v385_v6  ;;  %v368_v62 = vld [vmem:[%s2951_s29 + $0x570] sm:$0xff] }
 0x13b   : > { %v1519_v58 = vadd.f32 %v3399_v51, %v939_v53  ;;  %v3520_v51 = vpop.f32.mrf.mxu1  ;;  %2620 = vmatprep.mubr.msk.f32.mxu1 %vm2854_vm0, %v2853_v0 }
 0x13c   : > { %v943_v60 = vpop.f32.mrf.mxu0  ;;  %1182 = vmatmul.mubr.f32.gmra.mxu0 %v347_v54  ;;  %v369_v54 = vld [vmem:[%s2951_s29 + $0x578] sm:$0xff] }
 0x13d   : > { %2025 = vst.msk [vmem:[%s3481_s24 + $0x10] sm:$0xff] %vm2022_vm3, %v1519_v58  ;;  %v944_v63 = vadd.f32 %v3467_v27, %v943_v60  ;;  %1186 = vmatprep.mubr.f32.mxu0 %v351_v57  ;;  %v2472_v9 = vpop.f32.mrf.mxu1  ;;  %v400_v57 = vld [vmem:[%s2951_s29 + $0x670] sm:$0xff] }
 0x13e   : > { %v945_v2 = vpop.f32.mrf.mxu0  ;;  %2621 = vmatmul.mubr.msk.f32.gmra.mxu1 %vm548_vm2, %v388_v16  ;;  %v371_v9 = vld [vmem:[%s2951_s29 + $0x588] sm:$0xff] }
 0x13f   : > { %v1524_v5 = vadd.f32 %v3407_v56, %v944_v63  ;;  %v3532_v56 = vpop.f32.mrf.mxu1  ;;  %2623 = vmatprep.mubr.msk.f32.mxu1 %vm2854_vm0, %v2853_v0 }
 0x140   : > { %v948_v7 = vpop.f32.mrf.mxu0  ;;  %1187 = vmatmul.mubr.f32.gmra.mxu0 %v350_v1  ;;  %v372_v1 = vld [vmem:[%s2951_s29 + $0x590] sm:$0xff] }
 0x141   : > { %2026 = vst.msk [vmem:[%s3481_s24 + $0x18] sm:$0xff] %vm2022_vm3, %v1524_v5  ;;  %v949_v10 = vadd.f32 %v3467_v27, %v948_v7  ;;  %1191 = vmatprep.mubr.f32.mxu0 %v354_v4  ;;  %v2475_v19 = vpop.f32.mrf.mxu1  ;;  %v403_v4 = vld [vmem:[%s2951_s29 + $0x688] sm:$0xff] }
 0x142   : > { %v950_v12 = vpop.f32.mrf.mxu0  ;;  %2624 = vmatmul.mubr.msk.f32.gmra.mxu1 %vm548_vm2, %v391_v26  ;;  %v374_v19 = vld [vmem:[%s2951_s29 + $0x5a0] sm:$0xff] }
 0x143   : > { %v1529_v15 = vadd.f32 %v3415_v61, %v949_v10  ;;  %v3544_v61 = vpop.f32.mrf.mxu1  ;;  %2626 = vmatprep.mubr.msk.f32.mxu1 %vm2854_vm0, %v2853_v0 }
 0x144   : > { %v953_v17 = vpop.f32.mrf.mxu0  ;;  %1192 = vmatmul.mubr.f32.gmra.mxu0 %v353_v11  ;;  %v375_v11 = vld [vmem:[%s2951_s29 + $0x5a8] sm:$0xff] }
 0x145   : > { %2027 = vst.msk [vmem:[%s3481_s24 + $0x20] sm:$0xff] %vm2022_vm3, %v1529_v15  ;;  %v954_v20 = vadd.f32 %v3467_v27, %v953_v17  ;;  %1196 = vmatprep.mubr.f32.mxu0 %v357_v14  ;;  %v2478_v30 = vpop.f32.mrf.mxu1  ;;  %v406_v14 = vld [vmem:[%s2951_s29 + $0x6a0] sm:$0xff] }
 0x146   : > { %v955_v22 = vpop.f32.mrf.mxu0  ;;  %2627 = vmatmul.mubr.msk.f32.gmra.mxu1 %vm548_vm2, %v394_v36  ;;  %v377_v30 = vld [vmem:[%s2951_s29 + $0x5b8] sm:$0xff] }
 0x147   : > { %v1534_v25 = vadd.f32 %v3423_v3, %v954_v20  ;;  %v3556_v3 = vpop.f32.mrf.mxu1  ;;  %2629 = vmatprep.mubr.msk.f32.mxu1 %vm2854_vm0, %v2853_v0 }
 0x148   : > { %v958_v28 = vpop.f32.mrf.mxu0  ;;  %1197 = vmatmul.mubr.f32.gmra.mxu0 %v356_v21  ;;  %v378_v21 = vld [vmem:[%s2951_s29 + $0x5c0] sm:$0xff] }
 0x149   : > { %2028 = vst.msk [vmem:[%s3481_s24 + $0x28] sm:$0xff] %vm2022_vm3, %v1534_v25  ;;  %v959_v31 = vadd.f32 %v3467_v27, %v958_v28  ;;  %1201 = vmatprep.mubr.f32.mxu0 %v360_v24  ;;  %v2481_v39 = vpop.f32.mrf.mxu1  ;;  %v409_v24 = vld [vmem:[%s2951_s29 + $0x6b8] sm:$0xff] }
 0x14a   : > { %v960_v33 = vpop.f32.mrf.mxu0  ;;  %2630 = vmatmul.mubr.msk.f32.gmra.mxu1 %vm548_vm2, %v397_v47  ;;  %v380_v39 = vld [vmem:[%s2951_s29 + $0x5d0] sm:$0xff] }
 0x14b   : > { %v1539_v35 = vadd.f32 %v3431_v8, %v959_v31  ;;  %v3568_v8 = vpop.f32.mrf.mxu1  ;;  %2632 = vmatprep.mubr.msk.f32.mxu1 %vm2854_vm0, %v2853_v0 }
 0x14c   : > { %v963_v38 = vpop.f32.mrf.mxu0  ;;  %1202 = vmatmul.mubr.f32.gmra.mxu0 %v359_v32  ;;  %v381_v32 = vld [vmem:[%s2951_s29 + $0x5d8] sm:$0xff] }
 0x14d   : > { %2029 = vst.msk [vmem:[%s3481_s24 + $0x30] sm:$0xff] %vm2022_vm3, %v1539_v35  ;;  %v964_v40 = vadd.f32 %v3467_v27, %v963_v38  ;;  %1206 = vmatprep.mubr.f32.mxu0 %v363_v34  ;;  %v2484_v49 = vpop.f32.mrf.mxu1  ;;  %v412_v34 = vld [vmem:[%s2951_s29 + $0x6d0] sm:$0xff] }
 0x14e   : > { %v965_v43 = vpop.f32.mrf.mxu0  ;;  %2633 = vmatmul.mubr.msk.f32.gmra.mxu1 %vm548_vm2, %v400_v57  ;;  %v383_v49 = vld [vmem:[%s2951_s29 + $0x5e8] sm:$0xff] }
 0x14f   : > { %v1544_v45 = vadd.f32 %v3439_v13, %v964_v40  ;;  %v3580_v13 = vpop.f32.mrf.mxu1  ;;  %2635 = vmatprep.mubr.msk.f32.mxu1 %vm2854_vm0, %v2853_v0 }
 0x150   : > { %v968_v48 = vpop.f32.mrf.mxu0  ;;  %1207 = vmatmul.mubr.f32.gmra.mxu0 %v362_v42  ;;  %v384_v42 = vld [vmem:[%s2951_s29 + $0x5f0] sm:$0xff] }
 0x151   : > { %2030 = vst.msk [vmem:[%s3481_s24 + $0x38] sm:$0xff] %vm2022_vm3, %v1544_v45  ;;  %v969_v50 = vadd.f32 %v3467_v27, %v968_v48  ;;  %1211 = vmatprep.mubr.f32.mxu0 %v366_v44  ;;  %v2487_v59 = vpop.f32.mrf.mxu1  ;;  %v415_v44 = vld [vmem:[%s2951_s29 + $0x6e8] sm:$0xff] }
 0x152   : > { %v970_v53 = vpop.f32.mrf.mxu0  ;;  %2636 = vmatmul.mubr.msk.f32.gmra.mxu1 %vm548_vm2, %v403_v4  ;;  %v386_v59 = vld [vmem:[%s2951_s29 + $0x600] sm:$0xff] }
 0x153   : > { %v1549_v55 = vadd.f32 %v3449_v18, %v969_v50  ;;  %v3592_v18 = vpop.f32.mrf.mxu1  ;;  %2638 = vmatprep.mubr.msk.f32.mxu1 %vm2854_vm0, %v2853_v0 }
 0x154   : > { %v973_v58 = vpop.f32.mrf.mxu0  ;;  %1212 = vmatmul.mubr.f32.gmra.mxu0 %v365_v52  ;;  %v387_v52 = vld [vmem:[%s2951_s29 + $0x608] sm:$0xff] }
 0x155   : > { %2031 = vst.msk [vmem:[%s3481_s24 + $0x40] sm:$0xff] %vm2022_vm3, %v1549_v55  ;;  %v974_v60 = vadd.f32 %v3467_v27, %v973_v58  ;;  %1216 = vmatprep.mubr.f32.mxu0 %v369_v54  ;;  %v2490_v6 = vpop.f32.mrf.mxu1  ;;  %v418_v54 = vld [vmem:[%s2951_s29 + $0x700] sm:$0xff] }
 0x156   : > { %v975_v63 = vpop.f32.mrf.mxu0  ;;  %2639 = vmatmul.mubr.msk.f32.gmra.mxu1 %vm548_vm2, %v406_v14  ;;  %v389_v6 = vld [vmem:[%s2951_s29 + $0x618] sm:$0xff] }
 0x157   : > { %v1554_v2 = vadd.f32 %v3457_v23, %v974_v60  ;;  %v3604_v23 = vpop.f32.mrf.mxu1  ;;  %2641 = vmatprep.mubr.msk.f32.mxu1 %vm2854_vm0, %v2853_v0 }
 0x158   : > { %v978_v5 = vpop.f32.mrf.mxu0  ;;  %1217 = vmatmul.mubr.f32.gmra.mxu0 %v368_v62  ;;  %v390_v62 = vld [vmem:[%s2951_s29 + $0x620] sm:$0xff] }
 0x159   : > { %2032 = vst.msk [vmem:[%s3481_s24 + $0x48] sm:$0xff] %vm2022_vm3, %v1554_v2  ;;  %v979_v7 = vadd.f32 %v3467_v27, %v978_v5  ;;  %1221 = vmatprep.mubr.f32.mxu0 %v372_v1  ;;  %v2493_v16 = vpop.f32.mrf.mxu1  ;;  %v421_v1 = vld [vmem:[%s2951_s29 + $0x718] sm:$0xff] }
 0x15a   : > { %v980_v10 = vpop.f32.mrf.mxu0  ;;  %2642 = vmatmul.mubr.msk.f32.gmra.mxu1 %vm548_vm2, %v409_v24  ;;  %v392_v16 = vld [vmem:[%s2951_s29 + $0x630] sm:$0xff] }
 0x15b   : > { %v1559_v12 = vadd.f32 %v3470_v29, %v979_v7  ;;  %v3616_v29 = vpop.f32.mrf.mxu1  ;;  %2644 = vmatprep.mubr.msk.f32.mxu1 %vm2854_vm0, %v2853_v0 }
 0x15c   : > { %v983_v15 = vpop.f32.mrf.mxu0  ;;  %1222 = vmatmul.mubr.f32.gmra.mxu0 %v371_v9  ;;  %v393_v9 = vld [vmem:[%s2951_s29 + $0x638] sm:$0xff] }
 0x15d   : > { %2033 = vst.msk [vmem:[%s3481_s24 + $0x50] sm:$0xff] %vm2022_vm3, %v1559_v12  ;;  %v984_v17 = vadd.f32 %v3467_v27, %v983_v15  ;;  %1226 = vmatprep.mubr.f32.mxu0 %v375_v11  ;;  %v2496_v26 = vpop.f32.mrf.mxu1  ;;  %v424_v11 = vld [vmem:[%s2951_s29 + $0x730] sm:$0xff] }
 0x15e   : > { %v985_v20 = vpop.f32.mrf.mxu0  ;;  %2645 = vmatmul.mubr.msk.f32.gmra.mxu1 %vm548_vm2, %v412_v34  ;;  %v395_v26 = vld [vmem:[%s2951_s29 + $0x648] sm:$0xff] }
 0x15f   : > { %v1564_v22 = vadd.f32 %v3484_v37, %v984_v17  ;;  %v3628_v37 = vpop.f32.mrf.mxu1  ;;  %2647 = vmatprep.mubr.msk.f32.mxu1 %vm2854_vm0, %v2853_v0 }
 0x160   : > { %v988_v25 = vpop.f32.mrf.mxu0  ;;  %1227 = vmatmul.mubr.f32.gmra.mxu0 %v374_v19  ;;  %v396_v19 = vld [vmem:[%s2951_s29 + $0x650] sm:$0xff] }
 0x161   : > { %2034 = vst.msk [vmem:[%s3481_s24 + $0x58] sm:$0xff] %vm2022_vm3, %v1564_v22  ;;  %v989_v28 = vadd.f32 %v3467_v27, %v988_v25  ;;  %1231 = vmatprep.mubr.f32.mxu0 %v378_v21  ;;  %v2499_v36 = vpop.f32.mrf.mxu1  ;;  %v427_v21 = vld [vmem:[%s2951_s29 + $0x748] sm:$0xff] }
 0x162   : > { %v990_v31 = vpop.f32.mrf.mxu0  ;;  %2648 = vmatmul.mubr.msk.f32.gmra.mxu1 %vm548_vm2, %v415_v44  ;;  %v398_v36 = vld [vmem:[%s2951_s29 + $0x660] sm:$0xff] }
 0x163   : > { %v1569_v33 = vadd.f32 %v3496_v41, %v989_v28  ;;  %v3640_v41 = vpop.f32.mrf.mxu1  ;;  %2650 = vmatprep.mubr.msk.f32.mxu1 %vm2854_vm0, %v2853_v0 }
 0x164   : > { %v993_v35 = vpop.f32.mrf.mxu0  ;;  %1232 = vmatmul.mubr.f32.gmra.mxu0 %v377_v30  ;;  %v399_v30 = vld [vmem:[%s2951_s29 + $0x668] sm:$0xff] }
 0x165   : > { %2035 = vst.msk [vmem:[%s3481_s24 + $0x60] sm:$0xff] %vm2022_vm3, %v1569_v33  ;;  %v994_v38 = vadd.f32 %v3467_v27, %v993_v35  ;;  %1236 = vmatprep.mubr.f32.mxu0 %v381_v32  ;;  %v2502_v47 = vpop.f32.mrf.mxu1  ;;  %v430_v32 = vld [vmem:[%s2951_s29 + $0x760] sm:$0xff] }
 0x166   : > { %v995_v40 = vpop.f32.mrf.mxu0  ;;  %2651 = vmatmul.mubr.msk.f32.gmra.mxu1 %vm548_vm2, %v418_v54  ;;  %v401_v47 = vld [vmem:[%s2951_s29 + $0x678] sm:$0xff] }
 0x167   : > { %v1574_v43 = vadd.f32 %v3508_v46, %v994_v38  ;;  %v3652_v46 = vpop.f32.mrf.mxu1  ;;  %2653 = vmatprep.mubr.msk.f32.mxu1 %vm2854_vm0, %v2853_v0 }
 0x168   : > { %v998_v45 = vpop.f32.mrf.mxu0  ;;  %1237 = vmatmul.mubr.f32.gmra.mxu0 %v380_v39  ;;  %v402_v39 = vld [vmem:[%s2951_s29 + $0x680] sm:$0xff] }
 0x169   : > { %2036 = vst.msk [vmem:[%s3481_s24 + $0x68] sm:$0xff] %vm2022_vm3, %v1574_v43  ;;  %v999_v48 = vadd.f32 %v3467_v27, %v998_v45  ;;  %1241 = vmatprep.mubr.f32.mxu0 %v384_v42  ;;  %v2505_v57 = vpop.f32.mrf.mxu1  ;;  %v433_v42 = vld [vmem:[%s2951_s29 + $0x778] sm:$0xff] }
 0x16a   : > { %v1000_v50 = vpop.f32.mrf.mxu0  ;;  %2654 = vmatmul.mubr.msk.f32.gmra.mxu1 %vm548_vm2, %v421_v1  ;;  %v404_v57 = vld [vmem:[%s2951_s29 + $0x690] sm:$0xff] }
 0x16b   : > { %v1579_v53 = vadd.f32 %v3520_v51, %v999_v48  ;;  %v3664_v51 = vpop.f32.mrf.mxu1  ;;  %2656 = vmatprep.mubr.msk.f32.mxu1 %vm2854_vm0, %v2853_v0 }
 0x16c   : > { %v1003_v55 = vpop.f32.mrf.mxu0  ;;  %1242 = vmatmul.mubr.f32.gmra.mxu0 %v383_v49  ;;  %v405_v49 = vld [vmem:[%s2951_s29 + $0x698] sm:$0xff] }
 0x16d   : > { %2037 = vst.msk [vmem:[%s3481_s24 + $0x70] sm:$0xff] %vm2022_vm3, %v1579_v53  ;;  %v1004_v58 = vadd.f32 %v3467_v27, %v1003_v55  ;;  %1246 = vmatprep.mubr.f32.mxu0 %v387_v52  ;;  %v2508_v4 = vpop.f32.mrf.mxu1  ;;  %v436_v52 = vld [vmem:[%s2951_s29 + $0x790] sm:$0xff] }
 0x16e   : > { %v1005_v60 = vpop.f32.mrf.mxu0  ;;  %2657 = vmatmul.mubr.msk.f32.gmra.mxu1 %vm548_vm2, %v424_v11  ;;  %v407_v4 = vld [vmem:[%s2951_s29 + $0x6a8] sm:$0xff] }
 0x16f   : > { %v1584_v63 = vadd.f32 %v3532_v56, %v1004_v58  ;;  %v3676_v56 = vpop.f32.mrf.mxu1  ;;  %2659 = vmatprep.mubr.msk.f32.mxu1 %vm2854_vm0, %v2853_v0 }
 0x170   : > { %v1008_v2 = vpop.f32.mrf.mxu0  ;;  %1247 = vmatmul.mubr.f32.gmra.mxu0 %v386_v59  ;;  %v408_v59 = vld [vmem:[%s2951_s29 + $0x6b0] sm:$0xff] }
 0x171   : > { %2038 = vst.msk [vmem:[%s3481_s24 + $0x78] sm:$0xff] %vm2022_vm3, %v1584_v63  ;;  %v1009_v5 = vadd.f32 %v3467_v27, %v1008_v2  ;;  %1251 = vmatprep.mubr.f32.mxu0 %v390_v62  ;;  %v2511_v14 = vpop.f32.mrf.mxu1  ;;  %v439_v62 = vld [vmem:[%s2951_s29 + $0x7a8] sm:$0xff] }
 0x172   : > { %v1010_v7 = vpop.f32.mrf.mxu0  ;;  %2660 = vmatmul.mubr.msk.f32.gmra.mxu1 %vm548_vm2, %v427_v21  ;;  %v410_v14 = vld [vmem:[%s2951_s29 + $0x6c0] sm:$0xff] }
 0x173   : > { %v1589_v10 = vadd.f32 %v3544_v61, %v1009_v5  ;;  %v3688_v61 = vpop.f32.mrf.mxu1  ;;  %2662 = vmatprep.mubr.msk.f32.mxu1 %vm2854_vm0, %v2853_v0 }
 0x174   : > { %v1013_v12 = vpop.f32.mrf.mxu0  ;;  %1252 = vmatmul.mubr.f32.gmra.mxu0 %v389_v6  ;;  %v411_v6 = vld [vmem:[%s2951_s29 + $0x6c8] sm:$0xff] }
 0x175   : > { %2039 = vst.msk [vmem:[%s3481_s24 + $0x80] sm:$0xff] %vm2022_vm3, %v1589_v10  ;;  %v1014_v15 = vadd.f32 %v3467_v27, %v1013_v12  ;;  %1256 = vmatprep.mubr.f32.mxu0 %v393_v9  ;;  %v2514_v24 = vpop.f32.mrf.mxu1  ;;  %v442_v9 = vld [vmem:[%s2951_s29 + $0x7c0] sm:$0xff] }
 0x176   : > { %v1015_v17 = vpop.f32.mrf.mxu0  ;;  %2663 = vmatmul.mubr.msk.f32.gmra.mxu1 %vm548_vm2, %v430_v32  ;;  %v413_v24 = vld [vmem:[%s2951_s29 + $0x6d8] sm:$0xff] }
 0x177   : > { %v1594_v20 = vadd.f32 %v3556_v3, %v1014_v15  ;;  %v3700_v3 = vpop.f32.mrf.mxu1  ;;  %2665 = vmatprep.mubr.msk.f32.mxu1 %vm2854_vm0, %v2853_v0 }
 0x178   : > { %v1018_v22 = vpop.f32.mrf.mxu0  ;;  %1257 = vmatmul.mubr.f32.gmra.mxu0 %v392_v16  ;;  %v414_v16 = vld [vmem:[%s2951_s29 + $0x6e0] sm:$0xff] }
 0x179   : > { %2040 = vst.msk [vmem:[%s3481_s24 + $0x88] sm:$0xff] %vm2022_vm3, %v1594_v20  ;;  %v1019_v25 = vadd.f32 %v3467_v27, %v1018_v22  ;;  %1261 = vmatprep.mubr.f32.mxu0 %v396_v19  ;;  %v2517_v34 = vpop.f32.mrf.mxu1  ;;  %v445_v19 = vld [vmem:[%s2951_s29 + $0x7d8] sm:$0xff] }
 0x17a   : > { %v1020_v28 = vpop.f32.mrf.mxu0  ;;  %2666 = vmatmul.mubr.msk.f32.gmra.mxu1 %vm548_vm2, %v433_v42  ;;  %v416_v34 = vld [vmem:[%s2951_s29 + $0x6f0] sm:$0xff] }
 0x17b   : > { %v1599_v31 = vadd.f32 %v3568_v8, %v1019_v25  ;;  %v3712_v8 = vpop.f32.mrf.mxu1  ;;  %2668 = vmatprep.mubr.msk.f32.mxu1 %vm2854_vm0, %v2853_v0 }
 0x17c   : > { %v1023_v33 = vpop.f32.mrf.mxu0  ;;  %1262 = vmatmul.mubr.f32.gmra.mxu0 %v395_v26  ;;  %v417_v26 = vld [vmem:[%s2951_s29 + $0x6f8] sm:$0xff] }
 0x17d   : > { %2041 = vst.msk [vmem:[%s3481_s24 + $0x90] sm:$0xff] %vm2022_vm3, %v1599_v31  ;;  %v1024_v35 = vadd.f32 %v3467_v27, %v1023_v33  ;;  %1266 = vmatprep.mubr.f32.mxu0 %v399_v30  ;;  %v2520_v44 = vpop.f32.mrf.mxu1  ;;  %v448_v30 = vld [vmem:[%s2951_s29 + $0x7f0] sm:$0xff] }
 0x17e   : > { %v1025_v38 = vpop.f32.mrf.mxu0  ;;  %2669 = vmatmul.mubr.msk.f32.gmra.mxu1 %vm548_vm2, %v436_v52  ;;  %v419_v44 = vld [vmem:[%s2951_s29 + $0x708] sm:$0xff] }
 0x17f   : > { %v1604_v40 = vadd.f32 %v3580_v13, %v1024_v35  ;;  %v3724_v13 = vpop.f32.mrf.mxu1  ;;  %2671 = vmatprep.mubr.msk.f32.mxu1 %vm2854_vm0, %v2853_v0 }
 0x180   : > { %v1028_v43 = vpop.f32.mrf.mxu0  ;;  %1267 = vmatmul.mubr.f32.gmra.mxu0 %v398_v36  ;;  %v420_v36 = vld [vmem:[%s2951_s29 + $0x710] sm:$0xff] }
 0x181   : > { %2042 = vst.msk [vmem:[%s3481_s24 + $0x98] sm:$0xff] %vm2022_vm3, %v1604_v40  ;;  %v1029_v45 = vadd.f32 %v3467_v27, %v1028_v43  ;;  %1271 = vmatprep.mubr.f32.mxu0 %v402_v39  ;;  %v2523_v54 = vpop.f32.mrf.mxu1  ;;  %v451_v39 = vld [vmem:[%s2951_s29 + $0x808] sm:$0xff] }
 0x182   : > { %v1030_v48 = vpop.f32.mrf.mxu0  ;;  %2672 = vmatmul.mubr.msk.f32.gmra.mxu1 %vm548_vm2, %v439_v62  ;;  %v422_v54 = vld [vmem:[%s2951_s29 + $0x720] sm:$0xff] }
 0x183   : > { %v1609_v50 = vadd.f32 %v3592_v18, %v1029_v45  ;;  %v3736_v18 = vpop.f32.mrf.mxu1  ;;  %2674 = vmatprep.mubr.msk.f32.mxu1 %vm2854_vm0, %v2853_v0 }
 0x184   : > { %v1033_v53 = vpop.f32.mrf.mxu0  ;;  %1272 = vmatmul.mubr.f32.gmra.mxu0 %v401_v47  ;;  %v423_v47 = vld [vmem:[%s2951_s29 + $0x728] sm:$0xff] }
 0x185   : > { %2043 = vst.msk [vmem:[%s3481_s24 + $0xa0] sm:$0xff] %vm2022_vm3, %v1609_v50  ;;  %v1034_v55 = vadd.f32 %v3467_v27, %v1033_v53  ;;  %1276 = vmatprep.mubr.f32.mxu0 %v405_v49  ;;  %v2526_v1 = vpop.f32.mrf.mxu1  ;;  %v454_v49 = vld [vmem:[%s2951_s29 + $0x820] sm:$0xff] }
 0x186   : > { %v1035_v58 = vpop.f32.mrf.mxu0  ;;  %2675 = vmatmul.mubr.msk.f32.gmra.mxu1 %vm548_vm2, %v442_v9  ;;  %v425_v1 = vld [vmem:[%s2951_s29 + $0x738] sm:$0xff] }
 0x187   : > { %v1614_v60 = vadd.f32 %v3604_v23, %v1034_v55  ;;  %v3748_v23 = vpop.f32.mrf.mxu1  ;;  %2677 = vmatprep.mubr.msk.f32.mxu1 %vm2854_vm0, %v2853_v0 }
 0x188   : > { %v1038_v63 = vpop.f32.mrf.mxu0  ;;  %1277 = vmatmul.mubr.f32.gmra.mxu0 %v404_v57  ;;  %v426_v57 = vld [vmem:[%s2951_s29 + $0x740] sm:$0xff] }
 0x189   : > { %2044 = vst.msk [vmem:[%s3481_s24 + $0xa8] sm:$0xff] %vm2022_vm3, %v1614_v60  ;;  %v1039_v2 = vadd.f32 %v3467_v27, %v1038_v63  ;;  %1281 = vmatprep.mubr.f32.mxu0 %v408_v59  ;;  %v2529_v11 = vpop.f32.mrf.mxu1  ;;  %v457_v59 = vld [vmem:[%s2951_s29 + $0x838] sm:$0xff] }
 0x18a   : > { %v1040_v5 = vpop.f32.mrf.mxu0  ;;  %2678 = vmatmul.mubr.msk.f32.gmra.mxu1 %vm548_vm2, %v445_v19  ;;  %v428_v11 = vld [vmem:[%s2951_s29 + $0x750] sm:$0xff] }
 0x18b   : > { %v1619_v7 = vadd.f32 %v3616_v29, %v1039_v2  ;;  %v3760_v29 = vpop.f32.mrf.mxu1  ;;  %2680 = vmatprep.mubr.msk.f32.mxu1 %vm2854_vm0, %v2853_v0 }
 0x18c   : > { %v1043_v10 = vpop.f32.mrf.mxu0  ;;  %1282 = vmatmul.mubr.f32.gmra.mxu0 %v407_v4  ;;  %v429_v4 = vld [vmem:[%s2951_s29 + $0x758] sm:$0xff] }
 0x18d   : > { %2045 = vst.msk [vmem:[%s3481_s24 + $0xb0] sm:$0xff] %vm2022_vm3, %v1619_v7  ;;  %v1044_v12 = vadd.f32 %v3467_v27, %v1043_v10  ;;  %1286 = vmatprep.mubr.f32.mxu0 %v411_v6  ;;  %v2532_v21 = vpop.f32.mrf.mxu1  ;;  %v460_v6 = vld [vmem:[%s2951_s29 + $0x850] sm:$0xff] }
 0x18e   : > { %v1045_v15 = vpop.f32.mrf.mxu0  ;;  %2681 = vmatmul.mubr.msk.f32.gmra.mxu1 %vm548_vm2, %v448_v30  ;;  %v431_v21 = vld [vmem:[%s2951_s29 + $0x768] sm:$0xff] }
 0x18f   : > { %v1624_v17 = vadd.f32 %v3628_v37, %v1044_v12  ;;  %v3772_v37 = vpop.f32.mrf.mxu1  ;;  %2683 = vmatprep.mubr.msk.f32.mxu1 %vm2854_vm0, %v2853_v0 }
 0x190   : > { %v1048_v20 = vpop.f32.mrf.mxu0  ;;  %1287 = vmatmul.mubr.f32.gmra.mxu0 %v410_v14  ;;  %v432_v14 = vld [vmem:[%s2951_s29 + $0x770] sm:$0xff] }
 0x191   : > { %2046 = vst.msk [vmem:[%s3481_s24 + $0xb8] sm:$0xff] %vm2022_vm3, %v1624_v17  ;;  %v1049_v22 = vadd.f32 %v3467_v27, %v1048_v20  ;;  %1291 = vmatprep.mubr.f32.mxu0 %v414_v16  ;;  %v2535_v32 = vpop.f32.mrf.mxu1  ;;  %v463_v16 = vld [vmem:[%s2951_s29 + $0x868] sm:$0xff] }
 0x192   : > { %v1050_v25 = vpop.f32.mrf.mxu0  ;;  %2684 = vmatmul.mubr.msk.f32.gmra.mxu1 %vm548_vm2, %v451_v39  ;;  %v434_v32 = vld [vmem:[%s2951_s29 + $0x780] sm:$0xff] }
 0x193   : > { %v1629_v28 = vadd.f32 %v3640_v41, %v1049_v22  ;;  %v3784_v41 = vpop.f32.mrf.mxu1  ;;  %2686 = vmatprep.mubr.msk.f32.mxu1 %vm2854_vm0, %v2853_v0 }
 0x194   : > { %v1053_v31 = vpop.f32.mrf.mxu0  ;;  %1292 = vmatmul.mubr.f32.gmra.mxu0 %v413_v24  ;;  %v435_v24 = vld [vmem:[%s2951_s29 + $0x788] sm:$0xff] }
 0x195   : > { %2047 = vst.msk [vmem:[%s3481_s24 + $0xc0] sm:$0xff] %vm2022_vm3, %v1629_v28  ;;  %v1054_v33 = vadd.f32 %v3467_v27, %v1053_v31  ;;  %1296 = vmatprep.mubr.f32.mxu0 %v417_v26  ;;  %v2538_v42 = vpop.f32.mrf.mxu1  ;;  %v466_v26 = vld [vmem:[%s2951_s29 + $0x880] sm:$0xff] }
 0x196   : > { %v1055_v35 = vpop.f32.mrf.mxu0  ;;  %2687 = vmatmul.mubr.msk.f32.gmra.mxu1 %vm548_vm2, %v454_v49  ;;  %v437_v42 = vld [vmem:[%s2951_s29 + $0x798] sm:$0xff] }
 0x197   : > { %v1634_v38 = vadd.f32 %v3652_v46, %v1054_v33  ;;  %v3796_v46 = vpop.f32.mrf.mxu1  ;;  %2689 = vmatprep.mubr.msk.f32.mxu1 %vm2854_vm0, %v2853_v0 }
 0x198   : > { %v1058_v40 = vpop.f32.mrf.mxu0  ;;  %1297 = vmatmul.mubr.f32.gmra.mxu0 %v416_v34  ;;  %v438_v34 = vld [vmem:[%s2951_s29 + $0x7a0] sm:$0xff] }
 0x199   : > { %2048 = vst.msk [vmem:[%s3481_s24 + $0xc8] sm:$0xff] %vm2022_vm3, %v1634_v38  ;;  %v1059_v43 = vadd.f32 %v3467_v27, %v1058_v40  ;;  %1301 = vmatprep.mubr.f32.mxu0 %v420_v36  ;;  %v2541_v52 = vpop.f32.mrf.mxu1  ;;  %v469_v36 = vld [vmem:[%s2951_s29 + $0x898] sm:$0xff] }
 0x19a   : > { %v1060_v45 = vpop.f32.mrf.mxu0  ;;  %2690 = vmatmul.mubr.msk.f32.gmra.mxu1 %vm548_vm2, %v457_v59  ;;  %v440_v52 = vld [vmem:[%s2951_s29 + $0x7b0] sm:$0xff] }
 0x19b   : > { %v1639_v48 = vadd.f32 %v3664_v51, %v1059_v43  ;;  %v3808_v51 = vpop.f32.mrf.mxu1  ;;  %2692 = vmatprep.mubr.msk.f32.mxu1 %vm2854_vm0, %v2853_v0 }
 0x19c   : > { %v1063_v50 = vpop.f32.mrf.mxu0  ;;  %1302 = vmatmul.mubr.f32.gmra.mxu0 %v419_v44  ;;  %v441_v44 = vld [vmem:[%s2951_s29 + $0x7b8] sm:$0xff] }
 0x19d   : > { %2049 = vst.msk [vmem:[%s3481_s24 + $0xd0] sm:$0xff] %vm2022_vm3, %v1639_v48  ;;  %v1064_v53 = vadd.f32 %v3467_v27, %v1063_v50  ;;  %1306 = vmatprep.mubr.f32.mxu0 %v423_v47  ;;  %v2544_v62 = vpop.f32.mrf.mxu1  ;;  %v472_v47 = vld [vmem:[%s2951_s29 + $0x8b0] sm:$0xff] }
 0x19e   : > { %v1065_v55 = vpop.f32.mrf.mxu0  ;;  %2693 = vmatmul.mubr.msk.f32.gmra.mxu1 %vm548_vm2, %v460_v6  ;;  %v443_v62 = vld [vmem:[%s2951_s29 + $0x7c8] sm:$0xff] }
 0x19f   : > { %v1644_v58 = vadd.f32 %v3676_v56, %v1064_v53  ;;  %v3820_v56 = vpop.f32.mrf.mxu1  ;;  %2695 = vmatprep.mubr.msk.f32.mxu1 %vm2854_vm0, %v2853_v0 }
 0x1a0   : > { %v1068_v60 = vpop.f32.mrf.mxu0  ;;  %1307 = vmatmul.mubr.f32.gmra.mxu0 %v422_v54  ;;  %v444_v54 = vld [vmem:[%s2951_s29 + $0x7d0] sm:$0xff] }
 0x1a1   : > { %2050 = vst.msk [vmem:[%s3481_s24 + $0xd8] sm:$0xff] %vm2022_vm3, %v1644_v58  ;;  %v1069_v63 = vadd.f32 %v3467_v27, %v1068_v60  ;;  %1311 = vmatprep.mubr.f32.mxu0 %v426_v57  ;;  %v2547_v9 = vpop.f32.mrf.mxu1  ;;  %v475_v57 = vld [vmem:[%s2951_s29 + $0x8c8] sm:$0xff] }
 0x1a2   : > { %v1070_v2 = vpop.f32.mrf.mxu0  ;;  %2696 = vmatmul.mubr.msk.f32.gmra.mxu1 %vm548_vm2, %v463_v16  ;;  %v446_v9 = vld [vmem:[%s2951_s29 + $0x7e0] sm:$0xff] }
 0x1a3   : > { %v1649_v5 = vadd.f32 %v3688_v61, %v1069_v63  ;;  %v3832_v61 = vpop.f32.mrf.mxu1  ;;  %2698 = vmatprep.mubr.msk.f32.mxu1 %vm2854_vm0, %v2853_v0  ;;  %v3916_v16 = vld [vmem:[%s4366_s2] ss:$0 sm:$0xff] }
 0x1a4   : > { %v1073_v7 = vpop.f32.mrf.mxu0  ;;  %1312 = vmatmul.mubr.f32.gmra.mxu0 %v425_v1  ;;  %v447_v1 = vld [vmem:[%s2951_s29 + $0x7e8] sm:$0xff] }
 0x1a5   : > { %2051 = vst.msk [vmem:[%s3481_s24 + $0xe0] sm:$0xff] %vm2022_vm3, %v1649_v5  ;;  %v1074_v10 = vadd.f32 %v3467_v27, %v1073_v7  ;;  %1316 = vmatprep.mubr.f32.mxu0 %v429_v4  ;;  %v2550_v19 = vpop.f32.mrf.mxu1  ;;  %v478_v4 = vld [vmem:[%s2951_s29 + $0x8e0] sm:$0xff] }
 0x1a6   : > { %v1075_v12 = vpop.f32.mrf.mxu0  ;;  %2699 = vmatmul.mubr.msk.f32.gmra.mxu1 %vm548_vm2, %v466_v26 }
 0x1a7   : > { %v1654_v15 = vadd.f32 %v3700_v3, %v1074_v10  ;;  %v3844_v3 = vpop.f32.mrf.mxu1  ;;  %2701 = vmatprep.mubr.msk.f32.mxu1 %vm2854_vm0, %v2853_v0 }
 0x1a8   : > { %v1078_v17 = vpop.f32.mrf.mxu0  ;;  %1317 = vmatmul.mubr.f32.gmra.mxu0 %v428_v11  ;;  %v450_v11 = vld [vmem:[%s2951_s29 + $0x800] sm:$0xff] }
 0x1a9   : > { %2052 = vst.msk [vmem:[%s3481_s24 + $0xe8] sm:$0xff] %vm2022_vm3, %v1654_v15  ;;  %v1079_v20 = vadd.f32 %v3467_v27, %v1078_v17  ;;  %1321 = vmatprep.mubr.f32.mxu0 %v432_v14  ;;  %v2553_v30 = vpop.f32.mrf.mxu1  ;;  %v481_v14 = vld [vmem:[%s2951_s29 + $0x8f8] sm:$0xff] }
 0x1aa   : > { %v1080_v22 = vpop.f32.mrf.mxu0  ;;  %2702 = vmatmul.mubr.msk.f32.gmra.mxu1 %vm548_vm2, %v469_v36  ;;  %v452_v30 = vld [vmem:[%s2951_s29 + $0x810] sm:$0xff] }
 0x1ab   : > { %v1659_v25 = vadd.f32 %v3712_v8, %v1079_v20  ;;  %v3856_v8 = vpop.f32.mrf.mxu1  ;;  %2704 = vmatprep.mubr.msk.f32.mxu1 %vm2854_vm0, %v2853_v0  ;;  %v453_v20 = vld [vmem:[%s2951_s29 + $0x818] sm:$0xff] }
 0x1ac   : > { %v1083_v28 = vpop.f32.mrf.mxu0  ;;  %1322 = vmatmul.mubr.f32.gmra.mxu0 %v431_v21 }
 0x1ad   : > { %2053 = vst.msk [vmem:[%s3481_s24 + $0xf0] sm:$0xff] %vm2022_vm3, %v1659_v25  ;;  %v1084_v31 = vadd.f32 %v3467_v27, %v1083_v28  ;;  %1326 = vmatprep.mubr.f32.mxu0 %v435_v24  ;;  %v2556_v39 = vpop.f32.mrf.mxu1  ;;  %v484_v24 = vld [vmem:[%s2951_s29 + $0x910] sm:$0xff] }
 0x1ae   : > { %v1085_v33 = vpop.f32.mrf.mxu0  ;;  %2705 = vmatmul.mubr.msk.f32.gmra.mxu1 %vm548_vm2, %v472_v47  ;;  %v455_v39 = vld [vmem:[%s2951_s29 + $0x828] sm:$0xff] }
 0x1af   : > { %v1664_v35 = vadd.f32 %v3724_v13, %v1084_v31  ;;  %v3868_v13 = vpop.f32.mrf.mxu1  ;;  %2707 = vmatprep.mubr.msk.f32.mxu1 %vm2854_vm0, %v2853_v0 }
 0x1b0   : > { %v1088_v38 = vpop.f32.mrf.mxu0  ;;  %1327 = vmatmul.mubr.f32.gmra.mxu0 %v434_v32  ;;  %v456_v32 = vld [vmem:[%s2951_s29 + $0x830] sm:$0xff] }
 0x1b1   : > { %2054 = vst.msk [vmem:[%s3481_s24 + $0xf8] sm:$0xff] %vm2022_vm3, %v1664_v35  ;;  %v1089_v40 = vadd.f32 %v3467_v27, %v1088_v38  ;;  %1331 = vmatprep.mubr.f32.mxu0 %v438_v34  ;;  %v2559_v49 = vpop.f32.mrf.mxu1  ;;  %v487_v34 = vld [vmem:[%s2951_s29 + $0x928] sm:$0xff] }
 0x1b2   : > { %v1090_v43 = vpop.f32.mrf.mxu0  ;;  %2708 = vmatmul.mubr.msk.f32.gmra.mxu1 %vm548_vm2, %v475_v57  ;;  %v458_v49 = vld [vmem:[%s2951_s29 + $0x840] sm:$0xff] }
 0x1b3   : > { %v1669_v45 = vadd.f32 %v3736_v18, %v1089_v40  ;;  %v3880_v18 = vpop.f32.mrf.mxu1  ;;  %2710 = vmatprep.mubr.msk.f32.mxu1 %vm2854_vm0, %v2853_v0 }
 0x1b4   : > { %v1093_v48 = vpop.f32.mrf.mxu0  ;;  %1332 = vmatmul.mubr.f32.gmra.mxu0 %v437_v42  ;;  %v459_v42 = vld [vmem:[%s2951_s29 + $0x848] sm:$0xff] }
 0x1b5   : > { %2055 = vst.msk [vmem:[%s3481_s24 + $0x100] sm:$0xff] %vm2022_vm3, %v1669_v45  ;;  %v1094_v50 = vadd.f32 %v3467_v27, %v1093_v48  ;;  %1336 = vmatprep.mubr.f32.mxu0 %v441_v44  ;;  %v2562_v59 = vpop.f32.mrf.mxu1  ;;  %v490_v44 = vld [vmem:[%s2951_s29 + $0x940] sm:$0xff] }
 0x1b6   : > { %v1095_v53 = vpop.f32.mrf.mxu0  ;;  %2711 = vmatmul.mubr.msk.f32.gmra.mxu1 %vm548_vm2, %v478_v4  ;;  %v461_v59 = vld [vmem:[%s2951_s29 + $0x858] sm:$0xff] }
 0x1b7   : > { %v1674_v55 = vadd.f32 %v3748_v23, %v1094_v50  ;;  %v3892_v23 = vpop.f32.mrf.mxu1  ;;  %2713 = vmatprep.mubr.msk.f32.mxu1 %vm2854_vm0, %v2853_v0 }
 0x1b8   : > { %v1098_v58 = vpop.f32.mrf.mxu0  ;;  %1337 = vmatmul.mubr.f32.gmra.mxu0 %v440_v52  ;;  %v462_v52 = vld [vmem:[%s2951_s29 + $0x860] sm:$0xff] }
 0x1b9   : > { %2056 = vst.msk [vmem:[%s3481_s24 + $0x108] sm:$0xff] %vm2022_vm3, %v1674_v55  ;;  %v1099_v60 = vadd.f32 %v3467_v27, %v1098_v58  ;;  %1341 = vmatprep.mubr.f32.mxu0 %v444_v54  ;;  %v2565_v6 = vpop.f32.mrf.mxu1  ;;  %v493_v54 = vld [vmem:[%s2951_s29 + $0x958] sm:$0xff] }
 0x1ba   : > { %v1100_v63 = vpop.f32.mrf.mxu0  ;;  %2714 = vmatmul.mubr.msk.f32.gmra.mxu1 %vm548_vm2, %v481_v14  ;;  %v464_v6 = vld [vmem:[%s2951_s29 + $0x870] sm:$0xff] }
 0x1bb   : > { %v1679_v2 = vadd.f32 %v3760_v29, %v1099_v60  ;;  %v3904_v29 = vpop.f32.mrf.mxu1  ;;  %2716 = vmatprep.mubr.msk.f32.mxu1 %vm2854_vm0, %v2853_v0 }
 0x1bc   : > { %v1103_v5 = vpop.f32.mrf.mxu0  ;;  %1342 = vmatmul.mubr.f32.gmra.mxu0 %v443_v62  ;;  %v465_v62 = vld [vmem:[%s2951_s29 + $0x878] sm:$0xff] }
 0x1bd   : > { %2057 = vst.msk [vmem:[%s3481_s24 + $0x110] sm:$0xff] %vm2022_vm3, %v1679_v2  ;;  %v1104_v7 = vadd.f32 %v3467_v27, %v1103_v5  ;;  %1346 = vmatprep.mubr.f32.mxu0 %v447_v1  ;;  %v2568_v27 = vpop.f32.mrf.mxu1  ;;  %v496_v1 = vld [vmem:[%s2951_s29 + $0x970] sm:$0xff] }
 0x1be   : > { %v1105_v10 = vpop.f32.mrf.mxu0  ;;  %2717 = vmatmul.mubr.msk.f32.gmra.mxu1 %vm548_vm2, %v484_v24  ;;  %v467_v27 = vld [vmem:[%s2951_s29 + $0x888] sm:$0xff] }
 0x1bf   : > { %v1684_v12 = vadd.f32 %v3772_v37, %v1104_v7  ;;  %v449_v37 = vld [vmem:[%s2951_s29 + $0x7f8] sm:$0xff]  ;;  %v3921_v21 = vpop.f32.mrf.mxu1  ;;  %2719 = vmatprep.mubr.msk.f32.mxu1 %vm2854_vm0, %v2853_v0 }
 0x1c0   : > { %v1108_v15 = vpop.f32.mrf.mxu0  ;;  %1347 = vmatmul.mubr.f32.gmra.mxu0 %v446_v9  ;;  %v468_v9 = vld [vmem:[%s2951_s29 + $0x890] sm:$0xff] }
 0x1c1   : > { %2058 = vst.msk [vmem:[%s3481_s24 + $0x118] sm:$0xff] %vm2022_vm3, %v1684_v12  ;;  %v1109_v17 = vadd.f32 %v3916_v16, %v1108_v15  ;;  %1351 = vmatprep.mubr.f32.mxu0 %v450_v11  ;;  %v2571_v26 = vpop.f32.mrf.mxu1  ;;  %v499_v11 = vld [vmem:[%s2951_s29 + $0x988] sm:$0xff] }
 0x1c2   : > { %v1110_v19 = vpop.f32.mrf.mxu0  ;;  %2720 = vmatmul.mubr.msk.f32.gmra.mxu1 %vm548_vm2, %v487_v34  ;;  %v470_v26 = vld [vmem:[%s2951_s29 + $0x8a0] sm:$0xff]  ;;  %v473_v34 = vld [vmem:[%s2951_s29 + $0x8b8] sm:$0xff] }
 0x1c3   : > { %v1689_v22 = vadd.f32 %v3784_v41, %v1109_v17  ;;  %v3933_v41 = vpop.f32.mrf.mxu1  ;;  %2722 = vmatprep.mubr.msk.f32.mxu1 %vm2854_vm0, %v2853_v0 }
 0x1c4   : > { %v1113_v25 = vpop.f32.mrf.mxu0  ;;  %1352 = vmatmul.mubr.f32.gmra.mxu0 %v449_v37  ;;  %v471_v37 = vld [vmem:[%s2951_s29 + $0x8a8] sm:$0xff] }
 0x1c5   : > { %2059 = vst.msk [vmem:[%s3481_s24 + $0x120] sm:$0xff] %vm2022_vm3, %v1689_v22  ;;  %v1114_v28 = vadd.f32 %v3916_v16, %v1113_v25  ;;  %1356 = vmatprep.mubr.f32.mxu0 %v453_v20  ;;  %v2574_v36 = vpop.f32.mrf.mxu1  ;;  %v502_v20 = vld [vmem:[%s2951_s29 + $0x9a0] sm:$0xff] }
 0x1c6   : > { %v1115_v31 = vpop.f32.mrf.mxu0  ;;  %2723 = vmatmul.mubr.msk.f32.gmra.mxu1 %vm548_vm2, %v490_v44  ;;  %v477_v36 = vld [vmem:[%s2951_s29 + $0x8d8] sm:$0xff] }
 0x1c7   : > { %v1694_v33 = vadd.f32 %v3796_v46, %v1114_v28  ;;  %v3945_v46 = vpop.f32.mrf.mxu1  ;;  %2725 = vmatprep.mubr.msk.f32.mxu1 %vm2854_vm0, %v2853_v0 }
 0x1c8   : > { %v1118_v35 = vpop.f32.mrf.mxu0  ;;  %1357 = vmatmul.mubr.f32.gmra.mxu0 %v452_v30  ;;  %v474_v30 = vld [vmem:[%s2951_s29 + $0x8c0] sm:$0xff] }
 0x1c9   : > { %2060 = vst.msk [vmem:[%s3481_s24 + $0x128] sm:$0xff] %vm2022_vm3, %v1694_v33  ;;  %v1119_v38 = vadd.f32 %v3916_v16, %v1118_v35  ;;  %1361 = vmatprep.mubr.f32.mxu0 %v456_v32  ;;  %v2577_v47 = vpop.f32.mrf.mxu1 }
 0x1ca   : > { %v1120_v40 = vpop.f32.mrf.mxu0  ;;  %2726 = vmatmul.mubr.msk.f32.gmra.mxu1 %vm548_vm2, %v493_v54  ;;  %v483_v54 = vld [vmem:[%s2951_s29 + $0x908] sm:$0xff] }
 0x1cb   : > { %v1699_v43 = vadd.f32 %v3808_v51, %v1119_v38  ;;  %v3957_v51 = vpop.f32.mrf.mxu1  ;;  %2728 = vmatprep.mubr.msk.f32.mxu1 %vm2854_vm0, %v2853_v0 }
 0x1cc   : > { %v1123_v45 = vpop.f32.mrf.mxu0  ;;  %1362 = vmatmul.mubr.f32.gmra.mxu0 %v455_v39 }
 0x1cd   : > { %2061 = vst.msk [vmem:[%s3481_s24 + $0x130] sm:$0xff] %vm2022_vm3, %v1699_v43  ;;  %v1124_v48 = vadd.f32 %v3916_v16, %v1123_v45  ;;  %1366 = vmatprep.mubr.f32.mxu0 %v459_v42  ;;  %v2580_v57 = vpop.f32.mrf.mxu1  ;;  %v476_v43 = vld [vmem:[%s2951_s29 + $0x8d0] sm:$0xff] }
 0x1ce   : > { %v1125_v50 = vpop.f32.mrf.mxu0  ;;  %2729 = vmatmul.mubr.msk.f32.gmra.mxu1 %vm548_vm2, %v496_v1  ;;  %v480_v45 = vld [vmem:[%s2951_s29 + $0x8f0] sm:$0xff] }
 0x1cf   : > { %v1704_v53 = vadd.f32 %v3820_v56, %v1124_v48  ;;  %v3969_v56 = vpop.f32.mrf.mxu1  ;;  %2731 = vmatprep.mubr.msk.f32.mxu1 %vm2854_vm0, %v2853_v0 }
 0x1d0   : > { %v1128_v55 = vpop.f32.mrf.mxu0  ;;  %1367 = vmatmul.mubr.f32.gmra.mxu0 %v458_v49 }
 0x1d1   : > { %2062 = vst.msk [vmem:[%s3481_s24 + $0x138] sm:$0xff] %vm2022_vm3, %v1704_v53  ;;  %v1129_v58 = vadd.f32 %v3916_v16, %v1128_v55  ;;  %1371 = vmatprep.mubr.f32.mxu0 %v462_v52  ;;  %v2583_v4 = vpop.f32.mrf.mxu1  ;;  %v479_v52 = vld [vmem:[%s2951_s29 + $0x8e8] sm:$0xff] }
 0x1d2   : > { %v1130_v60 = vpop.f32.mrf.mxu0  ;;  %2732 = vmatmul.mubr.msk.f32.gmra.mxu1 %vm548_vm2, %v499_v11 }
 0x1d3   : > { %v1709_v63 = vadd.f32 %v3832_v61, %v1129_v58  ;;  %v3981_v61 = vpop.f32.mrf.mxu1  ;;  %2734 = vmatprep.mubr.msk.f32.mxu1 %vm2854_vm0, %v2853_v0  ;;  %v482_v60 = vld [vmem:[%s2951_s29 + $0x900] sm:$0xff] }
 0x1d4   : > { %v1133_v2 = vpop.f32.mrf.mxu0  ;;  %1372 = vmatmul.mubr.f32.gmra.mxu0 %v461_v59 }
 0x1d5   : > { %2063 = vst.msk [vmem:[%s3481_s24 + $0x140] sm:$0xff] %vm2022_vm3, %v1709_v63  ;;  %v1134_v5 = vadd.f32 %v3916_v16, %v1133_v2  ;;  %1376 = vmatprep.mubr.f32.mxu0 %v465_v62  ;;  %v2586_v14 = vpop.f32.mrf.mxu1  ;;  %v486_v63 = vld [vmem:[%s2951_s29 + $0x920] sm:$0xff] }
 0x1d6   : > { %v1135_v7 = vpop.f32.mrf.mxu0  ;;  %2735 = vmatmul.mubr.msk.f32.gmra.mxu1 %vm548_vm2, %v502_v20 }
 0x1d7   : > { %v1714_v10 = vadd.f32 %v3844_v3, %v1134_v5  ;;  %v3993_v3 = vpop.f32.mrf.mxu1 }
 0x1d8   : > { %v1138_v12 = vpop.f32.mrf.mxu0  ;;  %1377 = vmatmul.mubr.f32.gmra.mxu0 %v464_v6  ;;  %v485_v6 = vld [vmem:[%s2951_s29 + $0x918] sm:$0xff] }
 0x1d9   : > { %2064 = vst.msk [vmem:[%s3481_s24 + $0x148] sm:$0xff] %vm2022_vm3, %v1714_v10  ;;  %v1139_v15 = vadd.f32 %v3916_v16, %v1138_v12  ;;  %1381 = vmatprep.mubr.f32.mxu0 %v468_v9  ;;  %v2589_v24 = vpop.f32.mrf.mxu1  ;;  %v489_v9 = vld [vmem:[%s2951_s29 + $0x938] sm:$0xff] }
 0x1da   : > { %v1140_v17 = vpop.f32.mrf.mxu0  ;;  %v491_v24 = vld [vmem:[%s2951_s29 + $0x948] sm:$0xff] }
 0x1db   : > { %v1719_v19 = vadd.f32 %v3856_v8, %v1139_v15  ;;  %v4005_v31 = vpop.f32.mrf.mxu1  ;;  %v488_v15 = vld [vmem:[%s2951_s29 + $0x930] sm:$0xff] }
 0x1dc   : > { %v1143_v22 = vpop.f32.mrf.mxu0  ;;  %1382 = vmatmul.mubr.f32.gmra.mxu0 %v467_v27  ;;  %v492_v17 = vld [vmem:[%s2951_s29 + $0x950] sm:$0xff] }
 0x1dd   : > { %2065 = vst.msk [vmem:[%s3481_s24 + $0x150] sm:$0xff] %vm2022_vm3, %v1719_v19  ;;  %v1144_v25 = vadd.f32 %v3916_v16, %v1143_v22  ;;  %1386 = vmatprep.mubr.f32.mxu0 %v471_v37  ;;  %v2592_v32 = vpop.f32.mrf.mxu1 }
 0x1de   : > { %v1145_v28 = vpop.f32.mrf.mxu0  ;;  %v494_v32 = vld [vmem:[%s2951_s29 + $0x960] sm:$0xff] }
 0x1df   : > { %v1724_v0 = vadd.f32 %v3868_v13, %v1144_v25  ;;  %v4014_v38 = vpop.f32.mrf.mxu1 }
 0x1e0   : > { %v1148_v8 = vpop.f32.mrf.mxu0  ;;  %1387 = vmatmul.mubr.f32.gmra.mxu0 %v470_v26  ;;  %v495_v26 = vld [vmem:[%s2951_s29 + $0x968] sm:$0xff] }
 0x1e1   : > { %2066 = vst.msk [vmem:[%s3481_s24 + $0x158] sm:$0xff] %vm2022_vm3, %v1724_v0  ;;  %v1149_v33 = vadd.f32 %v3916_v16, %v1148_v8  ;;  %1391 = vmatprep.mubr.f32.mxu0 %v474_v30  ;;  %v2595_v13 = vpop.f32.mrf.mxu1 }
 0x1e2   : > { %v1150_v35 = vpop.f32.mrf.mxu0  ;;  %v497_v13 = vld [vmem:[%s2951_s29 + $0x978] sm:$0xff] }
 0x1e3   : > { %v1729_v39 = vadd.f32 %v3880_v18, %v1149_v33  ;;  %v4022_v47 = vpop.f32.mrf.mxu1 }
 0x1e4   : > { %v1153_v40 = vpop.f32.mrf.mxu0  ;;  %1392 = vmatmul.mubr.f32.gmra.mxu0 %v473_v34  ;;  %v498_v34 = vld [vmem:[%s2951_s29 + $0x980] sm:$0xff] }
 0x1e5   : > { %2067 = vst.msk [vmem:[%s3481_s24 + $0x160] sm:$0xff] %vm2022_vm3, %v1729_v39  ;;  %v1154_v42 = vadd.f32 %v3916_v16, %v1153_v40  ;;  %1396 = vmatprep.mubr.f32.mxu0 %v477_v36  ;;  %v2598_v18 = vpop.f32.mrf.mxu1 }
 0x1e6   : > { %v1155_v44 = vpop.f32.mrf.mxu0  ;;  %v500_v18 = vld [vmem:[%s2951_s29 + $0x990] sm:$0xff] }
 0x1e7   : > { %v1734_v48 = vadd.f32 %v3892_v23, %v1154_v42  ;;  %v4030_v55 = vpop.f32.mrf.mxu1 }
 0x1e8   : > { %v1158_v49 = vpop.f32.mrf.mxu0  ;;  %1397 = vmatmul.mubr.f32.gmra.mxu0 %v476_v43  ;;  %v501_v43 = vld [vmem:[%s2951_s29 + $0x998] sm:$0xff] }
 0x1e9   : > { %2068 = vst.msk [vmem:[%s3481_s24 + $0x168] sm:$0xff] %vm2022_vm3, %v1734_v48  ;;  %v1159_v50 = vadd.f32 %v3916_v16, %v1158_v49  ;;  %1401 = vmatprep.mubr.f32.mxu0 %v480_v45  ;;  %v2601_v23 = vpop.f32.mrf.mxu1 }
 0x1ea   : > { %v1160_v53 = vpop.f32.mrf.mxu0 }
 0x1eb   : > { %v1739_v57 = vadd.f32 %v3904_v29, %v1159_v50  ;;  %v4038_v1 = vpop.f32.mrf.mxu1 }
 0x1ec   : > { %v1163_v58 = vpop.f32.mrf.mxu0  ;;  %1402 = vmatmul.mubr.f32.gmra.mxu0 %v479_v52 }
 0x1ed   : > { %2069 = vst.msk [vmem:[%s3481_s24 + $0x170] sm:$0xff] %vm2022_vm3, %v1739_v57  ;;  %v1164_v59 = vadd.f32 %v3916_v16, %v1163_v58  ;;  %1406 = vmatprep.mubr.f32.mxu0 %v483_v54  ;;  %v2604_v29 = vpop.f32.mrf.mxu1 }
 0x1ee   : > { %v1165_v62 = vpop.f32.mrf.mxu0 }
 0x1ef   : > { %v1744_v2 = vadd.f32 %v3921_v21, %v1164_v59  ;;  %v4046_v10 = vpop.f32.mrf.mxu1 }
 0x1f0   : > { %v1168_v4 = vpop.f32.mrf.mxu0  ;;  %1407 = vmatmul.mubr.f32.gmra.mxu0 %v482_v60 }
 0x1f1   : > { %2070 = vst.msk [vmem:[%s3481_s24 + $0x178] sm:$0xff] %vm2022_vm3, %v1744_v2  ;;  %v1169_v5 = vadd.f32 %v3916_v16, %v1168_v4  ;;  %1411 = vmatprep.mubr.f32.mxu0 %v486_v63  ;;  %v2607_v21 = vpop.f32.mrf.mxu1 }
 0x1f2   : > { %v1170_v7 = vpop.f32.mrf.mxu0 }
 0x1f3   : > { %v1749_v11 = vadd.f32 %v3933_v41, %v1169_v5  ;;  %v4054_v37 = vpop.f32.mrf.mxu1 }
 0x1f4   : > { %v1173_v12 = vpop.f32.mrf.mxu0  ;;  %1412 = vmatmul.mubr.f32.gmra.mxu0 %v485_v6 }
 0x1f5   : > { %2071 = vst.msk [vmem:[%s3481_s24 + $0x180] sm:$0xff] %vm2022_vm3, %v1749_v11  ;;  %v1174_v14 = vadd.f32 %v3916_v16, %v1173_v12  ;;  %1416 = vmatprep.mubr.f32.mxu0 %v489_v9  ;;  %v2610_v41 = vpop.f32.mrf.mxu1 }
 0x1f6   : > { %v1175_v27 = vpop.f32.mrf.mxu0 }
 0x1f7   : > { %v1754_v19 = vadd.f32 %v3945_v46, %v1174_v14  ;;  %v4062_v28 = vpop.f32.mrf.mxu1 }
 0x1f8   : > { %v1178_v20 = vpop.f32.mrf.mxu0  ;;  %1417 = vmatmul.mubr.f32.gmra.mxu0 %v488_v15 }
 0x1f9   : > { %2072 = vst.msk [vmem:[%s3481_s24 + $0x188] sm:$0xff] %vm2022_vm3, %v1754_v19  ;;  %v1179_v22 = vadd.f32 %v3916_v16, %v1178_v20  ;;  %1421 = vmatprep.mubr.f32.mxu0 %v492_v17  ;;  %v2613_v46 = vpop.f32.mrf.mxu1 }
 0x1fa   : > { %v1180_v25 = vpop.f32.mrf.mxu0 }
 0x1fb   : > { %v1759_v30 = vadd.f32 %v3957_v51, %v1179_v22  ;;  %v4070_v35 = vpop.f32.mrf.mxu1 }
 0x1fc   : > { %v1183_v0 = vpop.f32.mrf.mxu0  ;;  %1422 = vmatmul.mubr.f32.gmra.mxu0 %v491_v24 }
 0x1fd   : > { %2073 = vst.msk [vmem:[%s3481_s24 + $0x190] sm:$0xff] %vm2022_vm3, %v1759_v30  ;;  %v1184_v8 = vadd.f32 %v3916_v16, %v1183_v0  ;;  %1426 = vmatprep.mubr.f32.mxu0 %v495_v26  ;;  %v2616_v51 = vpop.f32.mrf.mxu1 }
 0x1fe   : > { %v1185_v33 = vpop.f32.mrf.mxu0 }
 0x1ff   : > { %v1764_v36 = vadd.f32 %v3969_v56, %v1184_v8  ;;  %v4078_v44 = vpop.f32.mrf.mxu1 }
 0x200   : > { %v1188_v39 = vpop.f32.mrf.mxu0  ;;  %1427 = vmatmul.mubr.f32.gmra.mxu0 %v494_v32 }
 0x201   : > { %2074 = vst.msk [vmem:[%s3481_s24 + $0x198] sm:$0xff] %vm2022_vm3, %v1764_v36  ;;  %v1189_v40 = vadd.f32 %v3916_v16, %v1188_v39  ;;  %1431 = vmatprep.mubr.f32.mxu0 %v498_v34  ;;  %v2619_v56 = vpop.f32.mrf.mxu1 }
 0x202   : > { %v1190_v42 = vpop.f32.mrf.mxu0 }
 0x203   : > { %v1769_v45 = vadd.f32 %v3981_v61, %v1189_v40  ;;  %v4085_v52 = vpop.f32.mrf.mxu1 }
 0x204   : > { %v1193_v48 = vpop.f32.mrf.mxu0  ;;  %1432 = vmatmul.mubr.f32.gmra.mxu0 %v497_v13 }
 0x205   : > { %2075 = vst.msk [vmem:[%s3481_s24 + $0x1a0] sm:$0xff] %vm2022_vm3, %v1769_v45  ;;  %v1194_v49 = vadd.f32 %v3916_v16, %v1193_v48  ;;  %1436 = vmatprep.mubr.f32.mxu0 %v501_v43  ;;  %v2622_v57 = vpop.f32.mrf.mxu1 }
 0x206   : > { %v1195_v50 = vpop.f32.mrf.mxu0 }
 0x207   : > { %v1774_v53 = vadd.f32 %v3993_v3, %v1194_v49  ;;  %v4091_v23 = vpop.f32.mrf.mxu1 }
 0x208   : > { %v1198_v54 = vpop.f32.mrf.mxu0  ;;  %1437 = vmatmul.mubr.f32.gmra.mxu0 %v500_v18 }
 0x209   : > { %2076 = vst.msk [vmem:[%s3481_s24 + $0x1a8] sm:$0xff] %vm2022_vm3, %v1774_v53  ;;  %v1199_v61 = vadd.f32 %v3916_v16, %v1198_v54  ;;  %v2625_v62 = vpop.f32.mrf.mxu1 }
 0x20a   : > { %v1200_v58 = vpop.f32.mrf.mxu0 }
 0x20b   : > { %v1779_v59 = vadd.f32 %v4005_v31, %v1199_v61  ;;  %v4097_v2 = vpop.f32.mrf.mxu1 }
 0x20c   : > { %v1203_v60 = vpop.f32.mrf.mxu0 }
 0x20d   : > { %2077 = vst.msk [vmem:[%s3481_s24 + $0x1b0] sm:$0xff] %vm2022_vm3, %v1779_v59  ;;  %v1204_v3 = vadd.f32 %v3916_v16, %v1203_v60  ;;  %v2628_v5 = vpop.f32.mrf.mxu1 }
 0x20e   : > { %v1205_v63 = vpop.f32.mrf.mxu0 }
 0x20f   : > { %v1784_v4 = vadd.f32 %v4014_v38, %v1204_v3  ;;  %v4103_v7 = vpop.f32.mrf.mxu1 }
 0x210   : > { %v1208_v29 = vpop.f32.mrf.mxu0 }
 0x211   : > { %2078 = vst.msk [vmem:[%s3481_s24 + $0x1b8] sm:$0xff] %vm2022_vm3, %v1784_v4  ;;  %v1209_v6 = vadd.f32 %v3916_v16, %v1208_v29  ;;  %v2631_v12 = vpop.f32.mrf.mxu1 }
 0x212   : > { %v1210_v31 = vpop.f32.mrf.mxu0 }
 0x213   : > { %v1789_v9 = vadd.f32 %v4022_v47, %v1209_v6  ;;  %v4109_v14 = vpop.f32.mrf.mxu1 }
 0x214   : > { %v1213_v11 = vpop.f32.mrf.mxu0 }
 0x215   : > { %2079 = vst.msk [vmem:[%s3481_s24 + $0x1c0] sm:$0xff] %vm2022_vm3, %v1789_v9  ;;  %v1214_v21 = vadd.f32 %v3916_v16, %v1213_v11  ;;  %v2634_v17 = vpop.f32.mrf.mxu1 }
 0x216   : > { %v1215_v38 = vpop.f32.mrf.mxu0 }
 0x217   : > { %v1794_v15 = vadd.f32 %v4030_v55, %v1214_v21  ;;  %v4115_v20 = vpop.f32.mrf.mxu1 }
 0x218   : > { %v1218_v27 = vpop.f32.mrf.mxu0 }
 0x219   : > { %2080 = vst.msk [vmem:[%s3481_s24 + $0x1c8] sm:$0xff] %vm2022_vm3, %v1794_v15  ;;  %v1219_v19 = vadd.f32 %v3916_v16, %v1218_v27  ;;  %v2637_v24 = vpop.f32.mrf.mxu1 }
 0x21a   : > { %v1220_v47 = vpop.f32.mrf.mxu0 }
 0x21b   : > { %v1799_v41 = vadd.f32 %v4038_v1, %v1219_v19  ;;  %v4121_v26 = vpop.f32.mrf.mxu1 }
 0x21c   : > { %v1223_v22 = vpop.f32.mrf.mxu0 }
 0x21d   : > { %2081 = vst.msk [vmem:[%s3481_s24 + $0x1d0] sm:$0xff] %vm2022_vm3, %v1799_v41  ;;  %v1224_v25 = vadd.f32 %v3916_v16, %v1223_v22  ;;  %v2640_v46 = vpop.f32.mrf.mxu1 }
 0x21e   : > { %v1225_v55 = vpop.f32.mrf.mxu0 }
 0x21f   : > { %v1804_v30 = vadd.f32 %v4046_v10, %v1224_v25  ;;  %v4127_v32 = vpop.f32.mrf.mxu1 }
 0x220   : > { %v1228_v0 = vpop.f32.mrf.mxu0 }
 0x221   : > { %2082 = vst.msk [vmem:[%s3481_s24 + $0x1d8] sm:$0xff] %vm2022_vm3, %v1804_v30  ;;  %v1229_v8 = vadd.f32 %v3916_v16, %v1228_v0  ;;  %v2643_v36 = vpop.f32.mrf.mxu1 }
 0x222   : > { %v1230_v1 = vpop.f32.mrf.mxu0 }
 0x223   : > { %v1809_v33 = vadd.f32 %v4054_v37, %v1229_v8  ;;  %v4133_v51 = vpop.f32.mrf.mxu1 }
 0x224   : > { %v1233_v34 = vpop.f32.mrf.mxu0 }
 0x225   : > { %2083 = vst.msk [vmem:[%s3481_s24 + $0x1e0] sm:$0xff] %vm2022_vm3, %v1809_v33  ;;  %v1234_v39 = vadd.f32 %v3916_v16, %v1233_v34  ;;  %v2646_v42 = vpop.f32.mrf.mxu1 }
 0x226   : > { %v1235_v10 = vpop.f32.mrf.mxu0 }
 0x227   : > { %v1814_v40 = vadd.f32 %v4062_v28, %v1234_v39  ;;  %v4139_v45 = vpop.f32.mrf.mxu1 }
 0x228   : > { %v1238_v13 = vpop.f32.mrf.mxu0 }
 0x229   : > { %2084 = vst.msk [vmem:[%s3481_s24 + $0x1e8] sm:$0xff] %vm2022_vm3, %v1814_v40  ;;  %v1239_v43 = vadd.f32 %v3916_v16, %v1238_v13  ;;  %v2649_v49 = vpop.f32.mrf.mxu1 }
 0x22a   : > { %v1240_v37 = vpop.f32.mrf.mxu0 }
 0x22b   : > { %v1819_v48 = vadd.f32 %v4070_v35, %v1239_v43  ;;  %v4145_v50 = vpop.f32.mrf.mxu1 }
 0x22c   : > { %v1243_v56 = vpop.f32.mrf.mxu0 }
 0x22d   : > { %2085 = vst.msk [vmem:[%s3481_s24 + $0x1f0] sm:$0xff] %vm2022_vm3, %v1819_v48  ;;  %v1244_v18 = vadd.f32 %v3916_v16, %v1243_v56  ;;  %v2652_v57 = vpop.f32.mrf.mxu1 }
 0x22e   : > { %v1245_v28 = vpop.f32.mrf.mxu0 }
 0x22f   : > { %v1824_v53 = vadd.f32 %v4078_v44, %v1244_v18  ;;  %v4151_v58 = vpop.f32.mrf.mxu1 }
 0x230   : > { %v1248_v54 = vpop.f32.mrf.mxu0 }
 0x231   : > { %2086 = vst.msk [vmem:[%s3481_s24 + $0x1f8] sm:$0xff] %vm2022_vm3, %v1824_v53  ;;  %v1249_v61 = vadd.f32 %v3916_v16, %v1248_v54  ;;  %v2655_v62 = vpop.f32.mrf.mxu1 }
 0x232   : > { %v1250_v35 = vpop.f32.mrf.mxu0 }
 0x233   : > { %v1829_v59 = vadd.f32 %v4085_v52, %v1249_v61  ;;  %v4157_v63 = vpop.f32.mrf.mxu1 }
 0x234   : > { %v1253_v60 = vpop.f32.mrf.mxu0 }
 0x235   : > { %2087 = vst.msk [vmem:[%s3481_s24 + $0x200] sm:$0xff] %vm2022_vm3, %v1829_v59  ;;  %v1254_v3 = vadd.f32 %v3916_v16, %v1253_v60  ;;  %v2658_v5 = vpop.f32.mrf.mxu1 }
 0x236   : > { %v1255_v44 = vpop.f32.mrf.mxu0 }
 0x237   : > { %v1834_v4 = vadd.f32 %v4091_v23, %v1254_v3  ;;  %v4163_v31 = vpop.f32.mrf.mxu1 }
 0x238   : > { %v1258_v29 = vpop.f32.mrf.mxu0 }
 0x239   : > { %2088 = vst.msk [vmem:[%s3481_s24 + $0x208] sm:$0xff] %vm2022_vm3, %v1834_v4  ;;  %v1259_v6 = vadd.f32 %v3916_v16, %v1258_v29  ;;  %v2661_v12 = vpop.f32.mrf.mxu1 }
 0x23a   : > { %v1260_v52 = vpop.f32.mrf.mxu0 }
 0x23b   : > { %v1839_v9 = vadd.f32 %v4097_v2, %v1259_v6  ;;  %v4169_v38 = vpop.f32.mrf.mxu1 }
 0x23c   : > { %v1263_v11 = vpop.f32.mrf.mxu0 }
 0x23d   : > { %2089 = vst.msk [vmem:[%s3481_s24 + $0x210] sm:$0xff] %vm2022_vm3, %v1839_v9  ;;  %v1264_v21 = vadd.f32 %v3916_v16, %v1263_v11  ;;  %v2664_v17 = vpop.f32.mrf.mxu1 }
 0x23e   : > { %v1265_v23 = vpop.f32.mrf.mxu0 }
 0x23f   : > { %v1844_v15 = vadd.f32 %v4103_v7, %v1264_v21  ;;  %v4175_v47 = vpop.f32.mrf.mxu1 }
 0x240   : > { %v1268_v27 = vpop.f32.mrf.mxu0 }
 0x241   : > { %2090 = vst.msk [vmem:[%s3481_s24 + $0x218] sm:$0xff] %vm2022_vm3, %v1844_v15  ;;  %v1269_v19 = vadd.f32 %v3916_v16, %v1268_v27  ;;  %v2667_v24 = vpop.f32.mrf.mxu1 }
 0x242   : > { %v1270_v2 = vpop.f32.mrf.mxu0 }
 0x243   : > { %v1849_v41 = vadd.f32 %v4109_v14, %v1269_v19  ;;  %v4181_v55 = vpop.f32.mrf.mxu1 }
 0x244   : > { %v1273_v22 = vpop.f32.mrf.mxu0 }
 0x245   : > { %2091 = vst.msk [vmem:[%s3481_s24 + $0x220] sm:$0xff] %vm2022_vm3, %v1849_v41  ;;  %v1274_v25 = vadd.f32 %v3916_v16, %v1273_v22  ;;  %v2670_v46 = vpop.f32.mrf.mxu1 }
 0x246   : > { %v1275_v7 = vpop.f32.mrf.mxu0 }
 0x247   : > { %v1854_v30 = vadd.f32 %v4115_v20, %v1274_v25  ;;  %v4187_v1 = vpop.f32.mrf.mxu1 }
 0x248   : > { %v1278_v0 = vpop.f32.mrf.mxu0 }
 0x249   : > { %2092 = vst.msk [vmem:[%s3481_s24 + $0x228] sm:$0xff] %vm2022_vm3, %v1854_v30  ;;  %v1279_v8 = vadd.f32 %v3916_v16, %v1278_v0  ;;  %v2673_v36 = vpop.f32.mrf.mxu1 }
 0x24a   : > { %v1280_v14 = vpop.f32.mrf.mxu0 }
 0x24b   : > { %v1859_v33 = vadd.f32 %v4121_v26, %v1279_v8  ;;  %v4193_v10 = vpop.f32.mrf.mxu1 }
 0x24c   : > { %v1283_v34 = vpop.f32.mrf.mxu0 }
 0x24d   : > { %2093 = vst.msk [vmem:[%s3481_s24 + $0x230] sm:$0xff] %vm2022_vm3, %v1859_v33  ;;  %v1284_v39 = vadd.f32 %v3916_v16, %v1283_v34  ;;  %v2676_v42 = vpop.f32.mrf.mxu1 }
 0x24e   : > { %v1285_v20 = vpop.f32.mrf.mxu0 }
 0x24f   : > { %v1864_v40 = vadd.f32 %v4127_v32, %v1284_v39  ;;  %v4199_v37 = vpop.f32.mrf.mxu1 }
 0x250   : > { %v1288_v13 = vpop.f32.mrf.mxu0 }
 0x251   : > { %2094 = vst.msk [vmem:[%s3481_s24 + $0x238] sm:$0xff] %vm2022_vm3, %v1864_v40  ;;  %v1289_v43 = vadd.f32 %v3916_v16, %v1288_v13  ;;  %v2679_v49 = vpop.f32.mrf.mxu1 }
 0x252   : > { %v1290_v26 = vpop.f32.mrf.mxu0 }
 0x253   : > { %v1869_v48 = vadd.f32 %v4133_v51, %v1289_v43  ;;  %v4205_v28 = vpop.f32.mrf.mxu1 }
 0x254   : > { %v1293_v56 = vpop.f32.mrf.mxu0 }
 0x255   : > { %2095 = vst.msk [vmem:[%s3481_s24 + $0x240] sm:$0xff] %vm2022_vm3, %v1869_v48  ;;  %v1294_v18 = vadd.f32 %v3916_v16, %v1293_v56  ;;  %v2682_v57 = vpop.f32.mrf.mxu1 }
 0x256   : > { %v1295_v32 = vpop.f32.mrf.mxu0 }
 0x257   : > { %v1874_v53 = vadd.f32 %v4139_v45, %v1294_v18  ;;  %v4211_v35 = vpop.f32.mrf.mxu1 }
 0x258   : > { %v1298_v54 = vpop.f32.mrf.mxu0 }
 0x259   : > { %2096 = vst.msk [vmem:[%s3481_s24 + $0x248] sm:$0xff] %vm2022_vm3, %v1874_v53  ;;  %v1299_v61 = vadd.f32 %v3916_v16, %v1298_v54  ;;  %v2685_v62 = vpop.f32.mrf.mxu1 }
 0x25a   : > { %v1300_v51 = vpop.f32.mrf.mxu0 }
 0x25b   : > { %v1879_v59 = vadd.f32 %v4145_v50, %v1299_v61  ;;  %v4217_v44 = vpop.f32.mrf.mxu1 }
 0x25c   : > { %v1303_v60 = vpop.f32.mrf.mxu0 }
 0x25d   : > { %2097 = vst.msk [vmem:[%s3481_s24 + $0x250] sm:$0xff] %vm2022_vm3, %v1879_v59  ;;  %v1304_v3 = vadd.f32 %v3916_v16, %v1303_v60  ;;  %v2688_v5 = vpop.f32.mrf.mxu1 }
 0x25e   : > { %v1305_v45 = vpop.f32.mrf.mxu0 }
 0x25f   : > { %v1884_v4 = vadd.f32 %v4151_v58, %v1304_v3  ;;  %v4223_v52 = vpop.f32.mrf.mxu1 }
 0x260   : > { %v1308_v29 = vpop.f32.mrf.mxu0 }
 0x261   : > { %2098 = vst.msk [vmem:[%s3481_s24 + $0x258] sm:$0xff] %vm2022_vm3, %v1884_v4  ;;  %v1309_v6 = vadd.f32 %v3916_v16, %v1308_v29  ;;  %v2691_v12 = vpop.f32.mrf.mxu1 }
 0x262   : > { %v1310_v50 = vpop.f32.mrf.mxu0 }
 0x263   : > { %v1889_v9 = vadd.f32 %v4157_v63, %v1309_v6  ;;  %v4229_v23 = vpop.f32.mrf.mxu1 }
 0x264   : > { %v1313_v11 = vpop.f32.mrf.mxu0 }
 0x265   : > { %2099 = vst.msk [vmem:[%s3481_s24 + $0x260] sm:$0xff] %vm2022_vm3, %v1889_v9  ;;  %v1314_v21 = vadd.f32 %v3916_v16, %v1313_v11  ;;  %v2694_v17 = vpop.f32.mrf.mxu1 }
 0x266   : > { %v1315_v58 = vpop.f32.mrf.mxu0 }
 0x267   : > { %v1894_v15 = vadd.f32 %v4163_v31, %v1314_v21  ;;  %v4235_v2 = vpop.f32.mrf.mxu1 }
 0x268   : > { %v1318_v27 = vpop.f32.mrf.mxu0 }
 0x269   : > { %2100 = vst.msk [vmem:[%s3481_s24 + $0x268] sm:$0xff] %vm2022_vm3, %v1894_v15  ;;  %v1319_v19 = vadd.f32 %v3916_v16, %v1318_v27  ;;  %v2697_v24 = vpop.f32.mrf.mxu1 }
 0x26a   : > { %v1320_v63 = vpop.f32.mrf.mxu0 }
 0x26b   : > { %v1899_v41 = vadd.f32 %v4169_v38, %v1319_v19  ;;  %v4241_v7 = vpop.f32.mrf.mxu1 }
 0x26c   : > { %v1323_v22 = vpop.f32.mrf.mxu0 }
 0x26d   : > { %2101 = vst.msk [vmem:[%s3481_s24 + $0x270] sm:$0xff] %vm2022_vm3, %v1899_v41  ;;  %v1324_v25 = vadd.f32 %v3916_v16, %v1323_v22  ;;  %v2700_v46 = vpop.f32.mrf.mxu1 }
 0x26e   : > { %v1325_v31 = vpop.f32.mrf.mxu0 }
 0x26f   : > { %v1904_v30 = vadd.f32 %v4175_v47, %v1324_v25  ;;  %v4247_v14 = vpop.f32.mrf.mxu1 }
 0x270   : > { %v1328_v0 = vpop.f32.mrf.mxu0 }
 0x271   : > { %2102 = vst.msk [vmem:[%s3481_s24 + $0x278] sm:$0xff] %vm2022_vm3, %v1904_v30  ;;  %v1329_v8 = vadd.f32 %v3916_v16, %v1328_v0  ;;  %v2703_v36 = vpop.f32.mrf.mxu1 }
 0x272   : > { %v1330_v38 = vpop.f32.mrf.mxu0 }
 0x273   : > { %v1909_v33 = vadd.f32 %v4181_v55, %v1329_v8  ;;  %v4253_v20 = vpop.f32.mrf.mxu1 }
 0x274   : > { %v1333_v34 = vpop.f32.mrf.mxu0 }
 0x275   : > { %2103 = vst.msk [vmem:[%s3481_s24 + $0x280] sm:$0xff] %vm2022_vm3, %v1909_v33  ;;  %v1334_v39 = vadd.f32 %v3916_v16, %v1333_v34  ;;  %v2706_v42 = vpop.f32.mrf.mxu1 }
 0x276   : > { %v1335_v47 = vpop.f32.mrf.mxu0 }
 0x277   : > { %v1914_v40 = vadd.f32 %v4187_v1, %v1334_v39  ;;  %v4259_v26 = vpop.f32.mrf.mxu1 }
 0x278   : > { %v1338_v13 = vpop.f32.mrf.mxu0 }
 0x279   : > { %2104 = vst.msk [vmem:[%s3481_s24 + $0x288] sm:$0xff] %vm2022_vm3, %v1914_v40  ;;  %v1339_v43 = vadd.f32 %v3916_v16, %v1338_v13  ;;  %v2709_v49 = vpop.f32.mrf.mxu1 }
 0x27a   : > { %v1340_v55 = vpop.f32.mrf.mxu0 }
 0x27b   : > { %v1919_v48 = vadd.f32 %v4193_v10, %v1339_v43  ;;  %v4265_v32 = vpop.f32.mrf.mxu1 }
 0x27c   : > { %v1343_v56 = vpop.f32.mrf.mxu0 }
 0x27d   : > { %2105 = vst.msk [vmem:[%s3481_s24 + $0x290] sm:$0xff] %vm2022_vm3, %v1919_v48  ;;  %v1344_v18 = vadd.f32 %v3916_v16, %v1343_v56  ;;  %v2712_v57 = vpop.f32.mrf.mxu1 }
 0x27e   : > { %v1345_v1 = vpop.f32.mrf.mxu0 }
 0x27f   : > { %v1924_v53 = vadd.f32 %v4199_v37, %v1344_v18  ;;  %v4271_v51 = vpop.f32.mrf.mxu1 }
 0x280   : > { %v1348_v54 = vpop.f32.mrf.mxu0 }
 0x281   : > { %2106 = vst.msk [vmem:[%s3481_s24 + $0x298] sm:$0xff] %vm2022_vm3, %v1924_v53  ;;  %v1349_v61 = vadd.f32 %v3916_v16, %v1348_v54  ;;  %v2715_v62 = vpop.f32.mrf.mxu1 }
 0x282   : > { %v1350_v10 = vpop.f32.mrf.mxu0 }
 0x283   : > { %v1929_v59 = vadd.f32 %v4205_v28, %v1349_v61  ;;  %v4277_v45 = vpop.f32.mrf.mxu1 }
 0x284   : > { %v1353_v60 = vpop.f32.mrf.mxu0 }
 0x285   : > { %2107 = vst.msk [vmem:[%s3481_s24 + $0x2a0] sm:$0xff] %vm2022_vm3, %v1929_v59  ;;  %v1354_v3 = vadd.f32 %v3916_v16, %v1353_v60  ;;  %v2718_v5 = vpop.f32.mrf.mxu1 }
 0x286   : > { %v1355_v37 = vpop.f32.mrf.mxu0 }
 0x287   : > { %v1934_v4 = vadd.f32 %v4211_v35, %v1354_v3  ;;  %v4283_v50 = vpop.f32.mrf.mxu1 }
 0x288   : > { %v1358_v29 = vpop.f32.mrf.mxu0 }
 0x289   : > { %2108 = vst.msk [vmem:[%s3481_s24 + $0x2a8] sm:$0xff] %vm2022_vm3, %v1934_v4  ;;  %v1359_v6 = vadd.f32 %v3916_v16, %v1358_v29  ;;  %v2721_v12 = vpop.f32.mrf.mxu1 }
 0x28a   : > { %v1360_v28 = vpop.f32.mrf.mxu0 }
 0x28b   : > { %v1939_v9 = vadd.f32 %v4217_v44, %v1359_v6  ;;  %v4289_v58 = vpop.f32.mrf.mxu1 }
 0x28c   : > { %v1363_v11 = vpop.f32.mrf.mxu0 }
 0x28d   : > { %2109 = vst.msk [vmem:[%s3481_s24 + $0x2b0] sm:$0xff] %vm2022_vm3, %v1939_v9  ;;  %v1364_v21 = vadd.f32 %v3916_v16, %v1363_v11  ;;  %v2724_v17 = vpop.f32.mrf.mxu1 }
 0x28e   : > { %v1365_v35 = vpop.f32.mrf.mxu0 }
 0x28f   : > { %v1944_v15 = vadd.f32 %v4223_v52, %v1364_v21  ;;  %v4295_v63 = vpop.f32.mrf.mxu1 }
 0x290   : > { %v1368_v27 = vpop.f32.mrf.mxu0 }
 0x291   : > { %2110 = vst.msk [vmem:[%s3481_s24 + $0x2b8] sm:$0xff] %vm2022_vm3, %v1944_v15  ;;  %v1369_v19 = vadd.f32 %v3916_v16, %v1368_v27  ;;  %v2727_v24 = vpop.f32.mrf.mxu1 }
 0x292   : > { %v1370_v44 = vpop.f32.mrf.mxu0 }
 0x293   : > { %v1949_v41 = vadd.f32 %v4229_v23, %v1369_v19  ;;  %v2008_v31 = vpop.f32.mrf.mxu1 }
 0x294   : > { %v1373_v22 = vpop.f32.mrf.mxu0 }
 0x295   : > { %2111 = vst.msk [vmem:[%s3481_s24 + $0x2c0] sm:$0xff] %vm2022_vm3, %v1949_v41  ;;  %v1374_v25 = vadd.f32 %v3916_v16, %v1373_v22  ;;  %v2730_v46 = vpop.f32.mrf.mxu1 }
 0x296   : > { %v1375_v52 = vpop.f32.mrf.mxu0 }
 0x297   : > { %v1954_v30 = vadd.f32 %v4235_v2, %v1374_v25  ;;  %v2013_v23 = vpop.f32.mrf.mxu1 }
 0x298   : > { %v1378_v0 = vpop.f32.mrf.mxu0 }
 0x299   : > { %2112 = vst.msk [vmem:[%s3481_s24 + $0x2c8] sm:$0xff] %vm2022_vm3, %v1954_v30  ;;  %v1379_v8 = vadd.f32 %v3916_v16, %v1378_v0  ;;  %v2733_v36 = vpop.f32.mrf.mxu1 }
 0x29a   : > { %v1380_v38 = vpop.f32.mrf.mxu0 }
 0x29b   : > { %v1959_v33 = vadd.f32 %v4241_v7, %v1379_v8  ;;  %v2018_v47 = vpop.f32.mrf.mxu1 }
 0x29c   : > { %v1383_v34 = vpop.f32.mrf.mxu0 }
 0x29d   : > { %2113 = vst.msk [vmem:[%s3481_s24 + $0x2d0] sm:$0xff] %vm2022_vm3, %v1959_v33  ;;  %v1384_v39 = vadd.f32 %v3916_v16, %v1383_v34  ;;  %v2736_v42 = vpop.f32.mrf.mxu1 }
 0x29e   : > { %v1385_v2 = vpop.f32.mrf.mxu0 }
 0x29f   : > { %v1964_v40 = vadd.f32 %v4247_v14, %v1384_v39 }
 0x2a0   : > { %v1388_v13 = vpop.f32.mrf.mxu0 }
 0x2a1   : > { %2114 = vst.msk [vmem:[%s3481_s24 + $0x2d8] sm:$0xff] %vm2022_vm3, %v1964_v40  ;;  %v1389_v43 = vadd.f32 %v3916_v16, %v1388_v13 }
 0x2a2   : > { %v1390_v55 = vpop.f32.mrf.mxu0 }
 0x2a3   : > { %v1969_v7 = vadd.f32 %v4253_v20, %v1389_v43 }
 0x2a4   : > { %v1393_v48 = vpop.f32.mrf.mxu0 }
 0x2a5   : > { %2115 = vst.msk [vmem:[%s3481_s24 + $0x2e0] sm:$0xff] %vm2022_vm3, %v1969_v7  ;;  %v1394_v56 = vadd.f32 %v3916_v16, %v1393_v48 }
 0x2a6   : > { %v1395_v49 = vpop.f32.mrf.mxu0 }
 0x2a7   : > { %v1974_v18 = vadd.f32 %v4259_v26, %v1394_v56 }
 0x2a8   : > { %v1398_v14 = vpop.f32.mrf.mxu0 }
 0x2a9   : > { %2116 = vst.msk [vmem:[%s3481_s24 + $0x2e8] sm:$0xff] %vm2022_vm3, %v1974_v18  ;;  %v1399_v1 = vadd.f32 %v3916_v16, %v1398_v14 }
 0x2aa   : > { %v1400_v53 = vpop.f32.mrf.mxu0 }
 0x2ab   : > { %v1979_v54 = vadd.f32 %v4265_v32, %v1399_v1 }
 0x2ac   : > { %v1403_v57 = vpop.f32.mrf.mxu0 }
 0x2ad   : > { %2117 = vst.msk [vmem:[%s3481_s24 + $0x2f0] sm:$0xff] %vm2022_vm3, %v1979_v54  ;;  %v1404_v20 = vadd.f32 %v3916_v16, %v1403_v57 }
 0x2ae   : > { %v1405_v61 = vpop.f32.mrf.mxu0 }
 0x2af   : > { %v1984_v10 = vadd.f32 %v4271_v51, %v1404_v20  ;;  %v2785_v51 = vld [vmem:[%s4366_s2] ss:$0 sm:$0xff] }
 0x2b0   : > { %v1408_v59 = vpop.f32.mrf.mxu0 }
 0x2b1   : > { %2118 = vst.msk [vmem:[%s3481_s24 + $0x2f8] sm:$0xff] %vm2022_vm3, %v1984_v10  ;;  %v1409_v26 = vadd.f32 %v3916_v16, %v1408_v59 }
 0x2b2   : > { %v1410_v60 = vpop.f32.mrf.mxu0 }
 0x2b3   : > { %v1989_v62 = vadd.f32 %v4277_v45, %v1409_v26 }
 0x2b4   : > { %v1413_v3 = vpop.f32.mrf.mxu0 }
 0x2b5   : > { %2119 = vst.msk [vmem:[%s3481_s24 + $0x300] sm:$0xff] %vm2022_vm3, %v1989_v62  ;;  %v1414_v32 = vadd.f32 %v3916_v16, %v1413_v3 }
 0x2b6   : > { %v1415_v37 = vpop.f32.mrf.mxu0 }
 0x2b7   : > { %v1994_v4 = vadd.f32 %v4283_v50, %v1414_v32 }
 0x2b8   : > { %v1418_v29 = vpop.f32.mrf.mxu0 }
 0x2b9   : > { %2120 = vst.msk [vmem:[%s3481_s24 + $0x308] sm:$0xff] %vm2022_vm3, %v1994_v4  ;;  %v1419_v5 = vadd.f32 %v2785_v51, %v1418_v29 }
 0x2ba   : > { %v1420_v6 = vpop.f32.mrf.mxu0 }
 0x2bb   : > { %v1999_v45 = vadd.f32 %v4289_v58, %v1419_v5 }
 0x2bc   : > { %v1423_v28 = vpop.f32.mrf.mxu0 }
 0x2bd   : > { %2121 = vst.msk [vmem:[%s3481_s24 + $0x310] sm:$0xff] %vm2022_vm3, %v1999_v45  ;;  %v1424_v16 = vadd.f32 %v2785_v51, %v1423_v28 }
 0x2be   : > { %v1425_v9 = vpop.f32.mrf.mxu0 }
 0x2bf   : > { %v2004_v50 = vadd.f32 %v4295_v63, %v1424_v16 }
 0x2c0   : > { %v1428_v11 = vpop.f32.mrf.mxu0 }
 0x2c1   : > { %2122 = vst.msk [vmem:[%s3481_s24 + $0x318] sm:$0xff] %vm2022_vm3, %v2004_v50  ;;  %v1429_v12 = vadd.f32 %v2785_v51, %v1428_v11 }
 0x2c2   : > { %v1430_v21 = vpop.f32.mrf.mxu0 }
 0x2c3   : > { %v2009_v35 = vadd.f32 %v2008_v31, %v1429_v12 }
 0x2c4   : > { %v1433_v15 = vpop.f32.mrf.mxu0 }
 0x2c5   : > { %2123 = vst.msk [vmem:[%s3481_s24 + $0x320] sm:$0xff] %vm2022_vm3, %v2009_v35  ;;  %v1434_v27 = vadd.f32 %v2785_v51, %v1433_v15 }
 0x2c6   : > { %v1435_v58 = vpop.f32.mrf.mxu0 }
 0x2c7   : > { %v2014_v17 = vadd.f32 %v2013_v23, %v1434_v27 }
 0x2c8   : > { %v1438_v19 = vpop.f32.mrf.mxu0 }
 0x2c9   : > { %2124 = vst.msk [vmem:[%s3481_s24 + $0x328] sm:$0xff] %vm2022_vm3, %v2014_v17  ;;  %v1439_v44 = vadd.f32 %v2785_v51, %v1438_v19 }
 0x2ca   : > { %v1440_v41 = vpop.f32.mrf.mxu0 }
 0x2cb   : > { %v2019_v22 = vadd.f32 %v2018_v47, %v1439_v44 }
 0x2cd   : > { %2125 = vst.msk [vmem:[%s3481_s24 + $0x330] sm:$0xff] %vm2022_vm3, %v2019_v22 }
 0x2ce PF: > { %p13_p0 = scmp.ge.s32.totalorder %s2895_s17, 105   ;;  %s4372_s12 = smov %s2840_s13 }
 0x2cf   : > { %s4373_s13 = smov %s2844_s14  ;;  %s4374_s14 = smov %s2905_s20 }
 0x2d0   : > { %s4375_s15 = smov %s2895_s17  ;;  %15 = sbr.rel (!%p13_p0) target bundleno = 3 (0x3), region = 72 }
 0x2d5   :  { %2148 = vsyncpa [#allocation3], 1 }
 0x2d6   :  { %2150 = vsyncpa [#allocation3 + $0x1], 1 }

// kernel: cnn_forward.6
= control target key start
LH: loop header
LB: loop body
LE: loop exit
PB: predicated region body
PF: predicated region fallthrough
CT: control target
= control target key end

     0   :  { %s4031_s12 = smov 0   ;;  %s5351_s0 = inlined_call_operand.vmem [shape: f32[20000,72], index: 0, kind: input, shape index: {}]   ;;  %s5352_s1 = inlined_call_operand.vmem [shape: f32[72,16], index: 1, kind: input, shape index: {}]   ;;  %s5353_s2 = inlined_call_operand.vmem [shape: f32[1,16], index: 2, kind: input, shape index: {}]   ;;  %s5354_s3 = inlined_call_operand.vmem [shape: f32[20000,16], index: 3, kind: output, shape index: {}]  }
   0x1 LB: > { %s3063_s13 = sadd.s32 4294967295, %s4009_s12   ;;  %p3067_p0 = scmp.ge.s32.totalorder %s4009_s12, 1  ;;  %s4009_s12 = sphi %s4031_s12, %s13_s12  }
   0x2   : > { %p138_p1 = scmp.lt.s32.totalorder %s4009_s12, 11 }
   0x4   : > { %p139_p2 = pnand %p3067_p0, %p138_p1 }
   0x5   : > { %s162_s18 = smul.u32 (!%p139_p2), 250, %s3063_s13 }
   0x6   : > { %142 = sbr.rel (%p139_p2) target bundleno = 478 (0x1de), region = 32 }
   0x7   : > { %p163_p3 = scmp.lt.s32.totalorder (!%p139_p2), %s162_s18, 2499 }
   0xb   : > { %v432_v0 = vld [vmem:[%s5352_s1 + $0x40] sm:$0xff]  ;;  %v431_v1 = vld [vmem:[%s5352_s1 + $0x38] sm:$0xff]  ;;  %v430_v2 = vld [vmem:[%s5352_s1 + $0x30] sm:$0xff]  ;;  %s5356_s18 = smov (!%p163_p3, %s162_s18), 2499  ;;  %vm440_vm0 = vcmask 588800   ;;  %vm2756_vm1 = vcmask 130048  }
   0xc   : > { %3582 = vmatprep.subr.mxu0 %v432_v0  ;;  %3975 = vmatprep.subr.mxu1 %v432_v0  ;;  %v429_v3 = vld [vmem:[%s5352_s1 + $0x28] sm:$0xff]  ;;  %v428_v4 = vld [vmem:[%s5352_s1 + $0x20] sm:$0xff]  ;;  %v427_v5 = vld [vmem:[%s5352_s1 + $0x18] sm:$0xff]  ;;  %s3068_s27 = sshll.u32 %s5356_s18, 3 }
   0xd   : > { %3583 = vmatpush3.msra.mxu0 %v432_v0  ;;  %3984 = vmatpush3.msra.mxu1 %v432_v0  ;;  %v426_v6 = vld [vmem:[%s5352_s1 + $0x10] sm:$0xff]  ;;  %s4068_s5 = scalar_lea.vmem %s5351_s0, %s3068_s27  ;;  %v425_v7 = vld [vmem:[%s5352_s1 + $0x8] sm:$0xff]  ;;  %v424_v8 = vld [vmem:[%s5352_s1] sm:$0xff]  ;;  %s4482_s15 = scalar_lea.vmem %s5354_s3, %s3068_s27 }
   0xe   : > { %3584 = vmatprep.subr.mxu0 %v431_v1  ;;  %3976 = vmatprep.subr.mxu1 %v431_v1  ;;  %v174_v9 = vld [vmem:[%s4068_s5] sm:$0xff]  ;;  %v175_v10 = vld [vmem:[%s4068_s5 + $0x8] sm:$0xff]  ;;  %v300_v11 = vld [vmem:[%s4068_s5 + $0x3f0] sm:$0xff] }
   0xf   : > { %3585 = vmatpush3.msra.mxu0 %v431_v1  ;;  %3985 = vmatpush3.msra.mxu1 %v431_v1  ;;  %v176_v12 = vld [vmem:[%s4068_s5 + $0x10] sm:$0xff]  ;;  %v301_v13 = vld [vmem:[%s4068_s5 + $0x3f8] sm:$0xff]  ;;  %v302_v14 = vld [vmem:[%s4068_s5 + $0x400] sm:$0xff] }
  0x10   : > { %3586 = vmatprep.subr.mxu0 %v430_v2  ;;  %3977 = vmatprep.subr.mxu1 %v430_v2  ;;  %v177_v15 = vld [vmem:[%s4068_s5 + $0x18] sm:$0xff]  ;;  %v178_v16 = vld [vmem:[%s4068_s5 + $0x20] sm:$0xff]  ;;  %v303_v17 = vld [vmem:[%s4068_s5 + $0x408] sm:$0xff] }
  0x11   : > { %3587 = vmatpush3.msra.mxu0 %v430_v2  ;;  %3986 = vmatpush3.msra.mxu1 %v430_v2  ;;  %v304_v18 = vld [vmem:[%s4068_s5 + $0x410] sm:$0xff]  ;;  %v179_v19 = vld [vmem:[%s4068_s5 + $0x28] sm:$0xff]  ;;  %v305_v21 = vld [vmem:[%s4068_s5 + $0x418] sm:$0xff] }
  0x12   : > { %3588 = vmatprep.subr.mxu0 %v429_v3  ;;  %3978 = vmatprep.subr.mxu1 %v429_v3  ;;  %v180_v20 = vld [vmem:[%s4068_s5 + $0x30] sm:$0xff]  ;;  %v306_v22 = vld [vmem:[%s4068_s5 + $0x420] sm:$0xff]  ;;  %v181_v23 = vld [vmem:[%s4068_s5 + $0x38] sm:$0xff] }
  0x13   : > { %3589 = vmatpush3.msra.mxu0 %v429_v3  ;;  %3987 = vmatpush3.msra.mxu1 %v429_v3  ;;  %v182_v24 = vld [vmem:[%s4068_s5 + $0x40] sm:$0xff]  ;;  %v307_v25 = vld [vmem:[%s4068_s5 + $0x428] sm:$0xff]  ;;  %v308_v26 = vld [vmem:[%s4068_s5 + $0x430] sm:$0xff] }
  0x14   : > { %3590 = vmatprep.subr.mxu0 %v428_v4  ;;  %3979 = vmatprep.subr.mxu1 %v428_v4  ;;  %v183_v27 = vld [vmem:[%s4068_s5 + $0x48] sm:$0xff]  ;;  %v184_v28 = vld [vmem:[%s4068_s5 + $0x50] sm:$0xff]  ;;  %v309_v29 = vld [vmem:[%s4068_s5 + $0x438] sm:$0xff] }
  0x15   : > { %3591 = vmatpush3.msra.mxu0 %v428_v4  ;;  %3988 = vmatpush3.msra.mxu1 %v428_v4  ;;  %v310_v30 = vld [vmem:[%s4068_s5 + $0x440] sm:$0xff]  ;;  %v185_v31 = vld [vmem:[%s4068_s5 + $0x58] sm:$0xff]  ;;  %v311_v33 = vld [vmem:[%s4068_s5 + $0x448] sm:$0xff] }
  0x16   : > { %3592 = vmatprep.subr.mxu0 %v427_v5  ;;  %3980 = vmatprep.subr.mxu1 %v427_v5  ;;  %v186_v32 = vld [vmem:[%s4068_s5 + $0x60] sm:$0xff]  ;;  %v312_v34 = vld [vmem:[%s4068_s5 + $0x450] sm:$0xff]  ;;  %v187_v35 = vld [vmem:[%s4068_s5 + $0x68] sm:$0xff] }
  0x17   : > { %3593 = vmatpush3.msra.mxu0 %v427_v5  ;;  %3989 = vmatpush3.msra.mxu1 %v427_v5  ;;  %v188_v36 = vld [vmem:[%s4068_s5 + $0x70] sm:$0xff]  ;;  %v313_v37 = vld [vmem:[%s4068_s5 + $0x458] sm:$0xff]  ;;  %v314_v38 = vld [vmem:[%s4068_s5 + $0x460] sm:$0xff] }
  0x18   : > { %3594 = vmatprep.subr.mxu0 %v426_v6  ;;  %3981 = vmatprep.subr.mxu1 %v426_v6  ;;  %v189_v39 = vld [vmem:[%s4068_s5 + $0x78] sm:$0xff]  ;;  %v190_v40 = vld [vmem:[%s4068_s5 + $0x80] sm:$0xff]  ;;  %v315_v41 = vld [vmem:[%s4068_s5 + $0x468] sm:$0xff] }
  0x19   : > { %3595 = vmatpush3.msra.mxu0 %v426_v6  ;;  %3990 = vmatpush3.msra.mxu1 %v426_v6  ;;  %v316_v42 = vld [vmem:[%s4068_s5 + $0x470] sm:$0xff]  ;;  %v191_v43 = vld [vmem:[%s4068_s5 + $0x88] sm:$0xff]  ;;  %v317_v45 = vld [vmem:[%s4068_s5 + $0x478] sm:$0xff] }
  0x1a   : > { %3596 = vmatprep.subr.mxu0 %v425_v7  ;;  %3982 = vmatprep.subr.mxu1 %v425_v7  ;;  %v192_v44 = vld [vmem:[%s4068_s5 + $0x90] sm:$0xff]  ;;  %v318_v46 = vld [vmem:[%s4068_s5 + $0x480] sm:$0xff]  ;;  %v193_v47 = vld [vmem:[%s4068_s5 + $0x98] sm:$0xff] }
  0x1b   : > { %3597 = vmatpush3.msra.mxu0 %v425_v7  ;;  %3991 = vmatpush3.msra.mxu1 %v425_v7  ;;  %v194_v48 = vld [vmem:[%s4068_s5 + $0xa0] sm:$0xff]  ;;  %v319_v49 = vld [vmem:[%s4068_s5 + $0x488] sm:$0xff]  ;;  %v320_v50 = vld [vmem:[%s4068_s5 + $0x490] sm:$0xff] }
  0x1c   : > { %3598 = vmatprep.subr.mxu0 %v424_v8  ;;  %3600 = vmatprep.mubr.msk.f32.mxu0 %vm440_vm0, %v174_v9  ;;  %v195_v51 = vld [vmem:[%s4068_s5 + $0xa8] sm:$0xff]  ;;  %v196_v52 = vld [vmem:[%s4068_s5 + $0xb0] sm:$0xff]  ;;  %v321_v53 = vld [vmem:[%s4068_s5 + $0x498] sm:$0xff] }
  0x1d   : > { %3599 = vmatpush3.msra.mxu0 %v424_v8  ;;  %3983 = vmatprep.subr.mxu1 %v424_v8  ;;  %v322_v54 = vld [vmem:[%s4068_s5 + $0x4a0] sm:$0xff]  ;;  %v197_v55 = vld [vmem:[%s4068_s5 + $0xb8] sm:$0xff]  ;;  %v323_v57 = vld [vmem:[%s4068_s5 + $0x4a8] sm:$0xff] }
  0x1e   : > { %3601 = vmatmul.mubr.msk.f32.vlgmr.msra.gmra.mxu0 %vm440_vm0, %v175_v10  ;;  %3992 = vmatpush3.msra.mxu1 %v424_v8  ;;  %v198_v56 = vld [vmem:[%s4068_s5 + $0xc0] sm:$0xff]  ;;  %v324_v58 = vld [vmem:[%s4068_s5 + $0x4b0] sm:$0xff]  ;;  %v199_v59 = vld [vmem:[%s4068_s5 + $0xc8] sm:$0xff] }
  0x1f   : > { %3789 = vmatprep.mubr.msk.f32.mxu1 %vm440_vm0, %v300_v11  ;;  %3603 = vmatprep.mubr.msk.f32.mxu0 %vm440_vm0, %v176_v12  ;;  %v200_v60 = vld [vmem:[%s4068_s5 + $0xd0] sm:$0xff]  ;;  %v325_v61 = vld [vmem:[%s4068_s5 + $0x4b8] sm:$0xff]  ;;  %v326_v62 = vld [vmem:[%s4068_s5 + $0x4c0] sm:$0xff] }
  0x20   : > { %3790 = vmatmul.mubr.msk.f32.vlgmr.msra.gmra.mxu1 %vm440_vm0, %v301_v13  ;;  %v201_v63 = vld [vmem:[%s4068_s5 + $0xd8] sm:$0xff]  ;;  %v202_v0 = vld [vmem:[%s4068_s5 + $0xe0] sm:$0xff]  ;;  %v327_v1 = vld [vmem:[%s4068_s5 + $0x4c8] sm:$0xff] }
  0x21   : > { %3792 = vmatprep.mubr.msk.f32.mxu1 %vm440_vm0, %v302_v14  ;;  %v328_v2 = vld [vmem:[%s4068_s5 + $0x4d0] sm:$0xff]  ;;  %v203_v3 = vld [vmem:[%s4068_s5 + $0xe8] sm:$0xff]  ;;  %v329_v5 = vld [vmem:[%s4068_s5 + $0x4d8] sm:$0xff] }
  0x22   : > { %3604 = vmatmul.mubr.msk.f32.gmra.mxu0 %vm440_vm0, %v177_v15  ;;  %v204_v4 = vld [vmem:[%s4068_s5 + $0xf0] sm:$0xff]  ;;  %v330_v6 = vld [vmem:[%s4068_s5 + $0x4e0] sm:$0xff]  ;;  %v205_v7 = vld [vmem:[%s4068_s5 + $0xf8] sm:$0xff] }
  0x23   : > { %3606 = vmatprep.mubr.msk.f32.mxu0 %vm440_vm0, %v178_v16  ;;  %v206_v8 = vld [vmem:[%s4068_s5 + $0x100] sm:$0xff]  ;;  %v331_v9 = vld [vmem:[%s4068_s5 + $0x4e8] sm:$0xff]  ;;  %v332_v10 = vld [vmem:[%s4068_s5 + $0x4f0] sm:$0xff] }
  0x24   : > { %3793 = vmatmul.mubr.msk.f32.gmra.mxu1 %vm440_vm0, %v303_v17  ;;  %v207_v11 = vld [vmem:[%s4068_s5 + $0x108] sm:$0xff]  ;;  %v208_v12 = vld [vmem:[%s4068_s5 + $0x110] sm:$0xff]  ;;  %v333_v13 = vld [vmem:[%s4068_s5 + $0x4f8] sm:$0xff] }
  0x25   : > { %3795 = vmatprep.mubr.msk.f32.mxu1 %vm440_vm0, %v304_v18  ;;  %v334_v14 = vld [vmem:[%s4068_s5 + $0x500] sm:$0xff]  ;;  %v209_v15 = vld [vmem:[%s4068_s5 + $0x118] sm:$0xff]  ;;  %v335_v17 = vld [vmem:[%s4068_s5 + $0x508] sm:$0xff] }
  0x26   : > { %3607 = vmatmul.mubr.msk.f32.gmra.mxu0 %vm440_vm0, %v179_v19  ;;  %v210_v16 = vld [vmem:[%s4068_s5 + $0x120] sm:$0xff]  ;;  %v336_v18 = vld [vmem:[%s4068_s5 + $0x510] sm:$0xff]  ;;  %v211_v19 = vld [vmem:[%s4068_s5 + $0x128] sm:$0xff] }
  0x27   : > { %3609 = vmatprep.mubr.msk.f32.mxu0 %vm440_vm0, %v180_v20  ;;  %v212_v20 = vld [vmem:[%s4068_s5 + $0x130] sm:$0xff] }
  0x28   : > { %3796 = vmatmul.mubr.msk.f32.gmra.mxu1 %vm440_vm0, %v305_v21  ;;  %v337_v21 = vld [vmem:[%s4068_s5 + $0x518] sm:$0xff] }
  0x29   : > { %3798 = vmatprep.mubr.msk.f32.mxu1 %vm440_vm0, %v306_v22  ;;  %v338_v22 = vld [vmem:[%s4068_s5 + $0x520] sm:$0xff] }
  0x2a   : > { %3610 = vmatmul.mubr.msk.f32.gmra.mxu0 %vm440_vm0, %v181_v23  ;;  %v213_v23 = vld [vmem:[%s4068_s5 + $0x138] sm:$0xff] }
  0x2b   : > { %3612 = vmatprep.mubr.msk.f32.mxu0 %vm440_vm0, %v182_v24  ;;  %v214_v24 = vld [vmem:[%s4068_s5 + $0x140] sm:$0xff] }
  0x2c   : > { %3799 = vmatmul.mubr.msk.f32.gmra.mxu1 %vm440_vm0, %v307_v25  ;;  %v339_v25 = vld [vmem:[%s4068_s5 + $0x528] sm:$0xff] }
  0x2d   : > { %3801 = vmatprep.mubr.msk.f32.mxu1 %vm440_vm0, %v308_v26  ;;  %v340_v26 = vld [vmem:[%s4068_s5 + $0x530] sm:$0xff] }
  0x2e   : > { %3613 = vmatmul.mubr.msk.f32.gmra.mxu0 %vm440_vm0, %v183_v27  ;;  %v215_v27 = vld [vmem:[%s4068_s5 + $0x148] sm:$0xff] }
  0x2f   : > { %3615 = vmatprep.mubr.msk.f32.mxu0 %vm440_vm0, %v184_v28  ;;  %v216_v28 = vld [vmem:[%s4068_s5 + $0x150] sm:$0xff] }
  0x30   : > { %3802 = vmatmul.mubr.msk.f32.gmra.mxu1 %vm440_vm0, %v309_v29  ;;  %v341_v29 = vld [vmem:[%s4068_s5 + $0x538] sm:$0xff] }
  0x31   : > { %3804 = vmatprep.mubr.msk.f32.mxu1 %vm440_vm0, %v310_v30  ;;  %v342_v30 = vld [vmem:[%s4068_s5 + $0x540] sm:$0xff] }
  0x32   : > { %3616 = vmatmul.mubr.msk.f32.gmra.mxu0 %vm440_vm0, %v185_v31  ;;  %v217_v31 = vld [vmem:[%s4068_s5 + $0x158] sm:$0xff] }
  0x33   : > { %3618 = vmatprep.mubr.msk.f32.mxu0 %vm440_vm0, %v186_v32  ;;  %v218_v32 = vld [vmem:[%s4068_s5 + $0x160] sm:$0xff] }
  0x34   : > { %3805 = vmatmul.mubr.msk.f32.gmra.mxu1 %vm440_vm0, %v311_v33  ;;  %v343_v33 = vld [vmem:[%s4068_s5 + $0x548] sm:$0xff] }
  0x35   : > { %3807 = vmatprep.mubr.msk.f32.mxu1 %vm440_vm0, %v312_v34  ;;  %v344_v34 = vld [vmem:[%s4068_s5 + $0x550] sm:$0xff] }
  0x36   : > { %3619 = vmatmul.mubr.msk.f32.gmra.mxu0 %vm440_vm0, %v187_v35  ;;  %v219_v35 = vld [vmem:[%s4068_s5 + $0x168] sm:$0xff] }
  0x37   : > { %3621 = vmatprep.mubr.msk.f32.mxu0 %vm440_vm0, %v188_v36  ;;  %v220_v36 = vld [vmem:[%s4068_s5 + $0x170] sm:$0xff] }
  0x38   : > { %3808 = vmatmul.mubr.msk.f32.gmra.mxu1 %vm440_vm0, %v313_v37  ;;  %v345_v37 = vld [vmem:[%s4068_s5 + $0x558] sm:$0xff] }
  0x39   : > { %3810 = vmatprep.mubr.msk.f32.mxu1 %vm440_vm0, %v314_v38  ;;  %v346_v38 = vld [vmem:[%s4068_s5 + $0x560] sm:$0xff] }
  0x3a   : > { %3622 = vmatmul.mubr.msk.f32.gmra.mxu0 %vm440_vm0, %v189_v39  ;;  %v221_v39 = vld [vmem:[%s4068_s5 + $0x178] sm:$0xff] }
  0x3b   : > { %3624 = vmatprep.mubr.msk.f32.mxu0 %vm440_vm0, %v190_v40  ;;  %v222_v40 = vld [vmem:[%s4068_s5 + $0x180] sm:$0xff] }
  0x3c   : > { %3811 = vmatmul.mubr.msk.f32.gmra.mxu1 %vm440_vm0, %v315_v41  ;;  %v347_v41 = vld [vmem:[%s4068_s5 + $0x568] sm:$0xff] }
  0x3d   : > { %3813 = vmatprep.mubr.msk.f32.mxu1 %vm440_vm0, %v316_v42  ;;  %v348_v42 = vld [vmem:[%s4068_s5 + $0x570] sm:$0xff] }
  0x3e   : > { %3625 = vmatmul.mubr.msk.f32.gmra.mxu0 %vm440_vm0, %v191_v43  ;;  %v223_v43 = vld [vmem:[%s4068_s5 + $0x188] sm:$0xff] }
  0x3f   : > { %3627 = vmatprep.mubr.msk.f32.mxu0 %vm440_vm0, %v192_v44  ;;  %v224_v44 = vld [vmem:[%s4068_s5 + $0x190] sm:$0xff] }
  0x40   : > { %3814 = vmatmul.mubr.msk.f32.gmra.mxu1 %vm440_vm0, %v317_v45  ;;  %v349_v45 = vld [vmem:[%s4068_s5 + $0x578] sm:$0xff] }
  0x41   : > { %3816 = vmatprep.mubr.msk.f32.mxu1 %vm440_vm0, %v318_v46  ;;  %v350_v46 = vld [vmem:[%s4068_s5 + $0x580] sm:$0xff] }
  0x42   : > { %3628 = vmatmul.mubr.msk.f32.gmra.mxu0 %vm440_vm0, %v193_v47  ;;  %v225_v47 = vld [vmem:[%s4068_s5 + $0x198] sm:$0xff] }
  0x43   : > { %3630 = vmatprep.mubr.msk.f32.mxu0 %vm440_vm0, %v194_v48  ;;  %v226_v48 = vld [vmem:[%s4068_s5 + $0x1a0] sm:$0xff] }
  0x44   : > { %3817 = vmatmul.mubr.msk.f32.gmra.mxu1 %vm440_vm0, %v319_v49  ;;  %v351_v49 = vld [vmem:[%s4068_s5 + $0x588] sm:$0xff] }
  0x45   : > { %3819 = vmatprep.mubr.msk.f32.mxu1 %vm440_vm0, %v320_v50  ;;  %v352_v50 = vld [vmem:[%s4068_s5 + $0x590] sm:$0xff] }
  0x46   : > { %3631 = vmatmul.mubr.msk.f32.gmra.mxu0 %vm440_vm0, %v195_v51  ;;  %v227_v51 = vld [vmem:[%s4068_s5 + $0x1a8] sm:$0xff] }
  0x47   : > { %3633 = vmatprep.mubr.msk.f32.mxu0 %vm440_vm0, %v196_v52  ;;  %v228_v52 = vld [vmem:[%s4068_s5 + $0x1b0] sm:$0xff] }
  0x48   : > { %3820 = vmatmul.mubr.msk.f32.gmra.mxu1 %vm440_vm0, %v321_v53  ;;  %v353_v53 = vld [vmem:[%s4068_s5 + $0x598] sm:$0xff] }
  0x49   : > { %3822 = vmatprep.mubr.msk.f32.mxu1 %vm440_vm0, %v322_v54  ;;  %v354_v54 = vld [vmem:[%s4068_s5 + $0x5a0] sm:$0xff] }
  0x4a   : > { %3634 = vmatmul.mubr.msk.f32.gmra.mxu0 %vm440_vm0, %v197_v55  ;;  %v229_v55 = vld [vmem:[%s4068_s5 + $0x1b8] sm:$0xff] }
  0x4b   : > { %3636 = vmatprep.mubr.msk.f32.mxu0 %vm440_vm0, %v198_v56  ;;  %v230_v56 = vld [vmem:[%s4068_s5 + $0x1c0] sm:$0xff] }
  0x4c   : > { %3823 = vmatmul.mubr.msk.f32.gmra.mxu1 %vm440_vm0, %v323_v57  ;;  %v355_v57 = vld [vmem:[%s4068_s5 + $0x5a8] sm:$0xff] }
  0x4d   : > { %3825 = vmatprep.mubr.msk.f32.mxu1 %vm440_vm0, %v324_v58  ;;  %v356_v58 = vld [vmem:[%s4068_s5 + $0x5b0] sm:$0xff] }
  0x4e   : > { %3637 = vmatmul.mubr.msk.f32.gmra.mxu0 %vm440_vm0, %v199_v59  ;;  %v231_v59 = vld [vmem:[%s4068_s5 + $0x1c8] sm:$0xff] }
  0x4f   : > { %3639 = vmatprep.mubr.msk.f32.mxu0 %vm440_vm0, %v200_v60  ;;  %v232_v60 = vld [vmem:[%s4068_s5 + $0x1d0] sm:$0xff] }
  0x50   : > { %3826 = vmatmul.mubr.msk.f32.gmra.mxu1 %vm440_vm0, %v325_v61  ;;  %v357_v61 = vld [vmem:[%s4068_s5 + $0x5b8] sm:$0xff] }
  0x51   : > { %3828 = vmatprep.mubr.msk.f32.mxu1 %vm440_vm0, %v326_v62  ;;  %v358_v62 = vld [vmem:[%s4068_s5 + $0x5c0] sm:$0xff] }
  0x52   : > { %3640 = vmatmul.mubr.msk.f32.gmra.mxu0 %vm440_vm0, %v201_v63  ;;  %v233_v63 = vld [vmem:[%s4068_s5 + $0x1d8] sm:$0xff] }
  0x53   : > { %3642 = vmatprep.mubr.msk.f32.mxu0 %vm440_vm0, %v202_v0  ;;  %v234_v0 = vld [vmem:[%s4068_s5 + $0x1e0] sm:$0xff] }
  0x54   : > { %3829 = vmatmul.mubr.msk.f32.gmra.mxu1 %vm440_vm0, %v327_v1  ;;  %v359_v1 = vld [vmem:[%s4068_s5 + $0x5c8] sm:$0xff] }
  0x55   : > { %3831 = vmatprep.mubr.msk.f32.mxu1 %vm440_vm0, %v328_v2  ;;  %v360_v2 = vld [vmem:[%s4068_s5 + $0x5d0] sm:$0xff] }
  0x56   : > { %3643 = vmatmul.mubr.msk.f32.gmra.mxu0 %vm440_vm0, %v203_v3  ;;  %v235_v3 = vld [vmem:[%s4068_s5 + $0x1e8] sm:$0xff] }
  0x57   : > { %3645 = vmatprep.mubr.msk.f32.mxu0 %vm440_vm0, %v204_v4  ;;  %v236_v4 = vld [vmem:[%s4068_s5 + $0x1f0] sm:$0xff] }
  0x58   : > { %3832 = vmatmul.mubr.msk.f32.gmra.mxu1 %vm440_vm0, %v329_v5  ;;  %v361_v5 = vld [vmem:[%s4068_s5 + $0x5d8] sm:$0xff] }
  0x59   : > { %3834 = vmatprep.mubr.msk.f32.mxu1 %vm440_vm0, %v330_v6  ;;  %v362_v6 = vld [vmem:[%s4068_s5 + $0x5e0] sm:$0xff] }
  0x5a   : > { %3646 = vmatmul.mubr.msk.f32.gmra.mxu0 %vm440_vm0, %v205_v7  ;;  %v237_v7 = vld [vmem:[%s4068_s5 + $0x1f8] sm:$0xff] }
  0x5b   : > { %3648 = vmatprep.mubr.msk.f32.mxu0 %vm440_vm0, %v206_v8  ;;  %v238_v8 = vld [vmem:[%s4068_s5 + $0x200] sm:$0xff] }
  0x5c   : > { %3835 = vmatmul.mubr.msk.f32.gmra.mxu1 %vm440_vm0, %v331_v9  ;;  %v363_v9 = vld [vmem:[%s4068_s5 + $0x5e8] sm:$0xff] }
  0x5d   : > { %3837 = vmatprep.mubr.msk.f32.mxu1 %vm440_vm0, %v332_v10  ;;  %v364_v10 = vld [vmem:[%s4068_s5 + $0x5f0] sm:$0xff] }
  0x5e   : > { %3649 = vmatmul.mubr.msk.f32.gmra.mxu0 %vm440_vm0, %v207_v11  ;;  %v239_v11 = vld [vmem:[%s4068_s5 + $0x208] sm:$0xff] }
  0x5f   : > { %3651 = vmatprep.mubr.msk.f32.mxu0 %vm440_vm0, %v208_v12  ;;  %v240_v12 = vld [vmem:[%s4068_s5 + $0x210] sm:$0xff] }
  0x60   : > { %3838 = vmatmul.mubr.msk.f32.gmra.mxu1 %vm440_vm0, %v333_v13  ;;  %v365_v13 = vld [vmem:[%s4068_s5 + $0x5f8] sm:$0xff] }
  0x61   : > { %3840 = vmatprep.mubr.msk.f32.mxu1 %vm440_vm0, %v334_v14  ;;  %v366_v14 = vld [vmem:[%s4068_s5 + $0x600] sm:$0xff] }
  0x62   : > { %3652 = vmatmul.mubr.msk.f32.gmra.mxu0 %vm440_vm0, %v209_v15  ;;  %v241_v15 = vld [vmem:[%s4068_s5 + $0x218] sm:$0xff] }
  0x63   : > { %3654 = vmatprep.mubr.msk.f32.mxu0 %vm440_vm0, %v210_v16  ;;  %v242_v16 = vld [vmem:[%s4068_s5 + $0x220] sm:$0xff] }
  0x64   : > { %3841 = vmatmul.mubr.msk.f32.gmra.mxu1 %vm440_vm0, %v335_v17  ;;  %v367_v17 = vld [vmem:[%s4068_s5 + $0x608] sm:$0xff] }
  0x65   : > { %3843 = vmatprep.mubr.msk.f32.mxu1 %vm440_vm0, %v336_v18  ;;  %v368_v18 = vld [vmem:[%s4068_s5 + $0x610] sm:$0xff] }
  0x66   : > { %3655 = vmatmul.mubr.msk.f32.gmra.mxu0 %vm440_vm0, %v211_v19  ;;  %v243_v19 = vld [vmem:[%s4068_s5 + $0x228] sm:$0xff] }
  0x67   : > { %3657 = vmatprep.mubr.msk.f32.mxu0 %vm440_vm0, %v212_v20  ;;  %v244_v20 = vld [vmem:[%s4068_s5 + $0x230] sm:$0xff] }
  0x68   : > { %3844 = vmatmul.mubr.msk.f32.gmra.mxu1 %vm440_vm0, %v337_v21  ;;  %v369_v21 = vld [vmem:[%s4068_s5 + $0x618] sm:$0xff] }
  0x69   : > { %3846 = vmatprep.mubr.msk.f32.mxu1 %vm440_vm0, %v338_v22  ;;  %v370_v22 = vld [vmem:[%s4068_s5 + $0x620] sm:$0xff] }
  0x6a   : > { %3658 = vmatmul.mubr.msk.f32.gmra.mxu0 %vm440_vm0, %v213_v23  ;;  %v245_v23 = vld [vmem:[%s4068_s5 + $0x238] sm:$0xff] }
  0x6b   : > { %3660 = vmatprep.mubr.msk.f32.mxu0 %vm440_vm0, %v214_v24  ;;  %v246_v24 = vld [vmem:[%s4068_s5 + $0x240] sm:$0xff] }
  0x6c   : > { %3847 = vmatmul.mubr.msk.f32.gmra.mxu1 %vm440_vm0, %v339_v25  ;;  %v371_v25 = vld [vmem:[%s4068_s5 + $0x628] sm:$0xff] }
  0x6d   : > { %3849 = vmatprep.mubr.msk.f32.mxu1 %vm440_vm0, %v340_v26  ;;  %v372_v26 = vld [vmem:[%s4068_s5 + $0x630] sm:$0xff] }
  0x6e   : > { %3661 = vmatmul.mubr.msk.f32.gmra.mxu0 %vm440_vm0, %v215_v27  ;;  %v247_v27 = vld [vmem:[%s4068_s5 + $0x248] sm:$0xff] }
  0x6f   : > { %3663 = vmatprep.mubr.msk.f32.mxu0 %vm440_vm0, %v216_v28  ;;  %v248_v28 = vld [vmem:[%s4068_s5 + $0x250] sm:$0xff] }
  0x70   : > { %3850 = vmatmul.mubr.msk.f32.gmra.mxu1 %vm440_vm0, %v341_v29  ;;  %v373_v29 = vld [vmem:[%s4068_s5 + $0x638] sm:$0xff] }
  0x71   : > { %3852 = vmatprep.mubr.msk.f32.mxu1 %vm440_vm0, %v342_v30  ;;  %v374_v30 = vld [vmem:[%s4068_s5 + $0x640] sm:$0xff] }
  0x72   : > { %3664 = vmatmul.mubr.msk.f32.gmra.mxu0 %vm440_vm0, %v217_v31  ;;  %v249_v31 = vld [vmem:[%s4068_s5 + $0x258] sm:$0xff] }
  0x73   : > { %3666 = vmatprep.mubr.msk.f32.mxu0 %vm440_vm0, %v218_v32  ;;  %v250_v32 = vld [vmem:[%s4068_s5 + $0x260] sm:$0xff] }
  0x74   : > { %3853 = vmatmul.mubr.msk.f32.gmra.mxu1 %vm440_vm0, %v343_v33  ;;  %v375_v33 = vld [vmem:[%s4068_s5 + $0x648] sm:$0xff] }
  0x75   : > { %3855 = vmatprep.mubr.msk.f32.mxu1 %vm440_vm0, %v344_v34  ;;  %v376_v34 = vld [vmem:[%s4068_s5 + $0x650] sm:$0xff] }
  0x76   : > { %3667 = vmatmul.mubr.msk.f32.gmra.mxu0 %vm440_vm0, %v219_v35  ;;  %v251_v35 = vld [vmem:[%s4068_s5 + $0x268] sm:$0xff] }
  0x77   : > { %3669 = vmatprep.mubr.msk.f32.mxu0 %vm440_vm0, %v220_v36  ;;  %v252_v36 = vld [vmem:[%s4068_s5 + $0x270] sm:$0xff] }
  0x78   : > { %3856 = vmatmul.mubr.msk.f32.gmra.mxu1 %vm440_vm0, %v345_v37  ;;  %v377_v37 = vld [vmem:[%s4068_s5 + $0x658] sm:$0xff] }
  0x79   : > { %3858 = vmatprep.mubr.msk.f32.mxu1 %vm440_vm0, %v346_v38  ;;  %v378_v38 = vld [vmem:[%s4068_s5 + $0x660] sm:$0xff] }
  0x7a   : > { %3670 = vmatmul.mubr.msk.f32.gmra.mxu0 %vm440_vm0, %v221_v39  ;;  %v253_v39 = vld [vmem:[%s4068_s5 + $0x278] sm:$0xff] }
  0x7b   : > { %3672 = vmatprep.mubr.msk.f32.mxu0 %vm440_vm0, %v222_v40  ;;  %v254_v40 = vld [vmem:[%s4068_s5 + $0x280] sm:$0xff] }
  0x7c   : > { %3859 = vmatmul.mubr.msk.f32.gmra.mxu1 %vm440_vm0, %v347_v41  ;;  %v379_v41 = vld [vmem:[%s4068_s5 + $0x668] sm:$0xff] }
  0x7d   : > { %3861 = vmatprep.mubr.msk.f32.mxu1 %vm440_vm0, %v348_v42  ;;  %v380_v42 = vld [vmem:[%s4068_s5 + $0x670] sm:$0xff] }
  0x7e   : > { %3673 = vmatmul.mubr.msk.f32.gmra.mxu0 %vm440_vm0, %v223_v43  ;;  %v255_v43 = vld [vmem:[%s4068_s5 + $0x288] sm:$0xff] }
  0x7f   : > { %3675 = vmatprep.mubr.msk.f32.mxu0 %vm440_vm0, %v224_v44  ;;  %v256_v44 = vld [vmem:[%s4068_s5 + $0x290] sm:$0xff] }
  0x80   : > { %3862 = vmatmul.mubr.msk.f32.gmra.mxu1 %vm440_vm0, %v349_v45  ;;  %v381_v45 = vld [vmem:[%s4068_s5 + $0x678] sm:$0xff] }
  0x81   : > { %3864 = vmatprep.mubr.msk.f32.mxu1 %vm440_vm0, %v350_v46  ;;  %v382_v46 = vld [vmem:[%s4068_s5 + $0x680] sm:$0xff] }
  0x82   : > { %3676 = vmatmul.mubr.msk.f32.gmra.mxu0 %vm440_vm0, %v225_v47  ;;  %v257_v47 = vld [vmem:[%s4068_s5 + $0x298] sm:$0xff] }
  0x83   : > { %3678 = vmatprep.mubr.msk.f32.mxu0 %vm440_vm0, %v226_v48  ;;  %v258_v48 = vld [vmem:[%s4068_s5 + $0x2a0] sm:$0xff] }
  0x84   : > { %3865 = vmatmul.mubr.msk.f32.gmra.mxu1 %vm440_vm0, %v351_v49  ;;  %v383_v49 = vld [vmem:[%s4068_s5 + $0x688] sm:$0xff] }
  0x85   : > { %3867 = vmatprep.mubr.msk.f32.mxu1 %vm440_vm0, %v352_v50  ;;  %v384_v50 = vld [vmem:[%s4068_s5 + $0x690] sm:$0xff] }
  0x86   : > { %3679 = vmatmul.mubr.msk.f32.gmra.mxu0 %vm440_vm0, %v227_v51  ;;  %v259_v51 = vld [vmem:[%s4068_s5 + $0x2a8] sm:$0xff] }
  0x87   : > { %3681 = vmatprep.mubr.msk.f32.mxu0 %vm440_vm0, %v228_v52  ;;  %v260_v52 = vld [vmem:[%s4068_s5 + $0x2b0] sm:$0xff] }
  0x88   : > { %3868 = vmatmul.mubr.msk.f32.gmra.mxu1 %vm440_vm0, %v353_v53  ;;  %v385_v53 = vld [vmem:[%s4068_s5 + $0x698] sm:$0xff] }
  0x89   : > { %3870 = vmatprep.mubr.msk.f32.mxu1 %vm440_vm0, %v354_v54  ;;  %v386_v54 = vld [vmem:[%s4068_s5 + $0x6a0] sm:$0xff] }
  0x8a   : > { %3682 = vmatmul.mubr.msk.f32.gmra.mxu0 %vm440_vm0, %v229_v55  ;;  %v261_v55 = vld [vmem:[%s4068_s5 + $0x2b8] sm:$0xff] }
  0x8b   : > { %3684 = vmatprep.mubr.msk.f32.mxu0 %vm440_vm0, %v230_v56  ;;  %v262_v56 = vld [vmem:[%s4068_s5 + $0x2c0] sm:$0xff] }
  0x8c   : > { %3871 = vmatmul.mubr.msk.f32.gmra.mxu1 %vm440_vm0, %v355_v57  ;;  %v387_v57 = vld [vmem:[%s4068_s5 + $0x6a8] sm:$0xff] }
  0x8d   : > { %3873 = vmatprep.mubr.msk.f32.mxu1 %vm440_vm0, %v356_v58  ;;  %v388_v58 = vld [vmem:[%s4068_s5 + $0x6b0] sm:$0xff] }
  0x8e   : > { %3685 = vmatmul.mubr.msk.f32.gmra.mxu0 %vm440_vm0, %v231_v59  ;;  %v263_v59 = vld [vmem:[%s4068_s5 + $0x2c8] sm:$0xff] }
  0x8f   : > { %3687 = vmatprep.mubr.msk.f32.mxu0 %vm440_vm0, %v232_v60  ;;  %v264_v60 = vld [vmem:[%s4068_s5 + $0x2d0] sm:$0xff] }
  0x90   : > { %3874 = vmatmul.mubr.msk.f32.gmra.mxu1 %vm440_vm0, %v357_v61  ;;  %v389_v61 = vld [vmem:[%s4068_s5 + $0x6b8] sm:$0xff] }
  0x91   : > { %3876 = vmatprep.mubr.msk.f32.mxu1 %vm440_vm0, %v358_v62  ;;  %v390_v62 = vld [vmem:[%s4068_s5 + $0x6c0] sm:$0xff] }
  0x92   : > { %3688 = vmatmul.mubr.msk.f32.gmra.mxu0 %vm440_vm0, %v233_v63  ;;  %v265_v63 = vld [vmem:[%s4068_s5 + $0x2d8] sm:$0xff] }
  0x93   : > { %3690 = vmatprep.mubr.msk.f32.mxu0 %vm440_vm0, %v234_v0  ;;  %v266_v0 = vld [vmem:[%s4068_s5 + $0x2e0] sm:$0xff] }
  0x94   : > { %3877 = vmatmul.mubr.msk.f32.gmra.mxu1 %vm440_vm0, %v359_v1  ;;  %v391_v1 = vld [vmem:[%s4068_s5 + $0x6c8] sm:$0xff] }
  0x95   : > { %3879 = vmatprep.mubr.msk.f32.mxu1 %vm440_vm0, %v360_v2  ;;  %v392_v2 = vld [vmem:[%s4068_s5 + $0x6d0] sm:$0xff] }
  0x96   : > { %3691 = vmatmul.mubr.msk.f32.gmra.mxu0 %vm440_vm0, %v235_v3  ;;  %v267_v3 = vld [vmem:[%s4068_s5 + $0x2e8] sm:$0xff] }
  0x97   : > { %3693 = vmatprep.mubr.msk.f32.mxu0 %vm440_vm0, %v236_v4  ;;  %v268_v4 = vld [vmem:[%s4068_s5 + $0x2f0] sm:$0xff] }
  0x98   : > { %3880 = vmatmul.mubr.msk.f32.gmra.mxu1 %vm440_vm0, %v361_v5  ;;  %v393_v5 = vld [vmem:[%s4068_s5 + $0x6d8] sm:$0xff] }
  0x99   : > { %3882 = vmatprep.mubr.msk.f32.mxu1 %vm440_vm0, %v362_v6  ;;  %v394_v6 = vld [vmem:[%s4068_s5 + $0x6e0] sm:$0xff] }
  0x9a   : > { %3694 = vmatmul.mubr.msk.f32.gmra.mxu0 %vm440_vm0, %v237_v7  ;;  %v269_v7 = vld [vmem:[%s4068_s5 + $0x2f8] sm:$0xff] }
  0x9b   : > { %3696 = vmatprep.mubr.msk.f32.mxu0 %vm440_vm0, %v238_v8  ;;  %v270_v8 = vld [vmem:[%s4068_s5 + $0x300] sm:$0xff] }
  0x9c   : > { %3883 = vmatmul.mubr.msk.f32.gmra.mxu1 %vm440_vm0, %v363_v9  ;;  %v395_v9 = vld [vmem:[%s4068_s5 + $0x6e8] sm:$0xff] }
  0x9d   : > { %3885 = vmatprep.mubr.msk.f32.mxu1 %vm440_vm0, %v364_v10  ;;  %v396_v10 = vld [vmem:[%s4068_s5 + $0x6f0] sm:$0xff] }
  0x9e   : > { %3697 = vmatmul.mubr.msk.f32.gmra.mxu0 %vm440_vm0, %v239_v11  ;;  %v271_v11 = vld [vmem:[%s4068_s5 + $0x308] sm:$0xff] }
  0x9f   : > { %3699 = vmatprep.mubr.msk.f32.mxu0 %vm440_vm0, %v240_v12  ;;  %v4467_v12 = vld [vmem:[%s5353_s2] ss:$0 sm:$0xff] }
  0xa0   : > { %3886 = vmatmul.mubr.msk.f32.gmra.mxu1 %vm440_vm0, %v365_v13  ;;  %v272_v13 = vld [vmem:[%s4068_s5 + $0x310] sm:$0xff] }
  0xa1   : > { %3888 = vmatprep.mubr.msk.f32.mxu1 %vm440_vm0, %v366_v14  ;;  %v397_v14 = vld [vmem:[%s4068_s5 + $0x6f8] sm:$0xff] }
  0xa2   : > { %3700 = vmatmul.mubr.msk.f32.gmra.mxu0 %vm440_vm0, %v241_v15 }
  0xa3   : > { %3702 = vmatprep.mubr.msk.f32.mxu0 %vm440_vm0, %v242_v16  ;;  %v398_v16 = vld [vmem:[%s4068_s5 + $0x700] sm:$0xff] }
  0xa4   : > { %3889 = vmatmul.mubr.msk.f32.gmra.mxu1 %vm440_vm0, %v367_v17 }
  0xa5   : > { %3891 = vmatprep.mubr.msk.f32.mxu1 %vm440_vm0, %v368_v18  ;;  %v273_v18 = vld [vmem:[%s4068_s5 + $0x318] sm:$0xff] }
  0xa6   : > { %3703 = vmatmul.mubr.msk.f32.gmra.mxu0 %vm440_vm0, %v243_v19 }
  0xa7   : > { %3705 = vmatprep.mubr.msk.f32.mxu0 %vm440_vm0, %v244_v20 }
  0xa8   : > { %3892 = vmatmul.mubr.msk.f32.gmra.mxu1 %vm440_vm0, %v369_v21  ;;  %v274_v21 = vld [vmem:[%s4068_s5 + $0x320] sm:$0xff] }
  0xa9   : > { %3894 = vmatprep.mubr.msk.f32.mxu1 %vm440_vm0, %v370_v22 }
  0xaa   : > { %3706 = vmatmul.mubr.msk.f32.gmra.mxu0 %vm440_vm0, %v245_v23 }
  0xab   : > { %3708 = vmatprep.mubr.msk.f32.mxu0 %vm440_vm0, %v246_v24 }
  0xac   : > { %3895 = vmatmul.mubr.msk.f32.gmra.mxu1 %vm440_vm0, %v371_v25  ;;  %v399_v25 = vld [vmem:[%s4068_s5 + $0x708] sm:$0xff] }
  0xad   : > { %3897 = vmatprep.mubr.msk.f32.mxu1 %vm440_vm0, %v372_v26 }
  0xae   : > { %3709 = vmatmul.mubr.msk.f32.gmra.mxu0 %vm440_vm0, %v247_v27 }
  0xaf   : > { %3711 = vmatprep.mubr.msk.f32.mxu0 %vm440_vm0, %v248_v28  ;;  %v400_v28 = vld [vmem:[%s4068_s5 + $0x710] sm:$0xff] }
  0xb0   : > { %3898 = vmatmul.mubr.msk.f32.gmra.mxu1 %vm440_vm0, %v373_v29 }
  0xb1   : > { %3900 = vmatprep.mubr.msk.f32.mxu1 %vm440_vm0, %v374_v30 }
  0xb2   : > { %3712 = vmatmul.mubr.msk.f32.gmra.mxu0 %vm440_vm0, %v249_v31 }
  0xb3   : > { %3714 = vmatprep.mubr.msk.f32.mxu0 %vm440_vm0, %v250_v32 }
  0xb4   : > { %3901 = vmatmul.mubr.msk.f32.gmra.mxu1 %vm440_vm0, %v375_v33  ;;  %v275_v33 = vld [vmem:[%s4068_s5 + $0x328] sm:$0xff] }
  0xb5   : > { %3903 = vmatprep.mubr.msk.f32.mxu1 %vm440_vm0, %v376_v34 }
  0xb6   : > { %3715 = vmatmul.mubr.msk.f32.gmra.mxu0 %vm440_vm0, %v251_v35 }
  0xb7   : > { %3717 = vmatprep.mubr.msk.f32.mxu0 %vm440_vm0, %v252_v36  ;;  %v276_v36 = vld [vmem:[%s4068_s5 + $0x330] sm:$0xff] }
  0xb8   : > { %3904 = vmatmul.mubr.msk.f32.gmra.mxu1 %vm440_vm0, %v377_v37 }
  0xb9   : > { %3906 = vmatprep.mubr.msk.f32.mxu1 %vm440_vm0, %v378_v38 }
  0xba   : > { %3718 = vmatmul.mubr.msk.f32.gmra.mxu0 %vm440_vm0, %v253_v39 }
  0xbb   : > { %3720 = vmatprep.mubr.msk.f32.mxu0 %vm440_vm0, %v254_v40 }
  0xbc   : > { %3907 = vmatmul.mubr.msk.f32.gmra.mxu1 %vm440_vm0, %v379_v41  ;;  %v401_v41 = vld [vmem:[%s4068_s5 + $0x718] sm:$0xff] }
  0xbd   : > { %3909 = vmatprep.mubr.msk.f32.mxu1 %vm440_vm0, %v380_v42 }
  0xbe   : > { %3721 = vmatmul.mubr.msk.f32.gmra.mxu0 %vm440_vm0, %v255_v43 }
  0xbf   : > { %3723 = vmatprep.mubr.msk.f32.mxu0 %vm440_vm0, %v256_v44  ;;  %v402_v44 = vld [vmem:[%s4068_s5 + $0x720] sm:$0xff] }
  0xc0   : > { %3910 = vmatmul.mubr.msk.f32.gmra.mxu1 %vm440_vm0, %v381_v45 }
  0xc1   : > { %3912 = vmatprep.mubr.msk.f32.mxu1 %vm440_vm0, %v382_v46 }
  0xc2   : > { %3724 = vmatmul.mubr.msk.f32.gmra.mxu0 %vm440_vm0, %v257_v47 }
  0xc3   : > { %3726 = vmatprep.mubr.msk.f32.mxu0 %vm440_vm0, %v258_v48 }
  0xc4   : > { %3913 = vmatmul.mubr.msk.f32.gmra.mxu1 %vm440_vm0, %v383_v49  ;;  %v277_v49 = vld [vmem:[%s4068_s5 + $0x338] sm:$0xff] }
  0xc5   : > { %3915 = vmatprep.mubr.msk.f32.mxu1 %vm440_vm0, %v384_v50 }
  0xc6   : > { %3727 = vmatmul.mubr.msk.f32.gmra.mxu0 %vm440_vm0, %v259_v51 }
  0xc7   : > { %3729 = vmatprep.mubr.msk.f32.mxu0 %vm440_vm0, %v260_v52  ;;  %v278_v52 = vld [vmem:[%s4068_s5 + $0x340] sm:$0xff] }
  0xc8   : > { %3916 = vmatmul.mubr.msk.f32.gmra.mxu1 %vm440_vm0, %v385_v53 }
  0xc9   : > { %3918 = vmatprep.mubr.msk.f32.mxu1 %vm440_vm0, %v386_v54 }
  0xca   : > { %3730 = vmatmul.mubr.msk.f32.gmra.mxu0 %vm440_vm0, %v261_v55 }
  0xcb   : > { %3732 = vmatprep.mubr.msk.f32.mxu0 %vm440_vm0, %v262_v56 }
  0xcc   : > { %3919 = vmatmul.mubr.msk.f32.gmra.mxu1 %vm440_vm0, %v387_v57  ;;  %v403_v57 = vld [vmem:[%s4068_s5 + $0x728] sm:$0xff] }
  0xcd   : > { %3921 = vmatprep.mubr.msk.f32.mxu1 %vm440_vm0, %v388_v58 }
  0xce   : > { %3733 = vmatmul.mubr.msk.f32.gmra.mxu0 %vm440_vm0, %v263_v59 }
  0xcf   : > { %3735 = vmatprep.mubr.msk.f32.mxu0 %vm440_vm0, %v264_v60  ;;  %v404_v60 = vld [vmem:[%s4068_s5 + $0x730] sm:$0xff] }
  0xd0   : > { %3922 = vmatmul.mubr.msk.f32.gmra.mxu1 %vm440_vm0, %v389_v61 }
  0xd1   : > { %3924 = vmatprep.mubr.msk.f32.mxu1 %vm440_vm0, %v390_v62 }
  0xd2   : > { %3736 = vmatmul.mubr.msk.f32.gmra.mxu0 %vm440_vm0, %v265_v63 }
  0xd3   : > { %3738 = vmatprep.mubr.msk.f32.mxu0 %vm440_vm0, %v266_v0 }
  0xd4   : > { %3925 = vmatmul.mubr.msk.f32.gmra.mxu1 %vm440_vm0, %v391_v1  ;;  %v279_v1 = vld [vmem:[%s4068_s5 + $0x348] sm:$0xff] }
  0xd5   : > { %3927 = vmatprep.mubr.msk.f32.mxu1 %vm440_vm0, %v392_v2 }
  0xd6   : > { %3739 = vmatmul.mubr.msk.f32.gmra.mxu0 %vm440_vm0, %v267_v3 }
  0xd7   : > { %3741 = vmatprep.mubr.msk.f32.mxu0 %vm440_vm0, %v268_v4  ;;  %v280_v4 = vld [vmem:[%s4068_s5 + $0x350] sm:$0xff] }
  0xd8   : > { %3928 = vmatmul.mubr.msk.f32.gmra.mxu1 %vm440_vm0, %v393_v5 }
  0xd9   : > { %3930 = vmatprep.mubr.msk.f32.mxu1 %vm440_vm0, %v394_v6 }
  0xda   : > { %3742 = vmatmul.mubr.msk.f32.gmra.mxu0 %vm440_vm0, %v269_v7 }
  0xdb   : > { %3744 = vmatprep.mubr.msk.f32.mxu0 %vm440_vm0, %v270_v8 }
  0xdc   : > { %3931 = vmatmul.mubr.msk.f32.gmra.mxu1 %vm440_vm0, %v395_v9  ;;  %v405_v9 = vld [vmem:[%s4068_s5 + $0x738] sm:$0xff] }
  0xdd   : > { %3933 = vmatprep.mubr.msk.f32.mxu1 %vm440_vm0, %v396_v10 }
  0xde   : > { %v3602_v15 = vpop.f32.mrf.mxu0  ;;  %3745 = vmatmul.mubr.msk.f32.gmra.mxu0 %vm440_vm0, %v271_v11 }
  0xdf   : > { %v1263_v17 = vadd.f32 %v3602_v15, %v4467_v12  ;;  %3747 = vmatprep.mubr.msk.f32.mxu0 %vm440_vm0, %v272_v13  ;;  %v406_v13 = vld [vmem:[%s4068_s5 + $0x740] sm:$0xff] }
  0xe0   : > { %v1257_v19 = vpop.f32.mrf.mxu0  ;;  %v3791_v20 = vpop.f32.mrf.mxu1  ;;  %3934 = vmatmul.mubr.msk.f32.gmra.mxu1 %vm440_vm0, %v397_v14 }
  0xe1   : > { %v2507_v22 = vmax.f32 %v1263_v17, 0.0  ;;  %v1258_v23 = vadd.f32 %v4467_v12, %v1257_v19  ;;  %v1893_v24 = vadd.f32 %v3791_v20, %v4467_v12  ;;  %3936 = vmatprep.mubr.msk.f32.mxu1 %vm440_vm0, %v398_v16 }
  0xe2   : > { %v3605_v26 = vpop.f32.mrf.mxu0  ;;  %3748 = vmatmul.mubr.msk.f32.gmra.mxu0 %vm440_vm0, %v273_v18  ;;  %v1887_v27 = vpop.f32.mrf.mxu1  ;;  %v281_v18 = vld [vmem:[%s4068_s5 + $0x358] sm:$0xff] }
  0xe3   : > { %2758 = vst.msk [vmem:[%s4482_s15 + $0x8] sm:$0xff] %vm2756_vm1, %v2507_v22  ;;  %v2506_v29 = vmax.f32 %v1258_v23, 0.0  ;;  %v2633_v30 = vmax.f32 %v1893_v24, 0.0  ;;  %v1273_v31 = vadd.f32 %v3605_v26, %v4467_v12  ;;  %v1888_v32 = vadd.f32 %v4467_v12, %v1887_v27  ;;  %3750 = vmatprep.mubr.msk.f32.mxu0 %vm440_vm0, %v274_v21  ;;  %v282_v21 = vld [vmem:[%s4068_s5 + $0x360] sm:$0xff]  ;;  %v407_v26 = vld [vmem:[%s4068_s5 + $0x748] sm:$0xff] }
  0xe4   : > { %v1267_v34 = vpop.f32.mrf.mxu0  ;;  %v3794_v35 = vpop.f32.mrf.mxu1  ;;  %3937 = vmatmul.mubr.msk.f32.gmra.mxu1 %vm440_vm0, %v399_v25 }
  0xe5   : > { %2757 = vst.msk [vmem:[%s4482_s15] sm:$0xff] %vm2756_vm1, %v2506_v29  ;;  %2884 = vst.msk [vmem:[%s4482_s15 + $0x3f8] sm:$0xff] %vm2756_vm1, %v2633_v30  ;;  %v2509_v37 = vmax.f32 %v1273_v31, 0.0  ;;  %v2632_v38 = vmax.f32 %v1888_v32, 0.0  ;;  %v1268_v39 = vadd.f32 %v4467_v12, %v1267_v34  ;;  %v1903_v40 = vadd.f32 %v3794_v35, %v4467_v12  ;;  %3939 = vmatprep.mubr.msk.f32.mxu1 %vm440_vm0, %v400_v28  ;;  %v408_v29 = vld [vmem:[%s4068_s5 + $0x750] sm:$0xff]  ;;  %v283_v34 = vld [vmem:[%s4068_s5 + $0x368] sm:$0xff] }
  0xe6   : > { %v3608_v42 = vpop.f32.mrf.mxu0  ;;  %3751 = vmatmul.mubr.msk.f32.gmra.mxu0 %vm440_vm0, %v275_v33  ;;  %v1897_v43 = vpop.f32.mrf.mxu1 }
  0xe7   : > { %2760 = vst.msk [vmem:[%s4482_s15 + $0x18] sm:$0xff] %vm2756_vm1, %v2509_v37  ;;  %2883 = vst.msk [vmem:[%s4482_s15 + $0x3f0] sm:$0xff] %vm2756_vm1, %v2632_v38  ;;  %v2508_v45 = vmax.f32 %v1268_v39, 0.0  ;;  %v2635_v46 = vmax.f32 %v1903_v40, 0.0  ;;  %v1283_v47 = vadd.f32 %v3608_v42, %v4467_v12  ;;  %v1898_v48 = vadd.f32 %v4467_v12, %v1897_v43  ;;  %3753 = vmatprep.mubr.msk.f32.mxu0 %vm440_vm0, %v276_v36  ;;  %v284_v37 = vld [vmem:[%s4068_s5 + $0x370] sm:$0xff]  ;;  %v409_v42 = vld [vmem:[%s4068_s5 + $0x758] sm:$0xff] }
  0xe8   : > { %v1277_v50 = vpop.f32.mrf.mxu0  ;;  %v3797_v51 = vpop.f32.mrf.mxu1  ;;  %3940 = vmatmul.mubr.msk.f32.gmra.mxu1 %vm440_vm0, %v401_v41 }
  0xe9   : > { %2759 = vst.msk [vmem:[%s4482_s15 + $0x10] sm:$0xff] %vm2756_vm1, %v2508_v45  ;;  %2886 = vst.msk [vmem:[%s4482_s15 + $0x408] sm:$0xff] %vm2756_vm1, %v2635_v46  ;;  %v2511_v53 = vmax.f32 %v1283_v47, 0.0  ;;  %v2634_v54 = vmax.f32 %v1898_v48, 0.0  ;;  %v1278_v55 = vadd.f32 %v4467_v12, %v1277_v50  ;;  %v1913_v56 = vadd.f32 %v3797_v51, %v4467_v12  ;;  %3942 = vmatprep.mubr.msk.f32.mxu1 %vm440_vm0, %v402_v44  ;;  %v410_v45 = vld [vmem:[%s4068_s5 + $0x760] sm:$0xff]  ;;  %v285_v50 = vld [vmem:[%s4068_s5 + $0x378] sm:$0xff] }
  0xea   : > { %v3611_v58 = vpop.f32.mrf.mxu0  ;;  %3754 = vmatmul.mubr.msk.f32.gmra.mxu0 %vm440_vm0, %v277_v49  ;;  %v1907_v59 = vpop.f32.mrf.mxu1 }
  0xeb   : > { %2762 = vst.msk [vmem:[%s4482_s15 + $0x28] sm:$0xff] %vm2756_vm1, %v2511_v53  ;;  %2885 = vst.msk [vmem:[%s4482_s15 + $0x400] sm:$0xff] %vm2756_vm1, %v2634_v54  ;;  %v2510_v61 = vmax.f32 %v1278_v55, 0.0  ;;  %v2637_v62 = vmax.f32 %v1913_v56, 0.0  ;;  %v1293_v63 = vadd.f32 %v3611_v58, %v4467_v12  ;;  %v1908_v0 = vadd.f32 %v4467_v12, %v1907_v59  ;;  %3756 = vmatprep.mubr.msk.f32.mxu0 %vm440_vm0, %v278_v52  ;;  %v286_v53 = vld [vmem:[%s4068_s5 + $0x380] sm:$0xff]  ;;  %v411_v58 = vld [vmem:[%s4068_s5 + $0x768] sm:$0xff] }
  0xec   : > { %v1287_v2 = vpop.f32.mrf.mxu0  ;;  %v3800_v3 = vpop.f32.mrf.mxu1  ;;  %3943 = vmatmul.mubr.msk.f32.gmra.mxu1 %vm440_vm0, %v403_v57 }
  0xed   : > { %2761 = vst.msk [vmem:[%s4482_s15 + $0x20] sm:$0xff] %vm2756_vm1, %v2510_v61  ;;  %2888 = vst.msk [vmem:[%s4482_s15 + $0x418] sm:$0xff] %vm2756_vm1, %v2637_v62  ;;  %v2513_v5 = vmax.f32 %v1293_v63, 0.0  ;;  %v2636_v6 = vmax.f32 %v1908_v0, 0.0  ;;  %v1288_v7 = vadd.f32 %v4467_v12, %v1287_v2  ;;  %v1923_v8 = vadd.f32 %v3800_v3, %v4467_v12  ;;  %3945 = vmatprep.mubr.msk.f32.mxu1 %vm440_vm0, %v404_v60  ;;  %v412_v61 = vld [vmem:[%s4068_s5 + $0x770] sm:$0xff]  ;;  %v287_v2 = vld [vmem:[%s4068_s5 + $0x388] sm:$0xff] }
  0xee   : > { %v3614_v10 = vpop.f32.mrf.mxu0  ;;  %3757 = vmatmul.mubr.msk.f32.gmra.mxu0 %vm440_vm0, %v279_v1  ;;  %v1917_v11 = vpop.f32.mrf.mxu1 }
  0xef   : > { %2764 = vst.msk [vmem:[%s4482_s15 + $0x38] sm:$0xff] %vm2756_vm1, %v2513_v5  ;;  %2887 = vst.msk [vmem:[%s4482_s15 + $0x410] sm:$0xff] %vm2756_vm1, %v2636_v6  ;;  %v2512_v14 = vmax.f32 %v1288_v7, 0.0  ;;  %v2639_v15 = vmax.f32 %v1923_v8, 0.0  ;;  %v1303_v16 = vadd.f32 %v3614_v10, %v4467_v12  ;;  %v1918_v17 = vadd.f32 %v4467_v12, %v1917_v11  ;;  %3759 = vmatprep.mubr.msk.f32.mxu0 %vm440_vm0, %v280_v4  ;;  %v288_v5 = vld [vmem:[%s4068_s5 + $0x390] sm:$0xff]  ;;  %v413_v10 = vld [vmem:[%s4068_s5 + $0x778] sm:$0xff] }
  0xf0   : > { %v1297_v19 = vpop.f32.mrf.mxu0  ;;  %v3803_v20 = vpop.f32.mrf.mxu1  ;;  %3946 = vmatmul.mubr.msk.f32.gmra.mxu1 %vm440_vm0, %v405_v9 }
  0xf1   : > { %2763 = vst.msk [vmem:[%s4482_s15 + $0x30] sm:$0xff] %vm2756_vm1, %v2512_v14  ;;  %2890 = vst.msk [vmem:[%s4482_s15 + $0x428] sm:$0xff] %vm2756_vm1, %v2639_v15  ;;  %v2515_v22 = vmax.f32 %v1303_v16, 0.0  ;;  %v2638_v23 = vmax.f32 %v1918_v17, 0.0  ;;  %v1298_v24 = vadd.f32 %v4467_v12, %v1297_v19  ;;  %v1933_v25 = vadd.f32 %v3803_v20, %v4467_v12  ;;  %3948 = vmatprep.mubr.msk.f32.mxu1 %vm440_vm0, %v406_v13  ;;  %v414_v14 = vld [vmem:[%s4068_s5 + $0x780] sm:$0xff]  ;;  %v289_v19 = vld [vmem:[%s4068_s5 + $0x398] sm:$0xff] }
  0xf2   : > { %v3617_v27 = vpop.f32.mrf.mxu0  ;;  %3760 = vmatmul.mubr.msk.f32.gmra.mxu0 %vm440_vm0, %v281_v18  ;;  %v1927_v28 = vpop.f32.mrf.mxu1 }
  0xf3   : > { %2766 = vst.msk [vmem:[%s4482_s15 + $0x48] sm:$0xff] %vm2756_vm1, %v2515_v22  ;;  %2889 = vst.msk [vmem:[%s4482_s15 + $0x420] sm:$0xff] %vm2756_vm1, %v2638_v23  ;;  %v2514_v30 = vmax.f32 %v1298_v24, 0.0  ;;  %v2641_v31 = vmax.f32 %v1933_v25, 0.0  ;;  %v1313_v32 = vadd.f32 %v3617_v27, %v4467_v12  ;;  %v1928_v33 = vadd.f32 %v4467_v12, %v1927_v28  ;;  %3762 = vmatprep.mubr.msk.f32.mxu0 %vm440_vm0, %v282_v21  ;;  %v290_v22 = vld [vmem:[%s4068_s5 + $0x3a0] sm:$0xff]  ;;  %v415_v27 = vld [vmem:[%s4068_s5 + $0x788] sm:$0xff] }
  0xf4   : > { %v1307_v35 = vpop.f32.mrf.mxu0  ;;  %v3806_v36 = vpop.f32.mrf.mxu1  ;;  %3949 = vmatmul.mubr.msk.f32.gmra.mxu1 %vm440_vm0, %v407_v26 }
  0xf5   : > { %2765 = vst.msk [vmem:[%s4482_s15 + $0x40] sm:$0xff] %vm2756_vm1, %v2514_v30  ;;  %2892 = vst.msk [vmem:[%s4482_s15 + $0x438] sm:$0xff] %vm2756_vm1, %v2641_v31  ;;  %v2517_v38 = vmax.f32 %v1313_v32, 0.0  ;;  %v2640_v39 = vmax.f32 %v1928_v33, 0.0  ;;  %v1308_v40 = vadd.f32 %v4467_v12, %v1307_v35  ;;  %v1943_v41 = vadd.f32 %v3806_v36, %v4467_v12  ;;  %3951 = vmatprep.mubr.msk.f32.mxu1 %vm440_vm0, %v408_v29  ;;  %v416_v30 = vld [vmem:[%s4068_s5 + $0x790] sm:$0xff]  ;;  %v291_v35 = vld [vmem:[%s4068_s5 + $0x3a8] sm:$0xff] }
  0xf6   : > { %v3620_v43 = vpop.f32.mrf.mxu0  ;;  %3763 = vmatmul.mubr.msk.f32.gmra.mxu0 %vm440_vm0, %v283_v34  ;;  %v1937_v44 = vpop.f32.mrf.mxu1 }
  0xf7   : > { %2768 = vst.msk [vmem:[%s4482_s15 + $0x58] sm:$0xff] %vm2756_vm1, %v2517_v38  ;;  %2891 = vst.msk [vmem:[%s4482_s15 + $0x430] sm:$0xff] %vm2756_vm1, %v2640_v39  ;;  %v2516_v46 = vmax.f32 %v1308_v40, 0.0  ;;  %v2643_v47 = vmax.f32 %v1943_v41, 0.0  ;;  %v1323_v48 = vadd.f32 %v3620_v43, %v4467_v12  ;;  %v1938_v49 = vadd.f32 %v4467_v12, %v1937_v44  ;;  %3765 = vmatprep.mubr.msk.f32.mxu0 %vm440_vm0, %v284_v37  ;;  %v292_v38 = vld [vmem:[%s4068_s5 + $0x3b0] sm:$0xff]  ;;  %v417_v43 = vld [vmem:[%s4068_s5 + $0x798] sm:$0xff] }
  0xf8   : > { %v1317_v51 = vpop.f32.mrf.mxu0  ;;  %v3809_v52 = vpop.f32.mrf.mxu1  ;;  %3952 = vmatmul.mubr.msk.f32.gmra.mxu1 %vm440_vm0, %v409_v42 }
  0xf9   : > { %2767 = vst.msk [vmem:[%s4482_s15 + $0x50] sm:$0xff] %vm2756_vm1, %v2516_v46  ;;  %2894 = vst.msk [vmem:[%s4482_s15 + $0x448] sm:$0xff] %vm2756_vm1, %v2643_v47  ;;  %v2519_v54 = vmax.f32 %v1323_v48, 0.0  ;;  %v2642_v55 = vmax.f32 %v1938_v49, 0.0  ;;  %v1318_v56 = vadd.f32 %v4467_v12, %v1317_v51  ;;  %v1953_v57 = vadd.f32 %v3809_v52, %v4467_v12  ;;  %3954 = vmatprep.mubr.msk.f32.mxu1 %vm440_vm0, %v410_v45  ;;  %v418_v46 = vld [vmem:[%s4068_s5 + $0x7a0] sm:$0xff]  ;;  %v293_v51 = vld [vmem:[%s4068_s5 + $0x3b8] sm:$0xff] }
  0xfa   : > { %v3623_v59 = vpop.f32.mrf.mxu0  ;;  %3766 = vmatmul.mubr.msk.f32.gmra.mxu0 %vm440_vm0, %v285_v50  ;;  %v1947_v60 = vpop.f32.mrf.mxu1 }
  0xfb   : > { %2770 = vst.msk [vmem:[%s4482_s15 + $0x68] sm:$0xff] %vm2756_vm1, %v2519_v54  ;;  %2893 = vst.msk [vmem:[%s4482_s15 + $0x440] sm:$0xff] %vm2756_vm1, %v2642_v55  ;;  %v2518_v62 = vmax.f32 %v1318_v56, 0.0  ;;  %v2645_v63 = vmax.f32 %v1953_v57, 0.0  ;;  %v1333_v0 = vadd.f32 %v3623_v59, %v4467_v12  ;;  %v1948_v1 = vadd.f32 %v4467_v12, %v1947_v60  ;;  %3768 = vmatprep.mubr.msk.f32.mxu0 %vm440_vm0, %v286_v53  ;;  %v294_v54 = vld [vmem:[%s4068_s5 + $0x3c0] sm:$0xff]  ;;  %v419_v59 = vld [vmem:[%s4068_s5 + $0x7a8] sm:$0xff] }
  0xfc   : > { %v1327_v3 = vpop.f32.mrf.mxu0  ;;  %v3812_v4 = vpop.f32.mrf.mxu1  ;;  %3955 = vmatmul.mubr.msk.f32.gmra.mxu1 %vm440_vm0, %v411_v58 }
  0xfd   : > { %2769 = vst.msk [vmem:[%s4482_s15 + $0x60] sm:$0xff] %vm2756_vm1, %v2518_v62  ;;  %2896 = vst.msk [vmem:[%s4482_s15 + $0x458] sm:$0xff] %vm2756_vm1, %v2645_v63  ;;  %v2521_v6 = vmax.f32 %v1333_v0, 0.0  ;;  %v2644_v7 = vmax.f32 %v1948_v1, 0.0  ;;  %v1328_v8 = vadd.f32 %v4467_v12, %v1327_v3  ;;  %v1963_v9 = vadd.f32 %v3812_v4, %v4467_v12  ;;  %3957 = vmatprep.mubr.msk.f32.mxu1 %vm440_vm0, %v412_v61  ;;  %v420_v62 = vld [vmem:[%s4068_s5 + $0x7b0] sm:$0xff]  ;;  %v295_v3 = vld [vmem:[%s4068_s5 + $0x3c8] sm:$0xff] }
  0xfe   : > { %v3626_v11 = vpop.f32.mrf.mxu0  ;;  %3769 = vmatmul.mubr.msk.f32.gmra.mxu0 %vm440_vm0, %v287_v2  ;;  %v1957_v13 = vpop.f32.mrf.mxu1 }
  0xff   : > { %2772 = vst.msk [vmem:[%s4482_s15 + $0x78] sm:$0xff] %vm2756_vm1, %v2521_v6  ;;  %2895 = vst.msk [vmem:[%s4482_s15 + $0x450] sm:$0xff] %vm2756_vm1, %v2644_v7  ;;  %v2520_v15 = vmax.f32 %v1328_v8, 0.0  ;;  %v2647_v16 = vmax.f32 %v1963_v9, 0.0  ;;  %v1343_v17 = vadd.f32 %v3626_v11, %v4467_v12  ;;  %v1958_v18 = vadd.f32 %v4467_v12, %v1957_v13  ;;  %3771 = vmatprep.mubr.msk.f32.mxu0 %vm440_vm0, %v288_v5  ;;  %v296_v6 = vld [vmem:[%s4068_s5 + $0x3d0] sm:$0xff]  ;;  %v421_v11 = vld [vmem:[%s4068_s5 + $0x7b8] sm:$0xff] }
 0x100   : > { %v1337_v20 = vpop.f32.mrf.mxu0  ;;  %v3815_v21 = vpop.f32.mrf.mxu1  ;;  %3958 = vmatmul.mubr.msk.f32.gmra.mxu1 %vm440_vm0, %v413_v10 }
 0x101   : > { %2771 = vst.msk [vmem:[%s4482_s15 + $0x70] sm:$0xff] %vm2756_vm1, %v2520_v15  ;;  %2898 = vst.msk [vmem:[%s4482_s15 + $0x468] sm:$0xff] %vm2756_vm1, %v2647_v16  ;;  %v2523_v23 = vmax.f32 %v1343_v17, 0.0  ;;  %v2646_v24 = vmax.f32 %v1958_v18, 0.0  ;;  %v1338_v25 = vadd.f32 %v4467_v12, %v1337_v20  ;;  %v1973_v26 = vadd.f32 %v3815_v21, %v4467_v12  ;;  %3960 = vmatprep.mubr.msk.f32.mxu1 %vm440_vm0, %v414_v14  ;;  %v422_v15 = vld [vmem:[%s4068_s5 + $0x7c0] sm:$0xff]  ;;  %v297_v20 = vld [vmem:[%s4068_s5 + $0x3d8] sm:$0xff] }
 0x102   : > { %v3629_v28 = vpop.f32.mrf.mxu0  ;;  %3772 = vmatmul.mubr.msk.f32.gmra.mxu0 %vm440_vm0, %v289_v19  ;;  %v1967_v29 = vpop.f32.mrf.mxu1 }
 0x103   : > { %2774 = vst.msk [vmem:[%s4482_s15 + $0x88] sm:$0xff] %vm2756_vm1, %v2523_v23  ;;  %2897 = vst.msk [vmem:[%s4482_s15 + $0x460] sm:$0xff] %vm2756_vm1, %v2646_v24  ;;  %v2522_v31 = vmax.f32 %v1338_v25, 0.0  ;;  %v2649_v32 = vmax.f32 %v1973_v26, 0.0  ;;  %v1353_v33 = vadd.f32 %v3629_v28, %v4467_v12  ;;  %v1968_v34 = vadd.f32 %v4467_v12, %v1967_v29  ;;  %3774 = vmatprep.mubr.msk.f32.mxu0 %vm440_vm0, %v290_v22  ;;  %v298_v23 = vld [vmem:[%s4068_s5 + $0x3e0] sm:$0xff]  ;;  %v423_v28 = vld [vmem:[%s4068_s5 + $0x7c8] sm:$0xff] }
 0x104   : > { %v1347_v36 = vpop.f32.mrf.mxu0  ;;  %v3818_v37 = vpop.f32.mrf.mxu1  ;;  %3961 = vmatmul.mubr.msk.f32.gmra.mxu1 %vm440_vm0, %v415_v27 }
 0x105   : > { %2773 = vst.msk [vmem:[%s4482_s15 + $0x80] sm:$0xff] %vm2756_vm1, %v2522_v31  ;;  %2900 = vst.msk [vmem:[%s4482_s15 + $0x478] sm:$0xff] %vm2756_vm1, %v2649_v32  ;;  %v2525_v39 = vmax.f32 %v1353_v33, 0.0  ;;  %v2648_v40 = vmax.f32 %v1968_v34, 0.0  ;;  %v1348_v41 = vadd.f32 %v4467_v12, %v1347_v36  ;;  %v1983_v42 = vadd.f32 %v3818_v37, %v4467_v12  ;;  %3963 = vmatprep.mubr.msk.f32.mxu1 %vm440_vm0, %v416_v30 }
 0x106   : > { %v3632_v44 = vpop.f32.mrf.mxu0  ;;  %3775 = vmatmul.mubr.msk.f32.gmra.mxu0 %vm440_vm0, %v291_v35  ;;  %v1977_v45 = vpop.f32.mrf.mxu1  ;;  %v299_v35 = vld [vmem:[%s4068_s5 + $0x3e8] sm:$0xff] }
 0x107   : > { %2776 = vst.msk [vmem:[%s4482_s15 + $0x98] sm:$0xff] %vm2756_vm1, %v2525_v39  ;;  %2899 = vst.msk [vmem:[%s4482_s15 + $0x470] sm:$0xff] %vm2756_vm1, %v2648_v40  ;;  %v2524_v47 = vmax.f32 %v1348_v41, 0.0  ;;  %v2651_v48 = vmax.f32 %v1983_v42, 0.0  ;;  %v1363_v49 = vadd.f32 %v3632_v44, %v4467_v12  ;;  %v1978_v50 = vadd.f32 %v4467_v12, %v1977_v45  ;;  %3777 = vmatprep.mubr.msk.f32.mxu0 %vm440_vm0, %v292_v38 }
 0x108   : > { %v1357_v52 = vpop.f32.mrf.mxu0  ;;  %v3821_v53 = vpop.f32.mrf.mxu1  ;;  %3964 = vmatmul.mubr.msk.f32.gmra.mxu1 %vm440_vm0, %v417_v43 }
 0x109   : > { %2775 = vst.msk [vmem:[%s4482_s15 + $0x90] sm:$0xff] %vm2756_vm1, %v2524_v47  ;;  %2902 = vst.msk [vmem:[%s4482_s15 + $0x488] sm:$0xff] %vm2756_vm1, %v2651_v48  ;;  %v2527_v55 = vmax.f32 %v1363_v49, 0.0  ;;  %v2650_v56 = vmax.f32 %v1978_v50, 0.0  ;;  %v1358_v57 = vadd.f32 %v4467_v12, %v1357_v52  ;;  %v1993_v58 = vadd.f32 %v3821_v53, %v4467_v12  ;;  %3966 = vmatprep.mubr.msk.f32.mxu1 %vm440_vm0, %v418_v46 }
 0x10a   : > { %v3635_v60 = vpop.f32.mrf.mxu0  ;;  %3778 = vmatmul.mubr.msk.f32.gmra.mxu0 %vm440_vm0, %v293_v51  ;;  %v1987_v61 = vpop.f32.mrf.mxu1 }
 0x10b   : > { %2778 = vst.msk [vmem:[%s4482_s15 + $0xa8] sm:$0xff] %vm2756_vm1, %v2527_v55  ;;  %2901 = vst.msk [vmem:[%s4482_s15 + $0x480] sm:$0xff] %vm2756_vm1, %v2650_v56  ;;  %v2526_v63 = vmax.f32 %v1358_v57, 0.0  ;;  %v2653_v0 = vmax.f32 %v1993_v58, 0.0  ;;  %v1373_v1 = vadd.f32 %v3635_v60, %v4467_v12  ;;  %v1988_v2 = vadd.f32 %v4467_v12, %v1987_v61  ;;  %3780 = vmatprep.mubr.msk.f32.mxu0 %vm440_vm0, %v294_v54 }
 0x10c   : > { %v1367_v4 = vpop.f32.mrf.mxu0  ;;  %v3824_v5 = vpop.f32.mrf.mxu1  ;;  %3967 = vmatmul.mubr.msk.f32.gmra.mxu1 %vm440_vm0, %v419_v59 }
 0x10d   : > { %2777 = vst.msk [vmem:[%s4482_s15 + $0xa0] sm:$0xff] %vm2756_vm1, %v2526_v63  ;;  %2904 = vst.msk [vmem:[%s4482_s15 + $0x498] sm:$0xff] %vm2756_vm1, %v2653_v0  ;;  %v2529_v7 = vmax.f32 %v1373_v1, 0.0  ;;  %v2652_v8 = vmax.f32 %v1988_v2, 0.0  ;;  %v1368_v9 = vadd.f32 %v4467_v12, %v1367_v4  ;;  %v2003_v10 = vadd.f32 %v3824_v5, %v4467_v12  ;;  %3969 = vmatprep.mubr.msk.f32.mxu1 %vm440_vm0, %v420_v62 }
 0x10e   : > { %v3638_v13 = vpop.f32.mrf.mxu0  ;;  %3781 = vmatmul.mubr.msk.f32.gmra.mxu0 %vm440_vm0, %v295_v3  ;;  %v1997_v14 = vpop.f32.mrf.mxu1 }
 0x10f   : > { %2780 = vst.msk [vmem:[%s4482_s15 + $0xb8] sm:$0xff] %vm2756_vm1, %v2529_v7  ;;  %2903 = vst.msk [vmem:[%s4482_s15 + $0x490] sm:$0xff] %vm2756_vm1, %v2652_v8  ;;  %v2528_v16 = vmax.f32 %v1368_v9, 0.0  ;;  %v2655_v17 = vmax.f32 %v2003_v10, 0.0  ;;  %v1383_v18 = vadd.f32 %v3638_v13, %v4467_v12  ;;  %v1998_v19 = vadd.f32 %v4467_v12, %v1997_v14  ;;  %3783 = vmatprep.mubr.msk.f32.mxu0 %vm440_vm0, %v296_v6 }
 0x110   : > { %v1377_v21 = vpop.f32.mrf.mxu0  ;;  %v3827_v22 = vpop.f32.mrf.mxu1  ;;  %3970 = vmatmul.mubr.msk.f32.gmra.mxu1 %vm440_vm0, %v421_v11 }
 0x111   : > { %2779 = vst.msk [vmem:[%s4482_s15 + $0xb0] sm:$0xff] %vm2756_vm1, %v2528_v16  ;;  %2906 = vst.msk [vmem:[%s4482_s15 + $0x4a8] sm:$0xff] %vm2756_vm1, %v2655_v17  ;;  %v2531_v24 = vmax.f32 %v1383_v18, 0.0  ;;  %v2654_v25 = vmax.f32 %v1998_v19, 0.0  ;;  %v1378_v26 = vadd.f32 %v4467_v12, %v1377_v21  ;;  %v2013_v27 = vadd.f32 %v3827_v22, %v4467_v12  ;;  %3972 = vmatprep.mubr.msk.f32.mxu1 %vm440_vm0, %v422_v15 }
 0x112   : > { %v3641_v29 = vpop.f32.mrf.mxu0  ;;  %3784 = vmatmul.mubr.msk.f32.gmra.mxu0 %vm440_vm0, %v297_v20  ;;  %v2007_v30 = vpop.f32.mrf.mxu1 }
 0x113   : > { %2782 = vst.msk [vmem:[%s4482_s15 + $0xc8] sm:$0xff] %vm2756_vm1, %v2531_v24  ;;  %2905 = vst.msk [vmem:[%s4482_s15 + $0x4a0] sm:$0xff] %vm2756_vm1, %v2654_v25  ;;  %v2530_v31 = vmax.f32 %v1378_v26, 0.0  ;;  %v2657_v32 = vmax.f32 %v2013_v27, 0.0  ;;  %v1393_v33 = vadd.f32 %v3641_v29, %v4467_v12  ;;  %v2008_v34 = vadd.f32 %v4467_v12, %v2007_v30  ;;  %3786 = vmatprep.mubr.msk.f32.mxu0 %vm440_vm0, %v298_v23 }
 0x114   : > { %v1387_v36 = vpop.f32.mrf.mxu0  ;;  %v3830_v37 = vpop.f32.mrf.mxu1  ;;  %3973 = vmatmul.mubr.msk.f32.gmra.mxu1 %vm440_vm0, %v423_v28 }
 0x115   : > { %2781 = vst.msk [vmem:[%s4482_s15 + $0xc0] sm:$0xff] %vm2756_vm1, %v2530_v31  ;;  %2908 = vst.msk [vmem:[%s4482_s15 + $0x4b8] sm:$0xff] %vm2756_vm1, %v2657_v32  ;;  %v2533_v38 = vmax.f32 %v1393_v33, 0.0  ;;  %v2656_v39 = vmax.f32 %v2008_v34, 0.0  ;;  %v1388_v40 = vadd.f32 %v4467_v12, %v1387_v36  ;;  %v2023_v41 = vadd.f32 %v3830_v37, %v4467_v12 }
 0x116   : > { %v3644_v42 = vpop.f32.mrf.mxu0  ;;  %3787 = vmatmul.mubr.msk.f32.gmra.mxu0 %vm440_vm0, %v299_v35  ;;  %v2017_v43 = vpop.f32.mrf.mxu1 }
 0x117   : > { %2784 = vst.msk [vmem:[%s4482_s15 + $0xd8] sm:$0xff] %vm2756_vm1, %v2533_v38  ;;  %2907 = vst.msk [vmem:[%s4482_s15 + $0x4b0] sm:$0xff] %vm2756_vm1, %v2656_v39  ;;  %v2532_v44 = vmax.f32 %v1388_v40, 0.0  ;;  %v2659_v45 = vmax.f32 %v2023_v41, 0.0  ;;  %v1403_v46 = vadd.f32 %v3644_v42, %v4467_v12  ;;  %v2018_v47 = vadd.f32 %v4467_v12, %v2017_v43 }
 0x118   : > { %v1397_v48 = vpop.f32.mrf.mxu0  ;;  %v3833_v49 = vpop.f32.mrf.mxu1 }
 0x119   : > { %2783 = vst.msk [vmem:[%s4482_s15 + $0xd0] sm:$0xff] %vm2756_vm1, %v2532_v44  ;;  %2910 = vst.msk [vmem:[%s4482_s15 + $0x4c8] sm:$0xff] %vm2756_vm1, %v2659_v45  ;;  %v2535_v50 = vmax.f32 %v1403_v46, 0.0  ;;  %v2658_v51 = vmax.f32 %v2018_v47, 0.0  ;;  %v1398_v52 = vadd.f32 %v4467_v12, %v1397_v48  ;;  %v2033_v53 = vadd.f32 %v3833_v49, %v4467_v12 }
 0x11a   : > { %v3647_v54 = vpop.f32.mrf.mxu0  ;;  %v2027_v55 = vpop.f32.mrf.mxu1 }
 0x11b   : > { %2786 = vst.msk [vmem:[%s4482_s15 + $0xe8] sm:$0xff] %vm2756_vm1, %v2535_v50  ;;  %2909 = vst.msk [vmem:[%s4482_s15 + $0x4c0] sm:$0xff] %vm2756_vm1, %v2658_v51  ;;  %v2534_v56 = vmax.f32 %v1398_v52, 0.0  ;;  %v2661_v57 = vmax.f32 %v2033_v53, 0.0  ;;  %v1413_v58 = vadd.f32 %v3647_v54, %v4467_v12  ;;  %v2028_v59 = vadd.f32 %v4467_v12, %v2027_v55 }
 0x11c   : > { %v1407_v60 = vpop.f32.mrf.mxu0  ;;  %v3836_v61 = vpop.f32.mrf.mxu1 }
 0x11d   : > { %2785 = vst.msk [vmem:[%s4482_s15 + $0xe0] sm:$0xff] %vm2756_vm1, %v2534_v56  ;;  %2912 = vst.msk [vmem:[%s4482_s15 + $0x4d8] sm:$0xff] %vm2756_vm1, %v2661_v57  ;;  %v2537_v62 = vmax.f32 %v1413_v58, 0.0  ;;  %v2660_v63 = vmax.f32 %v2028_v59, 0.0  ;;  %v1408_v0 = vadd.f32 %v4467_v12, %v1407_v60  ;;  %v2043_v1 = vadd.f32 %v3836_v61, %v4467_v12 }
 0x11e   : > { %v3650_v2 = vpop.f32.mrf.mxu0  ;;  %v2037_v3 = vpop.f32.mrf.mxu1 }
 0x11f   : > { %2788 = vst.msk [vmem:[%s4482_s15 + $0xf8] sm:$0xff] %vm2756_vm1, %v2537_v62  ;;  %2911 = vst.msk [vmem:[%s4482_s15 + $0x4d0] sm:$0xff] %vm2756_vm1, %v2660_v63  ;;  %v2536_v4 = vmax.f32 %v1408_v0, 0.0  ;;  %v2663_v5 = vmax.f32 %v2043_v1, 0.0  ;;  %v1423_v6 = vadd.f32 %v3650_v2, %v4467_v12  ;;  %v2038_v7 = vadd.f32 %v4467_v12, %v2037_v3 }
 0x120   : > { %v1417_v8 = vpop.f32.mrf.mxu0  ;;  %v3839_v9 = vpop.f32.mrf.mxu1 }
 0x121   : > { %2787 = vst.msk [vmem:[%s4482_s15 + $0xf0] sm:$0xff] %vm2756_vm1, %v2536_v4  ;;  %2914 = vst.msk [vmem:[%s4482_s15 + $0x4e8] sm:$0xff] %vm2756_vm1, %v2663_v5  ;;  %v2539_v10 = vmax.f32 %v1423_v6, 0.0  ;;  %v2662_v11 = vmax.f32 %v2038_v7, 0.0  ;;  %v1418_v13 = vadd.f32 %v4467_v12, %v1417_v8  ;;  %v2053_v14 = vadd.f32 %v3839_v9, %v4467_v12 }
 0x122   : > { %v3653_v15 = vpop.f32.mrf.mxu0  ;;  %v2047_v16 = vpop.f32.mrf.mxu1 }
 0x123   : > { %2790 = vst.msk [vmem:[%s4482_s15 + $0x108] sm:$0xff] %vm2756_vm1, %v2539_v10  ;;  %2913 = vst.msk [vmem:[%s4482_s15 + $0x4e0] sm:$0xff] %vm2756_vm1, %v2662_v11  ;;  %v2538_v17 = vmax.f32 %v1418_v13, 0.0  ;;  %v2665_v18 = vmax.f32 %v2053_v14, 0.0  ;;  %v1433_v19 = vadd.f32 %v3653_v15, %v4467_v12  ;;  %v2048_v20 = vadd.f32 %v4467_v12, %v2047_v16 }
 0x124   : > { %v1427_v21 = vpop.f32.mrf.mxu0  ;;  %v3842_v22 = vpop.f32.mrf.mxu1 }
 0x125   : > { %2789 = vst.msk [vmem:[%s4482_s15 + $0x100] sm:$0xff] %vm2756_vm1, %v2538_v17  ;;  %2916 = vst.msk [vmem:[%s4482_s15 + $0x4f8] sm:$0xff] %vm2756_vm1, %v2665_v18  ;;  %v2541_v23 = vmax.f32 %v1433_v19, 0.0  ;;  %v2664_v24 = vmax.f32 %v2048_v20, 0.0  ;;  %v1428_v25 = vadd.f32 %v4467_v12, %v1427_v21  ;;  %v2063_v26 = vadd.f32 %v3842_v22, %v4467_v12 }
 0x126   : > { %v3656_v27 = vpop.f32.mrf.mxu0  ;;  %v2057_v28 = vpop.f32.mrf.mxu1 }
 0x127   : > { %2792 = vst.msk [vmem:[%s4482_s15 + $0x118] sm:$0xff] %vm2756_vm1, %v2541_v23  ;;  %2915 = vst.msk [vmem:[%s4482_s15 + $0x4f0] sm:$0xff] %vm2756_vm1, %v2664_v24  ;;  %v2540_v29 = vmax.f32 %v1428_v25, 0.0  ;;  %v2667_v30 = vmax.f32 %v2063_v26, 0.0  ;;  %v1443_v31 = vadd.f32 %v3656_v27, %v4467_v12  ;;  %v2058_v32 = vadd.f32 %v4467_v12, %v2057_v28 }
 0x128   : > { %v1437_v33 = vpop.f32.mrf.mxu0  ;;  %v3845_v34 = vpop.f32.mrf.mxu1 }
 0x129   : > { %2791 = vst.msk [vmem:[%s4482_s15 + $0x110] sm:$0xff] %vm2756_vm1, %v2540_v29  ;;  %2918 = vst.msk [vmem:[%s4482_s15 + $0x508] sm:$0xff] %vm2756_vm1, %v2667_v30  ;;  %v2543_v35 = vmax.f32 %v1443_v31, 0.0  ;;  %v2666_v36 = vmax.f32 %v2058_v32, 0.0  ;;  %v1438_v37 = vadd.f32 %v4467_v12, %v1437_v33  ;;  %v2073_v38 = vadd.f32 %v3845_v34, %v4467_v12 }
 0x12a   : > { %v3659_v39 = vpop.f32.mrf.mxu0  ;;  %v2067_v40 = vpop.f32.mrf.mxu1 }
 0x12b   : > { %2794 = vst.msk [vmem:[%s4482_s15 + $0x128] sm:$0xff] %vm2756_vm1, %v2543_v35  ;;  %2917 = vst.msk [vmem:[%s4482_s15 + $0x500] sm:$0xff] %vm2756_vm1, %v2666_v36  ;;  %v2542_v41 = vmax.f32 %v1438_v37, 0.0  ;;  %v2669_v42 = vmax.f32 %v2073_v38, 0.0  ;;  %v1453_v43 = vadd.f32 %v3659_v39, %v4467_v12  ;;  %v2068_v44 = vadd.f32 %v4467_v12, %v2067_v40 }
 0x12c   : > { %v1447_v45 = vpop.f32.mrf.mxu0  ;;  %v3848_v46 = vpop.f32.mrf.mxu1 }
 0x12d   : > { %2793 = vst.msk [vmem:[%s4482_s15 + $0x120] sm:$0xff] %vm2756_vm1, %v2542_v41  ;;  %2920 = vst.msk [vmem:[%s4482_s15 + $0x518] sm:$0xff] %vm2756_vm1, %v2669_v42  ;;  %v2545_v47 = vmax.f32 %v1453_v43, 0.0  ;;  %v2668_v48 = vmax.f32 %v2068_v44, 0.0  ;;  %v1448_v49 = vadd.f32 %v4467_v12, %v1447_v45  ;;  %v2083_v50 = vadd.f32 %v3848_v46, %v4467_v12 }
 0x12e   : > { %v3662_v51 = vpop.f32.mrf.mxu0  ;;  %v2077_v52 = vpop.f32.mrf.mxu1 }
 0x12f   : > { %2796 = vst.msk [vmem:[%s4482_s15 + $0x138] sm:$0xff] %vm2756_vm1, %v2545_v47  ;;  %2919 = vst.msk [vmem:[%s4482_s15 + $0x510] sm:$0xff] %vm2756_vm1, %v2668_v48  ;;  %v2544_v53 = vmax.f32 %v1448_v49, 0.0  ;;  %v2671_v54 = vmax.f32 %v2083_v50, 0.0  ;;  %v1463_v55 = vadd.f32 %v3662_v51, %v4467_v12  ;;  %v2078_v56 = vadd.f32 %v4467_v12, %v2077_v52 }
 0x130   : > { %v1457_v57 = vpop.f32.mrf.mxu0  ;;  %v3851_v58 = vpop.f32.mrf.mxu1 }
 0x131   : > { %2795 = vst.msk [vmem:[%s4482_s15 + $0x130] sm:$0xff] %vm2756_vm1, %v2544_v53  ;;  %2922 = vst.msk [vmem:[%s4482_s15 + $0x528] sm:$0xff] %vm2756_vm1, %v2671_v54  ;;  %v2547_v59 = vmax.f32 %v1463_v55, 0.0  ;;  %v2670_v60 = vmax.f32 %v2078_v56, 0.0  ;;  %v1458_v61 = vadd.f32 %v4467_v12, %v1457_v57  ;;  %v2093_v62 = vadd.f32 %v3851_v58, %v4467_v12  ;;  %v4885_v53 = vld [vmem:[%s5353_s2] ss:$0 sm:$0xff] }
 0x132   : > { %v3665_v63 = vpop.f32.mrf.mxu0  ;;  %v2087_v0 = vpop.f32.mrf.mxu1 }
 0x133   : > { %2798 = vst.msk [vmem:[%s4482_s15 + $0x148] sm:$0xff] %vm2756_vm1, %v2547_v59  ;;  %2921 = vst.msk [vmem:[%s4482_s15 + $0x520] sm:$0xff] %vm2756_vm1, %v2670_v60  ;;  %v2546_v1 = vmax.f32 %v1458_v61, 0.0  ;;  %v2673_v2 = vmax.f32 %v2093_v62, 0.0  ;;  %v1473_v3 = vadd.f32 %v3665_v63, %v4467_v12  ;;  %v2088_v4 = vadd.f32 %v4467_v12, %v2087_v0 }
 0x134   : > { %v1467_v5 = vpop.f32.mrf.mxu0  ;;  %v3854_v6 = vpop.f32.mrf.mxu1 }
 0x135   : > { %2797 = vst.msk [vmem:[%s4482_s15 + $0x140] sm:$0xff] %vm2756_vm1, %v2546_v1  ;;  %2924 = vst.msk [vmem:[%s4482_s15 + $0x538] sm:$0xff] %vm2756_vm1, %v2673_v2  ;;  %v2549_v7 = vmax.f32 %v1473_v3, 0.0  ;;  %v2672_v8 = vmax.f32 %v2088_v4, 0.0  ;;  %v1468_v9 = vadd.f32 %v4467_v12, %v1467_v5  ;;  %v2103_v10 = vadd.f32 %v3854_v6, %v4467_v12 }
 0x136   : > { %v3668_v11 = vpop.f32.mrf.mxu0  ;;  %v2097_v13 = vpop.f32.mrf.mxu1 }
 0x137   : > { %2800 = vst.msk [vmem:[%s4482_s15 + $0x158] sm:$0xff] %vm2756_vm1, %v2549_v7  ;;  %2923 = vst.msk [vmem:[%s4482_s15 + $0x530] sm:$0xff] %vm2756_vm1, %v2672_v8  ;;  %v2548_v14 = vmax.f32 %v1468_v9, 0.0  ;;  %v2675_v15 = vmax.f32 %v2103_v10, 0.0  ;;  %v1483_v16 = vadd.f32 %v3668_v11, %v4467_v12  ;;  %v2098_v17 = vadd.f32 %v4467_v12, %v2097_v13 }
 0x138   : > { %v1477_v18 = vpop.f32.mrf.mxu0  ;;  %v3857_v19 = vpop.f32.mrf.mxu1 }
 0x139   : > { %2799 = vst.msk [vmem:[%s4482_s15 + $0x150] sm:$0xff] %vm2756_vm1, %v2548_v14  ;;  %2926 = vst.msk [vmem:[%s4482_s15 + $0x548] sm:$0xff] %vm2756_vm1, %v2675_v15  ;;  %v2551_v20 = vmax.f32 %v1483_v16, 0.0  ;;  %v2674_v21 = vmax.f32 %v2098_v17, 0.0  ;;  %v1478_v22 = vadd.f32 %v4467_v12, %v1477_v18  ;;  %v2113_v23 = vadd.f32 %v3857_v19, %v4467_v12 }
 0x13a   : > { %v3671_v24 = vpop.f32.mrf.mxu0  ;;  %v2107_v25 = vpop.f32.mrf.mxu1 }
 0x13b   : > { %2802 = vst.msk [vmem:[%s4482_s15 + $0x168] sm:$0xff] %vm2756_vm1, %v2551_v20  ;;  %2925 = vst.msk [vmem:[%s4482_s15 + $0x540] sm:$0xff] %vm2756_vm1, %v2674_v21  ;;  %v2550_v26 = vmax.f32 %v1478_v22, 0.0  ;;  %v2677_v27 = vmax.f32 %v2113_v23, 0.0  ;;  %v1493_v28 = vadd.f32 %v3671_v24, %v4467_v12  ;;  %v2108_v29 = vadd.f32 %v4467_v12, %v2107_v25 }
 0x13c   : > { %v1487_v30 = vpop.f32.mrf.mxu0  ;;  %v3860_v31 = vpop.f32.mrf.mxu1 }
 0x13d   : > { %2801 = vst.msk [vmem:[%s4482_s15 + $0x160] sm:$0xff] %vm2756_vm1, %v2550_v26  ;;  %2928 = vst.msk [vmem:[%s4482_s15 + $0x558] sm:$0xff] %vm2756_vm1, %v2677_v27  ;;  %v2553_v32 = vmax.f32 %v1493_v28, 0.0  ;;  %v2676_v33 = vmax.f32 %v2108_v29, 0.0  ;;  %v1488_v34 = vadd.f32 %v4467_v12, %v1487_v30  ;;  %v2123_v35 = vadd.f32 %v3860_v31, %v4467_v12 }
 0x13e   : > { %v3674_v36 = vpop.f32.mrf.mxu0  ;;  %v2117_v37 = vpop.f32.mrf.mxu1 }
 0x13f   : > { %2804 = vst.msk [vmem:[%s4482_s15 + $0x178] sm:$0xff] %vm2756_vm1, %v2553_v32  ;;  %2927 = vst.msk [vmem:[%s4482_s15 + $0x550] sm:$0xff] %vm2756_vm1, %v2676_v33  ;;  %v2552_v38 = vmax.f32 %v1488_v34, 0.0  ;;  %v2679_v39 = vmax.f32 %v2123_v35, 0.0  ;;  %v1503_v40 = vadd.f32 %v3674_v36, %v4467_v12  ;;  %v2118_v41 = vadd.f32 %v4467_v12, %v2117_v37 }
 0x140   : > { %v1497_v42 = vpop.f32.mrf.mxu0  ;;  %v3863_v43 = vpop.f32.mrf.mxu1 }
 0x141   : > { %2803 = vst.msk [vmem:[%s4482_s15 + $0x170] sm:$0xff] %vm2756_vm1, %v2552_v38  ;;  %2930 = vst.msk [vmem:[%s4482_s15 + $0x568] sm:$0xff] %vm2756_vm1, %v2679_v39  ;;  %v2555_v44 = vmax.f32 %v1503_v40, 0.0  ;;  %v2678_v45 = vmax.f32 %v2118_v41, 0.0  ;;  %v1498_v46 = vadd.f32 %v4467_v12, %v1497_v42  ;;  %v2133_v47 = vadd.f32 %v3863_v43, %v4467_v12 }
 0x142   : > { %v3677_v48 = vpop.f32.mrf.mxu0  ;;  %v2127_v49 = vpop.f32.mrf.mxu1 }
 0x143   : > { %2806 = vst.msk [vmem:[%s4482_s15 + $0x188] sm:$0xff] %vm2756_vm1, %v2555_v44  ;;  %2929 = vst.msk [vmem:[%s4482_s15 + $0x560] sm:$0xff] %vm2756_vm1, %v2678_v45  ;;  %v2554_v50 = vmax.f32 %v1498_v46, 0.0  ;;  %v2681_v51 = vmax.f32 %v2133_v47, 0.0  ;;  %v1513_v52 = vadd.f32 %v3677_v48, %v4467_v12  ;;  %v2128_v54 = vadd.f32 %v4885_v53, %v2127_v49 }
 0x144   : > { %v1507_v55 = vpop.f32.mrf.mxu0  ;;  %v3866_v56 = vpop.f32.mrf.mxu1 }
 0x145   : > { %2805 = vst.msk [vmem:[%s4482_s15 + $0x180] sm:$0xff] %vm2756_vm1, %v2554_v50  ;;  %2932 = vst.msk [vmem:[%s4482_s15 + $0x578] sm:$0xff] %vm2756_vm1, %v2681_v51  ;;  %v2557_v57 = vmax.f32 %v1513_v52, 0.0  ;;  %v2680_v58 = vmax.f32 %v2128_v54, 0.0  ;;  %v1508_v59 = vadd.f32 %v4885_v53, %v1507_v55  ;;  %v2143_v12 = vadd.f32 %v4885_v53, %v3866_v56 }
 0x146   : > { %v3680_v60 = vpop.f32.mrf.mxu0  ;;  %v2137_v61 = vpop.f32.mrf.mxu1 }
 0x147   : > { %2808 = vst.msk [vmem:[%s4482_s15 + $0x198] sm:$0xff] %vm2756_vm1, %v2557_v57  ;;  %2931 = vst.msk [vmem:[%s4482_s15 + $0x570] sm:$0xff] %vm2756_vm1, %v2680_v58  ;;  %v2556_v62 = vmax.f32 %v1508_v59, 0.0  ;;  %v2683_v63 = vmax.f32 %v2143_v12, 0.0  ;;  %v1523_v0 = vadd.f32 %v4885_v53, %v3680_v60  ;;  %v2138_v1 = vadd.f32 %v4885_v53, %v2137_v61 }
 0x148   : > { %v1517_v2 = vpop.f32.mrf.mxu0  ;;  %v3869_v3 = vpop.f32.mrf.mxu1 }
 0x149   : > { %2807 = vst.msk [vmem:[%s4482_s15 + $0x190] sm:$0xff] %vm2756_vm1, %v2556_v62  ;;  %2934 = vst.msk [vmem:[%s4482_s15 + $0x588] sm:$0xff] %vm2756_vm1, %v2683_v63  ;;  %v2559_v4 = vmax.f32 %v1523_v0, 0.0  ;;  %v2682_v5 = vmax.f32 %v2138_v1, 0.0  ;;  %v1518_v6 = vadd.f32 %v4885_v53, %v1517_v2  ;;  %v2153_v7 = vadd.f32 %v4885_v53, %v3869_v3 }
 0x14a   : > { %v3683_v8 = vpop.f32.mrf.mxu0  ;;  %v2147_v9 = vpop.f32.mrf.mxu1 }
 0x14b   : > { %2810 = vst.msk [vmem:[%s4482_s15 + $0x1a8] sm:$0xff] %vm2756_vm1, %v2559_v4  ;;  %2933 = vst.msk [vmem:[%s4482_s15 + $0x580] sm:$0xff] %vm2756_vm1, %v2682_v5  ;;  %v2558_v10 = vmax.f32 %v1518_v6, 0.0  ;;  %v2685_v11 = vmax.f32 %v2153_v7, 0.0  ;;  %v1533_v13 = vadd.f32 %v4885_v53, %v3683_v8  ;;  %v2148_v14 = vadd.f32 %v4885_v53, %v2147_v9 }
 0x14c   : > { %v1527_v15 = vpop.f32.mrf.mxu0  ;;  %v3872_v16 = vpop.f32.mrf.mxu1 }
 0x14d   : > { %2809 = vst.msk [vmem:[%s4482_s15 + $0x1a0] sm:$0xff] %vm2756_vm1, %v2558_v10  ;;  %2936 = vst.msk [vmem:[%s4482_s15 + $0x598] sm:$0xff] %vm2756_vm1, %v2685_v11  ;;  %v2561_v17 = vmax.f32 %v1533_v13, 0.0  ;;  %v2684_v18 = vmax.f32 %v2148_v14, 0.0  ;;  %v1528_v19 = vadd.f32 %v4885_v53, %v1527_v15  ;;  %v2163_v20 = vadd.f32 %v4885_v53, %v3872_v16 }
 0x14e   : > { %v3686_v21 = vpop.f32.mrf.mxu0  ;;  %v2157_v22 = vpop.f32.mrf.mxu1 }
 0x14f   : > { %2812 = vst.msk [vmem:[%s4482_s15 + $0x1b8] sm:$0xff] %vm2756_vm1, %v2561_v17  ;;  %2935 = vst.msk [vmem:[%s4482_s15 + $0x590] sm:$0xff] %vm2756_vm1, %v2684_v18  ;;  %v2560_v23 = vmax.f32 %v1528_v19, 0.0  ;;  %v2687_v24 = vmax.f32 %v2163_v20, 0.0  ;;  %v1543_v25 = vadd.f32 %v4885_v53, %v3686_v21  ;;  %v2158_v26 = vadd.f32 %v4885_v53, %v2157_v22 }
 0x150   : > { %v1537_v27 = vpop.f32.mrf.mxu0  ;;  %v3875_v28 = vpop.f32.mrf.mxu1 }
 0x151   : > { %2811 = vst.msk [vmem:[%s4482_s15 + $0x1b0] sm:$0xff] %vm2756_vm1, %v2560_v23  ;;  %2938 = vst.msk [vmem:[%s4482_s15 + $0x5a8] sm:$0xff] %vm2756_vm1, %v2687_v24  ;;  %v2563_v29 = vmax.f32 %v1543_v25, 0.0  ;;  %v2686_v30 = vmax.f32 %v2158_v26, 0.0  ;;  %v1538_v31 = vadd.f32 %v4885_v53, %v1537_v27  ;;  %v2173_v32 = vadd.f32 %v4885_v53, %v3875_v28 }
 0x152   : > { %v3689_v33 = vpop.f32.mrf.mxu0  ;;  %v2167_v34 = vpop.f32.mrf.mxu1 }
 0x153   : > { %2814 = vst.msk [vmem:[%s4482_s15 + $0x1c8] sm:$0xff] %vm2756_vm1, %v2563_v29  ;;  %2937 = vst.msk [vmem:[%s4482_s15 + $0x5a0] sm:$0xff] %vm2756_vm1, %v2686_v30  ;;  %v2562_v35 = vmax.f32 %v1538_v31, 0.0  ;;  %v2689_v36 = vmax.f32 %v2173_v32, 0.0  ;;  %v1553_v37 = vadd.f32 %v4885_v53, %v3689_v33  ;;  %v2168_v38 = vadd.f32 %v4885_v53, %v2167_v34 }
 0x154   : > { %v1547_v39 = vpop.f32.mrf.mxu0  ;;  %v3878_v40 = vpop.f32.mrf.mxu1 }
 0x155   : > { %2813 = vst.msk [vmem:[%s4482_s15 + $0x1c0] sm:$0xff] %vm2756_vm1, %v2562_v35  ;;  %2940 = vst.msk [vmem:[%s4482_s15 + $0x5b8] sm:$0xff] %vm2756_vm1, %v2689_v36  ;;  %v2565_v41 = vmax.f32 %v1553_v37, 0.0  ;;  %v2688_v42 = vmax.f32 %v2168_v38, 0.0  ;;  %v1548_v43 = vadd.f32 %v4885_v53, %v1547_v39  ;;  %v2183_v44 = vadd.f32 %v4885_v53, %v3878_v40 }
 0x156   : > { %v3692_v45 = vpop.f32.mrf.mxu0  ;;  %v2177_v46 = vpop.f32.mrf.mxu1 }
 0x157   : > { %2816 = vst.msk [vmem:[%s4482_s15 + $0x1d8] sm:$0xff] %vm2756_vm1, %v2565_v41  ;;  %2939 = vst.msk [vmem:[%s4482_s15 + $0x5b0] sm:$0xff] %vm2756_vm1, %v2688_v42  ;;  %v2564_v47 = vmax.f32 %v1548_v43, 0.0  ;;  %v2691_v48 = vmax.f32 %v2183_v44, 0.0  ;;  %v1563_v49 = vadd.f32 %v4885_v53, %v3692_v45  ;;  %v2178_v50 = vadd.f32 %v4885_v53, %v2177_v46 }
 0x158   : > { %v1557_v51 = vpop.f32.mrf.mxu0  ;;  %v3881_v52 = vpop.f32.mrf.mxu1 }
 0x159   : > { %2815 = vst.msk [vmem:[%s4482_s15 + $0x1d0] sm:$0xff] %vm2756_vm1, %v2564_v47  ;;  %2942 = vst.msk [vmem:[%s4482_s15 + $0x5c8] sm:$0xff] %vm2756_vm1, %v2691_v48  ;;  %v2567_v54 = vmax.f32 %v1563_v49, 0.0  ;;  %v2690_v55 = vmax.f32 %v2178_v50, 0.0  ;;  %v1558_v56 = vadd.f32 %v4885_v53, %v1557_v51  ;;  %v2193_v57 = vadd.f32 %v4885_v53, %v3881_v52 }
 0x15a   : > { %v3695_v58 = vpop.f32.mrf.mxu0  ;;  %v2187_v59 = vpop.f32.mrf.mxu1 }
 0x15b   : > { %2818 = vst.msk [vmem:[%s4482_s15 + $0x1e8] sm:$0xff] %vm2756_vm1, %v2567_v54  ;;  %2941 = vst.msk [vmem:[%s4482_s15 + $0x5c0] sm:$0xff] %vm2756_vm1, %v2690_v55  ;;  %v2566_v12 = vmax.f32 %v1558_v56, 0.0  ;;  %v2693_v60 = vmax.f32 %v2193_v57, 0.0  ;;  %v1573_v61 = vadd.f32 %v4885_v53, %v3695_v58  ;;  %v2188_v62 = vadd.f32 %v4885_v53, %v2187_v59 }
 0x15c   : > { %v1567_v63 = vpop.f32.mrf.mxu0  ;;  %v3884_v0 = vpop.f32.mrf.mxu1 }
 0x15d   : > { %2817 = vst.msk [vmem:[%s4482_s15 + $0x1e0] sm:$0xff] %vm2756_vm1, %v2566_v12  ;;  %2944 = vst.msk [vmem:[%s4482_s15 + $0x5d8] sm:$0xff] %vm2756_vm1, %v2693_v60  ;;  %v2569_v1 = vmax.f32 %v1573_v61, 0.0  ;;  %v2692_v2 = vmax.f32 %v2188_v62, 0.0  ;;  %v1568_v3 = vadd.f32 %v4885_v53, %v1567_v63  ;;  %v2203_v4 = vadd.f32 %v4885_v53, %v3884_v0 }
 0x15e   : > { %v3698_v5 = vpop.f32.mrf.mxu0  ;;  %v2197_v6 = vpop.f32.mrf.mxu1 }
 0x15f   : > { %2820 = vst.msk [vmem:[%s4482_s15 + $0x1f8] sm:$0xff] %vm2756_vm1, %v2569_v1  ;;  %2943 = vst.msk [vmem:[%s4482_s15 + $0x5d0] sm:$0xff] %vm2756_vm1, %v2692_v2  ;;  %v2568_v7 = vmax.f32 %v1568_v3, 0.0  ;;  %v2695_v8 = vmax.f32 %v2203_v4, 0.0  ;;  %v1583_v9 = vadd.f32 %v4885_v53, %v3698_v5  ;;  %v2198_v10 = vadd.f32 %v4885_v53, %v2197_v6 }
 0x160   : > { %v1577_v11 = vpop.f32.mrf.mxu0  ;;  %v3887_v13 = vpop.f32.mrf.mxu1 }
 0x161   : > { %2819 = vst.msk [vmem:[%s4482_s15 + $0x1f0] sm:$0xff] %vm2756_vm1, %v2568_v7  ;;  %2946 = vst.msk [vmem:[%s4482_s15 + $0x5e8] sm:$0xff] %vm2756_vm1, %v2695_v8  ;;  %v2571_v14 = vmax.f32 %v1583_v9, 0.0  ;;  %v2694_v15 = vmax.f32 %v2198_v10, 0.0  ;;  %v1578_v16 = vadd.f32 %v4885_v53, %v1577_v11  ;;  %v2213_v17 = vadd.f32 %v4885_v53, %v3887_v13 }
 0x162   : > { %v3701_v18 = vpop.f32.mrf.mxu0  ;;  %v2207_v19 = vpop.f32.mrf.mxu1 }
 0x163   : > { %2822 = vst.msk [vmem:[%s4482_s15 + $0x208] sm:$0xff] %vm2756_vm1, %v2571_v14  ;;  %2945 = vst.msk [vmem:[%s4482_s15 + $0x5e0] sm:$0xff] %vm2756_vm1, %v2694_v15  ;;  %v2570_v20 = vmax.f32 %v1578_v16, 0.0  ;;  %v2697_v21 = vmax.f32 %v2213_v17, 0.0  ;;  %v1593_v22 = vadd.f32 %v4885_v53, %v3701_v18  ;;  %v2208_v23 = vadd.f32 %v4885_v53, %v2207_v19 }
 0x164   : > { %v1587_v24 = vpop.f32.mrf.mxu0  ;;  %v3890_v25 = vpop.f32.mrf.mxu1 }
 0x165   : > { %2821 = vst.msk [vmem:[%s4482_s15 + $0x200] sm:$0xff] %vm2756_vm1, %v2570_v20  ;;  %2948 = vst.msk [vmem:[%s4482_s15 + $0x5f8] sm:$0xff] %vm2756_vm1, %v2697_v21  ;;  %v2573_v26 = vmax.f32 %v1593_v22, 0.0  ;;  %v2696_v27 = vmax.f32 %v2208_v23, 0.0  ;;  %v1588_v28 = vadd.f32 %v4885_v53, %v1587_v24  ;;  %v2223_v29 = vadd.f32 %v4885_v53, %v3890_v25 }
 0x166   : > { %v3704_v30 = vpop.f32.mrf.mxu0  ;;  %v2217_v31 = vpop.f32.mrf.mxu1 }
 0x167   : > { %2824 = vst.msk [vmem:[%s4482_s15 + $0x218] sm:$0xff] %vm2756_vm1, %v2573_v26  ;;  %2947 = vst.msk [vmem:[%s4482_s15 + $0x5f0] sm:$0xff] %vm2756_vm1, %v2696_v27  ;;  %v2572_v32 = vmax.f32 %v1588_v28, 0.0  ;;  %v2699_v33 = vmax.f32 %v2223_v29, 0.0  ;;  %v1603_v34 = vadd.f32 %v4885_v53, %v3704_v30  ;;  %v2218_v35 = vadd.f32 %v4885_v53, %v2217_v31 }
 0x168   : > { %v1597_v36 = vpop.f32.mrf.mxu0  ;;  %v3893_v37 = vpop.f32.mrf.mxu1 }
 0x169   : > { %2823 = vst.msk [vmem:[%s4482_s15 + $0x210] sm:$0xff] %vm2756_vm1, %v2572_v32  ;;  %2950 = vst.msk [vmem:[%s4482_s15 + $0x608] sm:$0xff] %vm2756_vm1, %v2699_v33  ;;  %v2575_v38 = vmax.f32 %v1603_v34, 0.0  ;;  %v2698_v39 = vmax.f32 %v2218_v35, 0.0  ;;  %v1598_v40 = vadd.f32 %v4885_v53, %v1597_v36  ;;  %v2233_v41 = vadd.f32 %v4885_v53, %v3893_v37 }
 0x16a   : > { %v3707_v42 = vpop.f32.mrf.mxu0  ;;  %v2227_v43 = vpop.f32.mrf.mxu1 }
 0x16b   : > { %2826 = vst.msk [vmem:[%s4482_s15 + $0x228] sm:$0xff] %vm2756_vm1, %v2575_v38  ;;  %2949 = vst.msk [vmem:[%s4482_s15 + $0x600] sm:$0xff] %vm2756_vm1, %v2698_v39  ;;  %v2574_v44 = vmax.f32 %v1598_v40, 0.0  ;;  %v2701_v45 = vmax.f32 %v2233_v41, 0.0  ;;  %v1613_v46 = vadd.f32 %v4885_v53, %v3707_v42  ;;  %v2228_v47 = vadd.f32 %v4885_v53, %v2227_v43 }
 0x16c   : > { %v1607_v48 = vpop.f32.mrf.mxu0  ;;  %v3896_v49 = vpop.f32.mrf.mxu1 }
 0x16d   : > { %2825 = vst.msk [vmem:[%s4482_s15 + $0x220] sm:$0xff] %vm2756_vm1, %v2574_v44  ;;  %2952 = vst.msk [vmem:[%s4482_s15 + $0x618] sm:$0xff] %vm2756_vm1, %v2701_v45  ;;  %v2577_v50 = vmax.f32 %v1613_v46, 0.0  ;;  %v2700_v51 = vmax.f32 %v2228_v47, 0.0  ;;  %v1608_v52 = vadd.f32 %v4885_v53, %v1607_v48  ;;  %v2243_v54 = vadd.f32 %v4885_v53, %v3896_v49 }
 0x16e   : > { %v3710_v55 = vpop.f32.mrf.mxu0  ;;  %v2237_v56 = vpop.f32.mrf.mxu1 }
 0x16f   : > { %2828 = vst.msk [vmem:[%s4482_s15 + $0x238] sm:$0xff] %vm2756_vm1, %v2577_v50  ;;  %2951 = vst.msk [vmem:[%s4482_s15 + $0x610] sm:$0xff] %vm2756_vm1, %v2700_v51  ;;  %v2576_v57 = vmax.f32 %v1608_v52, 0.0  ;;  %v2703_v58 = vmax.f32 %v2243_v54, 0.0  ;;  %v1623_v59 = vadd.f32 %v4885_v53, %v3710_v55  ;;  %v2238_v12 = vadd.f32 %v4885_v53, %v2237_v56 }
 0x170   : > { %v1617_v60 = vpop.f32.mrf.mxu0  ;;  %v3899_v61 = vpop.f32.mrf.mxu1 }
 0x171   : > { %2827 = vst.msk [vmem:[%s4482_s15 + $0x230] sm:$0xff] %vm2756_vm1, %v2576_v57  ;;  %2954 = vst.msk [vmem:[%s4482_s15 + $0x628] sm:$0xff] %vm2756_vm1, %v2703_v58  ;;  %v2579_v62 = vmax.f32 %v1623_v59, 0.0  ;;  %v2702_v63 = vmax.f32 %v2238_v12, 0.0  ;;  %v1618_v0 = vadd.f32 %v4885_v53, %v1617_v60  ;;  %v2253_v1 = vadd.f32 %v4885_v53, %v3899_v61 }
 0x172   : > { %v3713_v2 = vpop.f32.mrf.mxu0  ;;  %v2247_v3 = vpop.f32.mrf.mxu1 }
 0x173   : > { %2830 = vst.msk [vmem:[%s4482_s15 + $0x248] sm:$0xff] %vm2756_vm1, %v2579_v62  ;;  %2953 = vst.msk [vmem:[%s4482_s15 + $0x620] sm:$0xff] %vm2756_vm1, %v2702_v63  ;;  %v2578_v4 = vmax.f32 %v1618_v0, 0.0  ;;  %v2705_v5 = vmax.f32 %v2253_v1, 0.0  ;;  %v1633_v6 = vadd.f32 %v4885_v53, %v3713_v2  ;;  %v2248_v7 = vadd.f32 %v4885_v53, %v2247_v3 }
 0x174   : > { %v1627_v8 = vpop.f32.mrf.mxu0  ;;  %v3902_v9 = vpop.f32.mrf.mxu1 }
 0x175   : > { %2829 = vst.msk [vmem:[%s4482_s15 + $0x240] sm:$0xff] %vm2756_vm1, %v2578_v4  ;;  %2956 = vst.msk [vmem:[%s4482_s15 + $0x638] sm:$0xff] %vm2756_vm1, %v2705_v5  ;;  %v2581_v10 = vmax.f32 %v1633_v6, 0.0  ;;  %v2704_v11 = vmax.f32 %v2248_v7, 0.0  ;;  %v1628_v13 = vadd.f32 %v4885_v53, %v1627_v8  ;;  %v2263_v14 = vadd.f32 %v4885_v53, %v3902_v9 }
 0x176   : > { %v3716_v15 = vpop.f32.mrf.mxu0  ;;  %v2257_v16 = vpop.f32.mrf.mxu1 }
 0x177   : > { %2832 = vst.msk [vmem:[%s4482_s15 + $0x258] sm:$0xff] %vm2756_vm1, %v2581_v10  ;;  %2955 = vst.msk [vmem:[%s4482_s15 + $0x630] sm:$0xff] %vm2756_vm1, %v2704_v11  ;;  %v2580_v17 = vmax.f32 %v1628_v13, 0.0  ;;  %v2707_v18 = vmax.f32 %v2263_v14, 0.0  ;;  %v1643_v19 = vadd.f32 %v4885_v53, %v3716_v15  ;;  %v2258_v20 = vadd.f32 %v4885_v53, %v2257_v16 }
 0x178   : > { %v1637_v21 = vpop.f32.mrf.mxu0  ;;  %v3905_v22 = vpop.f32.mrf.mxu1 }
 0x179   : > { %2831 = vst.msk [vmem:[%s4482_s15 + $0x250] sm:$0xff] %vm2756_vm1, %v2580_v17  ;;  %2958 = vst.msk [vmem:[%s4482_s15 + $0x648] sm:$0xff] %vm2756_vm1, %v2707_v18  ;;  %v2583_v23 = vmax.f32 %v1643_v19, 0.0  ;;  %v2706_v24 = vmax.f32 %v2258_v20, 0.0  ;;  %v1638_v25 = vadd.f32 %v4885_v53, %v1637_v21  ;;  %v2273_v26 = vadd.f32 %v4885_v53, %v3905_v22 }
 0x17a   : > { %v3719_v27 = vpop.f32.mrf.mxu0  ;;  %v2267_v28 = vpop.f32.mrf.mxu1 }
 0x17b   : > { %2834 = vst.msk [vmem:[%s4482_s15 + $0x268] sm:$0xff] %vm2756_vm1, %v2583_v23  ;;  %2957 = vst.msk [vmem:[%s4482_s15 + $0x640] sm:$0xff] %vm2756_vm1, %v2706_v24  ;;  %v2582_v29 = vmax.f32 %v1638_v25, 0.0  ;;  %v2709_v30 = vmax.f32 %v2273_v26, 0.0  ;;  %v1653_v31 = vadd.f32 %v4885_v53, %v3719_v27  ;;  %v2268_v32 = vadd.f32 %v4885_v53, %v2267_v28 }
 0x17c   : > { %v1647_v33 = vpop.f32.mrf.mxu0  ;;  %v3908_v34 = vpop.f32.mrf.mxu1 }
 0x17d   : > { %2833 = vst.msk [vmem:[%s4482_s15 + $0x260] sm:$0xff] %vm2756_vm1, %v2582_v29  ;;  %2960 = vst.msk [vmem:[%s4482_s15 + $0x658] sm:$0xff] %vm2756_vm1, %v2709_v30  ;;  %v2585_v35 = vmax.f32 %v1653_v31, 0.0  ;;  %v2708_v36 = vmax.f32 %v2268_v32, 0.0  ;;  %v1648_v37 = vadd.f32 %v4885_v53, %v1647_v33  ;;  %v2283_v38 = vadd.f32 %v4885_v53, %v3908_v34 }
 0x17e   : > { %v3722_v39 = vpop.f32.mrf.mxu0  ;;  %v2277_v40 = vpop.f32.mrf.mxu1 }
 0x17f   : > { %2836 = vst.msk [vmem:[%s4482_s15 + $0x278] sm:$0xff] %vm2756_vm1, %v2585_v35  ;;  %2959 = vst.msk [vmem:[%s4482_s15 + $0x650] sm:$0xff] %vm2756_vm1, %v2708_v36  ;;  %v2584_v41 = vmax.f32 %v1648_v37, 0.0  ;;  %v2711_v42 = vmax.f32 %v2283_v38, 0.0  ;;  %v1663_v43 = vadd.f32 %v4885_v53, %v3722_v39  ;;  %v2278_v44 = vadd.f32 %v4885_v53, %v2277_v40 }
 0x180   : > { %v1657_v45 = vpop.f32.mrf.mxu0  ;;  %v3911_v46 = vpop.f32.mrf.mxu1 }
 0x181   : > { %2835 = vst.msk [vmem:[%s4482_s15 + $0x270] sm:$0xff] %vm2756_vm1, %v2584_v41  ;;  %2962 = vst.msk [vmem:[%s4482_s15 + $0x668] sm:$0xff] %vm2756_vm1, %v2711_v42  ;;  %v2587_v47 = vmax.f32 %v1663_v43, 0.0  ;;  %v2710_v48 = vmax.f32 %v2278_v44, 0.0  ;;  %v1658_v49 = vadd.f32 %v4885_v53, %v1657_v45  ;;  %v2293_v50 = vadd.f32 %v4885_v53, %v3911_v46 }
 0x182   : > { %v3725_v51 = vpop.f32.mrf.mxu0  ;;  %v2287_v52 = vpop.f32.mrf.mxu1 }
 0x183   : > { %2838 = vst.msk [vmem:[%s4482_s15 + $0x288] sm:$0xff] %vm2756_vm1, %v2587_v47  ;;  %2961 = vst.msk [vmem:[%s4482_s15 + $0x660] sm:$0xff] %vm2756_vm1, %v2710_v48  ;;  %v2586_v54 = vmax.f32 %v1658_v49, 0.0  ;;  %v2713_v55 = vmax.f32 %v2293_v50, 0.0  ;;  %v1673_v56 = vadd.f32 %v4885_v53, %v3725_v51  ;;  %v2288_v57 = vadd.f32 %v4885_v53, %v2287_v52 }
 0x184   : > { %v1667_v58 = vpop.f32.mrf.mxu0  ;;  %v3914_v59 = vpop.f32.mrf.mxu1 }
 0x185   : > { %2837 = vst.msk [vmem:[%s4482_s15 + $0x280] sm:$0xff] %vm2756_vm1, %v2586_v54  ;;  %2964 = vst.msk [vmem:[%s4482_s15 + $0x678] sm:$0xff] %vm2756_vm1, %v2713_v55  ;;  %v2589_v12 = vmax.f32 %v1673_v56, 0.0  ;;  %v2712_v60 = vmax.f32 %v2288_v57, 0.0  ;;  %v1668_v61 = vadd.f32 %v4885_v53, %v1667_v58  ;;  %v2303_v62 = vadd.f32 %v4885_v53, %v3914_v59 }
 0x186   : > { %v3728_v63 = vpop.f32.mrf.mxu0  ;;  %v2297_v0 = vpop.f32.mrf.mxu1 }
 0x187   : > { %2840 = vst.msk [vmem:[%s4482_s15 + $0x298] sm:$0xff] %vm2756_vm1, %v2589_v12  ;;  %2963 = vst.msk [vmem:[%s4482_s15 + $0x670] sm:$0xff] %vm2756_vm1, %v2712_v60  ;;  %v2588_v1 = vmax.f32 %v1668_v61, 0.0  ;;  %v2715_v2 = vmax.f32 %v2303_v62, 0.0  ;;  %v1683_v3 = vadd.f32 %v4885_v53, %v3728_v63  ;;  %v2298_v4 = vadd.f32 %v4885_v53, %v2297_v0 }
 0x188   : > { %v1677_v5 = vpop.f32.mrf.mxu0  ;;  %v3917_v6 = vpop.f32.mrf.mxu1 }
 0x189   : > { %2839 = vst.msk [vmem:[%s4482_s15 + $0x290] sm:$0xff] %vm2756_vm1, %v2588_v1  ;;  %2966 = vst.msk [vmem:[%s4482_s15 + $0x688] sm:$0xff] %vm2756_vm1, %v2715_v2  ;;  %v2591_v7 = vmax.f32 %v1683_v3, 0.0  ;;  %v2714_v8 = vmax.f32 %v2298_v4, 0.0  ;;  %v1678_v9 = vadd.f32 %v4885_v53, %v1677_v5  ;;  %v2313_v10 = vadd.f32 %v4885_v53, %v3917_v6 }
 0x18a   : > { %v3731_v11 = vpop.f32.mrf.mxu0  ;;  %v2307_v13 = vpop.f32.mrf.mxu1 }
 0x18b   : > { %2842 = vst.msk [vmem:[%s4482_s15 + $0x2a8] sm:$0xff] %vm2756_vm1, %v2591_v7  ;;  %2965 = vst.msk [vmem:[%s4482_s15 + $0x680] sm:$0xff] %vm2756_vm1, %v2714_v8  ;;  %v2590_v14 = vmax.f32 %v1678_v9, 0.0  ;;  %v2717_v15 = vmax.f32 %v2313_v10, 0.0  ;;  %v1693_v16 = vadd.f32 %v4885_v53, %v3731_v11  ;;  %v2308_v17 = vadd.f32 %v4885_v53, %v2307_v13 }
 0x18c   : > { %v1687_v18 = vpop.f32.mrf.mxu0  ;;  %v3920_v19 = vpop.f32.mrf.mxu1 }
 0x18d   : > { %2841 = vst.msk [vmem:[%s4482_s15 + $0x2a0] sm:$0xff] %vm2756_vm1, %v2590_v14  ;;  %2968 = vst.msk [vmem:[%s4482_s15 + $0x698] sm:$0xff] %vm2756_vm1, %v2717_v15  ;;  %v2593_v20 = vmax.f32 %v1693_v16, 0.0  ;;  %v2716_v21 = vmax.f32 %v2308_v17, 0.0  ;;  %v1688_v22 = vadd.f32 %v4885_v53, %v1687_v18  ;;  %v2323_v23 = vadd.f32 %v4885_v53, %v3920_v19 }
 0x18e   : > { %v3734_v24 = vpop.f32.mrf.mxu0  ;;  %v2317_v25 = vpop.f32.mrf.mxu1 }
 0x18f   : > { %2844 = vst.msk [vmem:[%s4482_s15 + $0x2b8] sm:$0xff] %vm2756_vm1, %v2593_v20  ;;  %2967 = vst.msk [vmem:[%s4482_s15 + $0x690] sm:$0xff] %vm2756_vm1, %v2716_v21  ;;  %v2592_v26 = vmax.f32 %v1688_v22, 0.0  ;;  %v2719_v27 = vmax.f32 %v2323_v23, 0.0  ;;  %v1703_v28 = vadd.f32 %v4885_v53, %v3734_v24  ;;  %v2318_v29 = vadd.f32 %v4885_v53, %v2317_v25 }
 0x190   : > { %v1697_v30 = vpop.f32.mrf.mxu0  ;;  %v3923_v31 = vpop.f32.mrf.mxu1 }
 0x191   : > { %2843 = vst.msk [vmem:[%s4482_s15 + $0x2b0] sm:$0xff] %vm2756_vm1, %v2592_v26  ;;  %2970 = vst.msk [vmem:[%s4482_s15 + $0x6a8] sm:$0xff] %vm2756_vm1, %v2719_v27  ;;  %v2595_v32 = vmax.f32 %v1703_v28, 0.0  ;;  %v2718_v33 = vmax.f32 %v2318_v29, 0.0  ;;  %v1698_v34 = vadd.f32 %v4885_v53, %v1697_v30  ;;  %v2333_v35 = vadd.f32 %v4885_v53, %v3923_v31 }
 0x192   : > { %v3737_v36 = vpop.f32.mrf.mxu0  ;;  %v2327_v37 = vpop.f32.mrf.mxu1 }
 0x193   : > { %2846 = vst.msk [vmem:[%s4482_s15 + $0x2c8] sm:$0xff] %vm2756_vm1, %v2595_v32  ;;  %2969 = vst.msk [vmem:[%s4482_s15 + $0x6a0] sm:$0xff] %vm2756_vm1, %v2718_v33  ;;  %v2594_v38 = vmax.f32 %v1698_v34, 0.0  ;;  %v2721_v39 = vmax.f32 %v2333_v35, 0.0  ;;  %v1713_v40 = vadd.f32 %v4885_v53, %v3737_v36  ;;  %v2328_v41 = vadd.f32 %v4885_v53, %v2327_v37 }
 0x194   : > { %v1707_v42 = vpop.f32.mrf.mxu0  ;;  %v3926_v43 = vpop.f32.mrf.mxu1 }
 0x195   : > { %2845 = vst.msk [vmem:[%s4482_s15 + $0x2c0] sm:$0xff] %vm2756_vm1, %v2594_v38  ;;  %2972 = vst.msk [vmem:[%s4482_s15 + $0x6b8] sm:$0xff] %vm2756_vm1, %v2721_v39  ;;  %v2597_v44 = vmax.f32 %v1713_v40, 0.0  ;;  %v2720_v45 = vmax.f32 %v2328_v41, 0.0  ;;  %v1708_v46 = vadd.f32 %v4885_v53, %v1707_v42  ;;  %v2343_v47 = vadd.f32 %v4885_v53, %v3926_v43 }
 0x196   : > { %v3740_v48 = vpop.f32.mrf.mxu0  ;;  %v2337_v49 = vpop.f32.mrf.mxu1 }
 0x197   : > { %2848 = vst.msk [vmem:[%s4482_s15 + $0x2d8] sm:$0xff] %vm2756_vm1, %v2597_v44  ;;  %2971 = vst.msk [vmem:[%s4482_s15 + $0x6b0] sm:$0xff] %vm2756_vm1, %v2720_v45  ;;  %v2596_v50 = vmax.f32 %v1708_v46, 0.0  ;;  %v2723_v51 = vmax.f32 %v2343_v47, 0.0  ;;  %v1723_v52 = vadd.f32 %v4885_v53, %v3740_v48  ;;  %v2338_v54 = vadd.f32 %v4885_v53, %v2337_v49 }
 0x198   : > { %v1717_v55 = vpop.f32.mrf.mxu0  ;;  %v3929_v56 = vpop.f32.mrf.mxu1 }
 0x199   : > { %2847 = vst.msk [vmem:[%s4482_s15 + $0x2d0] sm:$0xff] %vm2756_vm1, %v2596_v50  ;;  %2974 = vst.msk [vmem:[%s4482_s15 + $0x6c8] sm:$0xff] %vm2756_vm1, %v2723_v51  ;;  %v2599_v57 = vmax.f32 %v1723_v52, 0.0  ;;  %v2722_v58 = vmax.f32 %v2338_v54, 0.0  ;;  %v1718_v59 = vadd.f32 %v4885_v53, %v1717_v55  ;;  %v2353_v12 = vadd.f32 %v4885_v53, %v3929_v56 }
 0x19a   : > { %v3743_v60 = vpop.f32.mrf.mxu0  ;;  %v2347_v61 = vpop.f32.mrf.mxu1 }
 0x19b   : > { %2850 = vst.msk [vmem:[%s4482_s15 + $0x2e8] sm:$0xff] %vm2756_vm1, %v2599_v57  ;;  %2973 = vst.msk [vmem:[%s4482_s15 + $0x6c0] sm:$0xff] %vm2756_vm1, %v2722_v58  ;;  %v2598_v62 = vmax.f32 %v1718_v59, 0.0  ;;  %v2725_v63 = vmax.f32 %v2353_v12, 0.0  ;;  %v1733_v0 = vadd.f32 %v4885_v53, %v3743_v60  ;;  %v2348_v1 = vadd.f32 %v4885_v53, %v2347_v61 }
 0x19c   : > { %v1727_v2 = vpop.f32.mrf.mxu0  ;;  %v3932_v3 = vpop.f32.mrf.mxu1 }
 0x19d   : > { %2849 = vst.msk [vmem:[%s4482_s15 + $0x2e0] sm:$0xff] %vm2756_vm1, %v2598_v62  ;;  %2976 = vst.msk [vmem:[%s4482_s15 + $0x6d8] sm:$0xff] %vm2756_vm1, %v2725_v63  ;;  %v2601_v4 = vmax.f32 %v1733_v0, 0.0  ;;  %v2724_v5 = vmax.f32 %v2348_v1, 0.0  ;;  %v1728_v6 = vadd.f32 %v4885_v53, %v1727_v2  ;;  %v2363_v7 = vadd.f32 %v4885_v53, %v3932_v3 }
 0x19e   : > { %v3746_v8 = vpop.f32.mrf.mxu0  ;;  %v2357_v9 = vpop.f32.mrf.mxu1 }
 0x19f   : > { %2852 = vst.msk [vmem:[%s4482_s15 + $0x2f8] sm:$0xff] %vm2756_vm1, %v2601_v4  ;;  %2975 = vst.msk [vmem:[%s4482_s15 + $0x6d0] sm:$0xff] %vm2756_vm1, %v2724_v5  ;;  %v2600_v10 = vmax.f32 %v1728_v6, 0.0  ;;  %v2727_v11 = vmax.f32 %v2363_v7, 0.0  ;;  %v1743_v13 = vadd.f32 %v4885_v53, %v3746_v8  ;;  %v2358_v14 = vadd.f32 %v4885_v53, %v2357_v9 }
 0x1a0   : > { %v1737_v15 = vpop.f32.mrf.mxu0  ;;  %v3935_v16 = vpop.f32.mrf.mxu1 }
 0x1a1   : > { %2851 = vst.msk [vmem:[%s4482_s15 + $0x2f0] sm:$0xff] %vm2756_vm1, %v2600_v10  ;;  %2978 = vst.msk [vmem:[%s4482_s15 + $0x6e8] sm:$0xff] %vm2756_vm1, %v2727_v11  ;;  %v2603_v17 = vmax.f32 %v1743_v13, 0.0  ;;  %v2726_v18 = vmax.f32 %v2358_v14, 0.0  ;;  %v1738_v19 = vadd.f32 %v4885_v53, %v1737_v15  ;;  %v2373_v20 = vadd.f32 %v4885_v53, %v3935_v16 }
 0x1a2   : > { %v3749_v21 = vpop.f32.mrf.mxu0  ;;  %v2367_v22 = vpop.f32.mrf.mxu1 }
 0x1a3   : > { %2854 = vst.msk [vmem:[%s4482_s15 + $0x308] sm:$0xff] %vm2756_vm1, %v2603_v17  ;;  %2977 = vst.msk [vmem:[%s4482_s15 + $0x6e0] sm:$0xff] %vm2756_vm1, %v2726_v18  ;;  %v2602_v23 = vmax.f32 %v1738_v19, 0.0  ;;  %v2729_v24 = vmax.f32 %v2373_v20, 0.0  ;;  %v1753_v25 = vadd.f32 %v4885_v53, %v3749_v21  ;;  %v2368_v26 = vadd.f32 %v4885_v53, %v2367_v22 }
 0x1a4   : > { %v1747_v27 = vpop.f32.mrf.mxu0  ;;  %v3938_v28 = vpop.f32.mrf.mxu1 }
 0x1a5   : > { %2853 = vst.msk [vmem:[%s4482_s15 + $0x300] sm:$0xff] %vm2756_vm1, %v2602_v23  ;;  %2980 = vst.msk [vmem:[%s4482_s15 + $0x6f8] sm:$0xff] %vm2756_vm1, %v2729_v24  ;;  %v2605_v29 = vmax.f32 %v1753_v25, 0.0  ;;  %v2728_v30 = vmax.f32 %v2368_v26, 0.0  ;;  %v1748_v31 = vadd.f32 %v4885_v53, %v1747_v27  ;;  %v2383_v32 = vadd.f32 %v4885_v53, %v3938_v28 }
 0x1a6   : > { %v3752_v33 = vpop.f32.mrf.mxu0  ;;  %v2377_v34 = vpop.f32.mrf.mxu1 }
 0x1a7   : > { %2856 = vst.msk [vmem:[%s4482_s15 + $0x318] sm:$0xff] %vm2756_vm1, %v2605_v29  ;;  %2979 = vst.msk [vmem:[%s4482_s15 + $0x6f0] sm:$0xff] %vm2756_vm1, %v2728_v30  ;;  %v2604_v35 = vmax.f32 %v1748_v31, 0.0  ;;  %v2731_v36 = vmax.f32 %v2383_v32, 0.0  ;;  %v1763_v37 = vadd.f32 %v4885_v53, %v3752_v33  ;;  %v2378_v38 = vadd.f32 %v4885_v53, %v2377_v34 }
 0x1a8   : > { %v1757_v39 = vpop.f32.mrf.mxu0  ;;  %v3941_v40 = vpop.f32.mrf.mxu1 }
 0x1a9   : > { %2855 = vst.msk [vmem:[%s4482_s15 + $0x310] sm:$0xff] %vm2756_vm1, %v2604_v35  ;;  %2982 = vst.msk [vmem:[%s4482_s15 + $0x708] sm:$0xff] %vm2756_vm1, %v2731_v36  ;;  %v2607_v41 = vmax.f32 %v1763_v37, 0.0  ;;  %v2730_v42 = vmax.f32 %v2378_v38, 0.0  ;;  %v1758_v43 = vadd.f32 %v4885_v53, %v1757_v39  ;;  %v2393_v44 = vadd.f32 %v4885_v53, %v3941_v40 }
 0x1aa   : > { %v3755_v45 = vpop.f32.mrf.mxu0  ;;  %v2387_v46 = vpop.f32.mrf.mxu1 }
 0x1ab   : > { %2858 = vst.msk [vmem:[%s4482_s15 + $0x328] sm:$0xff] %vm2756_vm1, %v2607_v41  ;;  %2981 = vst.msk [vmem:[%s4482_s15 + $0x700] sm:$0xff] %vm2756_vm1, %v2730_v42  ;;  %v2606_v47 = vmax.f32 %v1758_v43, 0.0  ;;  %v2733_v48 = vmax.f32 %v2393_v44, 0.0  ;;  %v1773_v49 = vadd.f32 %v4885_v53, %v3755_v45  ;;  %v2388_v50 = vadd.f32 %v4885_v53, %v2387_v46 }
 0x1ac   : > { %v1767_v51 = vpop.f32.mrf.mxu0  ;;  %v3944_v52 = vpop.f32.mrf.mxu1 }
 0x1ad   : > { %2857 = vst.msk [vmem:[%s4482_s15 + $0x320] sm:$0xff] %vm2756_vm1, %v2606_v47  ;;  %2984 = vst.msk [vmem:[%s4482_s15 + $0x718] sm:$0xff] %vm2756_vm1, %v2733_v48  ;;  %v2609_v54 = vmax.f32 %v1773_v49, 0.0  ;;  %v2732_v55 = vmax.f32 %v2388_v50, 0.0  ;;  %v1768_v56 = vadd.f32 %v4885_v53, %v1767_v51  ;;  %v2403_v57 = vadd.f32 %v4885_v53, %v3944_v52 }
 0x1ae   : > { %v3758_v58 = vpop.f32.mrf.mxu0  ;;  %v2397_v59 = vpop.f32.mrf.mxu1 }
 0x1af   : > { %2860 = vst.msk [vmem:[%s4482_s15 + $0x338] sm:$0xff] %vm2756_vm1, %v2609_v54  ;;  %2983 = vst.msk [vmem:[%s4482_s15 + $0x710] sm:$0xff] %vm2756_vm1, %v2732_v55  ;;  %v2608_v12 = vmax.f32 %v1768_v56, 0.0  ;;  %v2735_v60 = vmax.f32 %v2403_v57, 0.0  ;;  %v1783_v61 = vadd.f32 %v4885_v53, %v3758_v58  ;;  %v2398_v62 = vadd.f32 %v4885_v53, %v2397_v59 }
 0x1b0   : > { %v1777_v63 = vpop.f32.mrf.mxu0  ;;  %v3947_v0 = vpop.f32.mrf.mxu1 }
 0x1b1   : > { %2859 = vst.msk [vmem:[%s4482_s15 + $0x330] sm:$0xff] %vm2756_vm1, %v2608_v12  ;;  %2986 = vst.msk [vmem:[%s4482_s15 + $0x728] sm:$0xff] %vm2756_vm1, %v2735_v60  ;;  %v2611_v1 = vmax.f32 %v1783_v61, 0.0  ;;  %v2734_v2 = vmax.f32 %v2398_v62, 0.0  ;;  %v1778_v3 = vadd.f32 %v4885_v53, %v1777_v63  ;;  %v2413_v4 = vadd.f32 %v4885_v53, %v3947_v0  ;;  %v5274_v12 = vld [vmem:[%s5353_s2] ss:$0 sm:$0xff] }
 0x1b2   : > { %v3761_v5 = vpop.f32.mrf.mxu0  ;;  %v2407_v6 = vpop.f32.mrf.mxu1 }
 0x1b3   : > { %2862 = vst.msk [vmem:[%s4482_s15 + $0x348] sm:$0xff] %vm2756_vm1, %v2611_v1  ;;  %2985 = vst.msk [vmem:[%s4482_s15 + $0x720] sm:$0xff] %vm2756_vm1, %v2734_v2  ;;  %v2610_v7 = vmax.f32 %v1778_v3, 0.0  ;;  %v2737_v8 = vmax.f32 %v2413_v4, 0.0  ;;  %v1793_v9 = vadd.f32 %v4885_v53, %v3761_v5  ;;  %v2408_v10 = vadd.f32 %v4885_v53, %v2407_v6 }
 0x1b4   : > { %v1787_v11 = vpop.f32.mrf.mxu0  ;;  %v3950_v13 = vpop.f32.mrf.mxu1 }
 0x1b5   : > { %2861 = vst.msk [vmem:[%s4482_s15 + $0x340] sm:$0xff] %vm2756_vm1, %v2610_v7  ;;  %2988 = vst.msk [vmem:[%s4482_s15 + $0x738] sm:$0xff] %vm2756_vm1, %v2737_v8  ;;  %v2613_v14 = vmax.f32 %v1793_v9, 0.0  ;;  %v2736_v15 = vmax.f32 %v2408_v10, 0.0  ;;  %v1788_v16 = vadd.f32 %v4885_v53, %v1787_v11  ;;  %v2423_v17 = vadd.f32 %v4885_v53, %v3950_v13 }
 0x1b6   : > { %v3764_v18 = vpop.f32.mrf.mxu0  ;;  %v2417_v19 = vpop.f32.mrf.mxu1 }
 0x1b7   : > { %2864 = vst.msk [vmem:[%s4482_s15 + $0x358] sm:$0xff] %vm2756_vm1, %v2613_v14  ;;  %2987 = vst.msk [vmem:[%s4482_s15 + $0x730] sm:$0xff] %vm2756_vm1, %v2736_v15  ;;  %v2612_v20 = vmax.f32 %v1788_v16, 0.0  ;;  %v2739_v21 = vmax.f32 %v2423_v17, 0.0  ;;  %v1803_v22 = vadd.f32 %v4885_v53, %v3764_v18  ;;  %v2418_v23 = vadd.f32 %v4885_v53, %v2417_v19 }
 0x1b8   : > { %v1797_v24 = vpop.f32.mrf.mxu0  ;;  %v3953_v25 = vpop.f32.mrf.mxu1 }
 0x1b9   : > { %2863 = vst.msk [vmem:[%s4482_s15 + $0x350] sm:$0xff] %vm2756_vm1, %v2612_v20  ;;  %2990 = vst.msk [vmem:[%s4482_s15 + $0x748] sm:$0xff] %vm2756_vm1, %v2739_v21  ;;  %v2615_v26 = vmax.f32 %v1803_v22, 0.0  ;;  %v2738_v27 = vmax.f32 %v2418_v23, 0.0  ;;  %v1798_v28 = vadd.f32 %v4885_v53, %v1797_v24  ;;  %v2433_v29 = vadd.f32 %v4885_v53, %v3953_v25 }
 0x1ba   : > { %v3767_v30 = vpop.f32.mrf.mxu0  ;;  %v2427_v31 = vpop.f32.mrf.mxu1 }
 0x1bb   : > { %2866 = vst.msk [vmem:[%s4482_s15 + $0x368] sm:$0xff] %vm2756_vm1, %v2615_v26  ;;  %2989 = vst.msk [vmem:[%s4482_s15 + $0x740] sm:$0xff] %vm2756_vm1, %v2738_v27  ;;  %v2614_v32 = vmax.f32 %v1798_v28, 0.0  ;;  %v2741_v33 = vmax.f32 %v2433_v29, 0.0  ;;  %v1813_v34 = vadd.f32 %v4885_v53, %v3767_v30  ;;  %v2428_v35 = vadd.f32 %v4885_v53, %v2427_v31 }
 0x1bc   : > { %v1807_v36 = vpop.f32.mrf.mxu0  ;;  %v3956_v37 = vpop.f32.mrf.mxu1 }
 0x1bd   : > { %2865 = vst.msk [vmem:[%s4482_s15 + $0x360] sm:$0xff] %vm2756_vm1, %v2614_v32  ;;  %2992 = vst.msk [vmem:[%s4482_s15 + $0x758] sm:$0xff] %vm2756_vm1, %v2741_v33  ;;  %v2617_v38 = vmax.f32 %v1813_v34, 0.0  ;;  %v2740_v39 = vmax.f32 %v2428_v35, 0.0  ;;  %v1808_v40 = vadd.f32 %v4885_v53, %v1807_v36  ;;  %v2443_v41 = vadd.f32 %v4885_v53, %v3956_v37 }
 0x1be   : > { %v3770_v42 = vpop.f32.mrf.mxu0  ;;  %v2437_v43 = vpop.f32.mrf.mxu1 }
 0x1bf   : > { %2868 = vst.msk [vmem:[%s4482_s15 + $0x378] sm:$0xff] %vm2756_vm1, %v2617_v38  ;;  %2991 = vst.msk [vmem:[%s4482_s15 + $0x750] sm:$0xff] %vm2756_vm1, %v2740_v39  ;;  %v2616_v44 = vmax.f32 %v1808_v40, 0.0  ;;  %v2743_v45 = vmax.f32 %v2443_v41, 0.0  ;;  %v1823_v46 = vadd.f32 %v4885_v53, %v3770_v42  ;;  %v2438_v47 = vadd.f32 %v4885_v53, %v2437_v43 }
 0x1c0   : > { %v1817_v48 = vpop.f32.mrf.mxu0  ;;  %v3959_v49 = vpop.f32.mrf.mxu1 }
 0x1c1   : > { %2867 = vst.msk [vmem:[%s4482_s15 + $0x370] sm:$0xff] %vm2756_vm1, %v2616_v44  ;;  %2994 = vst.msk [vmem:[%s4482_s15 + $0x768] sm:$0xff] %vm2756_vm1, %v2743_v45  ;;  %v2619_v50 = vmax.f32 %v1823_v46, 0.0  ;;  %v2742_v51 = vmax.f32 %v2438_v47, 0.0  ;;  %v1818_v52 = vadd.f32 %v4885_v53, %v1817_v48  ;;  %v2453_v54 = vadd.f32 %v4885_v53, %v3959_v49 }
 0x1c2   : > { %v3773_v55 = vpop.f32.mrf.mxu0  ;;  %v2447_v56 = vpop.f32.mrf.mxu1 }
 0x1c3   : > { %2870 = vst.msk [vmem:[%s4482_s15 + $0x388] sm:$0xff] %vm2756_vm1, %v2619_v50  ;;  %2993 = vst.msk [vmem:[%s4482_s15 + $0x760] sm:$0xff] %vm2756_vm1, %v2742_v51  ;;  %v2618_v57 = vmax.f32 %v1818_v52, 0.0  ;;  %v2745_v58 = vmax.f32 %v2453_v54, 0.0  ;;  %v1833_v59 = vadd.f32 %v4885_v53, %v3773_v55  ;;  %v2448_v60 = vadd.f32 %v5274_v12, %v2447_v56 }
 0x1c4   : > { %v1827_v61 = vpop.f32.mrf.mxu0  ;;  %v3962_v62 = vpop.f32.mrf.mxu1 }
 0x1c5   : > { %2869 = vst.msk [vmem:[%s4482_s15 + $0x380] sm:$0xff] %vm2756_vm1, %v2618_v57  ;;  %2996 = vst.msk [vmem:[%s4482_s15 + $0x778] sm:$0xff] %vm2756_vm1, %v2745_v58  ;;  %v2621_v63 = vmax.f32 %v1833_v59, 0.0  ;;  %v2744_v0 = vmax.f32 %v2448_v60, 0.0  ;;  %v1828_v1 = vadd.f32 %v5274_v12, %v1827_v61  ;;  %v2463_v53 = vadd.f32 %v5274_v12, %v3962_v62 }
 0x1c6   : > { %v3776_v2 = vpop.f32.mrf.mxu0  ;;  %v2457_v3 = vpop.f32.mrf.mxu1 }
 0x1c7   : > { %2872 = vst.msk [vmem:[%s4482_s15 + $0x398] sm:$0xff] %vm2756_vm1, %v2621_v63  ;;  %2995 = vst.msk [vmem:[%s4482_s15 + $0x770] sm:$0xff] %vm2756_vm1, %v2744_v0  ;;  %v2620_v4 = vmax.f32 %v1828_v1, 0.0  ;;  %v2747_v5 = vmax.f32 %v2463_v53, 0.0  ;;  %v1843_v6 = vadd.f32 %v5274_v12, %v3776_v2  ;;  %v2458_v7 = vadd.f32 %v5274_v12, %v2457_v3 }
 0x1c8   : > { %v1837_v8 = vpop.f32.mrf.mxu0  ;;  %v3965_v9 = vpop.f32.mrf.mxu1 }
 0x1c9   : > { %2871 = vst.msk [vmem:[%s4482_s15 + $0x390] sm:$0xff] %vm2756_vm1, %v2620_v4  ;;  %2998 = vst.msk [vmem:[%s4482_s15 + $0x788] sm:$0xff] %vm2756_vm1, %v2747_v5  ;;  %v2623_v10 = vmax.f32 %v1843_v6, 0.0  ;;  %v2746_v11 = vmax.f32 %v2458_v7, 0.0  ;;  %v1838_v13 = vadd.f32 %v5274_v12, %v1837_v8  ;;  %v2473_v14 = vadd.f32 %v5274_v12, %v3965_v9 }
 0x1ca   : > { %v3779_v15 = vpop.f32.mrf.mxu0  ;;  %v2467_v16 = vpop.f32.mrf.mxu1 }
 0x1cb   : > { %2874 = vst.msk [vmem:[%s4482_s15 + $0x3a8] sm:$0xff] %vm2756_vm1, %v2623_v10  ;;  %2997 = vst.msk [vmem:[%s4482_s15 + $0x780] sm:$0xff] %vm2756_vm1, %v2746_v11  ;;  %v2622_v17 = vmax.f32 %v1838_v13, 0.0  ;;  %v2749_v18 = vmax.f32 %v2473_v14, 0.0  ;;  %v1853_v19 = vadd.f32 %v5274_v12, %v3779_v15  ;;  %v2468_v20 = vadd.f32 %v5274_v12, %v2467_v16 }
 0x1cc   : > { %v1847_v21 = vpop.f32.mrf.mxu0  ;;  %v3968_v22 = vpop.f32.mrf.mxu1 }
 0x1cd   : > { %2873 = vst.msk [vmem:[%s4482_s15 + $0x3a0] sm:$0xff] %vm2756_vm1, %v2622_v17  ;;  %3000 = vst.msk [vmem:[%s4482_s15 + $0x798] sm:$0xff] %vm2756_vm1, %v2749_v18  ;;  %v2625_v23 = vmax.f32 %v1853_v19, 0.0  ;;  %v2748_v24 = vmax.f32 %v2468_v20, 0.0  ;;  %v1848_v25 = vadd.f32 %v5274_v12, %v1847_v21  ;;  %v2483_v26 = vadd.f32 %v5274_v12, %v3968_v22 }
 0x1ce   : > { %v3782_v27 = vpop.f32.mrf.mxu0  ;;  %v2477_v28 = vpop.f32.mrf.mxu1 }
 0x1cf   : > { %2876 = vst.msk [vmem:[%s4482_s15 + $0x3b8] sm:$0xff] %vm2756_vm1, %v2625_v23  ;;  %2999 = vst.msk [vmem:[%s4482_s15 + $0x790] sm:$0xff] %vm2756_vm1, %v2748_v24  ;;  %v2624_v29 = vmax.f32 %v1848_v25, 0.0  ;;  %v2751_v30 = vmax.f32 %v2483_v26, 0.0  ;;  %v1863_v31 = vadd.f32 %v5274_v12, %v3782_v27  ;;  %v2478_v32 = vadd.f32 %v5274_v12, %v2477_v28 }
 0x1d0   : > { %v1857_v33 = vpop.f32.mrf.mxu0  ;;  %v3971_v34 = vpop.f32.mrf.mxu1 }
 0x1d1   : > { %2875 = vst.msk [vmem:[%s4482_s15 + $0x3b0] sm:$0xff] %vm2756_vm1, %v2624_v29  ;;  %3002 = vst.msk [vmem:[%s4482_s15 + $0x7a8] sm:$0xff] %vm2756_vm1, %v2751_v30  ;;  %v2627_v35 = vmax.f32 %v1863_v31, 0.0  ;;  %v2750_v36 = vmax.f32 %v2478_v32, 0.0  ;;  %v1858_v37 = vadd.f32 %v5274_v12, %v1857_v33  ;;  %v2493_v38 = vadd.f32 %v5274_v12, %v3971_v34 }
 0x1d2   : > { %v3785_v39 = vpop.f32.mrf.mxu0  ;;  %v2487_v40 = vpop.f32.mrf.mxu1 }
 0x1d3   : > { %2878 = vst.msk [vmem:[%s4482_s15 + $0x3c8] sm:$0xff] %vm2756_vm1, %v2627_v35  ;;  %3001 = vst.msk [vmem:[%s4482_s15 + $0x7a0] sm:$0xff] %vm2756_vm1, %v2750_v36  ;;  %v2626_v41 = vmax.f32 %v1858_v37, 0.0  ;;  %v2753_v42 = vmax.f32 %v2493_v38, 0.0  ;;  %v1873_v43 = vadd.f32 %v5274_v12, %v3785_v39  ;;  %v2488_v44 = vadd.f32 %v5274_v12, %v2487_v40 }
 0x1d4   : > { %v1867_v45 = vpop.f32.mrf.mxu0  ;;  %v3974_v46 = vpop.f32.mrf.mxu1 }
 0x1d5   : > { %2877 = vst.msk [vmem:[%s4482_s15 + $0x3c0] sm:$0xff] %vm2756_vm1, %v2626_v41  ;;  %3004 = vst.msk [vmem:[%s4482_s15 + $0x7b8] sm:$0xff] %vm2756_vm1, %v2753_v42  ;;  %v2629_v47 = vmax.f32 %v1873_v43, 0.0  ;;  %v2752_v48 = vmax.f32 %v2488_v44, 0.0  ;;  %v1868_v49 = vadd.f32 %v5274_v12, %v1867_v45  ;;  %v2503_v50 = vadd.f32 %v5274_v12, %v3974_v46 }
 0x1d6   : > { %v3788_v51 = vpop.f32.mrf.mxu0  ;;  %v2497_v52 = vpop.f32.mrf.mxu1 }
 0x1d7   : > { %2880 = vst.msk [vmem:[%s4482_s15 + $0x3d8] sm:$0xff] %vm2756_vm1, %v2629_v47  ;;  %3003 = vst.msk [vmem:[%s4482_s15 + $0x7b0] sm:$0xff] %vm2756_vm1, %v2752_v48  ;;  %v2628_v54 = vmax.f32 %v1868_v49, 0.0  ;;  %v2755_v55 = vmax.f32 %v2503_v50, 0.0  ;;  %v1883_v56 = vadd.f32 %v5274_v12, %v3788_v51  ;;  %v2498_v57 = vadd.f32 %v5274_v12, %v2497_v52 }
 0x1d8   : > { %v1877_v58 = vpop.f32.mrf.mxu0 }
 0x1d9   : > { %2879 = vst.msk [vmem:[%s4482_s15 + $0x3d0] sm:$0xff] %vm2756_vm1, %v2628_v54  ;;  %3006 = vst.msk [vmem:[%s4482_s15 + $0x7c8] sm:$0xff] %vm2756_vm1, %v2755_v55  ;;  %v2631_v59 = vmax.f32 %v1883_v56, 0.0  ;;  %v2754_v60 = vmax.f32 %v2498_v57, 0.0  ;;  %v1878_v61 = vadd.f32 %v5274_v12, %v1877_v58 }
 0x1db   : > { %2882 = vst.msk [vmem:[%s4482_s15 + $0x3e8] sm:$0xff] %vm2756_vm1, %v2631_v59  ;;  %3005 = vst.msk [vmem:[%s4482_s15 + $0x7c0] sm:$0xff] %vm2756_vm1, %v2754_v60  ;;  %v2630_v62 = vmax.f32 %v1878_v61, 0.0 }
 0x1dd   : > { %2881 = vst.msk [vmem:[%s4482_s15 + $0x3e0] sm:$0xff] %vm2756_vm1, %v2630_v62 }
 0x1de PF: > { %s13_s12 = sadd.s32 1, %s4009_s12  }
 0x1df   : > { %p10_p4 = scmp.ge.s32.totalorder %s13_s12, 12  }
 0x1e1   :  { %12 = sbr.rel (!%p10_p4) target bundleno = 1 (0x1), region = 62 }

// kernel: cnn_forward.7
= control target key start
LH: loop header
LB: loop body
LE: loop exit
PB: predicated region body
PF: predicated region fallthrough
CT: control target
= control target key end

     0   :  { %s932_s12 = smov 0   ;;  %s1348_s0 = inlined_call_operand.vmem [shape: f32[4232,400], index: 0, kind: input, shape index: {}]   ;;  %s1349_s1 = inlined_call_operand.vmem [shape: f32[400,32], index: 1, kind: input, shape index: {}]   ;;  %s1350_s2 = inlined_call_operand.vmem [shape: f32[1,32], index: 2, kind: input, shape index: {}]   ;;  %s1351_s3 = inlined_call_operand.vmem [shape: f32[4232,32], index: 3, kind: output, shape index: {}]  }
   0x1 LB: > { %s859_s13 = sadd.s32 4294967295, %s909_s12   ;;  %p863_p0 = scmp.ge.s32.totalorder %s909_s12, 1  ;;  %s909_s12 = sphi %s932_s12, %s13_s12  }
   0x2   : > { %p139_p1 = scmp.lt.s32.totalorder %s909_s12, 24 }
   0x4   : > { %p140_p2 = pnand %p863_p0, %p139_p1 }
   0x5   : > { %s164_s29 = smul.u32 (!%p140_p2), 23, %s859_s13 }
   0x6   : > { %143 = sbr.rel (%p140_p2) target bundleno = 364 (0x16c), region = 32 }
   0x7   : > { %p165_p3 = scmp.lt.s32.totalorder (!%p140_p2), %s164_s29, 528 }
   0xb   : > { %v284_v0 = vld [vmem:[%s1349_s1 + $0x78] sm:$0xff]  ;;  %v911_v1 = vmov 0.0   ;;  %v283_v2 = vld [vmem:[%s1349_s1 + $0x70] sm:$0xff]  ;;  %v282_v3 = vld [vmem:[%s1349_s1 + $0x68] sm:$0xff]  ;;  %s1353_s29 = smov (!%p165_p3, %s164_s29), 528  ;;  %vm326_vm0 = vcmask 130048  }
   0xc   : > { %396 = vmatprep.subr.mxu0 %v911_v1  ;;  %576 = vmatprep.subr.mxu1 %v911_v1  ;;  %v281_v4 = vld [vmem:[%s1349_s1 + $0x60] sm:$0xff]  ;;  %v316_v5 = vld [vmem:[%s1349_s1 + $0x178] sm:$0xff]  ;;  %v315_v6 = vld [vmem:[%s1349_s1 + $0x170] sm:$0xff]  ;;  %s893_s28 = sshll.u32 %s1353_s29, 5  ;;  %vm779_vm1 = vcmask 261120  }
   0xd   : > { %397 = vmatpush1.msra.mxu0 %v284_v0  ;;  %577 = vmatpush1.msra.mxu1 %v316_v5  ;;  %v280_v7 = vld [vmem:[%s1349_s1 + $0x58] sm:$0xff]  ;;  %v314_v8 = vld [vmem:[%s1349_s1 + $0x168] sm:$0xff]  ;;  %v279_v9 = vld [vmem:[%s1349_s1 + $0x50] sm:$0xff]  ;;  %s1082_s8 = scalar_lea.vmem %s1348_s0, %s893_s28 }
   0xe   : > { %398 = vmatprep.subr.mxu0 %v911_v1  ;;  %578 = vmatprep.subr.mxu1 %v911_v1  ;;  %v313_v10 = vld [vmem:[%s1349_s1 + $0x160] sm:$0xff]  ;;  %v278_v11 = vld [vmem:[%s1349_s1 + $0x48] sm:$0xff]  ;;  %v312_v12 = vld [vmem:[%s1349_s1 + $0x158] sm:$0xff] }
   0xf   : > { %399 = vmatpush1.msra.mxu0 %v283_v2  ;;  %579 = vmatpush1.msra.mxu1 %v315_v6  ;;  %v277_v13 = vld [vmem:[%s1349_s1 + $0x40] sm:$0xff]  ;;  %v311_v14 = vld [vmem:[%s1349_s1 + $0x150] sm:$0xff]  ;;  %v276_v15 = vld [vmem:[%s1349_s1 + $0x38] sm:$0xff] }
  0x10   : > { %400 = vmatprep.subr.mxu0 %v911_v1  ;;  %580 = vmatprep.subr.mxu1 %v911_v1  ;;  %v310_v16 = vld [vmem:[%s1349_s1 + $0x148] sm:$0xff]  ;;  %v275_v17 = vld [vmem:[%s1349_s1 + $0x30] sm:$0xff]  ;;  %v309_v18 = vld [vmem:[%s1349_s1 + $0x140] sm:$0xff] }
  0x11   : > { %401 = vmatpush1.msra.mxu0 %v282_v3  ;;  %581 = vmatpush1.msra.mxu1 %v314_v8  ;;  %v274_v19 = vld [vmem:[%s1349_s1 + $0x28] sm:$0xff]  ;;  %v308_v20 = vld [vmem:[%s1349_s1 + $0x138] sm:$0xff]  ;;  %v273_v21 = vld [vmem:[%s1349_s1 + $0x20] sm:$0xff] }
  0x12   : > { %402 = vmatprep.subr.mxu0 %v911_v1  ;;  %582 = vmatprep.subr.mxu1 %v911_v1  ;;  %v307_v22 = vld [vmem:[%s1349_s1 + $0x130] sm:$0xff]  ;;  %v272_v23 = vld [vmem:[%s1349_s1 + $0x18] sm:$0xff]  ;;  %v306_v24 = vld [vmem:[%s1349_s1 + $0x128] sm:$0xff] }
  0x13   : > { %403 = vmatpush1.msra.mxu0 %v281_v4  ;;  %583 = vmatpush1.msra.mxu1 %v313_v10  ;;  %v271_v25 = vld [vmem:[%s1349_s1 + $0x10] sm:$0xff]  ;;  %v305_v26 = vld [vmem:[%s1349_s1 + $0x120] sm:$0xff]  ;;  %v270_v27 = vld [vmem:[%s1349_s1 + $0x8] sm:$0xff] }
  0x14   : > { %404 = vmatprep.subr.mxu0 %v911_v1  ;;  %584 = vmatprep.subr.mxu1 %v911_v1  ;;  %v304_v28 = vld [vmem:[%s1349_s1 + $0x118] sm:$0xff]  ;;  %v269_v29 = vld [vmem:[%s1349_s1] sm:$0xff]  ;;  %v303_v30 = vld [vmem:[%s1349_s1 + $0x110] sm:$0xff] }
  0x15   : > { %405 = vmatpush1.msra.mxu0 %v280_v7  ;;  %585 = vmatpush1.msra.mxu1 %v312_v12  ;;  %v300_v31 = vld [vmem:[%s1349_s1 + $0xf8] sm:$0xff]  ;;  %v302_v32 = vld [vmem:[%s1349_s1 + $0x108] sm:$0xff]  ;;  %v299_v33 = vld [vmem:[%s1349_s1 + $0xf0] sm:$0xff] }
  0x16   : > { %406 = vmatprep.subr.mxu0 %v911_v1  ;;  %586 = vmatprep.subr.mxu1 %v911_v1  ;;  %v301_v34 = vld [vmem:[%s1349_s1 + $0x100] sm:$0xff]  ;;  %v298_v35 = vld [vmem:[%s1349_s1 + $0xe8] sm:$0xff]  ;;  %v296_v40 = vld [vmem:[%s1349_s1 + $0xd8] sm:$0xff] }
  0x17   : > { %407 = vmatpush1.msra.mxu0 %v279_v9  ;;  %587 = vmatpush1.msra.mxu1 %v311_v14  ;;  %v318_v36 = vld [vmem:[%s1349_s1 + $0x188] sm:$0xff]  ;;  %v297_v37 = vld [vmem:[%s1349_s1 + $0xe0] sm:$0xff]  ;;  %v180_v41 = vld [vmem:[%s1082_s8 + $0x18] sm:$0xff] }
  0x18   : > { %408 = vmatprep.subr.mxu0 %v911_v1  ;;  %588 = vmatprep.subr.mxu1 %v911_v1  ;;  %v178_v38 = vld [vmem:[%s1082_s8 + $0x8] sm:$0xff]  ;;  %v317_v39 = vld [vmem:[%s1349_s1 + $0x180] sm:$0xff]  ;;  %v179_v42 = vld [vmem:[%s1082_s8 + $0x10] sm:$0xff] }
  0x19   : > { %409 = vmatpush1.msra.mxu0 %v278_v11  ;;  %589 = vmatpush1.msra.mxu1 %v310_v16  ;;  %v295_v43 = vld [vmem:[%s1349_s1 + $0xd0] sm:$0xff]  ;;  %v184_v44 = vld [vmem:[%s1082_s8 + $0x38] sm:$0xff]  ;;  %v294_v45 = vld [vmem:[%s1349_s1 + $0xc8] sm:$0xff] }
  0x1a   : > { %410 = vmatprep.subr.mxu0 %v911_v1  ;;  %590 = vmatprep.subr.mxu1 %v911_v1  ;;  %v183_v46 = vld [vmem:[%s1082_s8 + $0x30] sm:$0xff]  ;;  %v293_v47 = vld [vmem:[%s1349_s1 + $0xc0] sm:$0xff]  ;;  %v188_v48 = vld [vmem:[%s1082_s8 + $0x58] sm:$0xff] }
  0x1b   : > { %411 = vmatpush1.msra.mxu0 %v277_v13  ;;  %591 = vmatpush1.msra.mxu1 %v309_v18  ;;  %v292_v49 = vld [vmem:[%s1349_s1 + $0xb8] sm:$0xff]  ;;  %v187_v50 = vld [vmem:[%s1082_s8 + $0x50] sm:$0xff]  ;;  %v290_v53 = vld [vmem:[%s1349_s1 + $0xa8] sm:$0xff] }
  0x1c   : > { %412 = vmatprep.subr.mxu0 %v911_v1  ;;  %592 = vmatprep.subr.mxu1 %v911_v1  ;;  %v291_v51 = vld [vmem:[%s1349_s1 + $0xb0] sm:$0xff]  ;;  %v192_v52 = vld [vmem:[%s1082_s8 + $0x78] sm:$0xff]  ;;  %v289_v55 = vld [vmem:[%s1349_s1 + $0xa0] sm:$0xff] }
  0x1d   : > { %413 = vmatpush1.msra.mxu0 %v276_v15  ;;  %593 = vmatpush1.msra.mxu1 %v308_v20  ;;  %v191_v54 = vld [vmem:[%s1082_s8 + $0x70] sm:$0xff]  ;;  %v196_v56 = vld [vmem:[%s1082_s8 + $0x98] sm:$0xff]  ;;  %v286_v61 = vld [vmem:[%s1349_s1 + $0x88] sm:$0xff] }
  0x1e   : > { %414 = vmatprep.subr.mxu0 %v911_v1  ;;  %594 = vmatprep.subr.mxu1 %v911_v1  ;;  %v288_v57 = vld [vmem:[%s1349_s1 + $0x98] sm:$0xff]  ;;  %v195_v58 = vld [vmem:[%s1082_s8 + $0x90] sm:$0xff]  ;;  %v285_v63 = vld [vmem:[%s1349_s1 + $0x80] sm:$0xff] }
  0x1f   : > { %415 = vmatpush1.msra.mxu0 %v275_v17  ;;  %595 = vmatpush1.msra.mxu1 %v307_v22  ;;  %v287_v59 = vld [vmem:[%s1349_s1 + $0x90] sm:$0xff]  ;;  %v200_v60 = vld [vmem:[%s1082_s8 + $0xb8] sm:$0xff]  ;;  %v177_v2 = vld [vmem:[%s1082_s8] sm:$0xff] }
  0x20   : > { %416 = vmatprep.subr.mxu0 %v911_v1  ;;  %596 = vmatprep.subr.mxu1 %v911_v1  ;;  %v199_v62 = vld [vmem:[%s1082_s8 + $0xb0] sm:$0xff]  ;;  %v204_v0 = vld [vmem:[%s1082_s8 + $0xd8] sm:$0xff]  ;;  %v182_v3 = vld [vmem:[%s1082_s8 + $0x28] sm:$0xff] }
  0x21   : > { %417 = vmatpush1.msra.mxu0 %v274_v19  ;;  %597 = vmatpush1.msra.mxu1 %v306_v24  ;;  %v203_v4 = vld [vmem:[%s1082_s8 + $0xd0] sm:$0xff]  ;;  %v208_v5 = vld [vmem:[%s1082_s8 + $0xf8] sm:$0xff]  ;;  %v181_v6 = vld [vmem:[%s1082_s8 + $0x20] sm:$0xff] }
  0x22   : > { %418 = vmatprep.subr.mxu0 %v911_v1  ;;  %598 = vmatprep.subr.mxu1 %v911_v1  ;;  %v186_v7 = vld [vmem:[%s1082_s8 + $0x48] sm:$0xff]  ;;  %v212_v8 = vld [vmem:[%s1082_s8 + $0x118] sm:$0xff]  ;;  %v185_v9 = vld [vmem:[%s1082_s8 + $0x40] sm:$0xff] }
  0x23   : > { %419 = vmatpush1.msra.mxu0 %v273_v21  ;;  %599 = vmatpush1.msra.mxu1 %v305_v26  ;;  %v190_v10 = vld [vmem:[%s1082_s8 + $0x68] sm:$0xff]  ;;  %v211_v11 = vld [vmem:[%s1082_s8 + $0x110] sm:$0xff]  ;;  %v216_v12 = vld [vmem:[%s1082_s8 + $0x138] sm:$0xff] }
  0x24   : > { %420 = vmatprep.subr.mxu0 %v911_v1  ;;  %600 = vmatprep.subr.mxu1 %v911_v1  ;;  %v189_v13 = vld [vmem:[%s1082_s8 + $0x60] sm:$0xff]  ;;  %v194_v14 = vld [vmem:[%s1082_s8 + $0x88] sm:$0xff]  ;;  %v215_v15 = vld [vmem:[%s1082_s8 + $0x130] sm:$0xff] }
  0x25   : > { %421 = vmatpush1.msra.mxu0 %v272_v23  ;;  %601 = vmatpush1.msra.mxu1 %v304_v28  ;;  %v220_v16 = vld [vmem:[%s1082_s8 + $0x158] sm:$0xff]  ;;  %v193_v17 = vld [vmem:[%s1082_s8 + $0x80] sm:$0xff]  ;;  %v198_v18 = vld [vmem:[%s1082_s8 + $0xa8] sm:$0xff] }
  0x26   : > { %422 = vmatprep.subr.mxu0 %v911_v1  ;;  %602 = vmatprep.subr.mxu1 %v911_v1  ;;  %v219_v19 = vld [vmem:[%s1082_s8 + $0x150] sm:$0xff]  ;;  %v224_v20 = vld [vmem:[%s1082_s8 + $0x178] sm:$0xff]  ;;  %v197_v21 = vld [vmem:[%s1082_s8 + $0xa0] sm:$0xff] }
  0x27   : > { %423 = vmatpush1.msra.mxu0 %v271_v25  ;;  %603 = vmatpush1.msra.mxu1 %v303_v30  ;;  %v202_v22 = vld [vmem:[%s1082_s8 + $0xc8] sm:$0xff]  ;;  %v223_v23 = vld [vmem:[%s1082_s8 + $0x170] sm:$0xff]  ;;  %v228_v24 = vld [vmem:[%s1082_s8 + $0x198] sm:$0xff] }
  0x28   : > { %424 = vmatprep.subr.mxu0 %v911_v1  ;;  %604 = vmatprep.subr.mxu1 %v911_v1  ;;  %v201_v25 = vld [vmem:[%s1082_s8 + $0xc0] sm:$0xff]  ;;  %v206_v26 = vld [vmem:[%s1082_s8 + $0xe8] sm:$0xff]  ;;  %v232_v28 = vld [vmem:[%s1082_s8 + $0x1b8] sm:$0xff] }
  0x29   : > { %425 = vmatpush1.msra.mxu0 %v270_v27  ;;  %605 = vmatpush1.msra.mxu1 %v302_v32  ;;  %v227_v27 = vld [vmem:[%s1082_s8 + $0x190] sm:$0xff]  ;;  %v210_v30 = vld [vmem:[%s1082_s8 + $0x108] sm:$0xff]  ;;  %v236_v32 = vld [vmem:[%s1082_s8 + $0x1d8] sm:$0xff] }
  0x2a   : > { %426 = vmatprep.subr.mxu0 %v911_v1  ;;  %606 = vmatprep.subr.mxu1 %v911_v1 }
  0x2b   : > { %427 = vmatpush1.msra.mxu0 %v269_v29  ;;  %607 = vmatpush1.msra.mxu1 %v301_v34  ;;  %v205_v29 = vld [vmem:[%s1082_s8 + $0xe0] sm:$0xff]  ;;  %v214_v34 = vld [vmem:[%s1082_s8 + $0x128] sm:$0xff] }
  0x2c   : > { %428 = vmatprep.subr.mxu0 %v911_v1  ;;  %636 = vmatprep.subr.mxu1 %v911_v1 }
  0x2d   : > { %429 = vmatpush2.msra.mxu0 %v300_v31  ;;  %637 = vmatpush2.msra.mxu1 %v318_v36  ;;  %v231_v31 = vld [vmem:[%s1082_s8 + $0x1b0] sm:$0xff]  ;;  %v240_v36 = vld [vmem:[%s1082_s8 + $0x1f8] sm:$0xff] }
  0x2e   : > { %430 = vmatprep.subr.mxu0 %v911_v1  ;;  %638 = vmatprep.subr.mxu1 %v911_v1 }
  0x2f   : > { %431 = vmatpush2.msra.mxu0 %v299_v33  ;;  %460 = vmatprep.mubr.f32.mxu0 %v178_v38  ;;  %v209_v33 = vld [vmem:[%s1082_s8 + $0x100] sm:$0xff]  ;;  %v218_v38 = vld [vmem:[%s1082_s8 + $0x148] sm:$0xff] }
  0x30   : > { %432 = vmatprep.subr.mxu0 %v911_v1  ;;  %639 = vmatpush2.msra.mxu1 %v317_v39  ;;  %v239_v39 = vld [vmem:[%s1082_s8 + $0x1f0] sm:$0xff] }
  0x31   : > { %433 = vmatpush2.msra.mxu0 %v298_v35  ;;  %868 = vmatprep.mubr.msk.f32.mxu1 %vm326_vm0, %v180_v41  ;;  %v235_v35 = vld [vmem:[%s1082_s8 + $0x1d0] sm:$0xff]  ;;  %v217_v41 = vld [vmem:[%s1082_s8 + $0x140] sm:$0xff] }
  0x32   : > { %434 = vmatprep.subr.mxu0 %v911_v1  ;;  %641 = vmatmul.mubr.f32.vlgmr.msra.gmra.mxu1 %v179_v42  ;;  %v222_v42 = vld [vmem:[%s1082_s8 + $0x168] sm:$0xff] }
  0x33   : > { %435 = vmatpush2.msra.mxu0 %v297_v37  ;;  %869 = vmatprep.mubr.msk.f32.mxu1 %vm326_vm0, %v184_v44  ;;  %v213_v37 = vld [vmem:[%s1082_s8 + $0x120] sm:$0xff]  ;;  %v248_v44 = vld [vmem:[%s1082_s8 + $0x238] sm:$0xff] }
  0x34   : > { %436 = vmatprep.subr.mxu0 %v911_v1 }
  0x35   : > { %437 = vmatpush2.msra.mxu0 %v296_v40  ;;  %v244_v40 = vld [vmem:[%s1082_s8 + $0x218] sm:$0xff] }
  0x36   : > { %438 = vmatprep.subr.mxu0 %v911_v1  ;;  %646 = vmatmul.mubr.f32.gmra.mxu1 %v183_v46  ;;  %v226_v46 = vld [vmem:[%s1082_s8 + $0x188] sm:$0xff] }
  0x37   : > { %439 = vmatpush2.msra.mxu0 %v295_v43  ;;  %870 = vmatprep.mubr.msk.f32.mxu1 %vm326_vm0, %v188_v48  ;;  %v243_v43 = vld [vmem:[%s1082_s8 + $0x210] sm:$0xff]  ;;  %v252_v48 = vld [vmem:[%s1082_s8 + $0x258] sm:$0xff] }
  0x38   : > { %440 = vmatprep.subr.mxu0 %v911_v1 }
  0x39   : > { %441 = vmatpush2.msra.mxu0 %v294_v45  ;;  %v221_v45 = vld [vmem:[%s1082_s8 + $0x160] sm:$0xff] }
  0x3a   : > { %442 = vmatprep.subr.mxu0 %v911_v1  ;;  %651 = vmatmul.mubr.f32.gmra.mxu1 %v187_v50  ;;  %v230_v50 = vld [vmem:[%s1082_s8 + $0x1a8] sm:$0xff] }
  0x3b   : > { %443 = vmatpush2.msra.mxu0 %v293_v47  ;;  %871 = vmatprep.mubr.msk.f32.mxu1 %vm326_vm0, %v192_v52  ;;  %v247_v47 = vld [vmem:[%s1082_s8 + $0x230] sm:$0xff]  ;;  %v256_v52 = vld [vmem:[%s1082_s8 + $0x278] sm:$0xff] }
  0x3c   : > { %444 = vmatprep.subr.mxu0 %v911_v1 }
  0x3d   : > { %445 = vmatpush2.msra.mxu0 %v292_v49  ;;  %v225_v49 = vld [vmem:[%s1082_s8 + $0x180] sm:$0xff] }
  0x3e   : > { %446 = vmatprep.subr.mxu0 %v911_v1  ;;  %656 = vmatmul.mubr.f32.gmra.mxu1 %v191_v54  ;;  %v234_v54 = vld [vmem:[%s1082_s8 + $0x1c8] sm:$0xff] }
  0x3f   : > { %447 = vmatpush2.msra.mxu0 %v291_v51  ;;  %872 = vmatprep.mubr.msk.f32.mxu1 %vm326_vm0, %v196_v56  ;;  %v251_v51 = vld [vmem:[%s1082_s8 + $0x250] sm:$0xff]  ;;  %v260_v56 = vld [vmem:[%s1082_s8 + $0x298] sm:$0xff] }
  0x40   : > { %448 = vmatprep.subr.mxu0 %v911_v1 }
  0x41   : > { %449 = vmatpush2.msra.mxu0 %v290_v53  ;;  %v229_v53 = vld [vmem:[%s1082_s8 + $0x1a0] sm:$0xff] }
  0x42   : > { %450 = vmatprep.subr.mxu0 %v911_v1  ;;  %661 = vmatmul.mubr.f32.gmra.mxu1 %v195_v58  ;;  %v238_v58 = vld [vmem:[%s1082_s8 + $0x1e8] sm:$0xff] }
  0x43   : > { %451 = vmatpush2.msra.mxu0 %v289_v55  ;;  %873 = vmatprep.mubr.msk.f32.mxu1 %vm326_vm0, %v200_v60  ;;  %v255_v55 = vld [vmem:[%s1082_s8 + $0x270] sm:$0xff]  ;;  %v264_v60 = vld [vmem:[%s1082_s8 + $0x2b8] sm:$0xff] }
  0x44   : > { %452 = vmatprep.subr.mxu0 %v911_v1 }
  0x45   : > { %453 = vmatpush2.msra.mxu0 %v288_v57  ;;  %v233_v57 = vld [vmem:[%s1082_s8 + $0x1c0] sm:$0xff] }
  0x46   : > { %454 = vmatprep.subr.mxu0 %v911_v1  ;;  %666 = vmatmul.mubr.f32.gmra.mxu1 %v199_v62  ;;  %v242_v62 = vld [vmem:[%s1082_s8 + $0x208] sm:$0xff] }
  0x47   : > { %455 = vmatpush2.msra.mxu0 %v287_v59  ;;  %874 = vmatprep.mubr.msk.f32.mxu1 %vm326_vm0, %v204_v0  ;;  %v259_v59 = vld [vmem:[%s1082_s8 + $0x290] sm:$0xff]  ;;  %v268_v0 = vld [vmem:[%s1082_s8 + $0x2d8] sm:$0xff] }
  0x48   : > { %456 = vmatprep.subr.mxu0 %v911_v1 }
  0x49   : > { %457 = vmatpush2.msra.mxu0 %v286_v61  ;;  %v237_v61 = vld [vmem:[%s1082_s8 + $0x1e0] sm:$0xff] }
  0x4a   : > { %458 = vmatprep.subr.mxu0 %v911_v1  ;;  %671 = vmatmul.mubr.f32.gmra.mxu1 %v203_v4  ;;  %v207_v1 = vld [vmem:[%s1082_s8 + $0xf0] sm:$0xff] }
  0x4b   : > { %459 = vmatpush2.msra.mxu0 %v285_v63  ;;  %875 = vmatprep.mubr.msk.f32.mxu1 %vm326_vm0, %v208_v5  ;;  %v263_v63 = vld [vmem:[%s1082_s8 + $0x2b0] sm:$0xff]  ;;  %v245_v5 = vld [vmem:[%s1082_s8 + $0x220] sm:$0xff] }
  0x4c   : > { %461 = vmatmul.mubr.f32.vlgmr.msra.gmra.mxu0 %v177_v2  ;;  %v241_v2 = vld [vmem:[%s1082_s8 + $0x200] sm:$0xff]  ;;  %v267_v4 = vld [vmem:[%s1082_s8 + $0x2d0] sm:$0xff] }
  0x4d   : > { %465 = vmatprep.mubr.f32.mxu0 %v182_v3  ;;  %v246_v3 = vld [vmem:[%s1082_s8 + $0x228] sm:$0xff] }
  0x4e   : > { %676 = vmatmul.mubr.f32.gmra.mxu1 %v207_v1  ;;  %v254_v1 = vld [vmem:[%s1082_s8 + $0x268] sm:$0xff] }
  0x4f   : > { %876 = vmatprep.mubr.msk.f32.mxu1 %vm326_vm0, %v212_v8  ;;  %v253_v8 = vld [vmem:[%s1082_s8 + $0x260] sm:$0xff] }
  0x50   : > { %466 = vmatmul.mubr.f32.gmra.mxu0 %v181_v6  ;;  %v250_v6 = vld [vmem:[%s1082_s8 + $0x248] sm:$0xff] }
  0x51   : > { %470 = vmatprep.mubr.f32.mxu0 %v186_v7  ;;  %v249_v7 = vld [vmem:[%s1082_s8 + $0x240] sm:$0xff] }
  0x52   : > { %681 = vmatmul.mubr.f32.gmra.mxu1 %v211_v11  ;;  %v262_v11 = vld [vmem:[%s1082_s8 + $0x2a8] sm:$0xff] }
  0x53   : > { %877 = vmatprep.mubr.msk.f32.mxu1 %vm326_vm0, %v216_v12  ;;  %v261_v12 = vld [vmem:[%s1082_s8 + $0x2a0] sm:$0xff] }
  0x54   : > { %471 = vmatmul.mubr.f32.gmra.mxu0 %v185_v9  ;;  %v258_v9 = vld [vmem:[%s1082_s8 + $0x288] sm:$0xff] }
  0x55   : > { %475 = vmatprep.mubr.f32.mxu0 %v190_v10  ;;  %v257_v10 = vld [vmem:[%s1082_s8 + $0x280] sm:$0xff] }
  0x56   : > { %686 = vmatmul.mubr.f32.gmra.mxu1 %v215_v15 }
  0x57   : > { %878 = vmatprep.mubr.msk.f32.mxu1 %vm326_vm0, %v220_v16 }
  0x58   : > { %476 = vmatmul.mubr.f32.gmra.mxu0 %v189_v13  ;;  %v266_v13 = vld [vmem:[%s1082_s8 + $0x2c8] sm:$0xff] }
  0x59   : > { %480 = vmatprep.mubr.f32.mxu0 %v194_v14  ;;  %v265_v14 = vld [vmem:[%s1082_s8 + $0x2c0] sm:$0xff]  ;;  %s866_s8 = sshll.u32 %s1353_s29, 3 }
  0x5a   : > { %691 = vmatmul.mubr.f32.gmra.mxu1 %v219_v19  ;;  %s1275_s23 = scalar_lea.vmem %s1351_s3, %s866_s8 }
  0x5b   : > { %879 = vmatprep.mubr.msk.f32.mxu1 %vm326_vm0, %v224_v20 }
  0x5c   : > { %481 = vmatmul.mubr.f32.gmra.mxu0 %v193_v17 }
  0x5d   : > { %485 = vmatprep.mubr.f32.mxu0 %v198_v18 }
  0x5e   : > { %696 = vmatmul.mubr.f32.gmra.mxu1 %v223_v23 }
  0x5f   : > { %880 = vmatprep.mubr.msk.f32.mxu1 %vm326_vm0, %v228_v24 }
  0x60   : > { %486 = vmatmul.mubr.f32.gmra.mxu0 %v197_v21 }
  0x61   : > { %490 = vmatprep.mubr.f32.mxu0 %v202_v22 }
  0x62   : > { %701 = vmatmul.mubr.f32.gmra.mxu1 %v227_v27 }
  0x63   : > { %881 = vmatprep.mubr.msk.f32.mxu1 %vm326_vm0, %v232_v28 }
  0x64   : > { %491 = vmatmul.mubr.f32.gmra.mxu0 %v201_v25  ;;  %v1268_v25 = vld [vmem:[%s1350_s2] ss:$0 sm:$0xff] }
  0x65   : > { %495 = vmatprep.mubr.f32.mxu0 %v206_v26 }
  0x66   : > { %706 = vmatmul.mubr.f32.gmra.mxu1 %v231_v31 }
  0x67   : > { %882 = vmatprep.mubr.msk.f32.mxu1 %vm326_vm0, %v236_v32 }
  0x68   : > { %496 = vmatmul.mubr.f32.gmra.mxu0 %v205_v29 }
  0x69   : > { %500 = vmatprep.mubr.f32.mxu0 %v210_v30 }
  0x6a   : > { %711 = vmatmul.mubr.f32.gmra.mxu1 %v235_v35 }
  0x6b   : > { %883 = vmatprep.mubr.msk.f32.mxu1 %vm326_vm0, %v240_v36 }
  0x6c   : > { %501 = vmatmul.mubr.f32.gmra.mxu0 %v209_v33 }
  0x6d   : > { %505 = vmatprep.mubr.f32.mxu0 %v214_v34 }
  0x6e   : > { %716 = vmatmul.mubr.f32.gmra.mxu1 %v239_v39 }
  0x6f   : > { %884 = vmatprep.mubr.msk.f32.mxu1 %vm326_vm0, %v244_v40 }
  0x70   : > { %506 = vmatmul.mubr.f32.gmra.mxu0 %v213_v37 }
  0x71   : > { %510 = vmatprep.mubr.f32.mxu0 %v218_v38 }
  0x72   : > { %721 = vmatmul.mubr.f32.gmra.mxu1 %v243_v43 }
  0x73   : > { %885 = vmatprep.mubr.msk.f32.mxu1 %vm326_vm0, %v248_v44 }
  0x74   : > { %511 = vmatmul.mubr.f32.gmra.mxu0 %v217_v41 }
  0x75   : > { %515 = vmatprep.mubr.f32.mxu0 %v222_v42 }
  0x76   : > { %726 = vmatmul.mubr.f32.gmra.mxu1 %v247_v47 }
  0x77   : > { %886 = vmatprep.mubr.msk.f32.mxu1 %vm326_vm0, %v252_v48 }
  0x78   : > { %516 = vmatmul.mubr.f32.gmra.mxu0 %v221_v45 }
  0x79   : > { %520 = vmatprep.mubr.f32.mxu0 %v226_v46 }
  0x7a   : > { %731 = vmatmul.mubr.f32.gmra.mxu1 %v251_v51 }
  0x7b   : > { %887 = vmatprep.mubr.msk.f32.mxu1 %vm326_vm0, %v256_v52 }
  0x7c   : > { %521 = vmatmul.mubr.f32.gmra.mxu0 %v225_v49 }
  0x7d   : > { %525 = vmatprep.mubr.f32.mxu0 %v230_v50 }
  0x7e   : > { %736 = vmatmul.mubr.f32.gmra.mxu1 %v255_v55 }
  0x7f   : > { %888 = vmatprep.mubr.msk.f32.mxu1 %vm326_vm0, %v260_v56 }
  0x80   : > { %526 = vmatmul.mubr.f32.gmra.mxu0 %v229_v53 }
  0x81   : > { %530 = vmatprep.mubr.f32.mxu0 %v234_v54 }
  0x82   : > { %741 = vmatmul.mubr.f32.gmra.mxu1 %v259_v59 }
  0x83   : > { %889 = vmatprep.mubr.msk.f32.mxu1 %vm326_vm0, %v264_v60 }
  0x84   : > { %531 = vmatmul.mubr.f32.gmra.mxu0 %v233_v57 }
  0x85   : > { %535 = vmatprep.mubr.f32.mxu0 %v238_v58 }
  0x86   : > { %746 = vmatmul.mubr.f32.gmra.mxu1 %v263_v63 }
  0x87   : > { %890 = vmatprep.mubr.msk.f32.mxu1 %vm326_vm0, %v268_v0 }
  0x88   : > { %536 = vmatmul.mubr.f32.gmra.mxu0 %v237_v61 }
  0x89   : > { %540 = vmatprep.mubr.f32.mxu0 %v242_v62 }
  0x8a   : > { %751 = vmatmul.mubr.f32.gmra.mxu1 %v267_v4 }
  0x8c   : > { %541 = vmatmul.mubr.f32.gmra.mxu0 %v241_v2 }
  0x8d   : > { %545 = vmatprep.mubr.f32.mxu0 %v246_v3 }
  0x90   : > { %546 = vmatmul.mubr.f32.gmra.mxu0 %v245_v5 }
  0x91   : > { %550 = vmatprep.mubr.f32.mxu0 %v250_v6 }
  0x94   : > { %551 = vmatmul.mubr.f32.gmra.mxu0 %v249_v7 }
  0x95   : > { %555 = vmatprep.mubr.f32.mxu0 %v254_v1 }
  0x98   : > { %556 = vmatmul.mubr.f32.gmra.mxu0 %v253_v8 }
  0x99   : > { %560 = vmatprep.mubr.f32.mxu0 %v258_v9 }
  0x9c   : > { %561 = vmatmul.mubr.f32.gmra.mxu0 %v257_v10 }
  0x9d   : > { %565 = vmatprep.mubr.f32.mxu0 %v262_v11 }
  0xa0   : > { %566 = vmatmul.mubr.f32.gmra.mxu0 %v261_v12 }
  0xa1   : > { %570 = vmatprep.mubr.f32.mxu0 %v266_v13 }
  0xa4   : > { %571 = vmatmul.mubr.f32.gmra.mxu0 %v265_v14 }
  0xf2   : > { %v642_v15 = vpop.f32.mrf.mxu1 }
  0xf4   : > { %v644_v16 = vpop.f32.mrf.mxu1 }
  0xf6   : > { %v647_v17 = vpop.f32.mrf.mxu1 }
  0xf8   : > { %v649_v18 = vpop.f32.mrf.mxu1 }
  0xfa   : > { %v652_v19 = vpop.f32.mrf.mxu1 }
  0xfc   : > { %v654_v20 = vpop.f32.mrf.mxu1 }
  0xfe   : > { %v657_v21 = vpop.f32.mrf.mxu1 }
 0x100   : > { %v659_v22 = vpop.f32.mrf.mxu1 }
 0x102   : > { %v662_v23 = vpop.f32.mrf.mxu1 }
 0x104   : > { %v664_v24 = vpop.f32.mrf.mxu1 }
 0x106   : > { %v667_v26 = vpop.f32.mrf.mxu1 }
 0x108   : > { %v669_v28 = vpop.f32.mrf.mxu1 }
 0x10a   : > { %v672_v31 = vpop.f32.mrf.mxu1 }
 0x10c   : > { %v462_v27 = vpop.f32.mrf.mxu0  ;;  %v674_v34 = vpop.f32.mrf.mxu1 }
 0x10d   : > { %v463_v29 = vadd.f32 %v1268_v25, %v462_v27 }
 0x10e   : > { %v464_v30 = vpop.f32.mrf.mxu0  ;;  %v677_v38 = vpop.f32.mrf.mxu1 }
 0x10f   : > { %v643_v32 = vadd.f32 %v642_v15, %v463_v29 }
 0x110   : > { %v467_v33 = vpop.f32.mrf.mxu0  ;;  %v679_v41 = vpop.f32.mrf.mxu1 }
 0x111   : > { %v756_v35 = vmax.f32 %v643_v32, 0.0  ;;  %v468_v36 = vadd.f32 %v1268_v25, %v467_v33 }
 0x112   : > { %v469_v37 = vpop.f32.mrf.mxu0  ;;  %v682_v45 = vpop.f32.mrf.mxu1 }
 0x113   : > { %780 = vst.msk [vmem:[%s1275_s23] sm:$0xff] %vm779_vm1, %v756_v35  ;;  %v648_v39 = vadd.f32 %v647_v17, %v468_v36 }
 0x114   : > { %v472_v40 = vpop.f32.mrf.mxu0  ;;  %v684_v48 = vpop.f32.mrf.mxu1 }
 0x115   : > { %v757_v42 = vmax.f32 %v648_v39, 0.0  ;;  %v473_v43 = vadd.f32 %v1268_v25, %v472_v40 }
 0x116   : > { %v474_v44 = vpop.f32.mrf.mxu0  ;;  %v687_v52 = vpop.f32.mrf.mxu1 }
 0x117   : > { %781 = vst.msk [vmem:[%s1275_s23 + $0x8] sm:$0xff] %vm779_vm1, %v757_v42  ;;  %v653_v46 = vadd.f32 %v652_v19, %v473_v43 }
 0x118   : > { %v477_v47 = vpop.f32.mrf.mxu0  ;;  %v689_v55 = vpop.f32.mrf.mxu1 }
 0x119   : > { %v758_v49 = vmax.f32 %v653_v46, 0.0  ;;  %v478_v50 = vadd.f32 %v1268_v25, %v477_v47 }
 0x11a   : > { %v479_v51 = vpop.f32.mrf.mxu0  ;;  %v692_v59 = vpop.f32.mrf.mxu1 }
 0x11b   : > { %782 = vst.msk [vmem:[%s1275_s23 + $0x10] sm:$0xff] %vm779_vm1, %v758_v49  ;;  %v658_v53 = vadd.f32 %v657_v21, %v478_v50 }
 0x11c   : > { %v482_v54 = vpop.f32.mrf.mxu0  ;;  %v694_v62 = vpop.f32.mrf.mxu1 }
 0x11d   : > { %v759_v56 = vmax.f32 %v658_v53, 0.0  ;;  %v483_v57 = vadd.f32 %v1268_v25, %v482_v54 }
 0x11e   : > { %v484_v58 = vpop.f32.mrf.mxu0  ;;  %v697_v3 = vpop.f32.mrf.mxu1 }
 0x11f   : > { %783 = vst.msk [vmem:[%s1275_s23 + $0x18] sm:$0xff] %vm779_vm1, %v759_v56  ;;  %v663_v60 = vadd.f32 %v662_v23, %v483_v57 }
 0x120   : > { %v487_v61 = vpop.f32.mrf.mxu0  ;;  %v699_v6 = vpop.f32.mrf.mxu1 }
 0x121   : > { %v760_v63 = vmax.f32 %v663_v60, 0.0  ;;  %v488_v0 = vadd.f32 %v1268_v25, %v487_v61 }
 0x122   : > { %v489_v2 = vpop.f32.mrf.mxu0  ;;  %v702_v9 = vpop.f32.mrf.mxu1 }
 0x123   : > { %784 = vst.msk [vmem:[%s1275_s23 + $0x20] sm:$0xff] %vm779_vm1, %v760_v63  ;;  %v668_v4 = vadd.f32 %v667_v26, %v488_v0 }
 0x124   : > { %v492_v5 = vpop.f32.mrf.mxu0  ;;  %v704_v12 = vpop.f32.mrf.mxu1 }
 0x125   : > { %v761_v7 = vmax.f32 %v668_v4, 0.0  ;;  %v493_v1 = vadd.f32 %v1268_v25, %v492_v5 }
 0x126   : > { %v494_v8 = vpop.f32.mrf.mxu0  ;;  %v707_v16 = vpop.f32.mrf.mxu1 }
 0x127   : > { %785 = vst.msk [vmem:[%s1275_s23 + $0x28] sm:$0xff] %vm779_vm1, %v761_v7  ;;  %v673_v10 = vadd.f32 %v672_v31, %v493_v1 }
 0x128   : > { %v497_v11 = vpop.f32.mrf.mxu0  ;;  %v709_v19 = vpop.f32.mrf.mxu1 }
 0x129   : > { %v762_v13 = vmax.f32 %v673_v10, 0.0  ;;  %v498_v14 = vadd.f32 %v1268_v25, %v497_v11 }
 0x12a   : > { %v499_v15 = vpop.f32.mrf.mxu0  ;;  %v712_v23 = vpop.f32.mrf.mxu1 }
 0x12b   : > { %786 = vst.msk [vmem:[%s1275_s23 + $0x30] sm:$0xff] %vm779_vm1, %v762_v13  ;;  %v678_v17 = vadd.f32 %v677_v38, %v498_v14 }
 0x12c   : > { %v502_v18 = vpop.f32.mrf.mxu0  ;;  %v714_v27 = vpop.f32.mrf.mxu1 }
 0x12d   : > { %v763_v20 = vmax.f32 %v678_v17, 0.0  ;;  %v503_v21 = vadd.f32 %v1268_v25, %v502_v18 }
 0x12e   : > { %v504_v22 = vpop.f32.mrf.mxu0  ;;  %v717_v31 = vpop.f32.mrf.mxu1 }
 0x12f   : > { %787 = vst.msk [vmem:[%s1275_s23 + $0x38] sm:$0xff] %vm779_vm1, %v763_v20  ;;  %v683_v24 = vadd.f32 %v682_v45, %v503_v21 }
 0x130   : > { %v507_v26 = vpop.f32.mrf.mxu0  ;;  %v719_v34 = vpop.f32.mrf.mxu1 }
 0x131   : > { %v764_v28 = vmax.f32 %v683_v24, 0.0  ;;  %v508_v29 = vadd.f32 %v1268_v25, %v507_v26 }
 0x132   : > { %v509_v30 = vpop.f32.mrf.mxu0  ;;  %v722_v38 = vpop.f32.mrf.mxu1 }
 0x133   : > { %788 = vst.msk [vmem:[%s1275_s23 + $0x40] sm:$0xff] %vm779_vm1, %v764_v28  ;;  %v688_v32 = vadd.f32 %v687_v52, %v508_v29 }
 0x134   : > { %v512_v33 = vpop.f32.mrf.mxu0  ;;  %v724_v41 = vpop.f32.mrf.mxu1 }
 0x135   : > { %v765_v35 = vmax.f32 %v688_v32, 0.0  ;;  %v513_v36 = vadd.f32 %v1268_v25, %v512_v33 }
 0x136   : > { %v514_v37 = vpop.f32.mrf.mxu0  ;;  %v727_v45 = vpop.f32.mrf.mxu1 }
 0x137   : > { %789 = vst.msk [vmem:[%s1275_s23 + $0x48] sm:$0xff] %vm779_vm1, %v765_v35  ;;  %v693_v39 = vadd.f32 %v692_v59, %v513_v36 }
 0x138   : > { %v517_v40 = vpop.f32.mrf.mxu0  ;;  %v729_v48 = vpop.f32.mrf.mxu1 }
 0x139   : > { %v766_v42 = vmax.f32 %v693_v39, 0.0  ;;  %v518_v43 = vadd.f32 %v1268_v25, %v517_v40 }
 0x13a   : > { %v519_v44 = vpop.f32.mrf.mxu0  ;;  %v732_v52 = vpop.f32.mrf.mxu1 }
 0x13b   : > { %790 = vst.msk [vmem:[%s1275_s23 + $0x50] sm:$0xff] %vm779_vm1, %v766_v42  ;;  %v698_v46 = vadd.f32 %v697_v3, %v518_v43 }
 0x13c   : > { %v522_v47 = vpop.f32.mrf.mxu0  ;;  %v734_v55 = vpop.f32.mrf.mxu1 }
 0x13d   : > { %v767_v49 = vmax.f32 %v698_v46, 0.0  ;;  %v523_v50 = vadd.f32 %v1268_v25, %v522_v47 }
 0x13e   : > { %v524_v51 = vpop.f32.mrf.mxu0  ;;  %v737_v59 = vpop.f32.mrf.mxu1 }
 0x13f   : > { %791 = vst.msk [vmem:[%s1275_s23 + $0x58] sm:$0xff] %vm779_vm1, %v767_v49  ;;  %v703_v53 = vadd.f32 %v702_v9, %v523_v50 }
 0x140   : > { %v527_v54 = vpop.f32.mrf.mxu0  ;;  %v739_v62 = vpop.f32.mrf.mxu1 }
 0x141   : > { %v768_v56 = vmax.f32 %v703_v53, 0.0  ;;  %v528_v57 = vadd.f32 %v1268_v25, %v527_v54 }
 0x142   : > { %v529_v58 = vpop.f32.mrf.mxu0  ;;  %v742_v3 = vpop.f32.mrf.mxu1 }
 0x143   : > { %792 = vst.msk [vmem:[%s1275_s23 + $0x60] sm:$0xff] %vm779_vm1, %v768_v56  ;;  %v708_v60 = vadd.f32 %v707_v16, %v528_v57 }
 0x144   : > { %v532_v61 = vpop.f32.mrf.mxu0  ;;  %v744_v6 = vpop.f32.mrf.mxu1 }
 0x145   : > { %v769_v63 = vmax.f32 %v708_v60, 0.0  ;;  %v533_v0 = vadd.f32 %v1268_v25, %v532_v61 }
 0x146   : > { %v534_v2 = vpop.f32.mrf.mxu0  ;;  %v747_v9 = vpop.f32.mrf.mxu1 }
 0x147   : > { %793 = vst.msk [vmem:[%s1275_s23 + $0x68] sm:$0xff] %vm779_vm1, %v769_v63  ;;  %v713_v4 = vadd.f32 %v712_v23, %v533_v0 }
 0x148   : > { %v537_v5 = vpop.f32.mrf.mxu0  ;;  %v749_v12 = vpop.f32.mrf.mxu1 }
 0x149   : > { %v770_v7 = vmax.f32 %v713_v4, 0.0  ;;  %v538_v1 = vadd.f32 %v1268_v25, %v537_v5 }
 0x14a   : > { %v539_v8 = vpop.f32.mrf.mxu0  ;;  %v752_v16 = vpop.f32.mrf.mxu1 }
 0x14b   : > { %794 = vst.msk [vmem:[%s1275_s23 + $0x70] sm:$0xff] %vm779_vm1, %v770_v7  ;;  %v718_v10 = vadd.f32 %v717_v31, %v538_v1 }
 0x14c   : > { %v542_v11 = vpop.f32.mrf.mxu0  ;;  %v754_v19 = vpop.f32.mrf.mxu1 }
 0x14d   : > { %v771_v13 = vmax.f32 %v718_v10, 0.0  ;;  %v543_v14 = vadd.f32 %v1268_v25, %v542_v11 }
 0x14e   : > { %v544_v15 = vpop.f32.mrf.mxu0 }
 0x14f   : > { %795 = vst.msk [vmem:[%s1275_s23 + $0x78] sm:$0xff] %vm779_vm1, %v771_v13  ;;  %v723_v17 = vadd.f32 %v722_v38, %v543_v14 }
 0x150   : > { %v547_v18 = vpop.f32.mrf.mxu0 }
 0x151   : > { %v772_v20 = vmax.f32 %v723_v17, 0.0  ;;  %v548_v21 = vadd.f32 %v1268_v25, %v547_v18 }
 0x152   : > { %v549_v22 = vpop.f32.mrf.mxu0 }
 0x153   : > { %796 = vst.msk [vmem:[%s1275_s23 + $0x80] sm:$0xff] %vm779_vm1, %v772_v20  ;;  %v728_v23 = vadd.f32 %v727_v45, %v548_v21 }
 0x154   : > { %v552_v24 = vpop.f32.mrf.mxu0 }
 0x155   : > { %v773_v26 = vmax.f32 %v728_v23, 0.0  ;;  %v553_v27 = vadd.f32 %v1268_v25, %v552_v24 }
 0x156   : > { %v554_v28 = vpop.f32.mrf.mxu0 }
 0x157   : > { %797 = vst.msk [vmem:[%s1275_s23 + $0x88] sm:$0xff] %vm779_vm1, %v773_v26  ;;  %v733_v29 = vadd.f32 %v732_v52, %v553_v27 }
 0x158   : > { %v557_v30 = vpop.f32.mrf.mxu0 }
 0x159   : > { %v774_v31 = vmax.f32 %v733_v29, 0.0  ;;  %v558_v32 = vadd.f32 %v1268_v25, %v557_v30 }
 0x15a   : > { %v559_v33 = vpop.f32.mrf.mxu0 }
 0x15b   : > { %798 = vst.msk [vmem:[%s1275_s23 + $0x90] sm:$0xff] %vm779_vm1, %v774_v31  ;;  %v738_v34 = vadd.f32 %v737_v59, %v558_v32 }
 0x15c   : > { %v562_v35 = vpop.f32.mrf.mxu0 }
 0x15d   : > { %v775_v36 = vmax.f32 %v738_v34, 0.0  ;;  %v563_v37 = vadd.f32 %v1268_v25, %v562_v35 }
 0x15e   : > { %v564_v38 = vpop.f32.mrf.mxu0 }
 0x15f   : > { %799 = vst.msk [vmem:[%s1275_s23 + $0x98] sm:$0xff] %vm779_vm1, %v775_v36  ;;  %v743_v39 = vadd.f32 %v742_v3, %v563_v37 }
 0x160   : > { %v567_v40 = vpop.f32.mrf.mxu0 }
 0x161   : > { %v776_v41 = vmax.f32 %v743_v39, 0.0  ;;  %v568_v42 = vadd.f32 %v1268_v25, %v567_v40 }
 0x162   : > { %v569_v43 = vpop.f32.mrf.mxu0 }
 0x163   : > { %800 = vst.msk [vmem:[%s1275_s23 + $0xa0] sm:$0xff] %vm779_vm1, %v776_v41  ;;  %v748_v44 = vadd.f32 %v747_v9, %v568_v42 }
 0x164   : > { %v572_v45 = vpop.f32.mrf.mxu0 }
 0x165   : > { %v777_v46 = vmax.f32 %v748_v44, 0.0  ;;  %v573_v47 = vadd.f32 %v1268_v25, %v572_v45 }
 0x166   : > { %v574_v48 = vpop.f32.mrf.mxu0 }
 0x167   : > { %801 = vst.msk [vmem:[%s1275_s23 + $0xa8] sm:$0xff] %vm779_vm1, %v777_v46  ;;  %v753_v49 = vadd.f32 %v752_v16, %v573_v47 }
 0x169   : > { %v778_v50 = vmax.f32 %v753_v49, 0.0 }
 0x16b   : > { %802 = vst.msk [vmem:[%s1275_s23 + $0xb0] sm:$0xff] %vm779_vm1, %v778_v50 }
 0x16c PF: > { %s13_s12 = sadd.s32 1, %s909_s12  }
 0x16d   : > { %p10_p4 = scmp.ge.s32.totalorder %s13_s12, 25  }
 0x16f   :  { %12 = sbr.rel (!%p10_p4) target bundleno = 1 (0x1), region = 62 }

// kernel: cnn_forward.8
= control target key start
LH: loop header
LB: loop body
LE: loop exit
PB: predicated region body
PF: predicated region fallthrough
CT: control target
= control target key end

     0   :  { %v1327_v0 = vmov 0.0   ;;  %vm1328_vm0 = vmmov 0   ;;  %vm296_vm1 = vcmask 261120   ;;  %vm1157_vm2 = vcmask 523264   ;;  %s2554_s1 = inlined_call_operand.vmem [shape: f32[800,64], index: 1, kind: input, shape index: {}]   ;;  %s2555_s0 = inlined_call_operand.vmem [shape: f32[200,800], index: 0, kind: input, shape index: {}]   ;;  %s2556_s2 = inlined_call_operand.vmem [shape: f32[1,64], index: 2, kind: input, shape index: {}]   ;;  %s2557_s3 = inlined_call_operand.vmem [shape: f32[200,64], index: 3, kind: output, shape index: {}]  }
   0x1   :  { %372 = vmatprep.subr.mxu0 %v1327_v0  ;;  %v204_v1 = vld [vmem:[%s2554_s1 + $0x78] sm:$0xff]  ;;  %562 = vmatprep.subr.mxu1 %v1327_v0  ;;  %v203_v3 = vld [vmem:[%s2554_s1 + $0x70] sm:$0xff]  ;;  %v202_v5 = vld [vmem:[%s2554_s1 + $0x68] sm:$0xff] }
   0x2   :  { %v236_v2 = vld [vmem:[%s2554_s1 + $0x178] sm:$0xff]  ;;  %373 = vmatpush1.msra.mxu0 %v204_v1  ;;  %v235_v4 = vld [vmem:[%s2554_s1 + $0x170] sm:$0xff]  ;;  %v234_v6 = vld [vmem:[%s2554_s1 + $0x168] sm:$0xff] }
   0x3   :  { %563 = vmatpush1.msra.mxu1 %v236_v2  ;;  %374 = vmatprep.subr.mxu0 %v1327_v0  ;;  %v201_v7 = vld [vmem:[%s2554_s1 + $0x60] sm:$0xff]  ;;  %v200_v9 = vld [vmem:[%s2554_s1 + $0x58] sm:$0xff]  ;;  %v199_v11 = vld [vmem:[%s2554_s1 + $0x50] sm:$0xff] }
   0x4   :  { %564 = vmatprep.subr.mxu1 %v1327_v0  ;;  %375 = vmatpush1.msra.mxu0 %v203_v3  ;;  %v233_v8 = vld [vmem:[%s2554_s1 + $0x160] sm:$0xff]  ;;  %v232_v10 = vld [vmem:[%s2554_s1 + $0x158] sm:$0xff]  ;;  %v231_v12 = vld [vmem:[%s2554_s1 + $0x150] sm:$0xff] }
   0x5   :  { %565 = vmatpush1.msra.mxu1 %v235_v4  ;;  %376 = vmatprep.subr.mxu0 %v1327_v0  ;;  %v198_v13 = vld [vmem:[%s2554_s1 + $0x48] sm:$0xff]  ;;  %v197_v15 = vld [vmem:[%s2554_s1 + $0x40] sm:$0xff]  ;;  %v196_v17 = vld [vmem:[%s2554_s1 + $0x38] sm:$0xff] }
   0x6   :  { %566 = vmatprep.subr.mxu1 %v1327_v0  ;;  %377 = vmatpush1.msra.mxu0 %v202_v5  ;;  %v230_v14 = vld [vmem:[%s2554_s1 + $0x148] sm:$0xff]  ;;  %v229_v16 = vld [vmem:[%s2554_s1 + $0x140] sm:$0xff]  ;;  %v228_v18 = vld [vmem:[%s2554_s1 + $0x138] sm:$0xff] }
   0x7   :  { %567 = vmatpush1.msra.mxu1 %v234_v6  ;;  %378 = vmatprep.subr.mxu0 %v1327_v0  ;;  %v195_v19 = vld [vmem:[%s2554_s1 + $0x30] sm:$0xff]  ;;  %v194_v21 = vld [vmem:[%s2554_s1 + $0x28] sm:$0xff]  ;;  %v193_v23 = vld [vmem:[%s2554_s1 + $0x20] sm:$0xff] }
   0x8   :  { %568 = vmatprep.subr.mxu1 %v1327_v0  ;;  %379 = vmatpush1.msra.mxu0 %v201_v7  ;;  %v227_v20 = vld [vmem:[%s2554_s1 + $0x130] sm:$0xff]  ;;  %v226_v22 = vld [vmem:[%s2554_s1 + $0x128] sm:$0xff]  ;;  %v225_v24 = vld [vmem:[%s2554_s1 + $0x120] sm:$0xff] }
   0x9   :  { %569 = vmatpush1.msra.mxu1 %v233_v8  ;;  %380 = vmatprep.subr.mxu0 %v1327_v0  ;;  %v192_v25 = vld [vmem:[%s2554_s1 + $0x18] sm:$0xff]  ;;  %v191_v27 = vld [vmem:[%s2554_s1 + $0x10] sm:$0xff]  ;;  %v190_v29 = vld [vmem:[%s2554_s1 + $0x8] sm:$0xff] }
   0xa   :  { %570 = vmatprep.subr.mxu1 %v1327_v0  ;;  %381 = vmatpush1.msra.mxu0 %v200_v9  ;;  %v224_v26 = vld [vmem:[%s2554_s1 + $0x118] sm:$0xff]  ;;  %v223_v28 = vld [vmem:[%s2554_s1 + $0x110] sm:$0xff]  ;;  %v222_v30 = vld [vmem:[%s2554_s1 + $0x108] sm:$0xff] }
   0xb   :  { %571 = vmatpush1.msra.mxu1 %v232_v10  ;;  %382 = vmatprep.subr.mxu0 %v1327_v0  ;;  %v189_v31 = vld [vmem:[%s2554_s1] sm:$0xff]  ;;  %v220_v33 = vld [vmem:[%s2554_s1 + $0xf8] sm:$0xff]  ;;  %v219_v35 = vld [vmem:[%s2554_s1 + $0xf0] sm:$0xff] }
   0xc   :  { %572 = vmatprep.subr.mxu1 %v1327_v0  ;;  %383 = vmatpush1.msra.mxu0 %v199_v11  ;;  %v221_v32 = vld [vmem:[%s2554_s1 + $0x100] sm:$0xff]  ;;  %v252_v34 = vld [vmem:[%s2554_s1 + $0x1f8] sm:$0xff]  ;;  %v251_v36 = vld [vmem:[%s2554_s1 + $0x1f0] sm:$0xff] }
   0xd   :  { %573 = vmatpush1.msra.mxu1 %v231_v12  ;;  %384 = vmatprep.subr.mxu0 %v1327_v0  ;;  %v218_v37 = vld [vmem:[%s2554_s1 + $0xe8] sm:$0xff]  ;;  %v217_v39 = vld [vmem:[%s2554_s1 + $0xe0] sm:$0xff]  ;;  %v216_v41 = vld [vmem:[%s2554_s1 + $0xd8] sm:$0xff] }
   0xe   :  { %574 = vmatprep.subr.mxu1 %v1327_v0  ;;  %385 = vmatpush1.msra.mxu0 %v198_v13  ;;  %v250_v38 = vld [vmem:[%s2554_s1 + $0x1e8] sm:$0xff]  ;;  %v249_v40 = vld [vmem:[%s2554_s1 + $0x1e0] sm:$0xff]  ;;  %v248_v42 = vld [vmem:[%s2554_s1 + $0x1d8] sm:$0xff] }
   0xf   :  { %575 = vmatpush1.msra.mxu1 %v230_v14  ;;  %386 = vmatprep.subr.mxu0 %v1327_v0  ;;  %v215_v43 = vld [vmem:[%s2554_s1 + $0xd0] sm:$0xff]  ;;  %v214_v45 = vld [vmem:[%s2554_s1 + $0xc8] sm:$0xff]  ;;  %v213_v47 = vld [vmem:[%s2554_s1 + $0xc0] sm:$0xff] }
  0x10   :  { %576 = vmatprep.subr.mxu1 %v1327_v0  ;;  %387 = vmatpush1.msra.mxu0 %v197_v15  ;;  %v247_v44 = vld [vmem:[%s2554_s1 + $0x1d0] sm:$0xff]  ;;  %v246_v46 = vld [vmem:[%s2554_s1 + $0x1c8] sm:$0xff]  ;;  %v245_v48 = vld [vmem:[%s2554_s1 + $0x1c0] sm:$0xff] }
  0x11   :  { %577 = vmatpush1.msra.mxu1 %v229_v16  ;;  %388 = vmatprep.subr.mxu0 %v1327_v0  ;;  %v212_v49 = vld [vmem:[%s2554_s1 + $0xb8] sm:$0xff]  ;;  %v211_v51 = vld [vmem:[%s2554_s1 + $0xb0] sm:$0xff]  ;;  %v210_v53 = vld [vmem:[%s2554_s1 + $0xa8] sm:$0xff] }
  0x12   :  { %578 = vmatprep.subr.mxu1 %v1327_v0  ;;  %389 = vmatpush1.msra.mxu0 %v196_v17  ;;  %v244_v50 = vld [vmem:[%s2554_s1 + $0x1b8] sm:$0xff]  ;;  %v243_v52 = vld [vmem:[%s2554_s1 + $0x1b0] sm:$0xff]  ;;  %v242_v54 = vld [vmem:[%s2554_s1 + $0x1a8] sm:$0xff] }
  0x13   :  { %579 = vmatpush1.msra.mxu1 %v228_v18  ;;  %390 = vmatprep.subr.mxu0 %v1327_v0  ;;  %v209_v55 = vld [vmem:[%s2554_s1 + $0xa0] sm:$0xff]  ;;  %v208_v57 = vld [vmem:[%s2554_s1 + $0x98] sm:$0xff]  ;;  %v207_v59 = vld [vmem:[%s2554_s1 + $0x90] sm:$0xff] }
  0x14   :  { %580 = vmatprep.subr.mxu1 %v1327_v0  ;;  %391 = vmatpush1.msra.mxu0 %v195_v19  ;;  %v241_v56 = vld [vmem:[%s2554_s1 + $0x1a0] sm:$0xff]  ;;  %v240_v58 = vld [vmem:[%s2554_s1 + $0x198] sm:$0xff]  ;;  %v239_v60 = vld [vmem:[%s2554_s1 + $0x190] sm:$0xff] }
  0x15   :  { %581 = vmatpush1.msra.mxu1 %v227_v20  ;;  %392 = vmatprep.subr.mxu0 %v1327_v0  ;;  %v206_v61 = vld [vmem:[%s2554_s1 + $0x88] sm:$0xff]  ;;  %v205_v1 = vld [vmem:[%s2554_s1 + $0x80] sm:$0xff]  ;;  %v17_v4 = vld [vmem:[%s2555_s0 + $0x18] sm:$0xff] }
  0x16   :  { %582 = vmatprep.subr.mxu1 %v1327_v0  ;;  %393 = vmatpush1.msra.mxu0 %v194_v21  ;;  %v238_v62 = vld [vmem:[%s2554_s1 + $0x188] sm:$0xff]  ;;  %v14_v2 = vld [vmem:[%s2555_s0] sm:$0xff]  ;;  %v16_v5 = vld [vmem:[%s2555_s0 + $0x10] sm:$0xff] }
  0x17   :  { %583 = vmatpush1.msra.mxu1 %v226_v22  ;;  %394 = vmatprep.subr.mxu0 %v1327_v0  ;;  %v15_v63 = vld [vmem:[%s2555_s0 + $0x8] sm:$0xff]  ;;  %v237_v3 = vld [vmem:[%s2554_s1 + $0x180] sm:$0xff]  ;;  %v268_v6 = vld [vmem:[%s2554_s1 + $0x278] sm:$0xff] }
  0x18   :  { %584 = vmatprep.subr.mxu1 %v1327_v0  ;;  %395 = vmatpush1.msra.mxu0 %v193_v23  ;;  %v22_v7 = vld [vmem:[%s2555_s0 + $0x40] sm:$0xff]  ;;  %v288_v8 = vld [vmem:[%s2554_s1 + $0x318] sm:$0xff]  ;;  %v24_v10 = vld [vmem:[%s2555_s0 + $0x50] sm:$0xff] }
  0x19   :  { %585 = vmatpush1.msra.mxu1 %v225_v24  ;;  %396 = vmatprep.subr.mxu0 %v1327_v0  ;;  %v21_v9 = vld [vmem:[%s2555_s0 + $0x38] sm:$0xff]  ;;  %v23_v11 = vld [vmem:[%s2555_s0 + $0x48] sm:$0xff]  ;;  %v267_v12 = vld [vmem:[%s2554_s1 + $0x270] sm:$0xff] }
  0x1a   :  { %586 = vmatprep.subr.mxu1 %v1327_v0  ;;  %397 = vmatpush1.msra.mxu0 %v192_v25  ;;  %v29_v13 = vld [vmem:[%s2555_s0 + $0x78] sm:$0xff]  ;;  %v28_v14 = vld [vmem:[%s2555_s0 + $0x70] sm:$0xff]  ;;  %v31_v15 = vld [vmem:[%s2555_s0 + $0x88] sm:$0xff] }
  0x1b   :  { %587 = vmatpush1.msra.mxu1 %v224_v26  ;;  %398 = vmatprep.subr.mxu0 %v1327_v0  ;;  %v266_v16 = vld [vmem:[%s2554_s1 + $0x268] sm:$0xff]  ;;  %v36_v17 = vld [vmem:[%s2555_s0 + $0xb0] sm:$0xff]  ;;  %v30_v18 = vld [vmem:[%s2555_s0 + $0x80] sm:$0xff] }
  0x1c   :  { %588 = vmatprep.subr.mxu1 %v1327_v0  ;;  %399 = vmatpush1.msra.mxu0 %v191_v27  ;;  %v265_v19 = vld [vmem:[%s2554_s1 + $0x260] sm:$0xff]  ;;  %v35_v21 = vld [vmem:[%s2555_s0 + $0xa8] sm:$0xff]  ;;  %v264_v22 = vld [vmem:[%s2554_s1 + $0x258] sm:$0xff] }
  0x1d   :  { %589 = vmatpush1.msra.mxu1 %v223_v28  ;;  %400 = vmatprep.subr.mxu0 %v1327_v0  ;;  %v38_v20 = vld [vmem:[%s2555_s0 + $0xc0] sm:$0xff]  ;;  %v43_v23 = vld [vmem:[%s2555_s0 + $0xe8] sm:$0xff]  ;;  %v37_v24 = vld [vmem:[%s2555_s0 + $0xb8] sm:$0xff] }
  0x1e   :  { %590 = vmatprep.subr.mxu1 %v1327_v0  ;;  %401 = vmatpush1.msra.mxu0 %v190_v29  ;;  %v45_v25 = vld [vmem:[%s2555_s0 + $0xf8] sm:$0xff]  ;;  %v263_v26 = vld [vmem:[%s2554_s1 + $0x250] sm:$0xff]  ;;  %v42_v27 = vld [vmem:[%s2555_s0 + $0xe0] sm:$0xff] }
  0x1f   :  { %591 = vmatpush1.msra.mxu1 %v222_v30  ;;  %402 = vmatprep.subr.mxu0 %v1327_v0  ;;  %v50_v28 = vld [vmem:[%s2555_s0 + $0x120] sm:$0xff]  ;;  %v262_v29 = vld [vmem:[%s2554_s1 + $0x248] sm:$0xff]  ;;  %v44_v30 = vld [vmem:[%s2555_s0 + $0xf0] sm:$0xff] }
  0x20   :  { %592 = vmatprep.subr.mxu1 %v1327_v0  ;;  %403 = vmatpush1.msra.mxu0 %v189_v31  ;;  %v52_v31 = vld [vmem:[%s2555_s0 + $0x130] sm:$0xff] }
  0x21   :  { %593 = vmatpush1.msra.mxu1 %v221_v32  ;;  %404 = vmatprep.subr.mxu0 %v1327_v0  ;;  %v261_v32 = vld [vmem:[%s2554_s1 + $0x240] sm:$0xff] }
  0x22   :  { %594 = vmatprep.subr.mxu1 %v1327_v0  ;;  %405 = vmatpush2.msra.mxu0 %v220_v33  ;;  %v49_v33 = vld [vmem:[%s2555_s0 + $0x118] sm:$0xff] }
  0x23   :  { %595 = vmatpush2.msra.mxu1 %v252_v34  ;;  %406 = vmatprep.subr.mxu0 %v1327_v0  ;;  %v57_v34 = vld [vmem:[%s2555_s0 + $0x158] sm:$0xff] }
  0x24   :  { %596 = vmatprep.subr.mxu1 %v1327_v0  ;;  %407 = vmatpush2.msra.mxu0 %v219_v35  ;;  %v260_v35 = vld [vmem:[%s2554_s1 + $0x238] sm:$0xff] }
  0x25   :  { %597 = vmatpush2.msra.mxu1 %v251_v36  ;;  %408 = vmatprep.subr.mxu0 %v1327_v0  ;;  %v51_v36 = vld [vmem:[%s2555_s0 + $0x128] sm:$0xff] }
  0x26   :  { %598 = vmatprep.subr.mxu1 %v1327_v0  ;;  %409 = vmatpush2.msra.mxu0 %v218_v37  ;;  %v59_v37 = vld [vmem:[%s2555_s0 + $0x168] sm:$0xff] }
  0x27   :  { %599 = vmatpush2.msra.mxu1 %v250_v38  ;;  %410 = vmatprep.subr.mxu0 %v1327_v0  ;;  %v287_v38 = vld [vmem:[%s2554_s1 + $0x310] sm:$0xff] }
  0x28   :  { %600 = vmatprep.subr.mxu1 %v1327_v0  ;;  %411 = vmatpush2.msra.mxu0 %v217_v39  ;;  %v56_v39 = vld [vmem:[%s2555_s0 + $0x150] sm:$0xff] }
  0x29   :  { %601 = vmatpush2.msra.mxu1 %v249_v40  ;;  %412 = vmatprep.subr.mxu0 %v1327_v0  ;;  %v64_v40 = vld [vmem:[%s2555_s0 + $0x190] sm:$0xff] }
  0x2a   :  { %602 = vmatprep.subr.mxu1 %v1327_v0  ;;  %413 = vmatpush2.msra.mxu0 %v216_v41  ;;  %v259_v41 = vld [vmem:[%s2554_s1 + $0x230] sm:$0xff] }
  0x2b   :  { %603 = vmatpush2.msra.mxu1 %v248_v42  ;;  %414 = vmatprep.subr.mxu0 %v1327_v0  ;;  %v58_v42 = vld [vmem:[%s2555_s0 + $0x160] sm:$0xff] }
  0x2c   :  { %604 = vmatprep.subr.mxu1 %v1327_v0  ;;  %415 = vmatpush2.msra.mxu0 %v215_v43  ;;  %v66_v43 = vld [vmem:[%s2555_s0 + $0x1a0] sm:$0xff] }
  0x2d   :  { %605 = vmatpush2.msra.mxu1 %v247_v44  ;;  %416 = vmatprep.subr.mxu0 %v1327_v0  ;;  %v258_v44 = vld [vmem:[%s2554_s1 + $0x228] sm:$0xff] }
  0x2e   :  { %606 = vmatprep.subr.mxu1 %v1327_v0  ;;  %417 = vmatpush2.msra.mxu0 %v214_v45  ;;  %v63_v45 = vld [vmem:[%s2555_s0 + $0x188] sm:$0xff] }
  0x2f   :  { %607 = vmatpush2.msra.mxu1 %v246_v46  ;;  %418 = vmatprep.subr.mxu0 %v1327_v0  ;;  %v71_v46 = vld [vmem:[%s2555_s0 + $0x1c8] sm:$0xff] }
  0x30   :  { %608 = vmatprep.subr.mxu1 %v1327_v0  ;;  %419 = vmatpush2.msra.mxu0 %v213_v47  ;;  %v257_v47 = vld [vmem:[%s2554_s1 + $0x220] sm:$0xff] }
  0x31   :  { %609 = vmatpush2.msra.mxu1 %v245_v48  ;;  %420 = vmatprep.subr.mxu0 %v1327_v0  ;;  %v65_v48 = vld [vmem:[%s2555_s0 + $0x198] sm:$0xff] }
  0x32   :  { %610 = vmatprep.subr.mxu1 %v1327_v0  ;;  %421 = vmatpush2.msra.mxu0 %v212_v49  ;;  %v73_v49 = vld [vmem:[%s2555_s0 + $0x1d8] sm:$0xff] }
  0x33   :  { %611 = vmatpush2.msra.mxu1 %v244_v50  ;;  %422 = vmatprep.subr.mxu0 %v1327_v0  ;;  %v256_v50 = vld [vmem:[%s2554_s1 + $0x218] sm:$0xff] }
  0x34   :  { %612 = vmatprep.subr.mxu1 %v1327_v0  ;;  %423 = vmatpush2.msra.mxu0 %v211_v51  ;;  %v70_v51 = vld [vmem:[%s2555_s0 + $0x1c0] sm:$0xff] }
  0x35   :  { %613 = vmatpush2.msra.mxu1 %v243_v52  ;;  %424 = vmatprep.subr.mxu0 %v1327_v0  ;;  %v78_v52 = vld [vmem:[%s2555_s0 + $0x200] sm:$0xff] }
  0x36   :  { %614 = vmatprep.subr.mxu1 %v1327_v0  ;;  %425 = vmatpush2.msra.mxu0 %v210_v53  ;;  %v255_v53 = vld [vmem:[%s2554_s1 + $0x210] sm:$0xff] }
  0x37   :  { %615 = vmatpush2.msra.mxu1 %v242_v54  ;;  %426 = vmatprep.subr.mxu0 %v1327_v0  ;;  %v72_v54 = vld [vmem:[%s2555_s0 + $0x1d0] sm:$0xff] }
  0x38   :  { %616 = vmatprep.subr.mxu1 %v1327_v0  ;;  %427 = vmatpush2.msra.mxu0 %v209_v55  ;;  %v80_v55 = vld [vmem:[%s2555_s0 + $0x210] sm:$0xff] }
  0x39   :  { %617 = vmatpush2.msra.mxu1 %v241_v56  ;;  %428 = vmatprep.subr.mxu0 %v1327_v0  ;;  %v254_v56 = vld [vmem:[%s2554_s1 + $0x208] sm:$0xff] }
  0x3a   :  { %618 = vmatprep.subr.mxu1 %v1327_v0  ;;  %429 = vmatpush2.msra.mxu0 %v208_v57  ;;  %v77_v57 = vld [vmem:[%s2555_s0 + $0x1f8] sm:$0xff] }
  0x3b   :  { %619 = vmatpush2.msra.mxu1 %v240_v58  ;;  %430 = vmatprep.subr.mxu0 %v1327_v0  ;;  %v85_v58 = vld [vmem:[%s2555_s0 + $0x238] sm:$0xff] }
  0x3c   :  { %620 = vmatprep.subr.mxu1 %v1327_v0  ;;  %431 = vmatpush2.msra.mxu0 %v207_v59  ;;  %v253_v59 = vld [vmem:[%s2554_s1 + $0x200] sm:$0xff] }
  0x3d   :  { %621 = vmatpush2.msra.mxu1 %v239_v60  ;;  %432 = vmatprep.subr.mxu0 %v1327_v0  ;;  %v79_v60 = vld [vmem:[%s2555_s0 + $0x208] sm:$0xff] }
  0x3e   :  { %622 = vmatprep.subr.mxu1 %v1327_v0  ;;  %433 = vmatpush2.msra.mxu0 %v206_v61  ;;  %v87_v61 = vld [vmem:[%s2555_s0 + $0x248] sm:$0xff] }
  0x3f   :  { %623 = vmatpush2.msra.mxu1 %v238_v62  ;;  %434 = vmatprep.subr.mxu0 %v1327_v0  ;;  %v284_v62 = vld [vmem:[%s2554_s1 + $0x2f8] sm:$0xff] }
  0x40   :  { %436 = vmatprep.mubr.f32.mxu0 %v15_v63  ;;  %435 = vmatpush2.msra.mxu0 %v205_v1  ;;  %v84_v63 = vld [vmem:[%s2555_s0 + $0x230] sm:$0xff] }
  0x41   :  { %624 = vmatprep.subr.mxu1 %v1327_v0  ;;  %437 = vmatmul.mubr.f32.vlgmr.msra.gmra.mxu0 %v14_v2  ;;  %v92_v1 = vld [vmem:[%s2555_s0 + $0x270] sm:$0xff]  ;;  %v286_v2 = vld [vmem:[%s2554_s1 + $0x308] sm:$0xff] }
  0x42   :  { %625 = vmatpush2.msra.mxu1 %v237_v3  ;;  %626 = vmatprep.mubr.f32.mxu1 %v17_v4  ;;  %v86_v3 = vld [vmem:[%s2555_s0 + $0x240] sm:$0xff] }
  0x43   :  { %752 = vmatprep.subr.mxu0 %v1327_v0  ;;  %627 = vmatmul.mubr.f32.vlgmr.msra.gmra.mxu1 %v16_v5  ;;  %v94_v4 = vld [vmem:[%s2555_s0 + $0x280] sm:$0xff]  ;;  %v283_v5 = vld [vmem:[%s2554_s1 + $0x2f0] sm:$0xff] }
  0x44   :  { %753 = vmatpush1.msra.mxu0 %v268_v6  ;;  %1242 = vmatprep.subr.mxu1 %v1327_v0  ;;  %v91_v6 = vld [vmem:[%s2555_s0 + $0x268] sm:$0xff] }
  0x45   :  { %441 = vmatprep.mubr.f32.mxu0 %v22_v7  ;;  %1243 = vmatpush3.msra.mxu1 %v288_v8  ;;  %v99_v7 = vld [vmem:[%s2555_s0 + $0x2a8] sm:$0xff] }
  0x46   :  { %442 = vmatmul.mubr.f32.gmra.mxu0 %v21_v9  ;;  %631 = vmatprep.mubr.f32.mxu1 %v24_v10  ;;  %v282_v8 = vld [vmem:[%s2554_s1 + $0x2e8] sm:$0xff]  ;;  %v93_v9 = vld [vmem:[%s2555_s0 + $0x278] sm:$0xff] }
  0x47   :  { %754 = vmatprep.subr.mxu0 %v1327_v0  ;;  %632 = vmatmul.mubr.f32.gmra.mxu1 %v23_v11  ;;  %v101_v10 = vld [vmem:[%s2555_s0 + $0x2b8] sm:$0xff]  ;;  %v281_v11 = vld [vmem:[%s2554_s1 + $0x2e0] sm:$0xff] }
  0x48   :  { %755 = vmatpush1.msra.mxu0 %v267_v12  ;;  %446 = vmatprep.mubr.f32.mxu0 %v29_v13  ;;  %v98_v12 = vld [vmem:[%s2555_s0 + $0x2a0] sm:$0xff] }
  0x49   :  { %756 = vmatprep.subr.mxu0 %v1327_v0  ;;  %636 = vmatprep.mubr.f32.mxu1 %v31_v15  ;;  %v106_v13 = vld [vmem:[%s2555_s0 + $0x2e0] sm:$0xff]  ;;  %v100_v15 = vld [vmem:[%s2555_s0 + $0x2b0] sm:$0xff] }
  0x4a   :  { %447 = vmatmul.mubr.f32.gmra.mxu0 %v28_v14  ;;  %1244 = vmatprep.subr.mxu1 %v1327_v0  ;;  %v280_v14 = vld [vmem:[%s2554_s1 + $0x2d8] sm:$0xff] }
  0x4b   :  { %757 = vmatpush1.msra.mxu0 %v266_v16  ;;  %451 = vmatprep.mubr.f32.mxu0 %v36_v17  ;;  %v108_v16 = vld [vmem:[%s2555_s0 + $0x2f0] sm:$0xff] }
  0x4c   :  { %637 = vmatmul.mubr.f32.gmra.mxu1 %v30_v18  ;;  %758 = vmatprep.subr.mxu0 %v1327_v0  ;;  %v279_v17 = vld [vmem:[%s2554_s1 + $0x2d0] sm:$0xff]  ;;  %v105_v18 = vld [vmem:[%s2555_s0 + $0x2d8] sm:$0xff] }
  0x4d   :  { %759 = vmatpush1.msra.mxu0 %v265_v19  ;;  %641 = vmatprep.mubr.f32.mxu1 %v38_v20  ;;  %v113_v19 = vld [vmem:[%s2555_s0 + $0x318] sm:$0xff]  ;;  %v278_v20 = vld [vmem:[%s2554_s1 + $0x2c8] sm:$0xff] }
  0x4e   :  { %452 = vmatmul.mubr.f32.gmra.mxu0 %v35_v21  ;;  %760 = vmatprep.subr.mxu0 %v1327_v0  ;;  %v107_v21 = vld [vmem:[%s2555_s0 + $0x2e8] sm:$0xff] }
  0x4f   :  { %761 = vmatpush1.msra.mxu0 %v264_v22  ;;  %456 = vmatprep.mubr.f32.mxu0 %v43_v23  ;;  %v115_v22 = vld [vmem:[%s2555_s0 + $0x328] sm:$0xff]  ;;  %v277_v23 = vld [vmem:[%s2554_s1 + $0x2c0] sm:$0xff] }
  0x50   :  { %642 = vmatmul.mubr.f32.gmra.mxu1 %v37_v24  ;;  %762 = vmatprep.subr.mxu0 %v1327_v0  ;;  %v112_v24 = vld [vmem:[%s2555_s0 + $0x310] sm:$0xff] }
  0x51   :  { %646 = vmatprep.mubr.f32.mxu1 %v45_v25  ;;  %763 = vmatpush1.msra.mxu0 %v263_v26  ;;  %v120_v25 = vld [vmem:[%s2555_s0 + $0x350] sm:$0xff]  ;;  %v276_v26 = vld [vmem:[%s2554_s1 + $0x2b8] sm:$0xff] }
  0x52   :  { %457 = vmatmul.mubr.f32.gmra.mxu0 %v42_v27  ;;  %764 = vmatprep.subr.mxu0 %v1327_v0  ;;  %v114_v27 = vld [vmem:[%s2555_s0 + $0x320] sm:$0xff] }
  0x53   :  { %461 = vmatprep.mubr.f32.mxu0 %v50_v28  ;;  %765 = vmatpush1.msra.mxu0 %v262_v29  ;;  %v122_v28 = vld [vmem:[%s2555_s0 + $0x360] sm:$0xff] }
  0x54   :  { %647 = vmatmul.mubr.f32.gmra.mxu1 %v44_v30  ;;  %766 = vmatprep.subr.mxu0 %v1327_v0  ;;  %v285_v29 = vld [vmem:[%s2554_s1 + $0x300] sm:$0xff]  ;;  %v119_v30 = vld [vmem:[%s2555_s0 + $0x348] sm:$0xff] }
  0x55   :  { %651 = vmatprep.mubr.f32.mxu1 %v52_v31  ;;  %767 = vmatpush1.msra.mxu0 %v261_v32  ;;  %v127_v31 = vld [vmem:[%s2555_s0 + $0x388] sm:$0xff]  ;;  %v275_v32 = vld [vmem:[%s2554_s1 + $0x2b0] sm:$0xff] }
  0x56   :  { %462 = vmatmul.mubr.f32.gmra.mxu0 %v49_v33  ;;  %768 = vmatprep.subr.mxu0 %v1327_v0  ;;  %v121_v33 = vld [vmem:[%s2555_s0 + $0x358] sm:$0xff] }
  0x57   :  { %466 = vmatprep.mubr.f32.mxu0 %v57_v34  ;;  %769 = vmatpush1.msra.mxu0 %v260_v35  ;;  %v129_v34 = vld [vmem:[%s2555_s0 + $0x398] sm:$0xff]  ;;  %v274_v35 = vld [vmem:[%s2554_s1 + $0x2a8] sm:$0xff] }
  0x58   :  { %652 = vmatmul.mubr.f32.gmra.mxu1 %v51_v36  ;;  %770 = vmatprep.subr.mxu0 %v1327_v0  ;;  %v126_v36 = vld [vmem:[%s2555_s0 + $0x380] sm:$0xff] }
  0x59   :  { %656 = vmatprep.mubr.f32.mxu1 %v59_v37  ;;  %1245 = vmatpush3.msra.mxu1 %v287_v38  ;;  %v134_v37 = vld [vmem:[%s2555_s0 + $0x3c0] sm:$0xff] }
  0x5a   :  { %467 = vmatmul.mubr.f32.gmra.mxu0 %v56_v39  ;;  %1246 = vmatprep.subr.mxu1 %v1327_v0  ;;  %v273_v38 = vld [vmem:[%s2554_s1 + $0x2a0] sm:$0xff]  ;;  %v128_v39 = vld [vmem:[%s2555_s0 + $0x390] sm:$0xff] }
  0x5b   :  { %471 = vmatprep.mubr.f32.mxu0 %v64_v40  ;;  %771 = vmatpush1.msra.mxu0 %v259_v41  ;;  %v136_v40 = vld [vmem:[%s2555_s0 + $0x3d0] sm:$0xff]  ;;  %v272_v41 = vld [vmem:[%s2554_s1 + $0x298] sm:$0xff] }
  0x5c   :  { %657 = vmatmul.mubr.f32.gmra.mxu1 %v58_v42  ;;  %772 = vmatprep.subr.mxu0 %v1327_v0  ;;  %v133_v42 = vld [vmem:[%s2555_s0 + $0x3b8] sm:$0xff] }
  0x5d   :  { %661 = vmatprep.mubr.f32.mxu1 %v66_v43  ;;  %773 = vmatpush1.msra.mxu0 %v258_v44  ;;  %v141_v43 = vld [vmem:[%s2555_s0 + $0x3f8] sm:$0xff]  ;;  %v271_v44 = vld [vmem:[%s2554_s1 + $0x290] sm:$0xff] }
  0x5e   :  { %472 = vmatmul.mubr.f32.gmra.mxu0 %v63_v45  ;;  %774 = vmatprep.subr.mxu0 %v1327_v0  ;;  %v135_v45 = vld [vmem:[%s2555_s0 + $0x3c8] sm:$0xff] }
  0x5f   :  { %476 = vmatprep.mubr.f32.mxu0 %v71_v46  ;;  %775 = vmatpush1.msra.mxu0 %v257_v47  ;;  %v143_v46 = vld [vmem:[%s2555_s0 + $0x408] sm:$0xff] }
  0x60   :  { %662 = vmatmul.mubr.f32.gmra.mxu1 %v65_v48  ;;  %776 = vmatprep.subr.mxu0 %v1327_v0  ;;  %v270_v47 = vld [vmem:[%s2554_s1 + $0x288] sm:$0xff]  ;;  %v140_v48 = vld [vmem:[%s2555_s0 + $0x3f0] sm:$0xff] }
  0x61   :  { %666 = vmatprep.mubr.f32.mxu1 %v73_v49  ;;  %777 = vmatpush1.msra.mxu0 %v256_v50  ;;  %v148_v49 = vld [vmem:[%s2555_s0 + $0x430] sm:$0xff]  ;;  %v269_v50 = vld [vmem:[%s2554_s1 + $0x280] sm:$0xff] }
  0x62   :  { %477 = vmatmul.mubr.f32.gmra.mxu0 %v70_v51  ;;  %778 = vmatprep.subr.mxu0 %v1327_v0  ;;  %v142_v51 = vld [vmem:[%s2555_s0 + $0x400] sm:$0xff] }
  0x63   :  { %481 = vmatprep.mubr.f32.mxu0 %v78_v52  ;;  %779 = vmatpush1.msra.mxu0 %v255_v53  ;;  %v150_v52 = vld [vmem:[%s2555_s0 + $0x440] sm:$0xff]  ;;  %v147_v53 = vld [vmem:[%s2555_s0 + $0x428] sm:$0xff] }
  0x64   :  { %667 = vmatmul.mubr.f32.gmra.mxu1 %v72_v54  ;;  %780 = vmatprep.subr.mxu0 %v1327_v0  ;;  %v155_v54 = vld [vmem:[%s2555_s0 + $0x468] sm:$0xff] }
  0x65   :  { %671 = vmatprep.mubr.f32.mxu1 %v80_v55  ;;  %781 = vmatpush1.msra.mxu0 %v254_v56  ;;  %v149_v55 = vld [vmem:[%s2555_s0 + $0x438] sm:$0xff] }
  0x66   :  { %482 = vmatmul.mubr.f32.gmra.mxu0 %v77_v57  ;;  %782 = vmatprep.subr.mxu0 %v1327_v0  ;;  %v157_v56 = vld [vmem:[%s2555_s0 + $0x478] sm:$0xff]  ;;  %v154_v57 = vld [vmem:[%s2555_s0 + $0x460] sm:$0xff] }
  0x67   :  { %486 = vmatprep.mubr.f32.mxu0 %v85_v58  ;;  %783 = vmatpush1.msra.mxu0 %v253_v59  ;;  %v162_v58 = vld [vmem:[%s2555_s0 + $0x4a0] sm:$0xff]  ;;  %v156_v59 = vld [vmem:[%s2555_s0 + $0x470] sm:$0xff] }
  0x68   :  { %672 = vmatmul.mubr.f32.gmra.mxu1 %v79_v60  ;;  %784 = vmatprep.subr.mxu0 %v1327_v0  ;;  %v164_v60 = vld [vmem:[%s2555_s0 + $0x4b0] sm:$0xff] }
  0x69   :  { %676 = vmatprep.mubr.f32.mxu1 %v87_v61  ;;  %785 = vmatpush2.msra.mxu0 %v284_v62  ;;  %v161_v61 = vld [vmem:[%s2555_s0 + $0x498] sm:$0xff] }
  0x6a   :  { %487 = vmatmul.mubr.f32.gmra.mxu0 %v84_v63  ;;  %1247 = vmatpush3.msra.mxu1 %v286_v2  ;;  %v169_v62 = vld [vmem:[%s2555_s0 + $0x4d8] sm:$0xff]  ;;  %v163_v63 = vld [vmem:[%s2555_s0 + $0x4a8] sm:$0xff]  ;;  %v168_v2 = vld [vmem:[%s2555_s0 + $0x4d0] sm:$0xff] }
  0x6b   :  { %491 = vmatprep.mubr.f32.mxu0 %v92_v1  ;;  %786 = vmatprep.subr.mxu0 %v1327_v0  ;;  %v171_v1 = vld [vmem:[%s2555_s0 + $0x4e8] sm:$0xff] }
  0x6c   :  { %677 = vmatmul.mubr.f32.gmra.mxu1 %v86_v3  ;;  %787 = vmatpush2.msra.mxu0 %v283_v5  ;;  %v176_v3 = vld [vmem:[%s2555_s0 + $0x510] sm:$0xff]  ;;  %v178_v5 = vld [vmem:[%s2555_s0 + $0x520] sm:$0xff] }
  0x6d   :  { %681 = vmatprep.mubr.f32.mxu1 %v94_v4  ;;  %788 = vmatprep.subr.mxu0 %v1327_v0  ;;  %v170_v4 = vld [vmem:[%s2555_s0 + $0x4e0] sm:$0xff] }
  0x6e   :  { %492 = vmatmul.mubr.f32.gmra.mxu0 %v91_v6  ;;  %1248 = vmatprep.subr.mxu1 %v1327_v0  ;;  %v175_v6 = vld [vmem:[%s2555_s0 + $0x508] sm:$0xff] }
  0x6f   :  { %496 = vmatprep.mubr.f32.mxu0 %v99_v7  ;;  %789 = vmatpush2.msra.mxu0 %v282_v8  ;;  %v183_v7 = vld [vmem:[%s2555_s0 + $0x548] sm:$0xff]  ;;  %v177_v8 = vld [vmem:[%s2555_s0 + $0x518] sm:$0xff] }
  0x70   :  { %682 = vmatmul.mubr.f32.gmra.mxu1 %v93_v9  ;;  %790 = vmatprep.subr.mxu0 %v1327_v0  ;;  %v185_v9 = vld [vmem:[%s2555_s0 + $0x558] sm:$0xff] }
  0x71   :  { %686 = vmatprep.mubr.f32.mxu1 %v101_v10  ;;  %791 = vmatpush2.msra.mxu0 %v281_v11  ;;  %v182_v10 = vld [vmem:[%s2555_s0 + $0x540] sm:$0xff]  ;;  %v19_v11 = vld [vmem:[%s2555_s0 + $0x28] sm:$0xff] }
  0x72   :  { %497 = vmatmul.mubr.f32.gmra.mxu0 %v98_v12  ;;  %792 = vmatprep.subr.mxu0 %v1327_v0  ;;  %v184_v12 = vld [vmem:[%s2555_s0 + $0x550] sm:$0xff] }
  0x73   :  { %501 = vmatprep.mubr.f32.mxu0 %v106_v13  ;;  %793 = vmatpush2.msra.mxu0 %v280_v14  ;;  %v18_v13 = vld [vmem:[%s2555_s0 + $0x20] sm:$0xff] }
  0x74   :  { %687 = vmatmul.mubr.f32.gmra.mxu1 %v100_v15  ;;  %794 = vmatprep.subr.mxu0 %v1327_v0  ;;  %v26_v14 = vld [vmem:[%s2555_s0 + $0x60] sm:$0xff]  ;;  %v20_v15 = vld [vmem:[%s2555_s0 + $0x30] sm:$0xff] }
  0x75   :  { %691 = vmatprep.mubr.f32.mxu1 %v108_v16  ;;  %795 = vmatpush2.msra.mxu0 %v279_v17  ;;  %v25_v16 = vld [vmem:[%s2555_s0 + $0x58] sm:$0xff] }
  0x76   :  { %502 = vmatmul.mubr.f32.gmra.mxu0 %v105_v18  ;;  %796 = vmatprep.subr.mxu0 %v1327_v0  ;;  %v33_v17 = vld [vmem:[%s2555_s0 + $0x98] sm:$0xff]  ;;  %v27_v18 = vld [vmem:[%s2555_s0 + $0x68] sm:$0xff] }
  0x77   :  { %506 = vmatprep.mubr.f32.mxu0 %v113_v19  ;;  %797 = vmatpush2.msra.mxu0 %v278_v20  ;;  %v32_v19 = vld [vmem:[%s2555_s0 + $0x90] sm:$0xff] }
  0x78   :  { %692 = vmatmul.mubr.f32.gmra.mxu1 %v107_v21  ;;  %798 = vmatprep.subr.mxu0 %v1327_v0  ;;  %v40_v20 = vld [vmem:[%s2555_s0 + $0xd0] sm:$0xff]  ;;  %v34_v21 = vld [vmem:[%s2555_s0 + $0xa0] sm:$0xff] }
  0x79   :  { %696 = vmatprep.mubr.f32.mxu1 %v115_v22  ;;  %799 = vmatpush2.msra.mxu0 %v277_v23  ;;  %v39_v22 = vld [vmem:[%s2555_s0 + $0xc8] sm:$0xff] }
  0x7a   :  { %507 = vmatmul.mubr.f32.gmra.mxu0 %v112_v24  ;;  %800 = vmatprep.subr.mxu0 %v1327_v0  ;;  %v47_v23 = vld [vmem:[%s2555_s0 + $0x108] sm:$0xff]  ;;  %v41_v24 = vld [vmem:[%s2555_s0 + $0xd8] sm:$0xff] }
  0x7b   :  { %511 = vmatprep.mubr.f32.mxu0 %v120_v25  ;;  %801 = vmatpush2.msra.mxu0 %v276_v26  ;;  %v46_v25 = vld [vmem:[%s2555_s0 + $0x100] sm:$0xff] }
  0x7c   :  { %697 = vmatmul.mubr.f32.gmra.mxu1 %v114_v27  ;;  %802 = vmatprep.subr.mxu0 %v1327_v0  ;;  %v54_v26 = vld [vmem:[%s2555_s0 + $0x140] sm:$0xff]  ;;  %v48_v27 = vld [vmem:[%s2555_s0 + $0x110] sm:$0xff] }
  0x7d   :  { %701 = vmatprep.mubr.f32.mxu1 %v122_v28  ;;  %1249 = vmatpush3.msra.mxu1 %v285_v29  ;;  %v53_v28 = vld [vmem:[%s2555_s0 + $0x138] sm:$0xff] }
  0x7e   :  { %512 = vmatmul.mubr.f32.gmra.mxu0 %v119_v30  ;;  %v61_v29 = vld [vmem:[%s2555_s0 + $0x178] sm:$0xff]  ;;  %v55_v30 = vld [vmem:[%s2555_s0 + $0x148] sm:$0xff] }
  0x7f   :  { %516 = vmatprep.mubr.f32.mxu0 %v127_v31  ;;  %803 = vmatpush2.msra.mxu0 %v275_v32  ;;  %v60_v31 = vld [vmem:[%s2555_s0 + $0x170] sm:$0xff] }
  0x80   :  { %702 = vmatmul.mubr.f32.gmra.mxu1 %v121_v33  ;;  %804 = vmatprep.subr.mxu0 %v1327_v0  ;;  %v68_v32 = vld [vmem:[%s2555_s0 + $0x1b0] sm:$0xff]  ;;  %v62_v33 = vld [vmem:[%s2555_s0 + $0x180] sm:$0xff] }
  0x81   :  { %706 = vmatprep.mubr.f32.mxu1 %v129_v34  ;;  %805 = vmatpush2.msra.mxu0 %v274_v35  ;;  %v67_v34 = vld [vmem:[%s2555_s0 + $0x1a8] sm:$0xff] }
  0x82   :  { %517 = vmatmul.mubr.f32.gmra.mxu0 %v126_v36  ;;  %806 = vmatprep.subr.mxu0 %v1327_v0  ;;  %v75_v35 = vld [vmem:[%s2555_s0 + $0x1e8] sm:$0xff]  ;;  %v69_v36 = vld [vmem:[%s2555_s0 + $0x1b8] sm:$0xff] }
  0x83   :  { %521 = vmatprep.mubr.f32.mxu0 %v134_v37  ;;  %807 = vmatpush2.msra.mxu0 %v273_v38  ;;  %v74_v37 = vld [vmem:[%s2555_s0 + $0x1e0] sm:$0xff] }
  0x84   :  { %707 = vmatmul.mubr.f32.gmra.mxu1 %v128_v39  ;;  %808 = vmatprep.subr.mxu0 %v1327_v0  ;;  %v82_v38 = vld [vmem:[%s2555_s0 + $0x220] sm:$0xff]  ;;  %v76_v39 = vld [vmem:[%s2555_s0 + $0x1f0] sm:$0xff] }
  0x85   :  { %711 = vmatprep.mubr.f32.mxu1 %v136_v40  ;;  %809 = vmatpush2.msra.mxu0 %v272_v41  ;;  %v81_v40 = vld [vmem:[%s2555_s0 + $0x218] sm:$0xff] }
  0x86   :  { %522 = vmatmul.mubr.f32.gmra.mxu0 %v133_v42  ;;  %810 = vmatprep.subr.mxu0 %v1327_v0  ;;  %v89_v41 = vld [vmem:[%s2555_s0 + $0x258] sm:$0xff]  ;;  %v83_v42 = vld [vmem:[%s2555_s0 + $0x228] sm:$0xff] }
  0x87   :  { %526 = vmatprep.mubr.f32.mxu0 %v141_v43  ;;  %811 = vmatpush2.msra.mxu0 %v271_v44  ;;  %v88_v43 = vld [vmem:[%s2555_s0 + $0x250] sm:$0xff] }
  0x88   :  { %712 = vmatmul.mubr.f32.gmra.mxu1 %v135_v45  ;;  %812 = vmatprep.subr.mxu0 %v1327_v0  ;;  %v96_v44 = vld [vmem:[%s2555_s0 + $0x290] sm:$0xff]  ;;  %v90_v45 = vld [vmem:[%s2555_s0 + $0x260] sm:$0xff] }
  0x89   :  { %716 = vmatprep.mubr.f32.mxu1 %v143_v46  ;;  %813 = vmatpush2.msra.mxu0 %v270_v47  ;;  %v95_v46 = vld [vmem:[%s2555_s0 + $0x288] sm:$0xff] }
  0x8a   :  { %527 = vmatmul.mubr.f32.gmra.mxu0 %v140_v48  ;;  %814 = vmatprep.subr.mxu0 %v1327_v0  ;;  %v103_v47 = vld [vmem:[%s2555_s0 + $0x2c8] sm:$0xff]  ;;  %v97_v48 = vld [vmem:[%s2555_s0 + $0x298] sm:$0xff] }
  0x8b   :  { %531 = vmatprep.mubr.f32.mxu0 %v148_v49  ;;  %815 = vmatpush2.msra.mxu0 %v269_v50  ;;  %v102_v49 = vld [vmem:[%s2555_s0 + $0x2c0] sm:$0xff] }
  0x8c   :  { %717 = vmatmul.mubr.f32.gmra.mxu1 %v142_v51  ;;  %v110_v50 = vld [vmem:[%s2555_s0 + $0x300] sm:$0xff]  ;;  %v104_v51 = vld [vmem:[%s2555_s0 + $0x2d0] sm:$0xff] }
  0x8d   :  { %721 = vmatprep.mubr.f32.mxu1 %v150_v52  ;;  %v109_v52 = vld [vmem:[%s2555_s0 + $0x2f8] sm:$0xff] }
  0x8e   :  { %532 = vmatmul.mubr.f32.gmra.mxu0 %v147_v53  ;;  %v117_v53 = vld [vmem:[%s2555_s0 + $0x338] sm:$0xff] }
  0x8f   :  { %536 = vmatprep.mubr.f32.mxu0 %v155_v54  ;;  %v111_v54 = vld [vmem:[%s2555_s0 + $0x308] sm:$0xff] }
  0x90   :  { %722 = vmatmul.mubr.f32.gmra.mxu1 %v149_v55  ;;  %v116_v55 = vld [vmem:[%s2555_s0 + $0x330] sm:$0xff] }
  0x91   :  { %726 = vmatprep.mubr.f32.mxu1 %v157_v56  ;;  %v124_v56 = vld [vmem:[%s2555_s0 + $0x370] sm:$0xff] }
  0x92   :  { %537 = vmatmul.mubr.f32.gmra.mxu0 %v154_v57  ;;  %v118_v57 = vld [vmem:[%s2555_s0 + $0x340] sm:$0xff] }
  0x93   :  { %541 = vmatprep.mubr.f32.mxu0 %v162_v58  ;;  %v123_v58 = vld [vmem:[%s2555_s0 + $0x368] sm:$0xff] }
  0x94   :  { %727 = vmatmul.mubr.f32.gmra.mxu1 %v156_v59  ;;  %v131_v59 = vld [vmem:[%s2555_s0 + $0x3a8] sm:$0xff] }
  0x95   :  { %731 = vmatprep.mubr.f32.mxu1 %v164_v60  ;;  %v125_v60 = vld [vmem:[%s2555_s0 + $0x378] sm:$0xff] }
  0x96   :  { %542 = vmatmul.mubr.f32.gmra.mxu0 %v161_v61  ;;  %v130_v61 = vld [vmem:[%s2555_s0 + $0x3a0] sm:$0xff] }
  0x97   :  { %546 = vmatprep.mubr.f32.mxu0 %v169_v62  ;;  %v138_v62 = vld [vmem:[%s2555_s0 + $0x3e0] sm:$0xff] }
  0x98   :  { %732 = vmatmul.mubr.f32.gmra.mxu1 %v163_v63  ;;  %v132_v63 = vld [vmem:[%s2555_s0 + $0x3b0] sm:$0xff] }
  0x99   :  { %736 = vmatprep.mubr.f32.mxu1 %v171_v1  ;;  %v137_v1 = vld [vmem:[%s2555_s0 + $0x3d8] sm:$0xff] }
  0x9a   :  { %547 = vmatmul.mubr.f32.gmra.mxu0 %v168_v2  ;;  %v145_v2 = vld [vmem:[%s2555_s0 + $0x418] sm:$0xff] }
  0x9b   :  { %551 = vmatprep.mubr.f32.mxu0 %v176_v3  ;;  %v139_v3 = vld [vmem:[%s2555_s0 + $0x3e8] sm:$0xff] }
  0x9c   :  { %737 = vmatmul.mubr.f32.gmra.mxu1 %v170_v4  ;;  %v144_v4 = vld [vmem:[%s2555_s0 + $0x410] sm:$0xff] }
  0x9d   :  { %741 = vmatprep.mubr.f32.mxu1 %v178_v5  ;;  %v152_v5 = vld [vmem:[%s2555_s0 + $0x450] sm:$0xff] }
  0x9e   :  { %552 = vmatmul.mubr.f32.gmra.mxu0 %v175_v6  ;;  %v146_v6 = vld [vmem:[%s2555_s0 + $0x420] sm:$0xff] }
  0x9f   :  { %556 = vmatprep.mubr.f32.mxu0 %v183_v7  ;;  %v151_v7 = vld [vmem:[%s2555_s0 + $0x448] sm:$0xff] }
  0xa0   :  { %742 = vmatmul.mubr.f32.gmra.mxu1 %v177_v8  ;;  %v159_v8 = vld [vmem:[%s2555_s0 + $0x488] sm:$0xff] }
  0xa1   :  { %746 = vmatprep.mubr.f32.mxu1 %v185_v9  ;;  %v153_v9 = vld [vmem:[%s2555_s0 + $0x458] sm:$0xff] }
  0xa2   :  { %557 = vmatmul.mubr.f32.gmra.mxu0 %v182_v10  ;;  %v158_v10 = vld [vmem:[%s2555_s0 + $0x480] sm:$0xff] }
  0xa3   :  { %816 = vmatprep.mubr.f32.mxu0 %v19_v11  ;;  %v166_v11 = vld [vmem:[%s2555_s0 + $0x4c0] sm:$0xff] }
  0xa4   :  { %747 = vmatmul.mubr.f32.gmra.mxu1 %v184_v12  ;;  %v160_v12 = vld [vmem:[%s2555_s0 + $0x490] sm:$0xff] }
  0xa5   :  { %1250 = vmatprep.mubr.msk.f32.mxu1 %vm1328_vm0, %v1327_v0 }
  0xa6   :  { %817 = vmatmul.mubr.f32.vlgmr.msra.gmra.mxu0 %v18_v13  ;;  %v165_v13 = vld [vmem:[%s2555_s0 + $0x4b8] sm:$0xff] }
  0xa7   :  { %821 = vmatprep.mubr.f32.mxu0 %v26_v14  ;;  %v173_v14 = vld [vmem:[%s2555_s0 + $0x4f8] sm:$0xff] }
  0xa8   :  { %1251 = vmatmul.mubr.msk.f32.vlgmr.msra.gmra.mxu1 %vm296_vm1, %v20_v15  ;;  %v167_v15 = vld [vmem:[%s2555_s0 + $0x4c8] sm:$0xff] }
  0xa9   :  { %1253 = vmatprep.mubr.msk.f32.mxu1 %vm1328_vm0, %v1327_v0 }
  0xaa   :  { %822 = vmatmul.mubr.f32.gmra.mxu0 %v25_v16  ;;  %v172_v16 = vld [vmem:[%s2555_s0 + $0x4f0] sm:$0xff] }
  0xab   :  { %826 = vmatprep.mubr.f32.mxu0 %v33_v17  ;;  %v180_v17 = vld [vmem:[%s2555_s0 + $0x530] sm:$0xff] }
  0xac   :  { %1254 = vmatmul.mubr.msk.f32.gmra.mxu1 %vm296_vm1, %v27_v18  ;;  %v174_v18 = vld [vmem:[%s2555_s0 + $0x500] sm:$0xff] }
  0xad   :  { %1256 = vmatprep.mubr.msk.f32.mxu1 %vm1328_vm0, %v1327_v0 }
  0xae   :  { %827 = vmatmul.mubr.f32.gmra.mxu0 %v32_v19  ;;  %v179_v19 = vld [vmem:[%s2555_s0 + $0x528] sm:$0xff] }
  0xaf   :  { %831 = vmatprep.mubr.f32.mxu0 %v40_v20  ;;  %v2334_v20 = vld [vmem:[%s2556_s2] ss:$0 sm:$0xff] }
  0xb0   :  { %1257 = vmatmul.mubr.msk.f32.gmra.mxu1 %vm296_vm1, %v34_v21  ;;  %v187_v21 = vld [vmem:[%s2555_s0 + $0x568] sm:$0xff] }
  0xb1   :  { %1259 = vmatprep.mubr.msk.f32.mxu1 %vm1328_vm0, %v1327_v0 }
  0xb2   :  { %832 = vmatmul.mubr.f32.gmra.mxu0 %v39_v22  ;;  %v181_v22 = vld [vmem:[%s2555_s0 + $0x538] sm:$0xff] }
  0xb3   :  { %836 = vmatprep.mubr.f32.mxu0 %v47_v23 }
  0xb4   :  { %1260 = vmatmul.mubr.msk.f32.gmra.mxu1 %vm296_vm1, %v41_v24 }
  0xb5   :  { %1262 = vmatprep.mubr.msk.f32.mxu1 %vm1328_vm0, %v1327_v0 }
  0xb6   :  { %837 = vmatmul.mubr.f32.gmra.mxu0 %v46_v25  ;;  %v186_v25 = vld [vmem:[%s2555_s0 + $0x560] sm:$0xff] }
  0xb7   :  { %841 = vmatprep.mubr.f32.mxu0 %v54_v26 }
  0xb8   :  { %1263 = vmatmul.mubr.msk.f32.gmra.mxu1 %vm296_vm1, %v48_v27 }
  0xb9   :  { %1265 = vmatprep.mubr.msk.f32.mxu1 %vm1328_vm0, %v1327_v0 }
  0xba   :  { %842 = vmatmul.mubr.f32.gmra.mxu0 %v53_v28 }
  0xbb   :  { %846 = vmatprep.mubr.f32.mxu0 %v61_v29  ;;  %v188_v29 = vld [vmem:[%s2555_s0 + $0x570] sm:$0xff] }
  0xbc   :  { %1266 = vmatmul.mubr.msk.f32.gmra.mxu1 %vm296_vm1, %v55_v30 }
  0xbd   :  { %1268 = vmatprep.mubr.msk.f32.mxu1 %vm1328_vm0, %v1327_v0 }
  0xbe   :  { %847 = vmatmul.mubr.f32.gmra.mxu0 %v60_v31 }
  0xbf   :  { %851 = vmatprep.mubr.f32.mxu0 %v68_v32 }
  0xc0   :  { %1269 = vmatmul.mubr.msk.f32.gmra.mxu1 %vm296_vm1, %v62_v33 }
  0xc1   :  { %1271 = vmatprep.mubr.msk.f32.mxu1 %vm1328_vm0, %v1327_v0 }
  0xc2   :  { %852 = vmatmul.mubr.f32.gmra.mxu0 %v67_v34 }
  0xc3   :  { %856 = vmatprep.mubr.f32.mxu0 %v75_v35 }
  0xc4   :  { %1272 = vmatmul.mubr.msk.f32.gmra.mxu1 %vm296_vm1, %v69_v36 }
  0xc5   :  { %1274 = vmatprep.mubr.msk.f32.mxu1 %vm1328_vm0, %v1327_v0 }
  0xc6   :  { %857 = vmatmul.mubr.f32.gmra.mxu0 %v74_v37 }
  0xc7   :  { %861 = vmatprep.mubr.f32.mxu0 %v82_v38 }
  0xc8   :  { %1275 = vmatmul.mubr.msk.f32.gmra.mxu1 %vm296_vm1, %v76_v39 }
  0xc9   :  { %1277 = vmatprep.mubr.msk.f32.mxu1 %vm1328_vm0, %v1327_v0 }
  0xca   :  { %862 = vmatmul.mubr.f32.gmra.mxu0 %v81_v40 }
  0xcb   :  { %866 = vmatprep.mubr.f32.mxu0 %v89_v41 }
  0xcc   :  { %1278 = vmatmul.mubr.msk.f32.gmra.mxu1 %vm296_vm1, %v83_v42 }
  0xcd   :  { %1280 = vmatprep.mubr.msk.f32.mxu1 %vm1328_vm0, %v1327_v0 }
  0xce   :  { %867 = vmatmul.mubr.f32.gmra.mxu0 %v88_v43 }
  0xcf   :  { %871 = vmatprep.mubr.f32.mxu0 %v96_v44 }
  0xd0   :  { %1281 = vmatmul.mubr.msk.f32.gmra.mxu1 %vm296_vm1, %v90_v45 }
  0xd1   :  { %1283 = vmatprep.mubr.msk.f32.mxu1 %vm1328_vm0, %v1327_v0 }
  0xd2   :  { %872 = vmatmul.mubr.f32.gmra.mxu0 %v95_v46 }
  0xd3   :  { %876 = vmatprep.mubr.f32.mxu0 %v103_v47 }
  0xd4   :  { %1284 = vmatmul.mubr.msk.f32.gmra.mxu1 %vm296_vm1, %v97_v48 }
  0xd5   :  { %1286 = vmatprep.mubr.msk.f32.mxu1 %vm1328_vm0, %v1327_v0 }
  0xd6   :  { %877 = vmatmul.mubr.f32.gmra.mxu0 %v102_v49 }
  0xd7   :  { %881 = vmatprep.mubr.f32.mxu0 %v110_v50 }
  0xd8   :  { %1287 = vmatmul.mubr.msk.f32.gmra.mxu1 %vm296_vm1, %v104_v51 }
  0xd9   :  { %1289 = vmatprep.mubr.msk.f32.mxu1 %vm1328_vm0, %v1327_v0 }
  0xda   :  { %882 = vmatmul.mubr.f32.gmra.mxu0 %v109_v52 }
  0xdb   :  { %886 = vmatprep.mubr.f32.mxu0 %v117_v53 }
  0xdc   :  { %1290 = vmatmul.mubr.msk.f32.gmra.mxu1 %vm296_vm1, %v111_v54 }
  0xdd   :  { %1292 = vmatprep.mubr.msk.f32.mxu1 %vm1328_vm0, %v1327_v0 }
  0xde   :  { %887 = vmatmul.mubr.f32.gmra.mxu0 %v116_v55 }
  0xdf   :  { %891 = vmatprep.mubr.f32.mxu0 %v124_v56 }
  0xe0   :  { %1293 = vmatmul.mubr.msk.f32.gmra.mxu1 %vm296_vm1, %v118_v57 }
  0xe1   :  { %1295 = vmatprep.mubr.msk.f32.mxu1 %vm1328_vm0, %v1327_v0 }
  0xe2   :  { %892 = vmatmul.mubr.f32.gmra.mxu0 %v123_v58 }
  0xe3   :  { %896 = vmatprep.mubr.f32.mxu0 %v131_v59 }
  0xe4   :  { %1296 = vmatmul.mubr.msk.f32.gmra.mxu1 %vm296_vm1, %v125_v60 }
  0xe5   :  { %1298 = vmatprep.mubr.msk.f32.mxu1 %vm1328_vm0, %v1327_v0 }
  0xe6   :  { %897 = vmatmul.mubr.f32.gmra.mxu0 %v130_v61 }
  0xe7   :  { %901 = vmatprep.mubr.f32.mxu0 %v138_v62 }
  0xe8   :  { %1299 = vmatmul.mubr.msk.f32.gmra.mxu1 %vm296_vm1, %v132_v63 }
  0xe9   :  { %1301 = vmatprep.mubr.msk.f32.mxu1 %vm1328_vm0, %v1327_v0 }
  0xea   :  { %902 = vmatmul.mubr.f32.gmra.mxu0 %v137_v1 }
  0xeb   :  { %906 = vmatprep.mubr.f32.mxu0 %v145_v2 }
  0xec   :  { %1302 = vmatmul.mubr.msk.f32.gmra.mxu1 %vm296_vm1, %v139_v3 }
  0xed   :  { %1304 = vmatprep.mubr.msk.f32.mxu1 %vm1328_vm0, %v1327_v0 }
  0xee   :  { %907 = vmatmul.mubr.f32.gmra.mxu0 %v144_v4 }
  0xef   :  { %911 = vmatprep.mubr.f32.mxu0 %v152_v5 }
  0xf0   :  { %1305 = vmatmul.mubr.msk.f32.gmra.mxu1 %vm296_vm1, %v146_v6 }
  0xf1   :  { %1307 = vmatprep.mubr.msk.f32.mxu1 %vm1328_vm0, %v1327_v0 }
  0xf2   :  { %912 = vmatmul.mubr.f32.gmra.mxu0 %v151_v7 }
  0xf3   :  { %916 = vmatprep.mubr.f32.mxu0 %v159_v8 }
  0xf4   :  { %1308 = vmatmul.mubr.msk.f32.gmra.mxu1 %vm296_vm1, %v153_v9 }
  0xf5   :  { %1310 = vmatprep.mubr.msk.f32.mxu1 %vm1328_vm0, %v1327_v0 }
  0xf6   :  { %917 = vmatmul.mubr.f32.gmra.mxu0 %v158_v10 }
  0xf7   :  { %921 = vmatprep.mubr.f32.mxu0 %v166_v11 }
  0xf8   :  { %1311 = vmatmul.mubr.msk.f32.gmra.mxu1 %vm296_vm1, %v160_v12 }
  0xf9   :  { %1313 = vmatprep.mubr.msk.f32.mxu1 %vm1328_vm0, %v1327_v0 }
  0xfa   :  { %922 = vmatmul.mubr.f32.gmra.mxu0 %v165_v13 }
  0xfb   :  { %926 = vmatprep.mubr.f32.mxu0 %v173_v14 }
  0xfc   :  { %1314 = vmatmul.mubr.msk.f32.gmra.mxu1 %vm296_vm1, %v167_v15 }
  0xfd   :  { %1316 = vmatprep.mubr.msk.f32.mxu1 %vm1328_vm0, %v1327_v0 }
  0xfe   :  { %927 = vmatmul.mubr.f32.gmra.mxu0 %v172_v16 }
  0xff   :  { %931 = vmatprep.mubr.f32.mxu0 %v180_v17 }
 0x100   :  { %1317 = vmatmul.mubr.msk.f32.gmra.mxu1 %vm296_vm1, %v174_v18 }
 0x101   :  { %1319 = vmatprep.mubr.msk.f32.mxu1 %vm1328_vm0, %v1327_v0  ;;  %v438_v23 = vpop.f32.mrf.mxu0 }
 0x102   :  { %932 = vmatmul.mubr.f32.gmra.mxu0 %v179_v19  ;;  %v439_v24 = vadd.f32 %v2334_v20, %v438_v23 }
 0x103   :  { %936 = vmatprep.mubr.f32.mxu0 %v187_v21  ;;  %v628_v26 = vpop.f32.mrf.mxu1  ;;  %v440_v27 = vpop.f32.mrf.mxu0 }
 0x104   :  { %1320 = vmatmul.mubr.msk.f32.gmra.mxu1 %vm296_vm1, %v181_v22  ;;  %v2349_v28 = vadd.f32 %v628_v26, %v439_v24 }
 0x105   :  { %1322 = vmatprep.mubr.msk.f32.mxu1 %vm1328_vm0, %v1327_v0  ;;  %v630_v30 = vpop.f32.mrf.mxu1 }
 0x106   :  { %v443_v31 = vpop.f32.mrf.mxu0  ;;  %937 = vmatmul.mubr.f32.gmra.mxu0 %v186_v25 }
 0x107   :  { %v444_v32 = vadd.f32 %v2334_v20, %v443_v31  ;;  %v633_v33 = vpop.f32.mrf.mxu1 }
 0x108   :  { %1323 = vmatmul.mubr.msk.f32.gmra.mxu1 %vm296_vm1, %v188_v29  ;;  %v445_v34 = vpop.f32.mrf.mxu0 }
 0x109   :  { %v2358_v35 = vadd.f32 %v633_v33, %v444_v32  ;;  %v635_v36 = vpop.f32.mrf.mxu1 }
 0x10a   :  { %v448_v37 = vpop.f32.mrf.mxu0 }
 0x10b   :  { %v449_v38 = vadd.f32 %v2334_v20, %v448_v37 }
 0x10c   :  { %v638_v0 = vpop.f32.mrf.mxu1  ;;  %v450_v39 = vpop.f32.mrf.mxu0 }
 0x10d   :  { %v2361_v40 = vadd.f32 %v638_v0, %v449_v38 }
 0x10e   :  { %v640_v41 = vpop.f32.mrf.mxu1  ;;  %v453_v42 = vpop.f32.mrf.mxu0 }
 0x10f   :  { %v454_v43 = vadd.f32 %v2334_v20, %v453_v42 }
 0x110   :  { %v643_v44 = vpop.f32.mrf.mxu1  ;;  %v455_v45 = vpop.f32.mrf.mxu0 }
 0x111   :  { %v2364_v46 = vadd.f32 %v643_v44, %v454_v43 }
 0x112   :  { %v645_v47 = vpop.f32.mrf.mxu1  ;;  %v458_v48 = vpop.f32.mrf.mxu0 }
 0x113   :  { %v459_v49 = vadd.f32 %v2334_v20, %v458_v48 }
 0x114   :  { %v648_v50 = vpop.f32.mrf.mxu1  ;;  %v460_v51 = vpop.f32.mrf.mxu0 }
 0x115   :  { %v2367_v52 = vadd.f32 %v648_v50, %v459_v49 }
 0x116   :  { %v650_v53 = vpop.f32.mrf.mxu1  ;;  %v463_v54 = vpop.f32.mrf.mxu0 }
 0x117   :  { %v464_v55 = vadd.f32 %v2334_v20, %v463_v54 }
 0x118   :  { %v653_v56 = vpop.f32.mrf.mxu1  ;;  %v465_v57 = vpop.f32.mrf.mxu0 }
 0x119   :  { %v2370_v58 = vadd.f32 %v653_v56, %v464_v55 }
 0x11a   :  { %v655_v59 = vpop.f32.mrf.mxu1  ;;  %v468_v60 = vpop.f32.mrf.mxu0 }
 0x11b   :  { %v469_v61 = vadd.f32 %v2334_v20, %v468_v60 }
 0x11c   :  { %v658_v62 = vpop.f32.mrf.mxu1  ;;  %v470_v63 = vpop.f32.mrf.mxu0 }
 0x11d   :  { %v2373_v1 = vadd.f32 %v658_v62, %v469_v61 }
 0x11e   :  { %v660_v2 = vpop.f32.mrf.mxu1  ;;  %v473_v3 = vpop.f32.mrf.mxu0 }
 0x11f   :  { %v474_v4 = vadd.f32 %v2334_v20, %v473_v3 }
 0x120   :  { %v663_v5 = vpop.f32.mrf.mxu1  ;;  %v475_v6 = vpop.f32.mrf.mxu0 }
 0x121   :  { %v2376_v7 = vadd.f32 %v663_v5, %v474_v4 }
 0x122   :  { %v665_v8 = vpop.f32.mrf.mxu1  ;;  %v478_v9 = vpop.f32.mrf.mxu0 }
 0x123   :  { %v479_v10 = vadd.f32 %v2334_v20, %v478_v9 }
 0x124   :  { %v668_v11 = vpop.f32.mrf.mxu1  ;;  %v480_v12 = vpop.f32.mrf.mxu0 }
 0x125   :  { %v2379_v13 = vadd.f32 %v668_v11, %v479_v10 }
 0x126   :  { %v670_v14 = vpop.f32.mrf.mxu1  ;;  %v483_v15 = vpop.f32.mrf.mxu0 }
 0x127   :  { %v484_v16 = vadd.f32 %v2334_v20, %v483_v15 }
 0x128   :  { %v673_v17 = vpop.f32.mrf.mxu1  ;;  %v485_v18 = vpop.f32.mrf.mxu0 }
 0x129   :  { %v2382_v19 = vadd.f32 %v673_v17, %v484_v16 }
 0x12a   :  { %v675_v21 = vpop.f32.mrf.mxu1  ;;  %v488_v22 = vpop.f32.mrf.mxu0 }
 0x12b   :  { %v489_v23 = vadd.f32 %v2334_v20, %v488_v22 }
 0x12c   :  { %v678_v24 = vpop.f32.mrf.mxu1  ;;  %v490_v25 = vpop.f32.mrf.mxu0 }
 0x12d   :  { %v2385_v26 = vadd.f32 %v678_v24, %v489_v23 }
 0x12e   :  { %v680_v27 = vpop.f32.mrf.mxu1  ;;  %v493_v29 = vpop.f32.mrf.mxu0 }
 0x12f   :  { %v494_v30 = vadd.f32 %v2334_v20, %v493_v29 }
 0x130   :  { %v683_v31 = vpop.f32.mrf.mxu1  ;;  %v495_v32 = vpop.f32.mrf.mxu0 }
 0x131   :  { %v2388_v33 = vadd.f32 %v683_v31, %v494_v30 }
 0x132   :  { %v685_v34 = vpop.f32.mrf.mxu1  ;;  %v498_v36 = vpop.f32.mrf.mxu0 }
 0x133   :  { %v499_v37 = vadd.f32 %v2334_v20, %v498_v36 }
 0x134   :  { %v688_v38 = vpop.f32.mrf.mxu1  ;;  %v500_v0 = vpop.f32.mrf.mxu0 }
 0x135   :  { %v2391_v39 = vadd.f32 %v688_v38, %v499_v37 }
 0x136   :  { %v690_v41 = vpop.f32.mrf.mxu1  ;;  %v503_v42 = vpop.f32.mrf.mxu0 }
 0x137   :  { %v504_v43 = vadd.f32 %v2334_v20, %v503_v42 }
 0x138   :  { %v693_v44 = vpop.f32.mrf.mxu1  ;;  %v505_v45 = vpop.f32.mrf.mxu0 }
 0x139   :  { %v2394_v47 = vadd.f32 %v693_v44, %v504_v43 }
 0x13a   :  { %v695_v48 = vpop.f32.mrf.mxu1  ;;  %v508_v49 = vpop.f32.mrf.mxu0 }
 0x13b   :  { %v509_v50 = vadd.f32 %v2334_v20, %v508_v49 }
 0x13c   :  { %v698_v51 = vpop.f32.mrf.mxu1  ;;  %v510_v53 = vpop.f32.mrf.mxu0 }
 0x13d   :  { %v2397_v54 = vadd.f32 %v698_v51, %v509_v50 }
 0x13e   :  { %v700_v55 = vpop.f32.mrf.mxu1  ;;  %v513_v56 = vpop.f32.mrf.mxu0 }
 0x13f   :  { %v514_v57 = vadd.f32 %v2334_v20, %v513_v56 }
 0x140   :  { %v703_v59 = vpop.f32.mrf.mxu1  ;;  %v515_v60 = vpop.f32.mrf.mxu0 }
 0x141   :  { %v2400_v61 = vadd.f32 %v703_v59, %v514_v57 }
 0x142   :  { %v705_v62 = vpop.f32.mrf.mxu1  ;;  %v518_v63 = vpop.f32.mrf.mxu0 }
 0x143   :  { %v519_v2 = vadd.f32 %v2334_v20, %v518_v63 }
 0x144   :  { %v708_v3 = vpop.f32.mrf.mxu1  ;;  %v520_v4 = vpop.f32.mrf.mxu0 }
 0x145   :  { %v2403_v5 = vadd.f32 %v708_v3, %v519_v2 }
 0x146   :  { %v710_v6 = vpop.f32.mrf.mxu1  ;;  %v523_v8 = vpop.f32.mrf.mxu0 }
 0x147   :  { %v524_v9 = vadd.f32 %v2334_v20, %v523_v8 }
 0x148   :  { %v713_v10 = vpop.f32.mrf.mxu1  ;;  %v525_v11 = vpop.f32.mrf.mxu0 }
 0x149   :  { %v2406_v12 = vadd.f32 %v713_v10, %v524_v9 }
 0x14a   :  { %v715_v14 = vpop.f32.mrf.mxu1  ;;  %v528_v15 = vpop.f32.mrf.mxu0 }
 0x14b   :  { %v529_v16 = vadd.f32 %v2334_v20, %v528_v15 }
 0x14c   :  { %v718_v17 = vpop.f32.mrf.mxu1  ;;  %v530_v18 = vpop.f32.mrf.mxu0 }
 0x14d   :  { %v2409_v21 = vadd.f32 %v718_v17, %v529_v16 }
 0x14e   :  { %v720_v22 = vpop.f32.mrf.mxu1  ;;  %v533_v23 = vpop.f32.mrf.mxu0 }
 0x14f   :  { %v534_v24 = vadd.f32 %v2334_v20, %v533_v23 }
 0x150   :  { %v723_v25 = vpop.f32.mrf.mxu1  ;;  %v535_v27 = vpop.f32.mrf.mxu0 }
 0x151   :  { %v2412_v29 = vadd.f32 %v723_v25, %v534_v24 }
 0x152   :  { %v725_v30 = vpop.f32.mrf.mxu1  ;;  %v538_v31 = vpop.f32.mrf.mxu0 }
 0x153   :  { %v539_v32 = vadd.f32 %v2334_v20, %v538_v31 }
 0x154   :  { %v728_v34 = vpop.f32.mrf.mxu1  ;;  %v540_v36 = vpop.f32.mrf.mxu0 }
 0x155   :  { %v2415_v37 = vadd.f32 %v728_v34, %v539_v32 }
 0x156   :  { %v730_v38 = vpop.f32.mrf.mxu1  ;;  %v543_v0 = vpop.f32.mrf.mxu0 }
 0x157   :  { %v544_v41 = vadd.f32 %v2334_v20, %v543_v0 }
 0x158   :  { %v733_v42 = vpop.f32.mrf.mxu1  ;;  %v545_v43 = vpop.f32.mrf.mxu0 }
 0x159   :  { %v2418_v44 = vadd.f32 %v733_v42, %v544_v41 }
 0x15a   :  { %v735_v45 = vpop.f32.mrf.mxu1  ;;  %v548_v48 = vpop.f32.mrf.mxu0 }
 0x15b   :  { %v549_v49 = vadd.f32 %v2334_v20, %v548_v48 }
 0x15c   :  { %v738_v50 = vpop.f32.mrf.mxu1  ;;  %v550_v51 = vpop.f32.mrf.mxu0 }
 0x15d   :  { %v2421_v53 = vadd.f32 %v738_v50, %v549_v49 }
 0x15e   :  { %v740_v55 = vpop.f32.mrf.mxu1  ;;  %v553_v56 = vpop.f32.mrf.mxu0 }
 0x15f   :  { %v554_v57 = vadd.f32 %v2334_v20, %v553_v56 }
 0x160   :  { %v743_v59 = vpop.f32.mrf.mxu1  ;;  %v555_v60 = vpop.f32.mrf.mxu0 }
 0x161   :  { %v2424_v62 = vadd.f32 %v743_v59, %v554_v57 }
 0x162   :  { %v745_v63 = vpop.f32.mrf.mxu1  ;;  %v558_v2 = vpop.f32.mrf.mxu0 }
 0x163   :  { %v559_v3 = vadd.f32 %v2334_v20, %v558_v2 }
 0x164   :  { %v748_v4 = vpop.f32.mrf.mxu1  ;;  %v560_v6 = vpop.f32.mrf.mxu0 }
 0x165   :  { %v2427_v8 = vadd.f32 %v748_v4, %v559_v3 }
 0x166   :  { %v750_v9 = vpop.f32.mrf.mxu1  ;;  %v818_v10 = vpop.f32.mrf.mxu0 }
 0x167   :  { %v819_v11 = vadd.f32 %v818_v10, %v2349_v28 }
 0x168   :  { %v1008_v14 = vpop.f32.mrf.mxu1  ;;  %v820_v15 = vpop.f32.mrf.mxu0 }
 0x169   :  { %v1009_v16 = vadd.f32 %v1008_v14, %v819_v11 }
 0x16a   :  { %v1252_v17 = vpop.f32.mrf.mxu1  ;;  %v823_v18 = vpop.f32.mrf.mxu0 }
 0x16b   :  { %v1132_v22 = vmax.f32 %v1009_v16, 0.0  ;;  %v824_v23 = vadd.f32 %v823_v18, %v2358_v35 }
 0x16c   :  { %v1013_v24 = vpop.f32.mrf.mxu1  ;;  %v825_v25 = vpop.f32.mrf.mxu0 }
 0x16d   :  { %1158 = vst.msk [vmem:[%s2557_s3] sm:$0xff] %vm1157_vm2, %v1132_v22  ;;  %v1014_v20 = vadd.f32 %v1013_v24, %v824_v23 }
 0x16e   :  { %v1255_v27 = vpop.f32.mrf.mxu1  ;;  %v828_v30 = vpop.f32.mrf.mxu0 }
 0x16f   :  { %v1133_v28 = vmax.f32 %v1014_v20, 0.0  ;;  %v829_v31 = vadd.f32 %v828_v30, %v2361_v40 }
 0x170   :  { %v1018_v32 = vpop.f32.mrf.mxu1  ;;  %v830_v34 = vpop.f32.mrf.mxu0 }
 0x171   :  { %1159 = vst.msk [vmem:[%s2557_s3 + $0x8] sm:$0xff] %vm1157_vm2, %v1133_v28  ;;  %v1019_v35 = vadd.f32 %v1018_v32, %v829_v31 }
 0x172   :  { %v1258_v36 = vpop.f32.mrf.mxu1  ;;  %v833_v38 = vpop.f32.mrf.mxu0 }
 0x173   :  { %v1134_v0 = vmax.f32 %v1019_v35, 0.0  ;;  %v834_v41 = vadd.f32 %v833_v38, %v2364_v46 }
 0x174   :  { %v1023_v42 = vpop.f32.mrf.mxu1  ;;  %v835_v43 = vpop.f32.mrf.mxu0 }
 0x175   :  { %1160 = vst.msk [vmem:[%s2557_s3 + $0x10] sm:$0xff] %vm1157_vm2, %v1134_v0  ;;  %v1024_v40 = vadd.f32 %v1023_v42, %v834_v41 }
 0x176   :  { %v1261_v45 = vpop.f32.mrf.mxu1  ;;  %v838_v48 = vpop.f32.mrf.mxu0 }
 0x177   :  { %v1135_v49 = vmax.f32 %v1024_v40, 0.0  ;;  %v839_v50 = vadd.f32 %v838_v48, %v2367_v52 }
 0x178   :  { %v1028_v51 = vpop.f32.mrf.mxu1  ;;  %v840_v55 = vpop.f32.mrf.mxu0 }
 0x179   :  { %1161 = vst.msk [vmem:[%s2557_s3 + $0x18] sm:$0xff] %vm1157_vm2, %v1135_v49  ;;  %v1029_v46 = vadd.f32 %v1028_v51, %v839_v50 }
 0x17a   :  { %v1264_v56 = vpop.f32.mrf.mxu1  ;;  %v843_v57 = vpop.f32.mrf.mxu0 }
 0x17b   :  { %v1136_v59 = vmax.f32 %v1029_v46, 0.0  ;;  %v844_v60 = vadd.f32 %v843_v57, %v2370_v58 }
 0x17c   :  { %v1033_v63 = vpop.f32.mrf.mxu1  ;;  %v845_v2 = vpop.f32.mrf.mxu0 }
 0x17d   :  { %1162 = vst.msk [vmem:[%s2557_s3 + $0x20] sm:$0xff] %vm1157_vm2, %v1136_v59  ;;  %v1034_v52 = vadd.f32 %v1033_v63, %v844_v60 }
 0x17e   :  { %v1267_v3 = vpop.f32.mrf.mxu1  ;;  %v848_v4 = vpop.f32.mrf.mxu0 }
 0x17f   :  { %v1137_v6 = vmax.f32 %v1034_v52, 0.0  ;;  %v849_v9 = vadd.f32 %v848_v4, %v2373_v1 }
 0x180   :  { %v1038_v10 = vpop.f32.mrf.mxu1  ;;  %v850_v11 = vpop.f32.mrf.mxu0 }
 0x181   :  { %1163 = vst.msk [vmem:[%s2557_s3 + $0x28] sm:$0xff] %vm1157_vm2, %v1137_v6  ;;  %v1039_v58 = vadd.f32 %v1038_v10, %v849_v9 }
 0x182   :  { %v1270_v14 = vpop.f32.mrf.mxu1  ;;  %v853_v15 = vpop.f32.mrf.mxu0 }
 0x183   :  { %v1138_v16 = vmax.f32 %v1039_v58, 0.0  ;;  %v854_v17 = vadd.f32 %v853_v15, %v2376_v7 }
 0x184   :  { %v1043_v18 = vpop.f32.mrf.mxu1  ;;  %v855_v22 = vpop.f32.mrf.mxu0 }
 0x185   :  { %1164 = vst.msk [vmem:[%s2557_s3 + $0x30] sm:$0xff] %vm1157_vm2, %v1138_v16  ;;  %v1044_v1 = vadd.f32 %v1043_v18, %v854_v17 }
 0x186   :  { %v1273_v23 = vpop.f32.mrf.mxu1  ;;  %v858_v24 = vpop.f32.mrf.mxu0 }
 0x187   :  { %v1139_v25 = vmax.f32 %v1044_v1, 0.0  ;;  %v859_v20 = vadd.f32 %v858_v24, %v2379_v13 }
 0x188   :  { %v1048_v27 = vpop.f32.mrf.mxu1  ;;  %v860_v30 = vpop.f32.mrf.mxu0 }
 0x189   :  { %1165 = vst.msk [vmem:[%s2557_s3 + $0x38] sm:$0xff] %vm1157_vm2, %v1139_v25  ;;  %v1049_v7 = vadd.f32 %v1048_v27, %v859_v20 }
 0x18a   :  { %v1276_v28 = vpop.f32.mrf.mxu1  ;;  %v863_v31 = vpop.f32.mrf.mxu0 }
 0x18b   :  { %v1140_v32 = vmax.f32 %v1049_v7, 0.0  ;;  %v864_v34 = vadd.f32 %v863_v31, %v2382_v19 }
 0x18c   :  { %v1053_v35 = vpop.f32.mrf.mxu1  ;;  %v865_v36 = vpop.f32.mrf.mxu0 }
 0x18d   :  { %1166 = vst.msk [vmem:[%s2557_s3 + $0x40] sm:$0xff] %vm1157_vm2, %v1140_v32  ;;  %v1054_v13 = vadd.f32 %v1053_v35, %v864_v34 }
 0x18e   :  { %v1279_v38 = vpop.f32.mrf.mxu1  ;;  %v868_v0 = vpop.f32.mrf.mxu0 }
 0x18f   :  { %v1141_v41 = vmax.f32 %v1054_v13, 0.0  ;;  %v869_v42 = vadd.f32 %v868_v0, %v2385_v26 }
 0x190   :  { %v1058_v43 = vpop.f32.mrf.mxu1  ;;  %v870_v40 = vpop.f32.mrf.mxu0 }
 0x191   :  { %1167 = vst.msk [vmem:[%s2557_s3 + $0x48] sm:$0xff] %vm1157_vm2, %v1141_v41  ;;  %v1059_v19 = vadd.f32 %v1058_v43, %v869_v42 }
 0x192   :  { %v1282_v45 = vpop.f32.mrf.mxu1  ;;  %v873_v48 = vpop.f32.mrf.mxu0 }
 0x193   :  { %v1142_v49 = vmax.f32 %v1059_v19, 0.0  ;;  %v874_v50 = vadd.f32 %v873_v48, %v2388_v33 }
 0x194   :  { %v1063_v51 = vpop.f32.mrf.mxu1  ;;  %v875_v55 = vpop.f32.mrf.mxu0 }
 0x195   :  { %1168 = vst.msk [vmem:[%s2557_s3 + $0x50] sm:$0xff] %vm1157_vm2, %v1142_v49  ;;  %v1064_v26 = vadd.f32 %v1063_v51, %v874_v50 }
 0x196   :  { %v1285_v46 = vpop.f32.mrf.mxu1  ;;  %v878_v56 = vpop.f32.mrf.mxu0 }
 0x197   :  { %v1143_v57 = vmax.f32 %v1064_v26, 0.0  ;;  %v879_v59 = vadd.f32 %v878_v56, %v2391_v39 }
 0x198   :  { %v1068_v60 = vpop.f32.mrf.mxu1  ;;  %v880_v63 = vpop.f32.mrf.mxu0 }
 0x199   :  { %1169 = vst.msk [vmem:[%s2557_s3 + $0x58] sm:$0xff] %vm1157_vm2, %v1143_v57  ;;  %v1069_v33 = vadd.f32 %v1068_v60, %v879_v59 }
 0x19a   :  { %v1288_v2 = vpop.f32.mrf.mxu1  ;;  %v883_v52 = vpop.f32.mrf.mxu0 }
 0x19b   :  { %v1144_v3 = vmax.f32 %v1069_v33, 0.0  ;;  %v884_v4 = vadd.f32 %v883_v52, %v2394_v47 }
 0x19c   :  { %v1073_v6 = vpop.f32.mrf.mxu1  ;;  %v885_v9 = vpop.f32.mrf.mxu0 }
 0x19d   :  { %1170 = vst.msk [vmem:[%s2557_s3 + $0x60] sm:$0xff] %vm1157_vm2, %v1144_v3  ;;  %v1074_v39 = vadd.f32 %v1073_v6, %v884_v4 }
 0x19e   :  { %v1291_v10 = vpop.f32.mrf.mxu1  ;;  %v888_v11 = vpop.f32.mrf.mxu0 }
 0x19f   :  { %v1145_v58 = vmax.f32 %v1074_v39, 0.0  ;;  %v889_v14 = vadd.f32 %v888_v11, %v2397_v54 }
 0x1a0   :  { %v1078_v15 = vpop.f32.mrf.mxu1  ;;  %v890_v16 = vpop.f32.mrf.mxu0 }
 0x1a1   :  { %1171 = vst.msk [vmem:[%s2557_s3 + $0x68] sm:$0xff] %vm1157_vm2, %v1145_v58  ;;  %v1079_v47 = vadd.f32 %v1078_v15, %v889_v14 }
 0x1a2   :  { %v1294_v17 = vpop.f32.mrf.mxu1  ;;  %v893_v18 = vpop.f32.mrf.mxu0 }
 0x1a3   :  { %v1146_v22 = vmax.f32 %v1079_v47, 0.0  ;;  %v894_v1 = vadd.f32 %v893_v18, %v2400_v61 }
 0x1a4   :  { %v1083_v23 = vpop.f32.mrf.mxu1  ;;  %v895_v24 = vpop.f32.mrf.mxu0 }
 0x1a5   :  { %1172 = vst.msk [vmem:[%s2557_s3 + $0x70] sm:$0xff] %vm1157_vm2, %v1146_v22  ;;  %v1084_v54 = vadd.f32 %v1083_v23, %v894_v1 }
 0x1a6   :  { %v1297_v25 = vpop.f32.mrf.mxu1  ;;  %v898_v20 = vpop.f32.mrf.mxu0 }
 0x1a7   :  { %v1147_v27 = vmax.f32 %v1084_v54, 0.0  ;;  %v899_v30 = vadd.f32 %v898_v20, %v2403_v5 }
 0x1a8   :  { %v1088_v7 = vpop.f32.mrf.mxu1  ;;  %v900_v28 = vpop.f32.mrf.mxu0 }
 0x1a9   :  { %1173 = vst.msk [vmem:[%s2557_s3 + $0x78] sm:$0xff] %vm1157_vm2, %v1147_v27  ;;  %v1089_v61 = vadd.f32 %v1088_v7, %v899_v30 }
 0x1aa   :  { %v1300_v31 = vpop.f32.mrf.mxu1  ;;  %v903_v32 = vpop.f32.mrf.mxu0 }
 0x1ab   :  { %v1148_v34 = vmax.f32 %v1089_v61, 0.0  ;;  %v904_v35 = vadd.f32 %v903_v32, %v2406_v12 }
 0x1ac   :  { %v1093_v36 = vpop.f32.mrf.mxu1  ;;  %v905_v13 = vpop.f32.mrf.mxu0 }
 0x1ad   :  { %1174 = vst.msk [vmem:[%s2557_s3 + $0x80] sm:$0xff] %vm1157_vm2, %v1148_v34  ;;  %v1094_v5 = vadd.f32 %v1093_v36, %v904_v35 }
 0x1ae   :  { %v1303_v38 = vpop.f32.mrf.mxu1  ;;  %v908_v0 = vpop.f32.mrf.mxu0 }
 0x1af   :  { %v1149_v41 = vmax.f32 %v1094_v5, 0.0  ;;  %v909_v42 = vadd.f32 %v908_v0, %v2409_v21 }
 0x1b0   :  { %v1098_v43 = vpop.f32.mrf.mxu1  ;;  %v910_v40 = vpop.f32.mrf.mxu0 }
 0x1b1   :  { %1175 = vst.msk [vmem:[%s2557_s3 + $0x88] sm:$0xff] %vm1157_vm2, %v1149_v41  ;;  %v1099_v12 = vadd.f32 %v1098_v43, %v909_v42 }
 0x1b2   :  { %v1306_v19 = vpop.f32.mrf.mxu1  ;;  %v913_v45 = vpop.f32.mrf.mxu0 }
 0x1b3   :  { %v1150_v48 = vmax.f32 %v1099_v12, 0.0  ;;  %v914_v49 = vadd.f32 %v913_v45, %v2412_v29 }
 0x1b4   :  { %v1103_v50 = vpop.f32.mrf.mxu1  ;;  %v915_v51 = vpop.f32.mrf.mxu0 }
 0x1b5   :  { %1176 = vst.msk [vmem:[%s2557_s3 + $0x90] sm:$0xff] %vm1157_vm2, %v1150_v48  ;;  %v1104_v21 = vadd.f32 %v1103_v50, %v914_v49 }
 0x1b6   :  { %v1309_v55 = vpop.f32.mrf.mxu1  ;;  %v918_v26 = vpop.f32.mrf.mxu0 }
 0x1b7   :  { %v1151_v46 = vmax.f32 %v1104_v21, 0.0  ;;  %v919_v56 = vadd.f32 %v918_v26, %v2415_v37 }
 0x1b8   :  { %v1108_v57 = vpop.f32.mrf.mxu1  ;;  %v920_v59 = vpop.f32.mrf.mxu0 }
 0x1b9   :  { %1177 = vst.msk [vmem:[%s2557_s3 + $0x98] sm:$0xff] %vm1157_vm2, %v1151_v46  ;;  %v1109_v29 = vadd.f32 %v1108_v57, %v919_v56 }
 0x1ba   :  { %v1312_v60 = vpop.f32.mrf.mxu1  ;;  %v923_v63 = vpop.f32.mrf.mxu0 }
 0x1bb   :  { %v1152_v33 = vmax.f32 %v1109_v29, 0.0  ;;  %v924_v2 = vadd.f32 %v923_v63, %v2418_v44 }
 0x1bc   :  { %v1113_v52 = vpop.f32.mrf.mxu1  ;;  %v925_v3 = vpop.f32.mrf.mxu0 }
 0x1bd   :  { %1178 = vst.msk [vmem:[%s2557_s3 + $0xa0] sm:$0xff] %vm1157_vm2, %v1152_v33  ;;  %v1114_v37 = vadd.f32 %v1113_v52, %v924_v2 }
 0x1be   :  { %v1315_v4 = vpop.f32.mrf.mxu1  ;;  %v928_v6 = vpop.f32.mrf.mxu0 }
 0x1bf   :  { %v1153_v9 = vmax.f32 %v1114_v37, 0.0  ;;  %v929_v39 = vadd.f32 %v928_v6, %v2421_v53 }
 0x1c0   :  { %v1118_v10 = vpop.f32.mrf.mxu1  ;;  %v930_v11 = vpop.f32.mrf.mxu0 }
 0x1c1   :  { %1179 = vst.msk [vmem:[%s2557_s3 + $0xa8] sm:$0xff] %vm1157_vm2, %v1153_v9  ;;  %v1119_v44 = vadd.f32 %v1118_v10, %v929_v39 }
 0x1c2   :  { %v1318_v58 = vpop.f32.mrf.mxu1  ;;  %v933_v14 = vpop.f32.mrf.mxu0 }
 0x1c3   :  { %v1154_v15 = vmax.f32 %v1119_v44, 0.0  ;;  %v934_v16 = vadd.f32 %v933_v14, %v2424_v62 }
 0x1c4   :  { %v1123_v47 = vpop.f32.mrf.mxu1  ;;  %v935_v17 = vpop.f32.mrf.mxu0 }
 0x1c5   :  { %1180 = vst.msk [vmem:[%s2557_s3 + $0xb0] sm:$0xff] %vm1157_vm2, %v1154_v15  ;;  %v1124_v53 = vadd.f32 %v1123_v47, %v934_v16 }
 0x1c6   :  { %v1321_v18 = vpop.f32.mrf.mxu1  ;;  %v938_v22 = vpop.f32.mrf.mxu0 }
 0x1c7   :  { %v1155_v1 = vmax.f32 %v1124_v53, 0.0  ;;  %v939_v23 = vadd.f32 %v938_v22, %v2427_v8 }
 0x1c8   :  { %v1128_v24 = vpop.f32.mrf.mxu1  ;;  %v940_v54 = vpop.f32.mrf.mxu0 }
 0x1c9   :  { %1181 = vst.msk [vmem:[%s2557_s3 + $0xb8] sm:$0xff] %vm1157_vm2, %v1155_v1  ;;  %v1129_v62 = vadd.f32 %v1128_v24, %v939_v23 }
 0x1ca   :  { %v1324_v25 = vpop.f32.mrf.mxu1 }
 0x1cb   :  { %v1156_v20 = vmax.f32 %v1129_v62, 0.0 }
 0x1cd   :  { %1182 = vst.msk [vmem:[%s2557_s3 + $0xc0] sm:$0xff] %vm1157_vm2, %v1156_v20 }

// kernel: cnn_forward.9
= control target key start
LH: loop header
LB: loop body
LE: loop exit
PB: predicated region body
PF: predicated region fallthrough
CT: control target
= control target key end

     0   :  { %s2762_s0 = inlined_call_operand.vmem [shape: f32[2,1600], index: 0, kind: input, shape index: {}]   ;;  %s2763_s1 = inlined_call_operand.vmem [shape: f32[1600,256], index: 1, kind: input, shape index: {}]   ;;  %s2764_s2 = inlined_call_operand.vmem [shape: f32[1,256], index: 2, kind: input, shape index: {}]   ;;  %s2765_s3 = inlined_call_operand.vmem [shape: f32[256,64], index: 3, kind: input, shape index: {}]   ;;  %s2766_s4 = inlined_call_operand.vmem [shape: f32[1,64], index: 4, kind: input, shape index: {}]   ;;  %s2767_s5 = inlined_call_operand.vmem [shape: f32[64,10], index: 5, kind: input, shape index: {}]   ;;  %s2768_s6 = inlined_call_operand.vmem [shape: f32[1,10], index: 6, kind: input, shape index: {}]   ;;  %s2769_s7 = inlined_call_operand.hbm [shape: f32[2,10], index: 7, kind: output, shape index: {}]  }
   0x1   :  { %v62_v0 = vld [vmem:[%s2763_s1 + $0xf8] sm:$0xff]  ;;  %v61_v1 = vld [vmem:[%s2763_s1 + $0xf0] sm:$0xff]  ;;  %v60_v2 = vld [vmem:[%s2763_s1 + $0xe8] sm:$0xff] }
   0x2   :  { %520 = vmatprep.subr.mxu0 %v62_v0  ;;  %v126_v3 = vld [vmem:[%s2763_s1 + $0x2f8] sm:$0xff]  ;;  %v59_v4 = vld [vmem:[%s2763_s1 + $0xe0] sm:$0xff]  ;;  %v125_v5 = vld [vmem:[%s2763_s1 + $0x2f0] sm:$0xff] }
   0x3   :  { %521 = vmatpush1.msra.mxu0 %v61_v1  ;;  %591 = vmatprep.subr.mxu1 %v126_v3  ;;  %v58_v6 = vld [vmem:[%s2763_s1 + $0xd8] sm:$0xff]  ;;  %v124_v7 = vld [vmem:[%s2763_s1 + $0x2e8] sm:$0xff]  ;;  %v57_v8 = vld [vmem:[%s2763_s1 + $0xd0] sm:$0xff] }
   0x4   :  { %522 = vmatprep.subr.mxu0 %v60_v2  ;;  %592 = vmatpush1.msra.mxu1 %v125_v5  ;;  %v123_v9 = vld [vmem:[%s2763_s1 + $0x2e0] sm:$0xff]  ;;  %v122_v10 = vld [vmem:[%s2763_s1 + $0x2d8] sm:$0xff]  ;;  %v56_v11 = vld [vmem:[%s2763_s1 + $0xc8] sm:$0xff] }
   0x5   :  { %523 = vmatpush1.msra.mxu0 %v59_v4  ;;  %593 = vmatprep.subr.mxu1 %v124_v7  ;;  %v121_v12 = vld [vmem:[%s2763_s1 + $0x2d0] sm:$0xff]  ;;  %v55_v13 = vld [vmem:[%s2763_s1 + $0xc0] sm:$0xff]  ;;  %v120_v14 = vld [vmem:[%s2763_s1 + $0x2c8] sm:$0xff] }
   0x6   :  { %524 = vmatprep.subr.mxu0 %v58_v6  ;;  %594 = vmatpush1.msra.mxu1 %v123_v9  ;;  %v54_v15 = vld [vmem:[%s2763_s1 + $0xb8] sm:$0xff]  ;;  %v119_v16 = vld [vmem:[%s2763_s1 + $0x2c0] sm:$0xff]  ;;  %v53_v17 = vld [vmem:[%s2763_s1 + $0xb0] sm:$0xff] }
   0x7   :  { %525 = vmatpush1.msra.mxu0 %v57_v8  ;;  %595 = vmatprep.subr.mxu1 %v122_v10  ;;  %v118_v18 = vld [vmem:[%s2763_s1 + $0x2b8] sm:$0xff]  ;;  %v52_v19 = vld [vmem:[%s2763_s1 + $0xa8] sm:$0xff]  ;;  %v117_v20 = vld [vmem:[%s2763_s1 + $0x2b0] sm:$0xff] }
   0x8   :  { %526 = vmatprep.subr.mxu0 %v56_v11  ;;  %596 = vmatpush1.msra.mxu1 %v121_v12  ;;  %v51_v21 = vld [vmem:[%s2763_s1 + $0xa0] sm:$0xff]  ;;  %v116_v22 = vld [vmem:[%s2763_s1 + $0x2a8] sm:$0xff]  ;;  %v50_v23 = vld [vmem:[%s2763_s1 + $0x98] sm:$0xff] }
   0x9   :  { %527 = vmatpush1.msra.mxu0 %v55_v13  ;;  %597 = vmatprep.subr.mxu1 %v120_v14  ;;  %v115_v24 = vld [vmem:[%s2763_s1 + $0x2a0] sm:$0xff]  ;;  %v49_v25 = vld [vmem:[%s2763_s1 + $0x90] sm:$0xff]  ;;  %v114_v26 = vld [vmem:[%s2763_s1 + $0x298] sm:$0xff] }
   0xa   :  { %528 = vmatprep.subr.mxu0 %v54_v15  ;;  %598 = vmatpush1.msra.mxu1 %v119_v16  ;;  %v48_v27 = vld [vmem:[%s2763_s1 + $0x88] sm:$0xff]  ;;  %v113_v28 = vld [vmem:[%s2763_s1 + $0x290] sm:$0xff]  ;;  %v47_v29 = vld [vmem:[%s2763_s1 + $0x80] sm:$0xff] }
   0xb   :  { %529 = vmatpush1.msra.mxu0 %v53_v17  ;;  %599 = vmatprep.subr.mxu1 %v118_v18  ;;  %v112_v30 = vld [vmem:[%s2763_s1 + $0x288] sm:$0xff]  ;;  %v46_v31 = vld [vmem:[%s2763_s1 + $0x78] sm:$0xff]  ;;  %v111_v32 = vld [vmem:[%s2763_s1 + $0x280] sm:$0xff] }
   0xc   :  { %530 = vmatprep.subr.mxu0 %v52_v19  ;;  %600 = vmatpush1.msra.mxu1 %v117_v20  ;;  %v45_v33 = vld [vmem:[%s2763_s1 + $0x70] sm:$0xff]  ;;  %v110_v34 = vld [vmem:[%s2763_s1 + $0x278] sm:$0xff]  ;;  %v44_v35 = vld [vmem:[%s2763_s1 + $0x68] sm:$0xff] }
   0xd   :  { %531 = vmatpush1.msra.mxu0 %v51_v21  ;;  %601 = vmatprep.subr.mxu1 %v116_v22  ;;  %v109_v36 = vld [vmem:[%s2763_s1 + $0x270] sm:$0xff]  ;;  %v43_v37 = vld [vmem:[%s2763_s1 + $0x60] sm:$0xff]  ;;  %v108_v38 = vld [vmem:[%s2763_s1 + $0x268] sm:$0xff] }
   0xe   :  { %532 = vmatprep.subr.mxu0 %v50_v23  ;;  %602 = vmatpush1.msra.mxu1 %v115_v24  ;;  %v42_v39 = vld [vmem:[%s2763_s1 + $0x58] sm:$0xff]  ;;  %v107_v40 = vld [vmem:[%s2763_s1 + $0x260] sm:$0xff]  ;;  %v41_v41 = vld [vmem:[%s2763_s1 + $0x50] sm:$0xff] }
   0xf   :  { %533 = vmatpush1.msra.mxu0 %v49_v25  ;;  %603 = vmatprep.subr.mxu1 %v114_v26  ;;  %v106_v42 = vld [vmem:[%s2763_s1 + $0x258] sm:$0xff]  ;;  %v40_v43 = vld [vmem:[%s2763_s1 + $0x48] sm:$0xff]  ;;  %v105_v44 = vld [vmem:[%s2763_s1 + $0x250] sm:$0xff] }
  0x10   :  { %534 = vmatprep.subr.mxu0 %v48_v27  ;;  %604 = vmatpush1.msra.mxu1 %v113_v28  ;;  %v39_v45 = vld [vmem:[%s2763_s1 + $0x40] sm:$0xff]  ;;  %v104_v46 = vld [vmem:[%s2763_s1 + $0x248] sm:$0xff]  ;;  %v38_v47 = vld [vmem:[%s2763_s1 + $0x38] sm:$0xff]  ;;  %v433_v27 = vlaneseq  ;;  %v1346_v28 = vmov 1983009808  }
  0x11   :  { %535 = vmatpush1.msra.mxu0 %v47_v29  ;;  %605 = vmatprep.subr.mxu1 %v112_v30  ;;  %v103_v48 = vld [vmem:[%s2763_s1 + $0x240] sm:$0xff]  ;;  %v37_v49 = vld [vmem:[%s2763_s1 + $0x30] sm:$0xff]  ;;  %v102_v50 = vld [vmem:[%s2763_s1 + $0x238] sm:$0xff]  ;;  %v449_v29 = vunpack.c.l.s4 %v1346_v28 }
  0x12   :  { %536 = vmatprep.subr.mxu0 %v46_v31  ;;  %606 = vmatpush1.msra.mxu1 %v111_v32  ;;  %v36_v51 = vld [vmem:[%s2763_s1 + $0x28] sm:$0xff]  ;;  %v101_v52 = vld [vmem:[%s2763_s1 + $0x230] sm:$0xff]  ;;  %v35_v53 = vld [vmem:[%s2763_s1 + $0x20] sm:$0xff] }
  0x13   :  { %537 = vmatpush1.msra.mxu0 %v45_v33  ;;  %607 = vmatprep.subr.mxu1 %v110_v34  ;;  %v100_v54 = vld [vmem:[%s2763_s1 + $0x228] sm:$0xff]  ;;  %v34_v55 = vld [vmem:[%s2763_s1 + $0x18] sm:$0xff]  ;;  %v99_v56 = vld [vmem:[%s2763_s1 + $0x220] sm:$0xff] }
  0x14   :  { %538 = vmatprep.subr.mxu0 %v44_v35  ;;  %608 = vmatpush1.msra.mxu1 %v109_v36  ;;  %v33_v57 = vld [vmem:[%s2763_s1 + $0x10] sm:$0xff]  ;;  %v98_v58 = vld [vmem:[%s2763_s1 + $0x218] sm:$0xff]  ;;  %v32_v59 = vld [vmem:[%s2763_s1 + $0x8] sm:$0xff] }
  0x15   :  { %539 = vmatpush1.msra.mxu0 %v43_v37  ;;  %609 = vmatprep.subr.mxu1 %v108_v38  ;;  %v97_v60 = vld [vmem:[%s2763_s1 + $0x210] sm:$0xff]  ;;  %v31_v61 = vld [vmem:[%s2763_s1] sm:$0xff]  ;;  %v96_v62 = vld [vmem:[%s2763_s1 + $0x208] sm:$0xff]  ;;  %v1687_v38 = vshrl.u32 %v433_v27, 7 }
  0x16   :  { %540 = vmatprep.subr.mxu0 %v42_v39  ;;  %610 = vmatpush1.msra.mxu1 %v107_v40  ;;  %v94_v63 = vld [vmem:[%s2763_s1 + $0x1f8] sm:$0xff]  ;;  %v95_v0 = vld [vmem:[%s2763_s1 + $0x200] sm:$0xff]  ;;  %v93_v1 = vld [vmem:[%s2763_s1 + $0x1f0] sm:$0xff]  ;;  %v450_v39 = vunpack.c.0.s8 %v449_v29 }
  0x17   :  { %541 = vmatpush1.msra.mxu0 %v41_v41  ;;  %611 = vmatprep.subr.mxu1 %v106_v42  ;;  %v158_v2 = vld [vmem:[%s2763_s1 + $0x3f8] sm:$0xff]  ;;  %v92_v3 = vld [vmem:[%s2763_s1 + $0x1e8] sm:$0xff]  ;;  %v157_v4 = vld [vmem:[%s2763_s1 + $0x3f0] sm:$0xff] }
  0x18   :  { %542 = vmatprep.subr.mxu0 %v40_v43  ;;  %612 = vmatpush1.msra.mxu1 %v105_v44  ;;  %v91_v5 = vld [vmem:[%s2763_s1 + $0x1e0] sm:$0xff]  ;;  %v156_v6 = vld [vmem:[%s2763_s1 + $0x3e8] sm:$0xff]  ;;  %v90_v7 = vld [vmem:[%s2763_s1 + $0x1d8] sm:$0xff] }
  0x19   :  { %543 = vmatpush1.msra.mxu0 %v39_v45  ;;  %613 = vmatprep.subr.mxu1 %v104_v46  ;;  %v155_v8 = vld [vmem:[%s2763_s1 + $0x3e0] sm:$0xff]  ;;  %v89_v9 = vld [vmem:[%s2763_s1 + $0x1d0] sm:$0xff]  ;;  %v154_v10 = vld [vmem:[%s2763_s1 + $0x3d8] sm:$0xff] }
  0x1a   :  { %544 = vmatprep.subr.mxu0 %v38_v47  ;;  %614 = vmatpush1.msra.mxu1 %v103_v48  ;;  %v88_v11 = vld [vmem:[%s2763_s1 + $0x1c8] sm:$0xff]  ;;  %v153_v12 = vld [vmem:[%s2763_s1 + $0x3d0] sm:$0xff]  ;;  %v87_v13 = vld [vmem:[%s2763_s1 + $0x1c0] sm:$0xff]  ;;  %v1714_v48 = vsub.s32 %v450_v39, %v1687_v38 }
  0x1b   :  { %545 = vmatpush1.msra.mxu0 %v37_v49  ;;  %615 = vmatprep.subr.mxu1 %v102_v50  ;;  %v152_v14 = vld [vmem:[%s2763_s1 + $0x3c8] sm:$0xff]  ;;  %v86_v15 = vld [vmem:[%s2763_s1 + $0x1b8] sm:$0xff]  ;;  %v151_v16 = vld [vmem:[%s2763_s1 + $0x3c0] sm:$0xff] }
  0x1c   :  { %546 = vmatprep.subr.mxu0 %v36_v51  ;;  %616 = vmatpush1.msra.mxu1 %v101_v52  ;;  %v85_v17 = vld [vmem:[%s2763_s1 + $0x1b0] sm:$0xff]  ;;  %v150_v18 = vld [vmem:[%s2763_s1 + $0x3b8] sm:$0xff]  ;;  %v84_v19 = vld [vmem:[%s2763_s1 + $0x1a8] sm:$0xff] }
  0x1d   :  { %547 = vmatpush1.msra.mxu0 %v35_v53  ;;  %617 = vmatprep.subr.mxu1 %v100_v54  ;;  %v149_v20 = vld [vmem:[%s2763_s1 + $0x3b0] sm:$0xff]  ;;  %v83_v21 = vld [vmem:[%s2763_s1 + $0x1a0] sm:$0xff]  ;;  %v148_v22 = vld [vmem:[%s2763_s1 + $0x3a8] sm:$0xff] }
  0x1e   :  { %548 = vmatprep.subr.mxu0 %v34_v55  ;;  %618 = vmatpush1.msra.mxu1 %v99_v56  ;;  %v82_v23 = vld [vmem:[%s2763_s1 + $0x198] sm:$0xff]  ;;  %v147_v24 = vld [vmem:[%s2763_s1 + $0x3a0] sm:$0xff]  ;;  %v81_v25 = vld [vmem:[%s2763_s1 + $0x190] sm:$0xff] }
  0x1f   :  { %549 = vmatpush1.msra.mxu0 %v33_v57  ;;  %619 = vmatprep.subr.mxu1 %v98_v58  ;;  %v146_v26 = vld [vmem:[%s2763_s1 + $0x398] sm:$0xff]  ;;  %v80_v30 = vld [vmem:[%s2763_s1 + $0x188] sm:$0xff]  ;;  %v145_v31 = vld [vmem:[%s2763_s1 + $0x390] sm:$0xff] }
  0x20   :  { %550 = vmatprep.subr.mxu0 %v32_v59  ;;  %620 = vmatpush1.msra.mxu1 %v97_v60  ;;  %v79_v32 = vld [vmem:[%s2763_s1 + $0x180] sm:$0xff]  ;;  %v144_v33 = vld [vmem:[%s2763_s1 + $0x388] sm:$0xff]  ;;  %v78_v34 = vld [vmem:[%s2763_s1 + $0x178] sm:$0xff] }
  0x21   :  { %551 = vmatpush1.msra.mxu0 %v31_v61  ;;  %621 = vmatprep.subr.mxu1 %v96_v62  ;;  %v143_v35 = vld [vmem:[%s2763_s1 + $0x380] sm:$0xff]  ;;  %v77_v36 = vld [vmem:[%s2763_s1 + $0x170] sm:$0xff]  ;;  %v142_v37 = vld [vmem:[%s2763_s1 + $0x378] sm:$0xff] }
  0x22   :  { %552 = vmatprep.subr.mxu0 %v94_v63  ;;  %622 = vmatpush1.msra.mxu1 %v95_v0  ;;  %v76_v40 = vld [vmem:[%s2763_s1 + $0x168] sm:$0xff]  ;;  %v141_v41 = vld [vmem:[%s2763_s1 + $0x370] sm:$0xff]  ;;  %v75_v42 = vld [vmem:[%s2763_s1 + $0x160] sm:$0xff] }
  0x23   :  { %553 = vmatpush2.msra.mxu0 %v93_v1  ;;  %623 = vmatprep.subr.mxu1 %v158_v2  ;;  %v140_v43 = vld [vmem:[%s2763_s1 + $0x368] sm:$0xff]  ;;  %v74_v44 = vld [vmem:[%s2763_s1 + $0x158] sm:$0xff]  ;;  %v139_v45 = vld [vmem:[%s2763_s1 + $0x360] sm:$0xff] }
  0x24   :  { %554 = vmatprep.subr.mxu0 %v92_v3  ;;  %624 = vmatpush2.msra.mxu1 %v157_v4  ;;  %v73_v46 = vld [vmem:[%s2763_s1 + $0x150] sm:$0xff]  ;;  %v138_v47 = vld [vmem:[%s2763_s1 + $0x358] sm:$0xff]  ;;  %v72_v49 = vld [vmem:[%s2763_s1 + $0x148] sm:$0xff] }
  0x25   :  { %555 = vmatpush2.msra.mxu0 %v91_v5  ;;  %625 = vmatprep.subr.mxu1 %v156_v6  ;;  %v137_v50 = vld [vmem:[%s2763_s1 + $0x350] sm:$0xff]  ;;  %v27_v51 = vld [vmem:[%s2762_s0] sm:$0xff]  ;;  %v136_v53 = vld [vmem:[%s2763_s1 + $0x348] sm:$0xff] }
  0x26   :  { %556 = vmatprep.subr.mxu0 %v90_v7  ;;  %626 = vmatpush2.msra.mxu1 %v155_v8  ;;  %v71_v52 = vld [vmem:[%s2763_s1 + $0x140] sm:$0xff]  ;;  %v70_v54 = vld [vmem:[%s2763_s1 + $0x138] sm:$0xff]  ;;  %v69_v56 = vld [vmem:[%s2763_s1 + $0x130] sm:$0xff]  ;;  %v454_v58 = vrot.slane %v27_v51, %v1714_v48  ;;  %v447_v59 = vcombine.high %v27_v51, %v27_v51 }
  0x27   :  { %557 = vmatpush2.msra.mxu0 %v89_v9  ;;  %627 = vmatprep.subr.mxu1 %v154_v10  ;;  %v135_v55 = vld [vmem:[%s2763_s1 + $0x340] sm:$0xff]  ;;  %v134_v57 = vld [vmem:[%s2763_s1 + $0x338] sm:$0xff]  ;;  %v68_v60 = vld [vmem:[%s2763_s1 + $0x128] sm:$0xff] }
  0x28   :  { %558 = vmatprep.subr.mxu0 %v88_v11  ;;  %628 = vmatpush2.msra.mxu1 %v153_v12  ;;  %v133_v61 = vld [vmem:[%s2763_s1 + $0x330] sm:$0xff]  ;;  %v67_v62 = vld [vmem:[%s2763_s1 + $0x120] sm:$0xff]  ;;  %v132_v63 = vld [vmem:[%s2763_s1 + $0x328] sm:$0xff]  ;;  %v462_v4 = vcombine.high %v454_v58, %v454_v58  ;;  %v461_v5 = vrot.slane %v447_v59, %v1714_v48 }
  0x29   :  { %559 = vmatpush2.msra.mxu0 %v87_v13  ;;  %629 = vmatprep.subr.mxu1 %v152_v14  ;;  %v66_v0 = vld [vmem:[%s2763_s1 + $0x118] sm:$0xff]  ;;  %v131_v1 = vld [vmem:[%s2763_s1 + $0x320] sm:$0xff]  ;;  %v65_v2 = vld [vmem:[%s2763_s1 + $0x110] sm:$0xff] }
  0x2a   :  { %560 = vmatprep.subr.mxu0 %v86_v15  ;;  %630 = vmatpush2.msra.mxu1 %v151_v16  ;;  %v130_v3 = vld [vmem:[%s2763_s1 + $0x318] sm:$0xff]  ;;  %v64_v6 = vld [vmem:[%s2763_s1 + $0x108] sm:$0xff]  ;;  %v63_v7 = vld [vmem:[%s2763_s1 + $0x100] sm:$0xff]  ;;  %v463_v12 = vcombine.high %v461_v5, %v461_v5 }
  0x2b   :  { %561 = vmatpush2.msra.mxu0 %v85_v17  ;;  %631 = vmatprep.subr.mxu1 %v150_v18  ;;  %v129_v8 = vld [vmem:[%s2763_s1 + $0x310] sm:$0xff]  ;;  %v128_v9 = vld [vmem:[%s2763_s1 + $0x308] sm:$0xff]  ;;  %v190_v10 = vld [vmem:[%s2763_s1 + $0x4f8] sm:$0xff] }
  0x2c   :  { %562 = vmatprep.subr.mxu0 %v84_v19  ;;  %632 = vmatpush2.msra.mxu1 %v149_v20  ;;  %v127_v11 = vld [vmem:[%s2763_s1 + $0x300] sm:$0xff]  ;;  %v189_v13 = vld [vmem:[%s2763_s1 + $0x4f0] sm:$0xff]  ;;  %v188_v14 = vld [vmem:[%s2763_s1 + $0x4e8] sm:$0xff] }
  0x2d   :  { %563 = vmatpush2.msra.mxu0 %v83_v21  ;;  %633 = vmatprep.subr.mxu1 %v148_v22  ;;  %v254_v15 = vld [vmem:[%s2763_s1 + $0x6f8] sm:$0xff]  ;;  %v187_v16 = vld [vmem:[%s2763_s1 + $0x4e0] sm:$0xff]  ;;  %v253_v17 = vld [vmem:[%s2763_s1 + $0x6f0] sm:$0xff] }
  0x2e   :  { %564 = vmatprep.subr.mxu0 %v82_v23  ;;  %634 = vmatpush2.msra.mxu1 %v147_v24  ;;  %v186_v18 = vld [vmem:[%s2763_s1 + $0x4d8] sm:$0xff]  ;;  %v252_v19 = vld [vmem:[%s2763_s1 + $0x6e8] sm:$0xff]  ;;  %v185_v20 = vld [vmem:[%s2763_s1 + $0x4d0] sm:$0xff] }
  0x2f   :  { %565 = vmatpush2.msra.mxu0 %v81_v25  ;;  %635 = vmatprep.subr.mxu1 %v146_v26  ;;  %v251_v21 = vld [vmem:[%s2763_s1 + $0x6e0] sm:$0xff]  ;;  %v184_v22 = vld [vmem:[%s2763_s1 + $0x4c8] sm:$0xff]  ;;  %v250_v23 = vld [vmem:[%s2763_s1 + $0x6d8] sm:$0xff] }
  0x30   :  { %566 = vmatprep.subr.mxu0 %v80_v30  ;;  %636 = vmatpush2.msra.mxu1 %v145_v31  ;;  %v183_v24 = vld [vmem:[%s2763_s1 + $0x4c0] sm:$0xff]  ;;  %v249_v25 = vld [vmem:[%s2763_s1 + $0x6d0] sm:$0xff]  ;;  %v182_v26 = vld [vmem:[%s2763_s1 + $0x4b8] sm:$0xff] }
  0x31   :  { %567 = vmatpush2.msra.mxu0 %v79_v32  ;;  %637 = vmatprep.subr.mxu1 %v144_v33  ;;  %v248_v27 = vld [vmem:[%s2763_s1 + $0x6c8] sm:$0xff]  ;;  %v181_v28 = vld [vmem:[%s2763_s1 + $0x4b0] sm:$0xff]  ;;  %v247_v29 = vld [vmem:[%s2763_s1 + $0x6c0] sm:$0xff] }
  0x32   :  { %568 = vmatprep.subr.mxu0 %v78_v34  ;;  %638 = vmatpush2.msra.mxu1 %v143_v35  ;;  %v180_v30 = vld [vmem:[%s2763_s1 + $0x4a8] sm:$0xff]  ;;  %v246_v31 = vld [vmem:[%s2763_s1 + $0x6b8] sm:$0xff]  ;;  %v179_v32 = vld [vmem:[%s2763_s1 + $0x4a0] sm:$0xff] }
  0x33   :  { %569 = vmatpush2.msra.mxu0 %v77_v36  ;;  %639 = vmatprep.subr.mxu1 %v142_v37  ;;  %v245_v33 = vld [vmem:[%s2763_s1 + $0x6b0] sm:$0xff]  ;;  %v178_v34 = vld [vmem:[%s2763_s1 + $0x498] sm:$0xff]  ;;  %v244_v35 = vld [vmem:[%s2763_s1 + $0x6a8] sm:$0xff] }
  0x34   :  { %570 = vmatprep.subr.mxu0 %v76_v40  ;;  %640 = vmatpush2.msra.mxu1 %v141_v41  ;;  %v177_v36 = vld [vmem:[%s2763_s1 + $0x490] sm:$0xff]  ;;  %v243_v37 = vld [vmem:[%s2763_s1 + $0x6a0] sm:$0xff]  ;;  %v176_v39 = vld [vmem:[%s2763_s1 + $0x488] sm:$0xff] }
  0x35   :  { %571 = vmatpush2.msra.mxu0 %v75_v42  ;;  %641 = vmatprep.subr.mxu1 %v140_v43  ;;  %v242_v40 = vld [vmem:[%s2763_s1 + $0x698] sm:$0xff]  ;;  %v175_v41 = vld [vmem:[%s2763_s1 + $0x480] sm:$0xff]  ;;  %v241_v42 = vld [vmem:[%s2763_s1 + $0x690] sm:$0xff] }
  0x36   :  { %572 = vmatprep.subr.mxu0 %v74_v44  ;;  %642 = vmatpush2.msra.mxu1 %v139_v45  ;;  %v174_v43 = vld [vmem:[%s2763_s1 + $0x478] sm:$0xff]  ;;  %v240_v44 = vld [vmem:[%s2763_s1 + $0x688] sm:$0xff]  ;;  %v173_v45 = vld [vmem:[%s2763_s1 + $0x470] sm:$0xff] }
  0x37   :  { %573 = vmatpush2.msra.mxu0 %v73_v46  ;;  %643 = vmatprep.subr.mxu1 %v138_v47  ;;  %v239_v46 = vld [vmem:[%s2763_s1 + $0x680] sm:$0xff]  ;;  %v172_v47 = vld [vmem:[%s2763_s1 + $0x468] sm:$0xff]  ;;  %v237_v51 = vld [vmem:[%s2763_s1 + $0x670] sm:$0xff] }
  0x38   :  { %574 = vmatprep.subr.mxu0 %v72_v49  ;;  %644 = vmatpush2.msra.mxu1 %v137_v50  ;;  %v238_v49 = vld [vmem:[%s2763_s1 + $0x678] sm:$0xff]  ;;  %v171_v50 = vld [vmem:[%s2763_s1 + $0x460] sm:$0xff]  ;;  %v233_v59 = vld [vmem:[%s2763_s1 + $0x650] sm:$0xff] }
  0x39   :  { %575 = vmatpush2.msra.mxu0 %v71_v52  ;;  %645 = vmatprep.subr.mxu1 %v136_v53  ;;  %v170_v52 = vld [vmem:[%s2763_s1 + $0x458] sm:$0xff]  ;;  %v236_v53 = vld [vmem:[%s2763_s1 + $0x668] sm:$0xff] }
  0x3a   :  { %576 = vmatprep.subr.mxu0 %v70_v54  ;;  %646 = vmatpush2.msra.mxu1 %v135_v55  ;;  %v169_v54 = vld [vmem:[%s2763_s1 + $0x450] sm:$0xff]  ;;  %v235_v55 = vld [vmem:[%s2763_s1 + $0x660] sm:$0xff] }
  0x3b   :  { %577 = vmatpush2.msra.mxu0 %v69_v56  ;;  %647 = vmatprep.subr.mxu1 %v134_v57  ;;  %v168_v56 = vld [vmem:[%s2763_s1 + $0x448] sm:$0xff]  ;;  %v234_v57 = vld [vmem:[%s2763_s1 + $0x658] sm:$0xff] }
  0x3c   :  { %578 = vmatprep.subr.mxu0 %v68_v60  ;;  %648 = vmatpush2.msra.mxu1 %v133_v61  ;;  %v166_v60 = vld [vmem:[%s2763_s1 + $0x438] sm:$0xff]  ;;  %v232_v61 = vld [vmem:[%s2763_s1 + $0x648] sm:$0xff] }
  0x3d   :  { %579 = vmatpush2.msra.mxu0 %v67_v62  ;;  %649 = vmatprep.subr.mxu1 %v132_v63  ;;  %v165_v62 = vld [vmem:[%s2763_s1 + $0x430] sm:$0xff]  ;;  %v231_v63 = vld [vmem:[%s2763_s1 + $0x640] sm:$0xff] }
  0x3e   :  { %580 = vmatprep.subr.mxu0 %v66_v0  ;;  %650 = vmatpush2.msra.mxu1 %v131_v1  ;;  %v164_v0 = vld [vmem:[%s2763_s1 + $0x428] sm:$0xff]  ;;  %v230_v1 = vld [vmem:[%s2763_s1 + $0x638] sm:$0xff] }
  0x3f   :  { %581 = vmatpush2.msra.mxu0 %v65_v2  ;;  %651 = vmatprep.subr.mxu1 %v130_v3  ;;  %v163_v2 = vld [vmem:[%s2763_s1 + $0x420] sm:$0xff]  ;;  %v229_v3 = vld [vmem:[%s2763_s1 + $0x630] sm:$0xff] }
  0x40   :  { %582 = vmatprep.subr.mxu0 %v64_v6  ;;  %584 = vmatprep.mubr.f32.mxu0 %v462_v4  ;;  %v162_v4 = vld [vmem:[%s2763_s1 + $0x418] sm:$0xff]  ;;  %v161_v6 = vld [vmem:[%s2763_s1 + $0x410] sm:$0xff] }
  0x41   :  { %583 = vmatpush2.msra.mxu0 %v63_v7  ;;  %652 = vmatpush2.msra.mxu1 %v129_v8  ;;  %v227_v7 = vld [vmem:[%s2763_s1 + $0x620] sm:$0xff]  ;;  %v160_v8 = vld [vmem:[%s2763_s1 + $0x408] sm:$0xff] }
  0x42   :  { %585 = vmatmul.mubr.f32.vlgmr.msra.gmra.mxu0 %v454_v58  ;;  %653 = vmatprep.subr.mxu1 %v128_v9  ;;  %v167_v58 = vld [vmem:[%s2763_s1 + $0x440] sm:$0xff]  ;;  %v226_v9 = vld [vmem:[%s2763_s1 + $0x618] sm:$0xff] }
  0x43   :  { %662 = vmatprep.subr.mxu0 %v190_v10  ;;  %654 = vmatpush2.msra.mxu1 %v127_v11  ;;  %v159_v10 = vld [vmem:[%s2763_s1 + $0x400] sm:$0xff]  ;;  %v225_v11 = vld [vmem:[%s2763_s1 + $0x610] sm:$0xff] }
  0x44   :  { %655 = vmatprep.mubr.f32.mxu1 %v463_v12  ;;  %663 = vmatpush1.msra.mxu0 %v189_v13  ;;  %v222_v12 = vld [vmem:[%s2763_s1 + $0x5f8] sm:$0xff]  ;;  %v224_v13 = vld [vmem:[%s2763_s1 + $0x608] sm:$0xff] }
  0x45   :  { %656 = vmatmul.mubr.f32.vlgmr.msra.gmra.mxu1 %v461_v5  ;;  %664 = vmatprep.subr.mxu0 %v188_v14  ;;  %v228_v5 = vld [vmem:[%s2763_s1 + $0x628] sm:$0xff]  ;;  %v221_v14 = vld [vmem:[%s2763_s1 + $0x5f0] sm:$0xff] }
  0x46   :  { %733 = vmatprep.subr.mxu1 %v254_v15  ;;  %665 = vmatpush1.msra.mxu0 %v187_v16  ;;  %v223_v15 = vld [vmem:[%s2763_s1 + $0x600] sm:$0xff]  ;;  %v220_v16 = vld [vmem:[%s2763_s1 + $0x5e8] sm:$0xff] }
  0x47   :  { %734 = vmatpush1.msra.mxu1 %v253_v17  ;;  %666 = vmatprep.subr.mxu0 %v186_v18  ;;  %v286_v17 = vld [vmem:[%s2763_s1 + $0x7f8] sm:$0xff]  ;;  %v219_v18 = vld [vmem:[%s2763_s1 + $0x5e0] sm:$0xff] }
  0x48   :  { %735 = vmatprep.subr.mxu1 %v252_v19  ;;  %667 = vmatpush1.msra.mxu0 %v185_v20  ;;  %v285_v19 = vld [vmem:[%s2763_s1 + $0x7f0] sm:$0xff]  ;;  %v218_v20 = vld [vmem:[%s2763_s1 + $0x5d8] sm:$0xff] }
  0x49   :  { %736 = vmatpush1.msra.mxu1 %v251_v21  ;;  %668 = vmatprep.subr.mxu0 %v184_v22  ;;  %v284_v21 = vld [vmem:[%s2763_s1 + $0x7e8] sm:$0xff]  ;;  %v217_v22 = vld [vmem:[%s2763_s1 + $0x5d0] sm:$0xff] }
  0x4a   :  { %737 = vmatprep.subr.mxu1 %v250_v23  ;;  %669 = vmatpush1.msra.mxu0 %v183_v24  ;;  %v283_v23 = vld [vmem:[%s2763_s1 + $0x7e0] sm:$0xff]  ;;  %v216_v24 = vld [vmem:[%s2763_s1 + $0x5c8] sm:$0xff] }
  0x4b   :  { %738 = vmatpush1.msra.mxu1 %v249_v25  ;;  %670 = vmatprep.subr.mxu0 %v182_v26  ;;  %v282_v25 = vld [vmem:[%s2763_s1 + $0x7d8] sm:$0xff]  ;;  %v215_v26 = vld [vmem:[%s2763_s1 + $0x5c0] sm:$0xff] }
  0x4c   :  { %739 = vmatprep.subr.mxu1 %v248_v27  ;;  %671 = vmatpush1.msra.mxu0 %v181_v28  ;;  %v281_v27 = vld [vmem:[%s2763_s1 + $0x7d0] sm:$0xff]  ;;  %v214_v28 = vld [vmem:[%s2763_s1 + $0x5b8] sm:$0xff] }
  0x4d   :  { %740 = vmatpush1.msra.mxu1 %v247_v29  ;;  %672 = vmatprep.subr.mxu0 %v180_v30  ;;  %v280_v29 = vld [vmem:[%s2763_s1 + $0x7c8] sm:$0xff]  ;;  %v213_v30 = vld [vmem:[%s2763_s1 + $0x5b0] sm:$0xff] }
  0x4e   :  { %741 = vmatprep.subr.mxu1 %v246_v31  ;;  %673 = vmatpush1.msra.mxu0 %v179_v32  ;;  %v279_v31 = vld [vmem:[%s2763_s1 + $0x7c0] sm:$0xff]  ;;  %v212_v32 = vld [vmem:[%s2763_s1 + $0x5a8] sm:$0xff] }
  0x4f   :  { %742 = vmatpush1.msra.mxu1 %v245_v33  ;;  %674 = vmatprep.subr.mxu0 %v178_v34  ;;  %v278_v33 = vld [vmem:[%s2763_s1 + $0x7b8] sm:$0xff]  ;;  %v211_v34 = vld [vmem:[%s2763_s1 + $0x5a0] sm:$0xff] }
  0x50   :  { %743 = vmatprep.subr.mxu1 %v244_v35  ;;  %675 = vmatpush1.msra.mxu0 %v177_v36  ;;  %v277_v35 = vld [vmem:[%s2763_s1 + $0x7b0] sm:$0xff]  ;;  %v210_v36 = vld [vmem:[%s2763_s1 + $0x598] sm:$0xff] }
  0x51   :  { %744 = vmatpush1.msra.mxu1 %v243_v37  ;;  %676 = vmatprep.subr.mxu0 %v176_v39  ;;  %v276_v37 = vld [vmem:[%s2763_s1 + $0x7a8] sm:$0xff]  ;;  %v209_v39 = vld [vmem:[%s2763_s1 + $0x590] sm:$0xff] }
  0x52   :  { %745 = vmatprep.subr.mxu1 %v242_v40  ;;  %677 = vmatpush1.msra.mxu0 %v175_v41  ;;  %v275_v40 = vld [vmem:[%s2763_s1 + $0x7a0] sm:$0xff]  ;;  %v208_v41 = vld [vmem:[%s2763_s1 + $0x588] sm:$0xff] }
  0x53   :  { %746 = vmatpush1.msra.mxu1 %v241_v42  ;;  %678 = vmatprep.subr.mxu0 %v174_v43  ;;  %v274_v42 = vld [vmem:[%s2763_s1 + $0x798] sm:$0xff]  ;;  %v207_v43 = vld [vmem:[%s2763_s1 + $0x580] sm:$0xff] }
  0x54   :  { %747 = vmatprep.subr.mxu1 %v240_v44  ;;  %679 = vmatpush1.msra.mxu0 %v173_v45  ;;  %v273_v44 = vld [vmem:[%s2763_s1 + $0x790] sm:$0xff]  ;;  %v206_v45 = vld [vmem:[%s2763_s1 + $0x578] sm:$0xff] }
  0x55   :  { %748 = vmatpush1.msra.mxu1 %v239_v46  ;;  %680 = vmatprep.subr.mxu0 %v172_v47  ;;  %v272_v46 = vld [vmem:[%s2763_s1 + $0x788] sm:$0xff]  ;;  %v205_v47 = vld [vmem:[%s2763_s1 + $0x570] sm:$0xff] }
  0x56   :  { %749 = vmatprep.subr.mxu1 %v238_v49  ;;  %681 = vmatpush1.msra.mxu0 %v171_v50  ;;  %v271_v49 = vld [vmem:[%s2763_s1 + $0x780] sm:$0xff]  ;;  %v204_v50 = vld [vmem:[%s2763_s1 + $0x568] sm:$0xff] }
  0x57   :  { %750 = vmatpush1.msra.mxu1 %v237_v51  ;;  %682 = vmatprep.subr.mxu0 %v170_v52  ;;  %v270_v51 = vld [vmem:[%s2763_s1 + $0x778] sm:$0xff]  ;;  %v203_v52 = vld [vmem:[%s2763_s1 + $0x560] sm:$0xff] }
  0x58   :  { %751 = vmatprep.subr.mxu1 %v236_v53  ;;  %683 = vmatpush1.msra.mxu0 %v169_v54  ;;  %v269_v53 = vld [vmem:[%s2763_s1 + $0x770] sm:$0xff]  ;;  %v202_v54 = vld [vmem:[%s2763_s1 + $0x558] sm:$0xff] }
  0x59   :  { %752 = vmatpush1.msra.mxu1 %v235_v55  ;;  %684 = vmatprep.subr.mxu0 %v168_v56  ;;  %v268_v55 = vld [vmem:[%s2763_s1 + $0x768] sm:$0xff]  ;;  %v201_v56 = vld [vmem:[%s2763_s1 + $0x550] sm:$0xff] }
  0x5a   :  { %753 = vmatprep.subr.mxu1 %v234_v57  ;;  %685 = vmatpush1.msra.mxu0 %v167_v58  ;;  %v267_v57 = vld [vmem:[%s2763_s1 + $0x760] sm:$0xff]  ;;  %v200_v58 = vld [vmem:[%s2763_s1 + $0x548] sm:$0xff] }
  0x5b   :  { %754 = vmatpush1.msra.mxu1 %v233_v59  ;;  %686 = vmatprep.subr.mxu0 %v166_v60  ;;  %v266_v59 = vld [vmem:[%s2763_s1 + $0x758] sm:$0xff]  ;;  %v199_v60 = vld [vmem:[%s2763_s1 + $0x540] sm:$0xff] }
  0x5c   :  { %755 = vmatprep.subr.mxu1 %v232_v61  ;;  %687 = vmatpush1.msra.mxu0 %v165_v62  ;;  %v28_v61 = vld [vmem:[%s2762_s0 + $0x8] sm:$0xff]  ;;  %v265_v62 = vld [vmem:[%s2763_s1 + $0x750] sm:$0xff] }
  0x5d   :  { %756 = vmatpush1.msra.mxu1 %v231_v63  ;;  %688 = vmatprep.subr.mxu0 %v164_v0  ;;  %v198_v63 = vld [vmem:[%s2763_s1 + $0x538] sm:$0xff]  ;;  %v264_v0 = vld [vmem:[%s2763_s1 + $0x748] sm:$0xff] }
  0x5e   :  { %757 = vmatprep.subr.mxu1 %v230_v1  ;;  %689 = vmatpush1.msra.mxu0 %v163_v2  ;;  %v197_v1 = vld [vmem:[%s2763_s1 + $0x530] sm:$0xff]  ;;  %v263_v2 = vld [vmem:[%s2763_s1 + $0x740] sm:$0xff] }
  0x5f   :  { %758 = vmatpush1.msra.mxu1 %v229_v3  ;;  %690 = vmatprep.subr.mxu0 %v162_v4  ;;  %v196_v3 = vld [vmem:[%s2763_s1 + $0x528] sm:$0xff]  ;;  %v464_v4 = vcombine.high %v28_v61, %v28_v61 }
  0x60   :  { %759 = vmatprep.subr.mxu1 %v228_v5  ;;  %691 = vmatpush1.msra.mxu0 %v161_v6  ;;  %v262_v5 = vld [vmem:[%s2763_s1 + $0x738] sm:$0xff]  ;;  %v195_v6 = vld [vmem:[%s2763_s1 + $0x520] sm:$0xff] }
  0x61   :  { %760 = vmatpush1.msra.mxu1 %v227_v7  ;;  %692 = vmatprep.subr.mxu0 %v160_v8  ;;  %v471_v7 = vrot.slane %v28_v61, %v1714_v48  ;;  %v261_v8 = vld [vmem:[%s2763_s1 + $0x730] sm:$0xff] }
  0x62   :  { %761 = vmatprep.subr.mxu1 %v226_v9  ;;  %693 = vmatpush1.msra.mxu0 %v159_v10  ;;  %v194_v9 = vld [vmem:[%s2763_s1 + $0x518] sm:$0xff]  ;;  %v260_v10 = vld [vmem:[%s2763_s1 + $0x728] sm:$0xff] }
  0x63   :  { %762 = vmatpush1.msra.mxu1 %v225_v11  ;;  %694 = vmatprep.subr.mxu0 %v222_v12  ;;  %v193_v11 = vld [vmem:[%s2763_s1 + $0x510] sm:$0xff]  ;;  %v259_v12 = vld [vmem:[%s2763_s1 + $0x720] sm:$0xff] }
  0x64   :  { %763 = vmatprep.subr.mxu1 %v224_v13  ;;  %695 = vmatpush2.msra.mxu0 %v221_v14  ;;  %v192_v13 = vld [vmem:[%s2763_s1 + $0x508] sm:$0xff]  ;;  %v478_v14 = vrot.slane %v464_v4, %v1714_v48 }
  0x65   :  { %764 = vmatpush1.msra.mxu1 %v223_v15  ;;  %696 = vmatprep.subr.mxu0 %v220_v16  ;;  %v258_v15 = vld [vmem:[%s2763_s1 + $0x718] sm:$0xff]  ;;  %v191_v16 = vld [vmem:[%s2763_s1 + $0x500] sm:$0xff] }
  0x66   :  { %765 = vmatprep.subr.mxu1 %v286_v17  ;;  %697 = vmatpush2.msra.mxu0 %v219_v18  ;;  %v479_v17 = vcombine.high %v471_v7, %v471_v7  ;;  %v257_v18 = vld [vmem:[%s2763_s1 + $0x710] sm:$0xff] }
  0x67   :  { %766 = vmatpush2.msra.mxu1 %v285_v19  ;;  %698 = vmatprep.subr.mxu0 %v218_v20  ;;  %v256_v19 = vld [vmem:[%s2763_s1 + $0x708] sm:$0xff]  ;;  %v318_v20 = vld [vmem:[%s2763_s1 + $0x8f8] sm:$0xff] }
  0x68   :  { %767 = vmatprep.subr.mxu1 %v284_v21  ;;  %699 = vmatpush2.msra.mxu0 %v217_v22  ;;  %v255_v21 = vld [vmem:[%s2763_s1 + $0x700] sm:$0xff]  ;;  %v480_v22 = vcombine.high %v478_v14, %v478_v14 }
  0x69   :  { %768 = vmatpush2.msra.mxu1 %v283_v23  ;;  %700 = vmatprep.subr.mxu0 %v216_v24  ;;  %v317_v23 = vld [vmem:[%s2763_s1 + $0x8f0] sm:$0xff]  ;;  %v316_v24 = vld [vmem:[%s2763_s1 + $0x8e8] sm:$0xff] }
  0x6a   :  { %769 = vmatprep.subr.mxu1 %v282_v25  ;;  %701 = vmatpush2.msra.mxu0 %v215_v26  ;;  %v382_v25 = vld [vmem:[%s2763_s1 + $0xaf8] sm:$0xff]  ;;  %v315_v26 = vld [vmem:[%s2763_s1 + $0x8e0] sm:$0xff] }
  0x6b   :  { %770 = vmatpush2.msra.mxu1 %v281_v27  ;;  %702 = vmatprep.subr.mxu0 %v214_v28  ;;  %v381_v27 = vld [vmem:[%s2763_s1 + $0xaf0] sm:$0xff]  ;;  %v314_v28 = vld [vmem:[%s2763_s1 + $0x8d8] sm:$0xff] }
  0x6c   :  { %771 = vmatprep.subr.mxu1 %v280_v29  ;;  %703 = vmatpush2.msra.mxu0 %v213_v30  ;;  %v380_v29 = vld [vmem:[%s2763_s1 + $0xae8] sm:$0xff]  ;;  %v313_v30 = vld [vmem:[%s2763_s1 + $0x8d0] sm:$0xff] }
  0x6d   :  { %772 = vmatpush2.msra.mxu1 %v279_v31  ;;  %704 = vmatprep.subr.mxu0 %v212_v32  ;;  %v379_v31 = vld [vmem:[%s2763_s1 + $0xae0] sm:$0xff]  ;;  %v312_v32 = vld [vmem:[%s2763_s1 + $0x8c8] sm:$0xff] }
  0x6e   :  { %773 = vmatprep.subr.mxu1 %v278_v33  ;;  %705 = vmatpush2.msra.mxu0 %v211_v34 }
  0x6f   :  { %774 = vmatpush2.msra.mxu1 %v277_v35  ;;  %706 = vmatprep.subr.mxu0 %v210_v36 }
  0x70   :  { %775 = vmatprep.subr.mxu1 %v276_v37  ;;  %707 = vmatpush2.msra.mxu0 %v209_v39 }
  0x71   :  { %776 = vmatpush2.msra.mxu1 %v275_v40  ;;  %708 = vmatprep.subr.mxu0 %v208_v41 }
  0x72   :  { %777 = vmatprep.subr.mxu1 %v274_v42  ;;  %709 = vmatpush2.msra.mxu0 %v207_v43 }
  0x73   :  { %778 = vmatpush2.msra.mxu1 %v273_v44  ;;  %710 = vmatprep.subr.mxu0 %v206_v45 }
  0x74   :  { %779 = vmatprep.subr.mxu1 %v272_v46  ;;  %711 = vmatpush2.msra.mxu0 %v205_v47 }
  0x75   :  { %780 = vmatpush2.msra.mxu1 %v271_v49  ;;  %712 = vmatprep.subr.mxu0 %v204_v50 }
  0x76   :  { %781 = vmatprep.subr.mxu1 %v270_v51  ;;  %713 = vmatpush2.msra.mxu0 %v203_v52 }
  0x77   :  { %782 = vmatpush2.msra.mxu1 %v269_v53  ;;  %714 = vmatprep.subr.mxu0 %v202_v54 }
  0x78   :  { %783 = vmatprep.subr.mxu1 %v268_v55  ;;  %715 = vmatpush2.msra.mxu0 %v201_v56 }
  0x79   :  { %784 = vmatpush2.msra.mxu1 %v267_v57  ;;  %716 = vmatprep.subr.mxu0 %v200_v58 }
  0x7a   :  { %785 = vmatprep.subr.mxu1 %v266_v59  ;;  %717 = vmatpush2.msra.mxu0 %v199_v60 }
  0x7b   :  { %786 = vmatpush2.msra.mxu1 %v265_v62  ;;  %718 = vmatprep.subr.mxu0 %v198_v63 }
  0x7c   :  { %787 = vmatprep.subr.mxu1 %v264_v0  ;;  %719 = vmatpush2.msra.mxu0 %v197_v1 }
  0x7d   :  { %788 = vmatpush2.msra.mxu1 %v263_v2  ;;  %720 = vmatprep.subr.mxu0 %v196_v3 }
  0x7e   :  { %789 = vmatprep.subr.mxu1 %v262_v5  ;;  %721 = vmatpush2.msra.mxu0 %v195_v6 }
  0x7f   :  { %790 = vmatpush2.msra.mxu1 %v261_v8  ;;  %722 = vmatprep.subr.mxu0 %v194_v9 }
  0x80   :  { %791 = vmatprep.subr.mxu1 %v260_v10  ;;  %723 = vmatpush2.msra.mxu0 %v193_v11 }
  0x81   :  { %792 = vmatpush2.msra.mxu1 %v259_v12  ;;  %724 = vmatprep.subr.mxu0 %v192_v13 }
  0x82   :  { %793 = vmatprep.subr.mxu1 %v258_v15  ;;  %725 = vmatpush2.msra.mxu0 %v191_v16 }
  0x83   :  { %726 = vmatprep.mubr.f32.mxu0 %v479_v17  ;;  %794 = vmatpush2.msra.mxu1 %v257_v18 }
  0x84   :  { %727 = vmatmul.mubr.f32.vlgmr.msra.gmra.mxu0 %v471_v7  ;;  %795 = vmatprep.subr.mxu1 %v256_v19 }
  0x85   :  { %804 = vmatprep.subr.mxu0 %v318_v20  ;;  %796 = vmatpush2.msra.mxu1 %v255_v21 }
  0x86   :  { %797 = vmatprep.mubr.f32.mxu1 %v480_v22  ;;  %805 = vmatpush1.msra.mxu0 %v317_v23 }
  0x87   :  { %798 = vmatmul.mubr.f32.vlgmr.msra.gmra.mxu1 %v478_v14  ;;  %806 = vmatprep.subr.mxu0 %v316_v24 }
  0x88   :  { %875 = vmatprep.subr.mxu1 %v382_v25  ;;  %807 = vmatpush1.msra.mxu0 %v315_v26 }
  0x89   :  { %12 = vsyncpa [#allocation3], 0  ;;  %876 = vmatpush1.msra.mxu1 %v381_v27  ;;  %808 = vmatprep.subr.mxu0 %v314_v28  ;;  %v378_v33 = vld [vmem:[%s2763_s1 + $0xad8] sm:$0xff]  ;;  %v311_v34 = vld [vmem:[%s2763_s1 + $0x8c0] sm:$0xff]  ;;  %vm517_vm0 = vcmask 523264   ;;  %vm1348_vm1 = vmmov 0  }
  0x8a   :  { %877 = vmatprep.subr.mxu1 %v380_v29  ;;  %809 = vmatpush1.msra.mxu0 %v313_v30  ;;  %v377_v35 = vld [vmem:[%s2763_s1 + $0xad0] sm:$0xff]  ;;  %v310_v36 = vld [vmem:[%s2763_s1 + $0x8b8] sm:$0xff]  ;;  %v376_v37 = vld [vmem:[%s2763_s1 + $0xac8] sm:$0xff]  ;;  %vm1217_vm2 = vcmask 74752  }
  0x8b   :  { %878 = vmatpush1.msra.mxu1 %v379_v31  ;;  %810 = vmatprep.subr.mxu0 %v312_v32  ;;  %v309_v39 = vld [vmem:[%s2763_s1 + $0x8b0] sm:$0xff]  ;;  %v375_v40 = vld [vmem:[%s2763_s1 + $0xac0] sm:$0xff]  ;;  %v308_v41 = vld [vmem:[%s2763_s1 + $0x8a8] sm:$0xff] }
  0x8c   :  { %879 = vmatprep.subr.mxu1 %v378_v33  ;;  %811 = vmatpush1.msra.mxu0 %v311_v34  ;;  %v374_v42 = vld [vmem:[%s2763_s1 + $0xab8] sm:$0xff]  ;;  %v307_v43 = vld [vmem:[%s2763_s1 + $0x8a0] sm:$0xff]  ;;  %v373_v44 = vld [vmem:[%s2763_s1 + $0xab0] sm:$0xff] }
  0x8d   :  { %880 = vmatpush1.msra.mxu1 %v377_v35  ;;  %812 = vmatprep.subr.mxu0 %v310_v36  ;;  %v306_v45 = vld [vmem:[%s2763_s1 + $0x898] sm:$0xff]  ;;  %v372_v46 = vld [vmem:[%s2763_s1 + $0xaa8] sm:$0xff]  ;;  %v305_v47 = vld [vmem:[%s2763_s1 + $0x890] sm:$0xff] }
  0x8e   :  { %881 = vmatprep.subr.mxu1 %v376_v37  ;;  %813 = vmatpush1.msra.mxu0 %v309_v39  ;;  %v371_v49 = vld [vmem:[%s2763_s1 + $0xaa0] sm:$0xff]  ;;  %v304_v50 = vld [vmem:[%s2763_s1 + $0x888] sm:$0xff]  ;;  %v370_v51 = vld [vmem:[%s2763_s1 + $0xa98] sm:$0xff] }
  0x8f   :  { %882 = vmatpush1.msra.mxu1 %v375_v40  ;;  %814 = vmatprep.subr.mxu0 %v308_v41  ;;  %v303_v52 = vld [vmem:[%s2763_s1 + $0x880] sm:$0xff]  ;;  %v369_v53 = vld [vmem:[%s2763_s1 + $0xa90] sm:$0xff]  ;;  %v302_v54 = vld [vmem:[%s2763_s1 + $0x878] sm:$0xff] }
  0x90   :  { %883 = vmatprep.subr.mxu1 %v374_v42  ;;  %815 = vmatpush1.msra.mxu0 %v307_v43  ;;  %v368_v55 = vld [vmem:[%s2763_s1 + $0xa88] sm:$0xff]  ;;  %v301_v56 = vld [vmem:[%s2763_s1 + $0x870] sm:$0xff]  ;;  %v367_v57 = vld [vmem:[%s2763_s1 + $0xa80] sm:$0xff] }
  0x91   :  { %884 = vmatpush1.msra.mxu1 %v373_v44  ;;  %816 = vmatprep.subr.mxu0 %v306_v45  ;;  %v300_v58 = vld [vmem:[%s2763_s1 + $0x868] sm:$0xff]  ;;  %v366_v59 = vld [vmem:[%s2763_s1 + $0xa78] sm:$0xff]  ;;  %v299_v60 = vld [vmem:[%s2763_s1 + $0x860] sm:$0xff] }
  0x92   :  { %885 = vmatprep.subr.mxu1 %v372_v46  ;;  %817 = vmatpush1.msra.mxu0 %v305_v47  ;;  %v365_v61 = vld [vmem:[%s2763_s1 + $0xa70] sm:$0xff]  ;;  %v298_v62 = vld [vmem:[%s2763_s1 + $0x858] sm:$0xff]  ;;  %v364_v63 = vld [vmem:[%s2763_s1 + $0xa68] sm:$0xff] }
  0x93   :  { %886 = vmatpush1.msra.mxu1 %v371_v49  ;;  %818 = vmatprep.subr.mxu0 %v304_v50  ;;  %v297_v0 = vld [vmem:[%s2763_s1 + $0x850] sm:$0xff]  ;;  %v363_v1 = vld [vmem:[%s2763_s1 + $0xa60] sm:$0xff]  ;;  %v296_v2 = vld [vmem:[%s2763_s1 + $0x848] sm:$0xff] }
  0x94   :  { %887 = vmatprep.subr.mxu1 %v370_v51  ;;  %819 = vmatpush1.msra.mxu0 %v303_v52  ;;  %v362_v3 = vld [vmem:[%s2763_s1 + $0xa58] sm:$0xff]  ;;  %v295_v4 = vld [vmem:[%s2763_s1 + $0x840] sm:$0xff]  ;;  %v361_v5 = vld [vmem:[%s2763_s1 + $0xa50] sm:$0xff] }
  0x95   :  { %888 = vmatpush1.msra.mxu1 %v369_v53  ;;  %820 = vmatprep.subr.mxu0 %v302_v54  ;;  %v294_v6 = vld [vmem:[%s2763_s1 + $0x838] sm:$0xff]  ;;  %v360_v7 = vld [vmem:[%s2763_s1 + $0xa48] sm:$0xff]  ;;  %v293_v8 = vld [vmem:[%s2763_s1 + $0x830] sm:$0xff] }
  0x96   :  { %889 = vmatprep.subr.mxu1 %v368_v55  ;;  %821 = vmatpush1.msra.mxu0 %v301_v56  ;;  %v359_v9 = vld [vmem:[%s2763_s1 + $0xa40] sm:$0xff]  ;;  %v292_v10 = vld [vmem:[%s2763_s1 + $0x828] sm:$0xff]  ;;  %v358_v11 = vld [vmem:[%s2763_s1 + $0xa38] sm:$0xff] }
  0x97   :  { %890 = vmatpush1.msra.mxu1 %v367_v57  ;;  %822 = vmatprep.subr.mxu0 %v300_v58  ;;  %v291_v12 = vld [vmem:[%s2763_s1 + $0x820] sm:$0xff]  ;;  %v357_v13 = vld [vmem:[%s2763_s1 + $0xa30] sm:$0xff]  ;;  %v290_v14 = vld [vmem:[%s2763_s1 + $0x818] sm:$0xff] }
  0x98   :  { %891 = vmatprep.subr.mxu1 %v366_v59  ;;  %823 = vmatpush1.msra.mxu0 %v299_v60  ;;  %v356_v15 = vld [vmem:[%s2763_s1 + $0xa28] sm:$0xff]  ;;  %v289_v16 = vld [vmem:[%s2763_s1 + $0x810] sm:$0xff]  ;;  %v355_v17 = vld [vmem:[%s2763_s1 + $0xa20] sm:$0xff] }
  0x99   :  { %892 = vmatpush1.msra.mxu1 %v365_v61  ;;  %824 = vmatprep.subr.mxu0 %v298_v62  ;;  %v288_v18 = vld [vmem:[%s2763_s1 + $0x808] sm:$0xff]  ;;  %v354_v19 = vld [vmem:[%s2763_s1 + $0xa18] sm:$0xff]  ;;  %v287_v20 = vld [vmem:[%s2763_s1 + $0x800] sm:$0xff] }
  0x9a   :  { %893 = vmatprep.subr.mxu1 %v364_v63  ;;  %825 = vmatpush1.msra.mxu0 %v297_v0  ;;  %v353_v21 = vld [vmem:[%s2763_s1 + $0xa10] sm:$0xff]  ;;  %v350_v22 = vld [vmem:[%s2763_s1 + $0x9f8] sm:$0xff]  ;;  %v352_v23 = vld [vmem:[%s2763_s1 + $0xa08] sm:$0xff] }
  0x9b   :  { %894 = vmatpush1.msra.mxu1 %v363_v1  ;;  %826 = vmatprep.subr.mxu0 %v296_v2  ;;  %v349_v24 = vld [vmem:[%s2763_s1 + $0x9f0] sm:$0xff]  ;;  %v351_v25 = vld [vmem:[%s2763_s1 + $0xa00] sm:$0xff]  ;;  %v348_v26 = vld [vmem:[%s2763_s1 + $0x9e8] sm:$0xff] }
  0x9c   :  { %895 = vmatprep.subr.mxu1 %v362_v3  ;;  %827 = vmatpush1.msra.mxu0 %v295_v4  ;;  %v414_v27 = vld [vmem:[%s2763_s1 + $0xbf8] sm:$0xff]  ;;  %v347_v28 = vld [vmem:[%s2763_s1 + $0x9e0] sm:$0xff]  ;;  %v413_v29 = vld [vmem:[%s2763_s1 + $0xbf0] sm:$0xff] }
  0x9d   :  { %896 = vmatpush1.msra.mxu1 %v361_v5  ;;  %828 = vmatprep.subr.mxu0 %v294_v6  ;;  %v346_v30 = vld [vmem:[%s2763_s1 + $0x9d8] sm:$0xff]  ;;  %v412_v31 = vld [vmem:[%s2763_s1 + $0xbe8] sm:$0xff]  ;;  %v345_v32 = vld [vmem:[%s2763_s1 + $0x9d0] sm:$0xff] }
  0x9e   :  { %897 = vmatprep.subr.mxu1 %v360_v7  ;;  %829 = vmatpush1.msra.mxu0 %v293_v8  ;;  %v411_v33 = vld [vmem:[%s2763_s1 + $0xbe0] sm:$0xff]  ;;  %v344_v34 = vld [vmem:[%s2763_s1 + $0x9c8] sm:$0xff]  ;;  %v410_v35 = vld [vmem:[%s2763_s1 + $0xbd8] sm:$0xff] }
  0x9f   :  { %898 = vmatpush1.msra.mxu1 %v359_v9  ;;  %830 = vmatprep.subr.mxu0 %v292_v10  ;;  %v343_v36 = vld [vmem:[%s2763_s1 + $0x9c0] sm:$0xff]  ;;  %v409_v37 = vld [vmem:[%s2763_s1 + $0xbd0] sm:$0xff]  ;;  %v342_v39 = vld [vmem:[%s2763_s1 + $0x9b8] sm:$0xff] }
  0xa0   :  { %899 = vmatprep.subr.mxu1 %v358_v11  ;;  %831 = vmatpush1.msra.mxu0 %v291_v12  ;;  %v408_v40 = vld [vmem:[%s2763_s1 + $0xbc8] sm:$0xff]  ;;  %v341_v41 = vld [vmem:[%s2763_s1 + $0x9b0] sm:$0xff]  ;;  %v407_v42 = vld [vmem:[%s2763_s1 + $0xbc0] sm:$0xff] }
  0xa1   :  { %900 = vmatpush1.msra.mxu1 %v357_v13  ;;  %832 = vmatprep.subr.mxu0 %v290_v14  ;;  %v340_v43 = vld [vmem:[%s2763_s1 + $0x9a8] sm:$0xff]  ;;  %v406_v44 = vld [vmem:[%s2763_s1 + $0xbb8] sm:$0xff]  ;;  %v339_v45 = vld [vmem:[%s2763_s1 + $0x9a0] sm:$0xff] }
  0xa2   :  { %901 = vmatprep.subr.mxu1 %v356_v15  ;;  %833 = vmatpush1.msra.mxu0 %v289_v16  ;;  %v405_v46 = vld [vmem:[%s2763_s1 + $0xbb0] sm:$0xff]  ;;  %v338_v47 = vld [vmem:[%s2763_s1 + $0x998] sm:$0xff]  ;;  %v404_v49 = vld [vmem:[%s2763_s1 + $0xba8] sm:$0xff] }
  0xa3   :  { %902 = vmatpush1.msra.mxu1 %v355_v17  ;;  %834 = vmatprep.subr.mxu0 %v288_v18  ;;  %v337_v50 = vld [vmem:[%s2763_s1 + $0x990] sm:$0xff]  ;;  %v403_v51 = vld [vmem:[%s2763_s1 + $0xba0] sm:$0xff]  ;;  %v336_v52 = vld [vmem:[%s2763_s1 + $0x988] sm:$0xff] }
  0xa4   :  { %903 = vmatprep.subr.mxu1 %v354_v19  ;;  %835 = vmatpush1.msra.mxu0 %v287_v20  ;;  %v402_v53 = vld [vmem:[%s2763_s1 + $0xb98] sm:$0xff]  ;;  %v335_v54 = vld [vmem:[%s2763_s1 + $0x980] sm:$0xff]  ;;  %v401_v55 = vld [vmem:[%s2763_s1 + $0xb90] sm:$0xff] }
  0xa5   :  { %904 = vmatpush1.msra.mxu1 %v353_v21  ;;  %836 = vmatprep.subr.mxu0 %v350_v22  ;;  %v334_v56 = vld [vmem:[%s2763_s1 + $0x978] sm:$0xff]  ;;  %v400_v57 = vld [vmem:[%s2763_s1 + $0xb88] sm:$0xff]  ;;  %v333_v58 = vld [vmem:[%s2763_s1 + $0x970] sm:$0xff] }
  0xa6   :  { %905 = vmatprep.subr.mxu1 %v352_v23  ;;  %837 = vmatpush2.msra.mxu0 %v349_v24  ;;  %v399_v59 = vld [vmem:[%s2763_s1 + $0xb80] sm:$0xff]  ;;  %v332_v60 = vld [vmem:[%s2763_s1 + $0x968] sm:$0xff]  ;;  %v398_v61 = vld [vmem:[%s2763_s1 + $0xb78] sm:$0xff] }
  0xa7   :  { %906 = vmatpush1.msra.mxu1 %v351_v25  ;;  %838 = vmatprep.subr.mxu0 %v348_v26  ;;  %v331_v62 = vld [vmem:[%s2763_s1 + $0x960] sm:$0xff]  ;;  %v397_v63 = vld [vmem:[%s2763_s1 + $0xb70] sm:$0xff]  ;;  %v330_v0 = vld [vmem:[%s2763_s1 + $0x958] sm:$0xff] }
  0xa8   :  { %907 = vmatprep.subr.mxu1 %v414_v27  ;;  %839 = vmatpush2.msra.mxu0 %v347_v28  ;;  %v396_v1 = vld [vmem:[%s2763_s1 + $0xb68] sm:$0xff]  ;;  %v329_v2 = vld [vmem:[%s2763_s1 + $0x950] sm:$0xff]  ;;  %v395_v3 = vld [vmem:[%s2763_s1 + $0xb60] sm:$0xff] }
  0xa9   :  { %908 = vmatpush2.msra.mxu1 %v413_v29  ;;  %840 = vmatprep.subr.mxu0 %v346_v30  ;;  %v328_v4 = vld [vmem:[%s2763_s1 + $0x948] sm:$0xff]  ;;  %v394_v5 = vld [vmem:[%s2763_s1 + $0xb58] sm:$0xff]  ;;  %v327_v6 = vld [vmem:[%s2763_s1 + $0x940] sm:$0xff] }
  0xaa   :  { %909 = vmatprep.subr.mxu1 %v412_v31  ;;  %841 = vmatpush2.msra.mxu0 %v345_v32  ;;  %v29_v7 = vld [vmem:[%s2762_s0 + $0x10] sm:$0xff]  ;;  %v326_v9 = vld [vmem:[%s2763_s1 + $0x938] sm:$0xff]  ;;  %v392_v10 = vld [vmem:[%s2763_s1 + $0xb48] sm:$0xff] }
  0xab   :  { %910 = vmatpush2.msra.mxu1 %v411_v33  ;;  %842 = vmatprep.subr.mxu0 %v344_v34  ;;  %v393_v8 = vld [vmem:[%s2763_s1 + $0xb50] sm:$0xff]  ;;  %v391_v12 = vld [vmem:[%s2763_s1 + $0xb40] sm:$0xff]  ;;  %v324_v13 = vld [vmem:[%s2763_s1 + $0x928] sm:$0xff]  ;;  %v481_v14 = vcombine.high %v29_v7, %v29_v7  ;;  %v488_v17 = vrot.slane %v29_v7, %v1714_v48 }
  0xac   :  { %911 = vmatprep.subr.mxu1 %v410_v35  ;;  %843 = vmatpush2.msra.mxu0 %v343_v36  ;;  %v325_v11 = vld [vmem:[%s2763_s1 + $0x930] sm:$0xff]  ;;  %v390_v15 = vld [vmem:[%s2763_s1 + $0xb38] sm:$0xff]  ;;  %v323_v16 = vld [vmem:[%s2763_s1 + $0x920] sm:$0xff] }
  0xad   :  { %912 = vmatpush2.msra.mxu1 %v409_v37  ;;  %844 = vmatprep.subr.mxu0 %v342_v39  ;;  %v389_v18 = vld [vmem:[%s2763_s1 + $0xb30] sm:$0xff]  ;;  %v322_v19 = vld [vmem:[%s2763_s1 + $0x918] sm:$0xff]  ;;  %v388_v20 = vld [vmem:[%s2763_s1 + $0xb28] sm:$0xff]  ;;  %v495_v24 = vrot.slane %v481_v14, %v1714_v48  ;;  %v496_v27 = vcombine.high %v488_v17, %v488_v17  ;;  %v1347_v39 = vmov 0.0  }
  0xae   :  { %913 = vmatprep.subr.mxu1 %v408_v40  ;;  %845 = vmatpush2.msra.mxu0 %v341_v41  ;;  %v321_v21 = vld [vmem:[%s2763_s1 + $0x910] sm:$0xff]  ;;  %v387_v22 = vld [vmem:[%s2763_s1 + $0xb20] sm:$0xff]  ;;  %v320_v23 = vld [vmem:[%s2763_s1 + $0x908] sm:$0xff] }
  0xaf   :  { %914 = vmatpush2.msra.mxu1 %v407_v42  ;;  %846 = vmatprep.subr.mxu0 %v340_v43  ;;  %v386_v25 = vld [vmem:[%s2763_s1 + $0xb18] sm:$0xff]  ;;  %v319_v26 = vld [vmem:[%s2763_s1 + $0x900] sm:$0xff]  ;;  %v385_v28 = vld [vmem:[%s2763_s1 + $0xb10] sm:$0xff]  ;;  %v497_v31 = vcombine.high %v495_v24, %v495_v24 }
  0xb0   :  { %915 = vmatprep.subr.mxu1 %v406_v44  ;;  %847 = vmatpush2.msra.mxu0 %v339_v45  ;;  %v384_v48 = vld [vmem:[%s2763_s1 + $0xb08] sm:$0xff]  ;;  %v430_v29 = vld [vmem:[%s2763_s1 + $0xc78] sm:$0xff]  ;;  %v383_v30 = vld [vmem:[%s2763_s1 + $0xb00] sm:$0xff] }
  0xb1   :  { %916 = vmatpush2.msra.mxu1 %v405_v46  ;;  %848 = vmatprep.subr.mxu0 %v338_v47  ;;  %v429_v32 = vld [vmem:[%s2763_s1 + $0xc70] sm:$0xff]  ;;  %v428_v33 = vld [vmem:[%s2763_s1 + $0xc68] sm:$0xff]  ;;  %v427_v34 = vld [vmem:[%s2763_s1 + $0xc60] sm:$0xff] }
  0xb2   :  { %917 = vmatprep.subr.mxu1 %v404_v49  ;;  %849 = vmatpush2.msra.mxu0 %v337_v50  ;;  %v426_v35 = vld [vmem:[%s2763_s1 + $0xc58] sm:$0xff]  ;;  %v425_v36 = vld [vmem:[%s2763_s1 + $0xc50] sm:$0xff]  ;;  %v424_v37 = vld [vmem:[%s2763_s1 + $0xc48] sm:$0xff] }
  0xb3   :  { %918 = vmatpush2.msra.mxu1 %v403_v51  ;;  %850 = vmatprep.subr.mxu0 %v336_v52  ;;  %v1050_v40 = vld [vmem:[%s2765_s3 + $0xf8] sm:$0xff]  ;;  %v1049_v42 = vld [vmem:[%s2765_s3 + $0xf0] sm:$0xff]  ;;  %v423_v43 = vld [vmem:[%s2763_s1 + $0xc40] sm:$0xff] }
  0xb4   :  { %919 = vmatprep.subr.mxu1 %v402_v53  ;;  %851 = vmatpush2.msra.mxu0 %v335_v54  ;;  %v1034_v41 = vld [vmem:[%s2765_s3 + $0x78] sm:$0xff]  ;;  %v1033_v44 = vld [vmem:[%s2765_s3 + $0x70] sm:$0xff]  ;;  %v1048_v46 = vld [vmem:[%s2765_s3 + $0xe8] sm:$0xff] }
  0xb5   :  { %920 = vmatpush2.msra.mxu1 %v401_v55  ;;  %852 = vmatprep.subr.mxu0 %v334_v56  ;;  %v422_v45 = vld [vmem:[%s2763_s1 + $0xc38] sm:$0xff]  ;;  %v421_v47 = vld [vmem:[%s2763_s1 + $0xc30] sm:$0xff]  ;;  %v1032_v49 = vld [vmem:[%s2765_s3 + $0x68] sm:$0xff] }
  0xb6   :  { %921 = vmatprep.subr.mxu1 %v400_v57  ;;  %853 = vmatpush2.msra.mxu0 %v333_v58  ;;  %v420_v50 = vld [vmem:[%s2763_s1 + $0xc28] sm:$0xff]  ;;  %v1047_v51 = vld [vmem:[%s2765_s3 + $0xe0] sm:$0xff]  ;;  %v418_v54 = vld [vmem:[%s2763_s1 + $0xc18] sm:$0xff] }
  0xb7   :  { %922 = vmatpush2.msra.mxu1 %v399_v59  ;;  %854 = vmatprep.subr.mxu0 %v332_v60  ;;  %v419_v52 = vld [vmem:[%s2763_s1 + $0xc20] sm:$0xff]  ;;  %v417_v55 = vld [vmem:[%s2763_s1 + $0xc10] sm:$0xff]  ;;  %v416_v56 = vld [vmem:[%s2763_s1 + $0xc08] sm:$0xff] }
  0xb8   :  { %923 = vmatprep.subr.mxu1 %v398_v61  ;;  %855 = vmatpush2.msra.mxu0 %v331_v62  ;;  %v1031_v53 = vld [vmem:[%s2765_s3 + $0x60] sm:$0xff]  ;;  %v1245_v58 = vld.sshfl [vmem:[%s2762_s0 + $0x18] sm:$0x3 pattern:$0x76325410]  ;;  %v1045_v61 = vld [vmem:[%s2765_s3 + $0xd0] sm:$0xff] }
  0xb9   :  { %924 = vmatpush2.msra.mxu1 %v397_v63  ;;  %856 = vmatprep.subr.mxu0 %v330_v0  ;;  %v415_v57 = vld [vmem:[%s2763_s1 + $0xc00] sm:$0xff]  ;;  %v1046_v59 = vld [vmem:[%s2765_s3 + $0xd8] sm:$0xff]  ;;  %v1029_v62 = vld [vmem:[%s2765_s3 + $0x50] sm:$0xff] }
  0xba   :  { %925 = vmatprep.subr.mxu1 %v396_v1  ;;  %857 = vmatpush2.msra.mxu0 %v329_v2  ;;  %v1030_v60 = vld [vmem:[%s2765_s3 + $0x58] sm:$0xff]  ;;  %v1044_v63 = vld [vmem:[%s2765_s3 + $0xc8] sm:$0xff]  ;;  %v1043_v1 = vld [vmem:[%s2765_s3 + $0xc0] sm:$0xff] }
  0xbb   :  { %926 = vmatpush2.msra.mxu1 %v395_v3  ;;  %858 = vmatprep.subr.mxu0 %v328_v4  ;;  %v1028_v0 = vld [vmem:[%s2765_s3 + $0x48] sm:$0xff]  ;;  %v1027_v2 = vld [vmem:[%s2765_s3 + $0x40] sm:$0xff]  ;;  %v1042_v3 = vld [vmem:[%s2765_s3 + $0xb8] sm:$0xff] }
  0xbc   :  { %927 = vmatprep.subr.mxu1 %v394_v5  ;;  %859 = vmatpush2.msra.mxu0 %v327_v6  ;;  %v1026_v4 = vld [vmem:[%s2765_s3 + $0x38] sm:$0xff]  ;;  %v1041_v5 = vld [vmem:[%s2765_s3 + $0xb0] sm:$0xff]  ;;  %v1040_v7 = vld [vmem:[%s2765_s3 + $0xa8] sm:$0xff] }
  0xbd   :  { %928 = vmatpush2.msra.mxu1 %v393_v8  ;;  %860 = vmatprep.subr.mxu0 %v326_v9  ;;  %v1025_v6 = vld [vmem:[%s2765_s3 + $0x30] sm:$0xff]  ;;  %v1024_v8 = vld [vmem:[%s2765_s3 + $0x28] sm:$0xff]  ;;  %v1039_v9 = vld [vmem:[%s2765_s3 + $0xa0] sm:$0xff] }
  0xbe   :  { %929 = vmatprep.subr.mxu1 %v392_v10  ;;  %861 = vmatpush2.msra.mxu0 %v325_v11  ;;  %v1023_v10 = vld [vmem:[%s2765_s3 + $0x20] sm:$0xff]  ;;  %v1038_v11 = vld [vmem:[%s2765_s3 + $0x98] sm:$0xff]  ;;  %v1021_v14 = vld [vmem:[%s2765_s3 + $0x10] sm:$0xff] }
  0xbf   :  { %930 = vmatpush2.msra.mxu1 %v391_v12  ;;  %862 = vmatprep.subr.mxu0 %v324_v13  ;;  %v1022_v12 = vld [vmem:[%s2765_s3 + $0x18] sm:$0xff]  ;;  %v1037_v13 = vld [vmem:[%s2765_s3 + $0x90] sm:$0xff] }
  0xc0   :  { %931 = vmatprep.subr.mxu1 %v390_v15  ;;  %863 = vmatpush2.msra.mxu0 %v323_v16  ;;  %v1036_v15 = vld [vmem:[%s2765_s3 + $0x88] sm:$0xff] }
  0xc1   :  { %932 = vmatpush2.msra.mxu1 %v389_v18  ;;  %864 = vmatprep.subr.mxu0 %v322_v19  ;;  %v1020_v16 = vld [vmem:[%s2765_s3 + $0x8] sm:$0xff]  ;;  %v1019_v18 = vld [vmem:[%s2765_s3] sm:$0xff]  ;;  %v1136_v19 = vld [vmem:[%s2767_s5 + $0x38] sm:$0xff] }
  0xc2   :  { %933 = vmatprep.subr.mxu1 %v388_v20  ;;  %865 = vmatpush2.msra.mxu0 %v321_v21  ;;  %v1135_v20 = vld [vmem:[%s2767_s5 + $0x30] sm:$0xff]  ;;  %v1134_v21 = vld [vmem:[%s2767_s5 + $0x28] sm:$0xff] }
  0xc3   :  { %934 = vmatpush2.msra.mxu1 %v387_v22  ;;  %866 = vmatprep.subr.mxu0 %v320_v23  ;;  %v435_v22 = vsub.s32 0, %v1687_v38  ;;  %v431_v23 = vld [vmem:[%s2764_s2] sm:$0x3] }
  0xc4   :  { %935 = vmatprep.subr.mxu1 %v386_v25  ;;  %867 = vmatpush2.msra.mxu0 %v319_v26 }
  0xc5   :  { %868 = vmatprep.mubr.f32.mxu0 %v496_v27  ;;  %936 = vmatpush2.msra.mxu1 %v385_v28  ;;  %v436_v26 = vrot.slane %v431_v23, %v435_v22 }
  0xc6   :  { %869 = vmatmul.mubr.f32.vlgmr.msra.gmra.mxu0 %v488_v17  ;;  %937 = vmatprep.subr.mxu1 %v384_v48  ;;  %v1035_v17 = vld [vmem:[%s2765_s3 + $0x80] sm:$0xff] }
  0xc7   :  { %962 = vmatprep.subr.mxu0 %v430_v29  ;;  %938 = vmatpush2.msra.mxu1 %v383_v30 }
  0xc8   :  { %939 = vmatprep.mubr.f32.mxu1 %v497_v31  ;;  %963 = vmatpush1.msra.mxu0 %v429_v32 }
  0xc9   :  { %940 = vmatmul.mubr.f32.vlgmr.msra.gmra.mxu1 %v495_v24  ;;  %964 = vmatprep.subr.mxu0 %v428_v33  ;;  %v439_v24 = vsub.s32 1, %v1687_v38 }
  0xca   :  { %965 = vmatpush1.msra.mxu0 %v427_v34  ;;  %1010 = vmatprep.mubr.f32.mxu0 %v1347_v39 }
  0xcb   :  { %966 = vmatprep.subr.mxu0 %v426_v35  ;;  %1250 = vmatprep.subr.mxu1 %v1050_v40  ;;  %v440_v27 = vrot.slane %v431_v23, %v439_v24 }
  0xcc   :  { %967 = vmatpush1.msra.mxu0 %v425_v36  ;;  %1251 = vmatpush3.msra.mxu1 %v1034_v41 }
  0xcd   :  { %968 = vmatprep.subr.mxu0 %v424_v37  ;;  %1252 = vmatprep.subr.mxu1 %v1049_v42 }
  0xce   :  { %969 = vmatpush1.msra.mxu0 %v423_v43  ;;  %1253 = vmatpush3.msra.mxu1 %v1033_v44 }
  0xcf   :  { %970 = vmatprep.subr.mxu0 %v422_v45  ;;  %1254 = vmatprep.subr.mxu1 %v1048_v46 }
  0xd0   :  { %971 = vmatpush1.msra.mxu0 %v421_v47  ;;  %1255 = vmatpush3.msra.mxu1 %v1032_v49 }
  0xd1   :  { %972 = vmatprep.subr.mxu0 %v420_v50  ;;  %1256 = vmatprep.subr.mxu1 %v1047_v51 }
  0xd2   :  { %973 = vmatpush1.msra.mxu0 %v419_v52  ;;  %1257 = vmatpush3.msra.mxu1 %v1031_v53 }
  0xd3   :  { %974 = vmatprep.subr.mxu0 %v418_v54  ;;  %1258 = vmatprep.subr.mxu1 %v1046_v59  ;;  %v1132_v59 = vld [vmem:[%s2767_s5 + $0x18] sm:$0xff] }
  0xd4   :  { %975 = vmatpush1.msra.mxu0 %v417_v55  ;;  %1259 = vmatpush3.msra.mxu1 %v1030_v60  ;;  %v1131_v60 = vld [vmem:[%s2767_s5 + $0x10] sm:$0xff] }
  0xd5   :  { %976 = vmatprep.subr.mxu0 %v416_v56  ;;  %1260 = vmatprep.subr.mxu1 %v1045_v61  ;;  %v1130_v61 = vld [vmem:[%s2767_s5 + $0x8] sm:$0xff] }
  0xd6   :  { %977 = vmatpush1.msra.mxu0 %v415_v57  ;;  %1261 = vmatpush3.msra.mxu1 %v1029_v62  ;;  %v1129_v62 = vld [vmem:[%s2767_s5] sm:$0xff] }
  0xd7   :  { %1246 = vmatmul.mubr.msk.f32.vlgmr.msra.gmra.mxu0 %vm517_vm0, %v1245_v58  ;;  %1294 = vmatprep.subr.mxu0 %v1347_v39  ;;  %v1133_v58 = vld [vmem:[%s2767_s5 + $0x20] sm:$0xff] }
  0xd8   :  { %1262 = vmatprep.subr.mxu1 %v1044_v63  ;;  %1295 = vmatpush3.msra.mxu0 %v1136_v19 }
  0xd9   :  { %1263 = vmatpush3.msra.mxu1 %v1028_v0  ;;  %1296 = vmatprep.subr.mxu0 %v1347_v39  ;;  %v1247_v0 = vld [vmem:[%s2766_s4] ss:$0 sm:$0xff]  ;;  %s1349_s4 = smov [#allocation2]  }
  0xda   :  { %1264 = vmatprep.subr.mxu1 %v1043_v1  ;;  %1297 = vmatpush3.msra.mxu0 %v1135_v20  ;;  %s1237_s5 = sshll.u32 %s1349_s4, 4  ;;  %s1238_s5 = int_to_ptr.vmem [resolvable:$true] %s1237_s5 }
  0xdb   :  { %1265 = vmatpush3.msra.mxu1 %v1027_v2  ;;  %1298 = vmatprep.subr.mxu0 %v1347_v39  ;;  %p1329_p1 = scmp.lt.s32.totalorder %s1238_s5, %s1238_s5 }
  0xdc   :  { %1266 = vmatprep.subr.mxu1 %v1042_v3  ;;  %1299 = vmatpush3.msra.mxu0 %v1134_v21 }
  0xdd   :  { %1267 = vmatpush3.msra.mxu1 %v1026_v4  ;;  %1300 = vmatprep.subr.mxu0 %v1347_v39 }
  0xde   :  { %1268 = vmatprep.subr.mxu1 %v1041_v5  ;;  %1301 = vmatpush3.msra.mxu0 %v1133_v58  ;;  %v1248_v5 = vld [vmem:[%s2768_s6] ss:$0 sm:$0xff]  ;;  %s1324_s6 = scalar_lea.vmem %s1238_s5, 32 }
  0xdf   :  { %1269 = vmatpush3.msra.mxu1 %v1025_v6  ;;  %1302 = vmatprep.subr.mxu0 %v1347_v39  ;;  %p1325_p0 = scmp.ne.s32.totalorder %s1238_s5, %s1324_s6  ;;  %p1330_p2 = scmp.lt.s32.totalorder %s1324_s6, %s1324_s6 }
  0xe0   :  { %1270 = vmatprep.subr.mxu1 %v1040_v7  ;;  %1303 = vmatpush3.msra.mxu0 %v1132_v59 }
  0xe1   :  { %1271 = vmatpush3.msra.mxu1 %v1024_v8  ;;  %1304 = vmatprep.subr.mxu0 %v1347_v39  ;;  %p1331_p3 = por %p1330_p2, %p1329_p1 }
  0xe2   :  { %1272 = vmatprep.subr.mxu1 %v1039_v9  ;;  %1305 = vmatpush3.msra.mxu0 %v1131_v60 }
  0xe3   :  { %1273 = vmatpush3.msra.mxu1 %v1023_v10  ;;  %1306 = vmatprep.subr.mxu0 %v1347_v39  ;;  %p1332_p4 = pnand %p1331_p3, %p1325_p0 }
  0xe4   :  { %1274 = vmatprep.subr.mxu1 %v1038_v11  ;;  %1307 = vmatpush3.msra.mxu0 %v1130_v61 }
  0xe5   :  { %1275 = vmatpush3.msra.mxu1 %v1022_v12  ;;  %1308 = vmatprep.subr.mxu0 %v1347_v39 }
  0xe6   :  { %1276 = vmatprep.subr.mxu1 %v1037_v13  ;;  %1309 = vmatpush3.msra.mxu0 %v1129_v62 }
  0xe7   :  { %1277 = vmatpush3.msra.mxu1 %v1021_v14  ;;  %1310 = vmatprep.mubr.msk.f32.mxu0 %vm1348_vm1, %v1347_v39 }
  0xe8   :  { %1278 = vmatprep.subr.mxu1 %v1036_v15 }
  0xe9   :  { %1279 = vmatpush3.msra.mxu1 %v1020_v16 }
  0xea   :  { %1280 = vmatprep.subr.mxu1 %v1035_v17 }
  0xeb   :  { %1281 = vmatpush3.msra.mxu1 %v1019_v18 }
 0x102   :  { %v586_v25 = vpop.f32.mrf.mxu0 }
 0x103   :  { %v587_v29 = vadd.f32 %v586_v25, %v436_v26 }
 0x104   :  { %v588_v28 = vpop.f32.mrf.mxu0 }
 0x105   :  { %v657_v48 = vpop.f32.mrf.mxu1  ;;  %v589_v31 = vadd.f32 %v588_v28, %v440_v27 }
 0x106   :  { %v658_v33 = vadd.f32 %v657_v48, %v587_v29 }
 0x107   :  { %v659_v32 = vpop.f32.mrf.mxu1 }
 0x108   :  { %v660_v36 = vadd.f32 %v659_v32, %v589_v31 }
 0x144   :  { %v728_v30 = vpop.f32.mrf.mxu0 }
 0x145   :  { %v729_v37 = vadd.f32 %v728_v30, %v658_v33 }
 0x146   :  { %v730_v34 = vpop.f32.mrf.mxu0 }
 0x147   :  { %v799_v35 = vpop.f32.mrf.mxu1  ;;  %v731_v41 = vadd.f32 %v730_v34, %v660_v36 }
 0x148   :  { %v800_v43 = vadd.f32 %v799_v35, %v729_v37 }
 0x149   :  { %v801_v42 = vpop.f32.mrf.mxu1 }
 0x14a   :  { %v802_v45 = vadd.f32 %v801_v42, %v731_v41 }
 0x186   :  { %v870_v40 = vpop.f32.mrf.mxu0 }
 0x187   :  { %v871_v46 = vadd.f32 %v870_v40, %v800_v43 }
 0x188   :  { %v872_v44 = vpop.f32.mrf.mxu0 }
 0x189   :  { %v941_v38 = vpop.f32.mrf.mxu1  ;;  %v873_v47 = vadd.f32 %v872_v44, %v802_v45 }
 0x18a   :  { %v942_v50 = vadd.f32 %v941_v38, %v871_v46 }
 0x18b   :  { %v943_v49 = vpop.f32.mrf.mxu1 }
 0x18c   :  { %v944_v52 = vadd.f32 %v943_v49, %v873_v47 }
 0x197   :  { %v1012_v51 = vpop.f32.mrf.mxu0 }
 0x198   :  { %v1013_v53 = vadd.f32 %v1012_v51, %v942_v50 }
 0x199   :  { %v1014_v54 = vpop.f32.mrf.mxu0 }
 0x19a   :  { %v1015_v55 = vadd.f32 %v1014_v54, %v944_v52  ;;  %v1017_v57 = vmax.f32 %v1013_v53, 0.0 }
 0x19c   :  { %v1018_v56 = vmax.f32 %v1015_v55, 0.0 }
 0x19e   :  { %1122 = vmatprep.mubr.f32.mxu1 %v1018_v56 }
 0x19f   :  { %1123 = vmatmul.mubr.f32.vlgmr.msra.gmra.mxu1 %v1017_v57 }
 0x25f   :  { %v1282_v63 = vpop.f32.mrf.mxu1 }
 0x261   :  { %v1283_v1 = vpop.f32.mrf.mxu1 }
 0x262   :  { %v1284_v2 = vadd.f32 %v1283_v1, %v1282_v63 }
 0x264   :  { %v1125_v3 = vadd.f32 %v1284_v2, %v1247_v0 }
 0x266   :  { %v1128_v4 = vmax.f32 %v1125_v3, 0.0 }
 0x268   :  { %1311 = vmatmul.mubr.msk.f32.vlgmr.msra.gmra.mxu0 %vm517_vm0, %v1128_v4 }
 0x328   :  { %v1213_v6 = vpop.f32.mrf.mxu0 }
 0x329   :  { %v1214_v7 = vadd.f32 %v1248_v5, %v1213_v6 }
 0x32a   :  { %v1312_v8 = vpop.f32.mrf.mxu0 }
 0x32b   :  { %v1218_v39 = vsel %vm1217_vm2, %v1214_v7, -inf }
 0x32c   :  { %1219 = vmax.xlane.f32.xlu0 %v1218_v39 }
 0x3b5   :  { %v1220_v9 = vpop.xlane.xlu0 %1219 }
 0x3b6   :  { %v1221_v10 = vsub.f32 %v1214_v7, %v1220_v9 }
 0x3b8   :  { %v1222_v11 = vmul.f32 1.442695, %v1221_v10 }
 0x3ba   :  { %1320 = vpow2.f32 %v1222_v11 }
 0x3c7   :  { %v1321_v12 = vpop.eup %1320 }
 0x3c8   :  { %v1224_v13 = vsel %vm1217_vm2, %v1321_v12, 0.0 }
 0x3c9   :  { %1225 = vadd.xlane.f32.xlu0 %v1224_v13 }
 0x452   :  { %v1226_v14 = vpop.xlane.xlu0 %1225 }
 0x453   :  { %1322 = vlog2.f32 %v1226_v14 }
 0x460   :  { %v1323_v15 = vpop.eup %1322 }
 0x461   :  { %v1228_v16 = vmul.f32 0.6931472, %v1323_v15 }
 0x463   :  { %v1229_v17 = vsub.f32 %v1221_v10, %v1228_v16 }
 0x465   :  { %1230 = vst.msk [vmem:[#allocation2] sm:$0x3] %vm1217_vm2, %v1229_v17 }
 0x466   :  { %1335 = shalt.err (!%p1332_p4)
}
 0x467   :  { %1240 = dma.vmem_to_hbm [thread:$0]  %s1238_s5, 32, %s2769_s7, [#allocation3]  }
 0x468   :  { %1344 = dma.done.wait [#allocation3], 32  }
 0x469   :  { %1345 = vsyncadd [#allocation3], 4294967264 }
 0x46a   :  { %1244 = vsyncpa [#allocation3], 1 }

</bundles_post_ra>
